<compile_context>
chip_gen: v7x
topology: tpu7x:2x2x1
jax: 0.10.0
libtpu: 0.0.40
codegen_flags: <defaults>
</compile_context>

<pallas_src>
import functools

import jax
import jax.numpy as jnp
from jax.experimental import pallas as pl
from jax.experimental.pallas import tpu as pltpu

BN_EPS = 1e-5
KCHUNK = 512          # K-dim slab size for streamed weights (multiple of 128 and 256)


# ----------------------------------------------------------------------------
# Fused Pallas kernel: streamed weights + all layers + final BN + loss
# ----------------------------------------------------------------------------
def _bn_f32(y):
    """BatchNorm1d with batch statistics (training mode, biased variance)."""
    mean = jnp.mean(y, axis=0, keepdims=True)
    var = jnp.mean((y - mean) ** 2, axis=0, keepdims=True)
    return (y - mean) * jax.lax.rsqrt(var + BN_EPS)


def _vt_kernel(*refs, metas, units, n_v, n_t, n_p, lambd):
    """Ref layout:
       [0] y1 (B, v_feats) f32 VMEM        [1] y2 (B, t_feats) f32 VMEM
       [2] aux (3, sum_dout) f32 VMEM      (rows: bias / gamma / beta, packed per layer)
       [3 .. 3+L)  per-layer bf16 weights, HBM (pl.ANY), streamed manually
       [3+L]  loss (1,1) f32 SMEM
       [4+L]  wbuf (2, KCHUNK, max_dout) bf16 VMEM scratch (double buffer)
       [5+L]  DMA semaphores (2,)
    """
    n_layers = len(metas)
    y1_ref, y2_ref, aux_ref = refs[0], refs[1], refs[2]
    w_refs = refs[3:3 + n_layers]
    out_ref = refs[3 + n_layers]
    wbuf = refs[4 + n_layers]
    sem = refs[5 + n_layers]

    n_units = len(units)

    def make_copy(u):
        layer, k0, ks, dout = units[u]
        slot = u % 2
        return pltpu.make_async_copy(
            w_refs[layer].at[pl.ds(k0, ks), :],      # contiguous rows in HBM
            wbuf.at[slot, :ks, :dout],               # tile-aligned VMEM window
            sem.at[slot])

    # Prime the pipeline: start streaming the first weight slab immediately.
    cps = [None] * n_units
    cps[0] = make_copy(0)
    cps[0].start()
    state = {"u": 0}

    def apply_layer(layer_idx, x, bn_groups):
        din, dout, add_bias, use_bn, use_relu, off = metas[layer_idx]
        n_chunks = (din + KCHUNK - 1) // KCHUNK
        y = None
        for c in range(n_chunks):
            u = state["u"]
            state["u"] = u + 1
            slot = u % 2
            cps[u].wait()                            # weight slab u now in VMEM
            if u + 1 < n_units:                      # prefetch next slab (other slot)
                cps[u + 1] = make_copy(u + 1)
                cps[u + 1].start()
            k0 = c * KCHUNK
            ks = min(KCHUNK, din - k0)
            part = jnp.dot(x[:, k0:k0 + ks].astype(jnp.bfloat16),
                           wbuf[slot, :ks, :dout],
                           preferred_element_type=jnp.float32)   # MXU bf16 -> f32
            y = part if y is None else y + part
        if add_bias:                                 # only layers NOT followed by BN
            y = y + aux_ref[0:1, off:off + dout]
        if use_bn:
            gamma = aux_ref[1:2, off:off + dout]
            beta = aux_ref[2:3, off:off + dout]
            if bn_groups == 1:
                y = _bn_f32(y) * gamma + beta
            else:                                    # stacked branches: per-branch stats
                h = y.shape[0] // bn_groups
                y = jnp.concatenate(
                    [_bn_f32(y[g * h:(g + 1) * h]) * gamma + beta
                     for g in range(bn_groups)], axis=0)
        if use_relu:
            y = jnp.maximum(y, 0.0)
        return y

    # branch 1: v2r
    x1 = y1_ref[...]
    for i in range(n_v):
        x1 = apply_layer(i, x1, bn_groups=1)
    # branch 2: t2r
    x2 = y2_ref[...]
    for i in range(n_t):
        x2 = apply_layer(n_v + i, x2, bn_groups=1)

    # shared projector applied ONCE on the stacked [2B, 512] activation
    b = x1.shape[0]
    xs = jnp.concatenate([x1, x2], axis=0)
    for i in range(n_p):
        xs = apply_layer(n_v + n_t + i, xs, bn_groups=2)

    # affine-free BatchNorm1d + Barlow-Twins cross-correlation loss
    p1 = _bn_f32(xs[:b])
    p2 = _bn_f32(xs[b:])
    c = jax.lax.dot_general(p1, p2, (((0,), (0,)), ((), ())),
                            preferred_element_type=jnp.float32)   # [D, D]
    d = c.shape[0]
    row = jax.lax.broadcasted_iota(jnp.int32, (d, d), 0)
    col = jax.lax.broadcasted_iota(jnp.int32, (d, d), 1)
    term = jnp.where(row == col, (c - 1.0) ** 2, lambd * (c * c))
    out_ref[0, 0] = jnp.sum(term)


def make_vt_forward(cfgs, n_v, n_t, n_p, lambd):
    # static per-layer metadata (din, dout, add_bias, use_bn, use_relu, aux_offset)
    metas, off = [], 0
    for (din, dout, use_bias, use_bn, use_relu) in cfgs:
        add_bias = bool(use_bias) and not bool(use_bn)   # bias before BN is a no-op
        metas.append((din, dout, add_bias, bool(use_bn), bool(use_relu), off))
        off += dout
    # streaming schedule: one "unit" per (layer, K-chunk)
    units = []
    for li, (din, dout, *_r) in enumerate(cfgs):
        for c in range((din + KCHUNK - 1) // KCHUNK):
            k0 = c * KCHUNK
            units.append((li, k0, min(KCHUNK, din - k0), dout))
    max_ks = max(u[2] for u in units)
    max_dout = max(u[3] for u in units)

    kernel = functools.partial(
        _vt_kernel, metas=tuple(metas), units=tuple(units),
        n_v=n_v, n_t=n_t, n_p=n_p, lambd=float(lambd))

    def forward(y1, y2, weights, aux_packed):
        B = y1.shape[0]
        flat = [y1, y2, aux_packed] + list(weights)

        flops = 0
        for k, (din, dout, *_r) in enumerate(cfgs):
            rows = 2 * B if k >= n_v + n_t else B       # projector runs on stacked rows
            flops += 2 * rows * din * dout
        d_last = cfgs[-1][1]
        flops += 2 * B * d_last * d_last
        bytes_accessed = int(sum(a.size * a.dtype.itemsize for a in flat)) + 4

        out = pl.pallas_call(
            kernel,
            out_shape=jax.ShapeDtypeStruct((1, 1), jnp.float32),
            in_specs=([pl.BlockSpec(memory_space=pltpu.MemorySpace.VMEM)] * 3
                      + [pl.BlockSpec(memory_space=pl.ANY)] * len(weights)),
            out_specs=pl.BlockSpec(memory_space=pltpu.MemorySpace.SMEM),
            scratch_shapes=[pltpu.VMEM((2, max_ks, max_dout), jnp.bfloat16),
                            pltpu.SemaphoreType.DMA((2,))],
            compiler_params=pltpu.CompilerParams(
                vmem_limit_bytes=16 * 1024 * 1024),
            cost_estimate=pl.CostEstimate(flops=flops, transcendentals=0,
                                          bytes_accessed=bytes_accessed),
        )(*flat)
        return out[0, 0]

    return forward


# ----------------------------------------------------------------------------
# Module configuration & deterministic parameter init
# ----------------------------------------------------------------------------
def v2r_cfg(n):
    # (din, dout, use_bias, use_bn, use_relu); Dropout layers are identity.
    return [
        (n, n // 2, True, True, True),
        (n // 2, n // 4, True, True, True),
        (n // 4, n // 8, True, True, True),
        (n // 8, n // 16, True, True, True),
        (n // 16, n // 8, True, True, True),
        (n // 8, n // 4, True, False, False),
    ]


def t2r_cfg(n):
    return [
        (n, n // 2, True, True, True),
        (n // 2, n // 4, True, True, True),
        (n // 4, n // 2, True, True, True),
        (n // 2, n, True, False, False),
    ]


def projector_cfg(sizes):
    cfg = [(sizes[i], sizes[i + 1], False, True, True)
           for i in range(len(sizes) - 2)]
    cfg.append((sizes[-2], sizes[-1], False, False, False))
    return cfg


def init_params(key, cfgs):
    params = []
    for (din, dout, use_bias, use_bn, _) in cfgs:
        key, kw, kb, kg, kbt = jax.random.split(key, 5)
        w = jax.random.normal(kw, (din, dout), jnp.float32) / jnp.sqrt(din)
        b = (0.01 * jax.random.normal(kb, (1, dout), jnp.float32)
             if use_bias else jnp.zeros((1, dout), jnp.float32))
        g = (1.0 + 0.1 * jax.random.normal(kg, (1, dout), jnp.float32)
             if use_bn else jnp.ones((1, dout), jnp.float32))
        bt = (0.1 * jax.random.normal(kbt, (1, dout), jnp.float32)
              if use_bn else jnp.zeros((1, dout), jnp.float32))
        params.append((w, b, g, bt))
    return params


def pack_params(params):
    weights = tuple(w.astype(jnp.bfloat16) for (w, _, _, _) in params)
    aux_packed = jnp.concatenate(
        [jnp.concatenate([b, g, bt], axis=0) for (_, b, g, bt) in params], axis=1)
    return weights, aux_packed                           # weights: bf16, aux: [3, sum_dout] f32


# ----------------------------------------------------------------------------
# Pure-JAX reference (PyTorch-faithful structure, same bf16-weight matmul path)
# ----------------------------------------------------------------------------
def ref_forward(y1, y2, params, cfgs, n_v, n_t, n_p, lambd):
    def layer(x, p, cfg):
        _, _, use_bias, use_bn, use_relu = cfg
        w, b, g, bt = p
        y = jnp.dot(x.astype(jnp.bfloat16), w.astype(jnp.bfloat16),
                    preferred_element_type=jnp.float32)
        if use_bias:
            y = y + b
        if use_bn:
            m = jnp.mean(y, axis=0, keepdims=True)
            v = jnp.mean((y - m) ** 2, axis=0, keepdims=True)
            y = (y - m) / jnp.sqrt(v + BN_EPS) * g + bt
        if use_relu:
            y = jnp.maximum(y, 0.0)
        return y

    x1 = y1
    for i in range(n_v):
        x1 = layer(x1, params[i], cfgs[i])
    x2 = y2
    for i in range(n_t):
        x2 = layer(x2, params[n_v + i], cfgs[n_v + i])
    for i in range(n_p):
        x1 = layer(x1, params[n_v + n_t + i], cfgs[n_v + n_t + i])
    for i in range(n_p):
        x2 = layer(x2, params[n_v + n_t + i], cfgs[n_v + n_t + i])

    def bn(z):
        m = jnp.mean(z, axis=0, keepdims=True)
        v = jnp.mean((z - m) ** 2, axis=0, keepdims=True)
        return (z - m) / jnp.sqrt(v + BN_EPS)

    p1, p2 = bn(x1), bn(x2)
    c = p1.T @ p2
    on_diag = jnp.sum((jnp.diagonal(c) - 1.0) ** 2)
    off_diag = jnp.sum(c ** 2) - jnp.sum(jnp.diagonal(c) ** 2)
    return on_diag + lambd * off_diag


# ----------------------------------------------------------------------------
if __name__ == "__main__":
    # Shapes implied by the module: projector input hard-coded to 512
    #   -> v_num_feats / 4 == 512 => v_num_feats = 2048
    #   -> t_num_feats      == 512 => t_num_feats = 512
    B = 8
    V_FEATS = 2048
    T_FEATS = 512
    PROJECTOR = "256-128"            # args.projector
    LAMBD = 0.0051                   # args.lambd
    sizes = [512] + [int(s) for s in PROJECTOR.split("-")]

    cfg_v = v2r_cfg(V_FEATS)
    cfg_t = t2r_cfg(T_FEATS)
    cfg_p = projector_cfg(sizes)
    cfgs = cfg_v + cfg_t + cfg_p
    n_v, n_t, n_p = len(cfg_v), len(cfg_t), len(cfg_p)

    key = jax.random.PRNGKey(0)
    k_p, k_y1, k_y2 = jax.random.split(key, 3)
    params = init_params(k_p, cfgs)
    weights, aux_packed = pack_params(params)

    y1 = jax.random.normal(k_y1, (B, V_FEATS), jnp.float32)
    y2 = jax.random.normal(k_y2, (B, T_FEATS), jnp.float32)

    vt_forward = make_vt_forward(cfgs, n_v, n_t, n_p, LAMBD)
    loss = jax.jit(vt_forward)(y1, y2, weights, aux_packed)
    loss = jax.block_until_ready(loss)

    loss_ref = jax.block_until_ready(
        ref_forward(y1, y2, params, cfgs, n_v, n_t, n_p, LAMBD))

    rel_err = abs(float(loss) - float(loss_ref)) / (abs(float(loss_ref)) + 1e-6)
    assert jnp.isfinite(loss), "loss is not finite"
    assert rel_err < 2e-2, f"mismatch vs reference: {float(loss)} vs {float(loss_ref)}"

    print("KERNEL_OK")
</pallas_src>

<mosaic_0001>
module attributes {stable_mosaic.version = 11 : i64} {
  func.func @_vt_kernel(%arg0: memref<8x2048xf32, #tpu.memory_space<vmem>>, %arg1: memref<8x512xf32, #tpu.memory_space<vmem>>, %arg2: memref<3x4224xf32, #tpu.memory_space<vmem>>, %arg3: memref<2048x1024xbf16, #tpu.memory_space<any>>, %arg4: memref<1024x512xbf16, #tpu.memory_space<any>>, %arg5: memref<512x256xbf16, #tpu.memory_space<any>>, %arg6: memref<256x128xbf16, #tpu.memory_space<any>>, %arg7: memref<128x256xbf16, #tpu.memory_space<any>>, %arg8: memref<256x512xbf16, #tpu.memory_space<any>>, %arg9: memref<512x256xbf16, #tpu.memory_space<any>>, %arg10: memref<256x128xbf16, #tpu.memory_space<any>>, %arg11: memref<128x256xbf16, #tpu.memory_space<any>>, %arg12: memref<256x512xbf16, #tpu.memory_space<any>>, %arg13: memref<512x256xbf16, #tpu.memory_space<any>>, %arg14: memref<256x128xbf16, #tpu.memory_space<any>>, %arg15: memref<1x1xf32, #tpu.memory_space<smem>>, %arg16: memref<2x512x1024xbf16, #tpu.memory_space<vmem>>, %arg17: memref<2x!tpu.dma_semaphore, #tpu.memory_space<semaphore_mem>>) attributes {dimension_semantics = [], scalar_prefetch = 0 : i64, scratch_operands = 2 : i64, tpu.core_type = #tpu.core_type<tc>} {
    %c0_i32 = arith.constant 0 : i32
    %c0_i32_0 = arith.constant 0 : i32
    %c0_i32_1 = arith.constant 0 : i32
    %c0_i32_2 = arith.constant 0 : i32
    %0 = tpu.memref_slice %arg3[%c0_i32_1, %c0_i32_2] : memref<2048x1024xbf16, #tpu.memory_space<any>> -> memref<512x1024xbf16, #tpu.memory_space<any>>
    %c0_i32_3 = arith.constant 0 : i32
    %c0_i32_4 = arith.constant 0 : i32
    %1 = tpu.memref_slice %arg16[%c0_i32, %c0_i32_3, %c0_i32_4] : memref<2x512x1024xbf16, #tpu.memory_space<vmem>> -> memref<1x512x1024xbf16, #tpu.memory_space<vmem>>
    %2 = tpu.memref_squeeze %1 : memref<1x512x1024xbf16, #tpu.memory_space<vmem>> -> memref<512x1024xbf16, #tpu.memory_space<vmem>>
    %3 = tpu.memref_slice %arg17[%c0_i32_0] : memref<2x!tpu.dma_semaphore, #tpu.memory_space<semaphore_mem>> -> memref<1x!tpu.dma_semaphore, #tpu.memory_space<semaphore_mem>>
    %4 = tpu.memref_squeeze %3 : memref<1x!tpu.dma_semaphore, #tpu.memory_space<semaphore_mem>> -> memref<!tpu.dma_semaphore, #tpu.memory_space<semaphore_mem>>
    tpu.enqueue_dma source(%0 : memref<512x1024xbf16, #tpu.memory_space<any>>) target(%2 : memref<512x1024xbf16, #tpu.memory_space<vmem>>) target_semaphore(%4 : memref<!tpu.dma_semaphore, #tpu.memory_space<semaphore_mem>>)
    %c0 = arith.constant 0 : index
    %c0_5 = arith.constant 0 : index
    %5 = vector.load %arg0[%c0, %c0_5] : memref<8x2048xf32, #tpu.memory_space<vmem>>, vector<8x2048xf32>
    %c0_i32_6 = arith.constant 0 : i32
    %c0_i32_7 = arith.constant 0 : i32
    %c0_i32_8 = arith.constant 0 : i32
    %c0_i32_9 = arith.constant 0 : i32
    %6 = tpu.memref_slice %arg3[%c0_i32_8, %c0_i32_9] : memref<2048x1024xbf16, #tpu.memory_space<any>> -> memref<512x1024xbf16, #tpu.memory_space<any>>
    %c0_i32_10 = arith.constant 0 : i32
    %c0_i32_11 = arith.constant 0 : i32
    %7 = tpu.memref_slice %arg16[%c0_i32_6, %c0_i32_10, %c0_i32_11] : memref<2x512x1024xbf16, #tpu.memory_space<vmem>> -> memref<1x512x1024xbf16, #tpu.memory_space<vmem>>
    %8 = tpu.memref_squeeze %7 : memref<1x512x1024xbf16, #tpu.memory_space<vmem>> -> memref<512x1024xbf16, #tpu.memory_space<vmem>>
    %9 = tpu.memref_slice %arg17[%c0_i32_7] : memref<2x!tpu.dma_semaphore, #tpu.memory_space<semaphore_mem>> -> memref<1x!tpu.dma_semaphore, #tpu.memory_space<semaphore_mem>>
    %10 = tpu.memref_squeeze %9 : memref<1x!tpu.dma_semaphore, #tpu.memory_space<semaphore_mem>> -> memref<!tpu.dma_semaphore, #tpu.memory_space<semaphore_mem>>
    tpu.wait_dma2 semaphore(%10 : memref<!tpu.dma_semaphore, #tpu.memory_space<semaphore_mem>>) src(%6 : memref<512x1024xbf16, #tpu.memory_space<any>>) dst(%8 : memref<512x1024xbf16, #tpu.memory_space<vmem>>)
    %c1_i32 = arith.constant 1 : i32
    %c1_i32_12 = arith.constant 1 : i32
    %c512_i32 = arith.constant 512 : i32
    %c0_i32_13 = arith.constant 0 : i32
    %11 = tpu.memref_slice %arg3[%c512_i32, %c0_i32_13] : memref<2048x1024xbf16, #tpu.memory_space<any>> -> memref<512x1024xbf16, #tpu.memory_space<any>>
    %c0_i32_14 = arith.constant 0 : i32
    %c0_i32_15 = arith.constant 0 : i32
    %12 = tpu.memref_slice %arg16[%c1_i32, %c0_i32_14, %c0_i32_15] : memref<2x512x1024xbf16, #tpu.memory_space<vmem>> -> memref<1x512x1024xbf16, #tpu.memory_space<vmem>>
    %13 = tpu.memref_squeeze %12 : memref<1x512x1024xbf16, #tpu.memory_space<vmem>> -> memref<512x1024xbf16, #tpu.memory_space<vmem>>
    %14 = tpu.memref_slice %arg17[%c1_i32_12] : memref<2x!tpu.dma_semaphore, #tpu.memory_space<semaphore_mem>> -> memref<1x!tpu.dma_semaphore, #tpu.memory_space<semaphore_mem>>
    %15 = tpu.memref_squeeze %14 : memref<1x!tpu.dma_semaphore, #tpu.memory_space<semaphore_mem>> -> memref<!tpu.dma_semaphore, #tpu.memory_space<semaphore_mem>>
    tpu.enqueue_dma source(%11 : memref<512x1024xbf16, #tpu.memory_space<any>>) target(%13 : memref<512x1024xbf16, #tpu.memory_space<vmem>>) target_semaphore(%15 : memref<!tpu.dma_semaphore, #tpu.memory_space<semaphore_mem>>)
    %16 = vector.extract_strided_slice %5 {offsets = [0, 0], sizes = [8, 512], strides = [1, 1]} : vector<8x2048xf32> to vector<8x512xf32>
    %17 = arith.truncf %16 : vector<8x512xf32> to vector<8x512xbf16>
    %c0_16 = arith.constant 0 : index
    %c0_17 = arith.constant 0 : index
    %c0_18 = arith.constant 0 : index
    %18 = vector.load %arg16[%c0_16, %c0_17, %c0_18] : memref<2x512x1024xbf16, #tpu.memory_space<vmem>>, vector<1x512x1024xbf16>
    %19 = vector.shape_cast %18 : vector<1x512x1024xbf16> to vector<512x1024xbf16>
    %cst = arith.constant dense<0.000000e+00> : vector<8x1024xf32>
    %20 = tpu.matmul %17, %19, %cst {dimension_numbers = #tpu.dot_dimension_numbers<[1], [0], [0], [1], [0, 0, 1, 1], [], []>} : vector<8x512xbf16>, vector<512x1024xbf16>, vector<8x1024xf32> -> vector<8x1024xf32>
    %c1_i32_19 = arith.constant 1 : i32
    %c1_i32_20 = arith.constant 1 : i32
    %c512_i32_21 = arith.constant 512 : i32
    %c0_i32_22 = arith.constant 0 : i32
    %21 = tpu.memref_slice %arg3[%c512_i32_21, %c0_i32_22] : memref<2048x1024xbf16, #tpu.memory_space<any>> -> memref<512x1024xbf16, #tpu.memory_space<any>>
    %c0_i32_23 = arith.constant 0 : i32
    %c0_i32_24 = arith.constant 0 : i32
    %22 = tpu.memref_slice %arg16[%c1_i32_19, %c0_i32_23, %c0_i32_24] : memref<2x512x1024xbf16, #tpu.memory_space<vmem>> -> memref<1x512x1024xbf16, #tpu.memory_space<vmem>>
    %23 = tpu.memref_squeeze %22 : memref<1x512x1024xbf16, #tpu.memory_space<vmem>> -> memref<512x1024xbf16, #tpu.memory_space<vmem>>
    %24 = tpu.memref_slice %arg17[%c1_i32_20] : memref<2x!tpu.dma_semaphore, #tpu.memory_space<semaphore_mem>> -> memref<1x!tpu.dma_semaphore, #tpu.memory_space<semaphore_mem>>
    %25 = tpu.memref_squeeze %24 : memref<1x!tpu.dma_semaphore, #tpu.memory_space<semaphore_mem>> -> memref<!tpu.dma_semaphore, #tpu.memory_space<semaphore_mem>>
    tpu.wait_dma2 semaphore(%25 : memref<!tpu.dma_semaphore, #tpu.memory_space<semaphore_mem>>) src(%21 : memref<512x1024xbf16, #tpu.memory_space<any>>) dst(%23 : memref<512x1024xbf16, #tpu.memory_space<vmem>>)
    %c0_i32_25 = arith.constant 0 : i32
    %c0_i32_26 = arith.constant 0 : i32
    %c1024_i32 = arith.constant 1024 : i32
    %c0_i32_27 = arith.constant 0 : i32
    %26 = tpu.memref_slice %arg3[%c1024_i32, %c0_i32_27] : memref<2048x1024xbf16, #tpu.memory_space<any>> -> memref<512x1024xbf16, #tpu.memory_space<any>>
    %c0_i32_28 = arith.constant 0 : i32
    %c0_i32_29 = arith.constant 0 : i32
    %27 = tpu.memref_slice %arg16[%c0_i32_25, %c0_i32_28, %c0_i32_29] : memref<2x512x1024xbf16, #tpu.memory_space<vmem>> -> memref<1x512x1024xbf16, #tpu.memory_space<vmem>>
    %28 = tpu.memref_squeeze %27 : memref<1x512x1024xbf16, #tpu.memory_space<vmem>> -> memref<512x1024xbf16, #tpu.memory_space<vmem>>
    %29 = tpu.memref_slice %arg17[%c0_i32_26] : memref<2x!tpu.dma_semaphore, #tpu.memory_space<semaphore_mem>> -> memref<1x!tpu.dma_semaphore, #tpu.memory_space<semaphore_mem>>
    %30 = tpu.memref_squeeze %29 : memref<1x!tpu.dma_semaphore, #tpu.memory_space<semaphore_mem>> -> memref<!tpu.dma_semaphore, #tpu.memory_space<semaphore_mem>>
    tpu.enqueue_dma source(%26 : memref<512x1024xbf16, #tpu.memory_space<any>>) target(%28 : memref<512x1024xbf16, #tpu.memory_space<vmem>>) target_semaphore(%30 : memref<!tpu.dma_semaphore, #tpu.memory_space<semaphore_mem>>)
    %31 = vector.extract_strided_slice %5 {offsets = [0, 512], sizes = [8, 512], strides = [1, 1]} : vector<8x2048xf32> to vector<8x512xf32>
    %32 = arith.truncf %31 : vector<8x512xf32> to vector<8x512xbf16>
    %c1 = arith.constant 1 : index
    %c0_30 = arith.constant 0 : index
    %c0_31 = arith.constant 0 : index
    %33 = vector.load %arg16[%c1, %c0_30, %c0_31] : memref<2x512x1024xbf16, #tpu.memory_space<vmem>>, vector<1x512x1024xbf16>
    %34 = vector.shape_cast %33 : vector<1x512x1024xbf16> to vector<512x1024xbf16>
    %cst_32 = arith.constant dense<0.000000e+00> : vector<8x1024xf32>
    %35 = tpu.matmul %32, %34, %cst_32 {dimension_numbers = #tpu.dot_dimension_numbers<[1], [0], [0], [1], [0, 0, 1, 1], [], []>} : vector<8x512xbf16>, vector<512x1024xbf16>, vector<8x1024xf32> -> vector<8x1024xf32>
    %36 = arith.addf %20, %35 : vector<8x1024xf32>
    %c0_i32_33 = arith.constant 0 : i32
    %c0_i32_34 = arith.constant 0 : i32
    %c1024_i32_35 = arith.constant 1024 : i32
    %c0_i32_36 = arith.constant 0 : i32
    %37 = tpu.memref_slice %arg3[%c1024_i32_35, %c0_i32_36] : memref<2048x1024xbf16, #tpu.memory_space<any>> -> memref<512x1024xbf16, #tpu.memory_space<any>>
    %c0_i32_37 = arith.constant 0 : i32
    %c0_i32_38 = arith.constant 0 : i32
    %38 = tpu.memref_slice %arg16[%c0_i32_33, %c0_i32_37, %c0_i32_38] : memref<2x512x1024xbf16, #tpu.memory_space<vmem>> -> memref<1x512x1024xbf16, #tpu.memory_space<vmem>>
    %39 = tpu.memref_squeeze %38 : memref<1x512x1024xbf16, #tpu.memory_space<vmem>> -> memref<512x1024xbf16, #tpu.memory_space<vmem>>
    %40 = tpu.memref_slice %arg17[%c0_i32_34] : memref<2x!tpu.dma_semaphore, #tpu.memory_space<semaphore_mem>> -> memref<1x!tpu.dma_semaphore, #tpu.memory_space<semaphore_mem>>
    %41 = tpu.memref_squeeze %40 : memref<1x!tpu.dma_semaphore, #tpu.memory_space<semaphore_mem>> -> memref<!tpu.dma_semaphore, #tpu.memory_space<semaphore_mem>>
    tpu.wait_dma2 semaphore(%41 : memref<!tpu.dma_semaphore, #tpu.memory_space<semaphore_mem>>) src(%37 : memref<512x1024xbf16, #tpu.memory_space<any>>) dst(%39 : memref<512x1024xbf16, #tpu.memory_space<vmem>>)
    %c1_i32_39 = arith.constant 1 : i32
    %c1_i32_40 = arith.constant 1 : i32
    %c1536_i32 = arith.constant 1536 : i32
    %c0_i32_41 = arith.constant 0 : i32
    %42 = tpu.memref_slice %arg3[%c1536_i32, %c0_i32_41] : memref<2048x1024xbf16, #tpu.memory_space<any>> -> memref<512x1024xbf16, #tpu.memory_space<any>>
    %c0_i32_42 = arith.constant 0 : i32
    %c0_i32_43 = arith.constant 0 : i32
    %43 = tpu.memref_slice %arg16[%c1_i32_39, %c0_i32_42, %c0_i32_43] : memref<2x512x1024xbf16, #tpu.memory_space<vmem>> -> memref<1x512x1024xbf16, #tpu.memory_space<vmem>>
    %44 = tpu.memref_squeeze %43 : memref<1x512x1024xbf16, #tpu.memory_space<vmem>> -> memref<512x1024xbf16, #tpu.memory_space<vmem>>
    %45 = tpu.memref_slice %arg17[%c1_i32_40] : memref<2x!tpu.dma_semaphore, #tpu.memory_space<semaphore_mem>> -> memref<1x!tpu.dma_semaphore, #tpu.memory_space<semaphore_mem>>
    %46 = tpu.memref_squeeze %45 : memref<1x!tpu.dma_semaphore, #tpu.memory_space<semaphore_mem>> -> memref<!tpu.dma_semaphore, #tpu.memory_space<semaphore_mem>>
    tpu.enqueue_dma source(%42 : memref<512x1024xbf16, #tpu.memory_space<any>>) target(%44 : memref<512x1024xbf16, #tpu.memory_space<vmem>>) target_semaphore(%46 : memref<!tpu.dma_semaphore, #tpu.memory_space<semaphore_mem>>)
    %47 = vector.extract_strided_slice %5 {offsets = [0, 1024], sizes = [8, 512], strides = [1, 1]} : vector<8x2048xf32> to vector<8x512xf32>
    %48 = arith.truncf %47 : vector<8x512xf32> to vector<8x512xbf16>
    %c0_44 = arith.constant 0 : index
    %c0_45 = arith.constant 0 : index
    %c0_46 = arith.constant 0 : index
    %49 = vector.load %arg16[%c0_44, %c0_45, %c0_46] : memref<2x512x1024xbf16, #tpu.memory_space<vmem>>, vector<1x512x1024xbf16>
    %50 = vector.shape_cast %49 : vector<1x512x1024xbf16> to vector<512x1024xbf16>
    %cst_47 = arith.constant dense<0.000000e+00> : vector<8x1024xf32>
    %51 = tpu.matmul %48, %50, %cst_47 {dimension_numbers = #tpu.dot_dimension_numbers<[1], [0], [0], [1], [0, 0, 1, 1], [], []>} : vector<8x512xbf16>, vector<512x1024xbf16>, vector<8x1024xf32> -> vector<8x1024xf32>
    %52 = arith.addf %36, %51 : vector<8x1024xf32>
    %c1_i32_48 = arith.constant 1 : i32
    %c1_i32_49 = arith.constant 1 : i32
    %c1536_i32_50 = arith.constant 1536 : i32
    %c0_i32_51 = arith.constant 0 : i32
    %53 = tpu.memref_slice %arg3[%c1536_i32_50, %c0_i32_51] : memref<2048x1024xbf16, #tpu.memory_space<any>> -> memref<512x1024xbf16, #tpu.memory_space<any>>
    %c0_i32_52 = arith.constant 0 : i32
    %c0_i32_53 = arith.constant 0 : i32
    %54 = tpu.memref_slice %arg16[%c1_i32_48, %c0_i32_52, %c0_i32_53] : memref<2x512x1024xbf16, #tpu.memory_space<vmem>> -> memref<1x512x1024xbf16, #tpu.memory_space<vmem>>
    %55 = tpu.memref_squeeze %54 : memref<1x512x1024xbf16, #tpu.memory_space<vmem>> -> memref<512x1024xbf16, #tpu.memory_space<vmem>>
    %56 = tpu.memref_slice %arg17[%c1_i32_49] : memref<2x!tpu.dma_semaphore, #tpu.memory_space<semaphore_mem>> -> memref<1x!tpu.dma_semaphore, #tpu.memory_space<semaphore_mem>>
    %57 = tpu.memref_squeeze %56 : memref<1x!tpu.dma_semaphore, #tpu.memory_space<semaphore_mem>> -> memref<!tpu.dma_semaphore, #tpu.memory_space<semaphore_mem>>
    tpu.wait_dma2 semaphore(%57 : memref<!tpu.dma_semaphore, #tpu.memory_space<semaphore_mem>>) src(%53 : memref<512x1024xbf16, #tpu.memory_space<any>>) dst(%55 : memref<512x1024xbf16, #tpu.memory_space<vmem>>)
    %c0_i32_54 = arith.constant 0 : i32
    %c0_i32_55 = arith.constant 0 : i32
    %c0_i32_56 = arith.constant 0 : i32
    %c0_i32_57 = arith.constant 0 : i32
    %58 = tpu.memref_slice %arg4[%c0_i32_56, %c0_i32_57] : memref<1024x512xbf16, #tpu.memory_space<any>> -> memref<512x512xbf16, #tpu.memory_space<any>>
    %c0_i32_58 = arith.constant 0 : i32
    %c0_i32_59 = arith.constant 0 : i32
    %59 = tpu.memref_slice %arg16[%c0_i32_54, %c0_i32_58, %c0_i32_59] : memref<2x512x1024xbf16, #tpu.memory_space<vmem>> -> memref<1x512x512xbf16, #tpu.memory_space<vmem>>
    %60 = tpu.memref_squeeze %59 : memref<1x512x512xbf16, #tpu.memory_space<vmem>> -> memref<512x512xbf16, #tpu.memory_space<vmem>>
    %61 = tpu.memref_slice %arg17[%c0_i32_55] : memref<2x!tpu.dma_semaphore, #tpu.memory_space<semaphore_mem>> -> memref<1x!tpu.dma_semaphore, #tpu.memory_space<semaphore_mem>>
    %62 = tpu.memref_squeeze %61 : memref<1x!tpu.dma_semaphore, #tpu.memory_space<semaphore_mem>> -> memref<!tpu.dma_semaphore, #tpu.memory_space<semaphore_mem>>
    tpu.enqueue_dma source(%58 : memref<512x512xbf16, #tpu.memory_space<any>>) target(%60 : memref<512x512xbf16, #tpu.memory_space<vmem>>) target_semaphore(%62 : memref<!tpu.dma_semaphore, #tpu.memory_space<semaphore_mem>>)
    %63 = vector.extract_strided_slice %5 {offsets = [0, 1536], sizes = [8, 512], strides = [1, 1]} : vector<8x2048xf32> to vector<8x512xf32>
    %64 = arith.truncf %63 : vector<8x512xf32> to vector<8x512xbf16>
    %c1_60 = arith.constant 1 : index
    %c0_61 = arith.constant 0 : index
    %c0_62 = arith.constant 0 : index
    %65 = vector.load %arg16[%c1_60, %c0_61, %c0_62] : memref<2x512x1024xbf16, #tpu.memory_space<vmem>>, vector<1x512x1024xbf16>
    %66 = vector.shape_cast %65 : vector<1x512x1024xbf16> to vector<512x1024xbf16>
    %cst_63 = arith.constant dense<0.000000e+00> : vector<8x1024xf32>
    %67 = tpu.matmul %64, %66, %cst_63 {dimension_numbers = #tpu.dot_dimension_numbers<[1], [0], [0], [1], [0, 0, 1, 1], [], []>} : vector<8x512xbf16>, vector<512x1024xbf16>, vector<8x1024xf32> -> vector<8x1024xf32>
    %68 = arith.addf %52, %67 : vector<8x1024xf32>
    %c1_64 = arith.constant 1 : index
    %c0_65 = arith.constant 0 : index
    %69 = vector.load %arg2[%c1_64, %c0_65] : memref<3x4224xf32, #tpu.memory_space<vmem>>, vector<1x1024xf32>
    %c2 = arith.constant 2 : index
    %c0_66 = arith.constant 0 : index
    %70 = vector.load %arg2[%c2, %c0_66] : memref<3x4224xf32, #tpu.memory_space<vmem>>, vector<1x1024xf32>
    %cst_67 = arith.constant dense<0.000000e+00> : vector<1024xf32>
    %71 = vector.multi_reduction <add>, %68, %cst_67 [0] : vector<8x1024xf32> to vector<1024xf32>
    %72 = vector.shape_cast %71 : vector<1024xf32> to vector<1x1024xf32>
    %cst_68 = arith.constant 8.000000e+00 : f32
    %73 = vector.broadcast %cst_68 : f32 to vector<1x1024xf32>
    %74 = arith.divf %72, %73 : vector<1x1024xf32>
    %75 = vector.broadcast %74 : vector<1x1024xf32> to vector<8x1024xf32>
    %76 = arith.subf %68, %75 : vector<8x1024xf32>
    %77 = arith.mulf %76, %76 : vector<8x1024xf32>
    %cst_69 = arith.constant dense<0.000000e+00> : vector<1024xf32>
    %78 = vector.multi_reduction <add>, %77, %cst_69 [0] : vector<8x1024xf32> to vector<1024xf32>
    %79 = vector.shape_cast %78 : vector<1024xf32> to vector<1x1024xf32>
    %cst_70 = arith.constant 8.000000e+00 : f32
    %80 = vector.broadcast %cst_70 : f32 to vector<1x1024xf32>
    %81 = arith.divf %79, %80 : vector<1x1024xf32>
    %82 = vector.broadcast %74 : vector<1x1024xf32> to vector<8x1024xf32>
    %83 = arith.subf %68, %82 : vector<8x1024xf32>
    %cst_71 = arith.constant 9.99999974E-6 : f32
    %84 = vector.broadcast %cst_71 : f32 to vector<1x1024xf32>
    %85 = arith.addf %81, %84 : vector<1x1024xf32>
    %86 = math.rsqrt %85 : vector<1x1024xf32>
    %87 = vector.broadcast %86 : vector<1x1024xf32> to vector<8x1024xf32>
    %88 = arith.mulf %83, %87 : vector<8x1024xf32>
    %89 = vector.broadcast %69 : vector<1x1024xf32> to vector<8x1024xf32>
    %90 = arith.mulf %88, %89 : vector<8x1024xf32>
    %91 = vector.broadcast %70 : vector<1x1024xf32> to vector<8x1024xf32>
    %92 = arith.addf %90, %91 : vector<8x1024xf32>
    %cst_72 = arith.constant 0.000000e+00 : f32
    %93 = vector.broadcast %cst_72 : f32 to vector<8x1024xf32>
    %94 = arith.maximumf %92, %93 : vector<8x1024xf32>
    %c0_i32_73 = arith.constant 0 : i32
    %c0_i32_74 = arith.constant 0 : i32
    %c0_i32_75 = arith.constant 0 : i32
    %c0_i32_76 = arith.constant 0 : i32
    %95 = tpu.memref_slice %arg4[%c0_i32_75, %c0_i32_76] : memref<1024x512xbf16, #tpu.memory_space<any>> -> memref<512x512xbf16, #tpu.memory_space<any>>
    %c0_i32_77 = arith.constant 0 : i32
    %c0_i32_78 = arith.constant 0 : i32
    %96 = tpu.memref_slice %arg16[%c0_i32_73, %c0_i32_77, %c0_i32_78] : memref<2x512x1024xbf16, #tpu.memory_space<vmem>> -> memref<1x512x512xbf16, #tpu.memory_space<vmem>>
    %97 = tpu.memref_squeeze %96 : memref<1x512x512xbf16, #tpu.memory_space<vmem>> -> memref<512x512xbf16, #tpu.memory_space<vmem>>
    %98 = tpu.memref_slice %arg17[%c0_i32_74] : memref<2x!tpu.dma_semaphore, #tpu.memory_space<semaphore_mem>> -> memref<1x!tpu.dma_semaphore, #tpu.memory_space<semaphore_mem>>
    %99 = tpu.memref_squeeze %98 : memref<1x!tpu.dma_semaphore, #tpu.memory_space<semaphore_mem>> -> memref<!tpu.dma_semaphore, #tpu.memory_space<semaphore_mem>>
    tpu.wait_dma2 semaphore(%99 : memref<!tpu.dma_semaphore, #tpu.memory_space<semaphore_mem>>) src(%95 : memref<512x512xbf16, #tpu.memory_space<any>>) dst(%97 : memref<512x512xbf16, #tpu.memory_space<vmem>>)
    %c1_i32_79 = arith.constant 1 : i32
    %c1_i32_80 = arith.constant 1 : i32
    %c512_i32_81 = arith.constant 512 : i32
    %c0_i32_82 = arith.constant 0 : i32
    %100 = tpu.memref_slice %arg4[%c512_i32_81, %c0_i32_82] : memref<1024x512xbf16, #tpu.memory_space<any>> -> memref<512x512xbf16, #tpu.memory_space<any>>
    %c0_i32_83 = arith.constant 0 : i32
    %c0_i32_84 = arith.constant 0 : i32
    %101 = tpu.memref_slice %arg16[%c1_i32_79, %c0_i32_83, %c0_i32_84] : memref<2x512x1024xbf16, #tpu.memory_space<vmem>> -> memref<1x512x512xbf16, #tpu.memory_space<vmem>>
    %102 = tpu.memref_squeeze %101 : memref<1x512x512xbf16, #tpu.memory_space<vmem>> -> memref<512x512xbf16, #tpu.memory_space<vmem>>
    %103 = tpu.memref_slice %arg17[%c1_i32_80] : memref<2x!tpu.dma_semaphore, #tpu.memory_space<semaphore_mem>> -> memref<1x!tpu.dma_semaphore, #tpu.memory_space<semaphore_mem>>
    %104 = tpu.memref_squeeze %103 : memref<1x!tpu.dma_semaphore, #tpu.memory_space<semaphore_mem>> -> memref<!tpu.dma_semaphore, #tpu.memory_space<semaphore_mem>>
    tpu.enqueue_dma source(%100 : memref<512x512xbf16, #tpu.memory_space<any>>) target(%102 : memref<512x512xbf16, #tpu.memory_space<vmem>>) target_semaphore(%104 : memref<!tpu.dma_semaphore, #tpu.memory_space<semaphore_mem>>)
    %105 = vector.extract_strided_slice %94 {offsets = [0, 0], sizes = [8, 512], strides = [1, 1]} : vector<8x1024xf32> to vector<8x512xf32>
    %106 = arith.truncf %105 : vector<8x512xf32> to vector<8x512xbf16>
    %c0_85 = arith.constant 0 : index
    %c0_86 = arith.constant 0 : index
    %c0_87 = arith.constant 0 : index
    %107 = vector.load %arg16[%c0_85, %c0_86, %c0_87] : memref<2x512x1024xbf16, #tpu.memory_space<vmem>>, vector<1x512x512xbf16>
    %108 = vector.shape_cast %107 : vector<1x512x512xbf16> to vector<512x512xbf16>
    %cst_88 = arith.constant dense<0.000000e+00> : vector<8x512xf32>
    %109 = tpu.matmul %106, %108, %cst_88 {dimension_numbers = #tpu.dot_dimension_numbers<[1], [0], [0], [1], [0, 0, 1, 1], [], []>} : vector<8x512xbf16>, vector<512x512xbf16>, vector<8x512xf32> -> vector<8x512xf32>
    %c1_i32_89 = arith.constant 1 : i32
    %c1_i32_90 = arith.constant 1 : i32
    %c512_i32_91 = arith.constant 512 : i32
    %c0_i32_92 = arith.constant 0 : i32
    %110 = tpu.memref_slice %arg4[%c512_i32_91, %c0_i32_92] : memref<1024x512xbf16, #tpu.memory_space<any>> -> memref<512x512xbf16, #tpu.memory_space<any>>
    %c0_i32_93 = arith.constant 0 : i32
    %c0_i32_94 = arith.constant 0 : i32
    %111 = tpu.memref_slice %arg16[%c1_i32_89, %c0_i32_93, %c0_i32_94] : memref<2x512x1024xbf16, #tpu.memory_space<vmem>> -> memref<1x512x512xbf16, #tpu.memory_space<vmem>>
    %112 = tpu.memref_squeeze %111 : memref<1x512x512xbf16, #tpu.memory_space<vmem>> -> memref<512x512xbf16, #tpu.memory_space<vmem>>
    %113 = tpu.memref_slice %arg17[%c1_i32_90] : memref<2x!tpu.dma_semaphore, #tpu.memory_space<semaphore_mem>> -> memref<1x!tpu.dma_semaphore, #tpu.memory_space<semaphore_mem>>
    %114 = tpu.memref_squeeze %113 : memref<1x!tpu.dma_semaphore, #tpu.memory_space<semaphore_mem>> -> memref<!tpu.dma_semaphore, #tpu.memory_space<semaphore_mem>>
    tpu.wait_dma2 semaphore(%114 : memref<!tpu.dma_semaphore, #tpu.memory_space<semaphore_mem>>) src(%110 : memref<512x512xbf16, #tpu.memory_space<any>>) dst(%112 : memref<512x512xbf16, #tpu.memory_space<vmem>>)
    %c0_i32_95 = arith.constant 0 : i32
    %c0_i32_96 = arith.constant 0 : i32
    %c0_i32_97 = arith.constant 0 : i32
    %c0_i32_98 = arith.constant 0 : i32
    %115 = tpu.memref_slice %arg5[%c0_i32_97, %c0_i32_98] : memref<512x256xbf16, #tpu.memory_space<any>> -> memref<512x256xbf16, #tpu.memory_space<any>>
    %c0_i32_99 = arith.constant 0 : i32
    %c0_i32_100 = arith.constant 0 : i32
    %116 = tpu.memref_slice %arg16[%c0_i32_95, %c0_i32_99, %c0_i32_100] : memref<2x512x1024xbf16, #tpu.memory_space<vmem>> -> memref<1x512x256xbf16, #tpu.memory_space<vmem>>
    %117 = tpu.memref_squeeze %116 : memref<1x512x256xbf16, #tpu.memory_space<vmem>> -> memref<512x256xbf16, #tpu.memory_space<vmem>>
    %118 = tpu.memref_slice %arg17[%c0_i32_96] : memref<2x!tpu.dma_semaphore, #tpu.memory_space<semaphore_mem>> -> memref<1x!tpu.dma_semaphore, #tpu.memory_space<semaphore_mem>>
    %119 = tpu.memref_squeeze %118 : memref<1x!tpu.dma_semaphore, #tpu.memory_space<semaphore_mem>> -> memref<!tpu.dma_semaphore, #tpu.memory_space<semaphore_mem>>
    tpu.enqueue_dma source(%115 : memref<512x256xbf16, #tpu.memory_space<any>>) target(%117 : memref<512x256xbf16, #tpu.memory_space<vmem>>) target_semaphore(%119 : memref<!tpu.dma_semaphore, #tpu.memory_space<semaphore_mem>>)
    %120 = vector.extract_strided_slice %94 {offsets = [0, 512], sizes = [8, 512], strides = [1, 1]} : vector<8x1024xf32> to vector<8x512xf32>
    %121 = arith.truncf %120 : vector<8x512xf32> to vector<8x512xbf16>
    %c1_101 = arith.constant 1 : index
    %c0_102 = arith.constant 0 : index
    %c0_103 = arith.constant 0 : index
    %122 = vector.load %arg16[%c1_101, %c0_102, %c0_103] : memref<2x512x1024xbf16, #tpu.memory_space<vmem>>, vector<1x512x512xbf16>
    %123 = vector.shape_cast %122 : vector<1x512x512xbf16> to vector<512x512xbf16>
    %cst_104 = arith.constant dense<0.000000e+00> : vector<8x512xf32>
    %124 = tpu.matmul %121, %123, %cst_104 {dimension_numbers = #tpu.dot_dimension_numbers<[1], [0], [0], [1], [0, 0, 1, 1], [], []>} : vector<8x512xbf16>, vector<512x512xbf16>, vector<8x512xf32> -> vector<8x512xf32>
    %125 = arith.addf %109, %124 : vector<8x512xf32>
    %c1_105 = arith.constant 1 : index
    %c1024 = arith.constant 1024 : index
    %126 = vector.load %arg2[%c1_105, %c1024] : memref<3x4224xf32, #tpu.memory_space<vmem>>, vector<1x512xf32>
    %c2_106 = arith.constant 2 : index
    %c1024_107 = arith.constant 1024 : index
    %127 = vector.load %arg2[%c2_106, %c1024_107] : memref<3x4224xf32, #tpu.memory_space<vmem>>, vector<1x512xf32>
    %cst_108 = arith.constant dense<0.000000e+00> : vector<512xf32>
    %128 = vector.multi_reduction <add>, %125, %cst_108 [0] : vector<8x512xf32> to vector<512xf32>
    %129 = vector.shape_cast %128 : vector<512xf32> to vector<1x512xf32>
    %cst_109 = arith.constant 8.000000e+00 : f32
    %130 = vector.broadcast %cst_109 : f32 to vector<1x512xf32>
    %131 = arith.divf %129, %130 : vector<1x512xf32>
    %132 = vector.broadcast %131 : vector<1x512xf32> to vector<8x512xf32>
    %133 = arith.subf %125, %132 : vector<8x512xf32>
    %134 = arith.mulf %133, %133 : vector<8x512xf32>
    %cst_110 = arith.constant dense<0.000000e+00> : vector<512xf32>
    %135 = vector.multi_reduction <add>, %134, %cst_110 [0] : vector<8x512xf32> to vector<512xf32>
    %136 = vector.shape_cast %135 : vector<512xf32> to vector<1x512xf32>
    %cst_111 = arith.constant 8.000000e+00 : f32
    %137 = vector.broadcast %cst_111 : f32 to vector<1x512xf32>
    %138 = arith.divf %136, %137 : vector<1x512xf32>
    %139 = vector.broadcast %131 : vector<1x512xf32> to vector<8x512xf32>
    %140 = arith.subf %125, %139 : vector<8x512xf32>
    %cst_112 = arith.constant 9.99999974E-6 : f32
    %141 = vector.broadcast %cst_112 : f32 to vector<1x512xf32>
    %142 = arith.addf %138, %141 : vector<1x512xf32>
    %143 = math.rsqrt %142 : vector<1x512xf32>
    %144 = vector.broadcast %143 : vector<1x512xf32> to vector<8x512xf32>
    %145 = arith.mulf %140, %144 : vector<8x512xf32>
    %146 = vector.broadcast %126 : vector<1x512xf32> to vector<8x512xf32>
    %147 = arith.mulf %145, %146 : vector<8x512xf32>
    %148 = vector.broadcast %127 : vector<1x512xf32> to vector<8x512xf32>
    %149 = arith.addf %147, %148 : vector<8x512xf32>
    %cst_113 = arith.constant 0.000000e+00 : f32
    %150 = vector.broadcast %cst_113 : f32 to vector<8x512xf32>
    %151 = arith.maximumf %149, %150 : vector<8x512xf32>
    %c0_i32_114 = arith.constant 0 : i32
    %c0_i32_115 = arith.constant 0 : i32
    %c0_i32_116 = arith.constant 0 : i32
    %c0_i32_117 = arith.constant 0 : i32
    %152 = tpu.memref_slice %arg5[%c0_i32_116, %c0_i32_117] : memref<512x256xbf16, #tpu.memory_space<any>> -> memref<512x256xbf16, #tpu.memory_space<any>>
    %c0_i32_118 = arith.constant 0 : i32
    %c0_i32_119 = arith.constant 0 : i32
    %153 = tpu.memref_slice %arg16[%c0_i32_114, %c0_i32_118, %c0_i32_119] : memref<2x512x1024xbf16, #tpu.memory_space<vmem>> -> memref<1x512x256xbf16, #tpu.memory_space<vmem>>
    %154 = tpu.memref_squeeze %153 : memref<1x512x256xbf16, #tpu.memory_space<vmem>> -> memref<512x256xbf16, #tpu.memory_space<vmem>>
    %155 = tpu.memref_slice %arg17[%c0_i32_115] : memref<2x!tpu.dma_semaphore, #tpu.memory_space<semaphore_mem>> -> memref<1x!tpu.dma_semaphore, #tpu.memory_space<semaphore_mem>>
    %156 = tpu.memref_squeeze %155 : memref<1x!tpu.dma_semaphore, #tpu.memory_space<semaphore_mem>> -> memref<!tpu.dma_semaphore, #tpu.memory_space<semaphore_mem>>
    tpu.wait_dma2 semaphore(%156 : memref<!tpu.dma_semaphore, #tpu.memory_space<semaphore_mem>>) src(%152 : memref<512x256xbf16, #tpu.memory_space<any>>) dst(%154 : memref<512x256xbf16, #tpu.memory_space<vmem>>)
    %c1_i32_120 = arith.constant 1 : i32
    %c1_i32_121 = arith.constant 1 : i32
    %c0_i32_122 = arith.constant 0 : i32
    %c0_i32_123 = arith.constant 0 : i32
    %157 = tpu.memref_slice %arg6[%c0_i32_122, %c0_i32_123] : memref<256x128xbf16, #tpu.memory_space<any>> -> memref<256x128xbf16, #tpu.memory_space<any>>
    %c0_i32_124 = arith.constant 0 : i32
    %c0_i32_125 = arith.constant 0 : i32
    %158 = tpu.memref_slice %arg16[%c1_i32_120, %c0_i32_124, %c0_i32_125] : memref<2x512x1024xbf16, #tpu.memory_space<vmem>> -> memref<1x256x128xbf16, #tpu.memory_space<vmem>>
    %159 = tpu.memref_squeeze %158 : memref<1x256x128xbf16, #tpu.memory_space<vmem>> -> memref<256x128xbf16, #tpu.memory_space<vmem>>
    %160 = tpu.memref_slice %arg17[%c1_i32_121] : memref<2x!tpu.dma_semaphore, #tpu.memory_space<semaphore_mem>> -> memref<1x!tpu.dma_semaphore, #tpu.memory_space<semaphore_mem>>
    %161 = tpu.memref_squeeze %160 : memref<1x!tpu.dma_semaphore, #tpu.memory_space<semaphore_mem>> -> memref<!tpu.dma_semaphore, #tpu.memory_space<semaphore_mem>>
    tpu.enqueue_dma source(%157 : memref<256x128xbf16, #tpu.memory_space<any>>) target(%159 : memref<256x128xbf16, #tpu.memory_space<vmem>>) target_semaphore(%161 : memref<!tpu.dma_semaphore, #tpu.memory_space<semaphore_mem>>)
    %162 = arith.truncf %151 : vector<8x512xf32> to vector<8x512xbf16>
    %c0_126 = arith.constant 0 : index
    %c0_127 = arith.constant 0 : index
    %c0_128 = arith.constant 0 : index
    %163 = vector.load %arg16[%c0_126, %c0_127, %c0_128] : memref<2x512x1024xbf16, #tpu.memory_space<vmem>>, vector<1x512x256xbf16>
    %164 = vector.shape_cast %163 : vector<1x512x256xbf16> to vector<512x256xbf16>
    %cst_129 = arith.constant dense<0.000000e+00> : vector<8x256xf32>
    %165 = tpu.matmul %162, %164, %cst_129 {dimension_numbers = #tpu.dot_dimension_numbers<[1], [0], [0], [1], [0, 0, 1, 1], [], []>} : vector<8x512xbf16>, vector<512x256xbf16>, vector<8x256xf32> -> vector<8x256xf32>
    %c1_130 = arith.constant 1 : index
    %c1536 = arith.constant 1536 : index
    %166 = vector.load %arg2[%c1_130, %c1536] : memref<3x4224xf32, #tpu.memory_space<vmem>>, vector<1x256xf32>
    %c2_131 = arith.constant 2 : index
    %c1536_132 = arith.constant 1536 : index
    %167 = vector.load %arg2[%c2_131, %c1536_132] : memref<3x4224xf32, #tpu.memory_space<vmem>>, vector<1x256xf32>
    %cst_133 = arith.constant dense<0.000000e+00> : vector<256xf32>
    %168 = vector.multi_reduction <add>, %165, %cst_133 [0] : vector<8x256xf32> to vector<256xf32>
    %169 = vector.shape_cast %168 : vector<256xf32> to vector<1x256xf32>
    %cst_134 = arith.constant 8.000000e+00 : f32
    %170 = vector.broadcast %cst_134 : f32 to vector<1x256xf32>
    %171 = arith.divf %169, %170 : vector<1x256xf32>
    %172 = vector.broadcast %171 : vector<1x256xf32> to vector<8x256xf32>
    %173 = arith.subf %165, %172 : vector<8x256xf32>
    %174 = arith.mulf %173, %173 : vector<8x256xf32>
    %cst_135 = arith.constant dense<0.000000e+00> : vector<256xf32>
    %175 = vector.multi_reduction <add>, %174, %cst_135 [0] : vector<8x256xf32> to vector<256xf32>
    %176 = vector.shape_cast %175 : vector<256xf32> to vector<1x256xf32>
    %cst_136 = arith.constant 8.000000e+00 : f32
    %177 = vector.broadcast %cst_136 : f32 to vector<1x256xf32>
    %178 = arith.divf %176, %177 : vector<1x256xf32>
    %179 = vector.broadcast %171 : vector<1x256xf32> to vector<8x256xf32>
    %180 = arith.subf %165, %179 : vector<8x256xf32>
    %cst_137 = arith.constant 9.99999974E-6 : f32
    %181 = vector.broadcast %cst_137 : f32 to vector<1x256xf32>
    %182 = arith.addf %178, %181 : vector<1x256xf32>
    %183 = math.rsqrt %182 : vector<1x256xf32>
    %184 = vector.broadcast %183 : vector<1x256xf32> to vector<8x256xf32>
    %185 = arith.mulf %180, %184 : vector<8x256xf32>
    %186 = vector.broadcast %166 : vector<1x256xf32> to vector<8x256xf32>
    %187 = arith.mulf %185, %186 : vector<8x256xf32>
    %188 = vector.broadcast %167 : vector<1x256xf32> to vector<8x256xf32>
    %189 = arith.addf %187, %188 : vector<8x256xf32>
    %cst_138 = arith.constant 0.000000e+00 : f32
    %190 = vector.broadcast %cst_138 : f32 to vector<8x256xf32>
    %191 = arith.maximumf %189, %190 : vector<8x256xf32>
    %c1_i32_139 = arith.constant 1 : i32
    %c1_i32_140 = arith.constant 1 : i32
    %c0_i32_141 = arith.constant 0 : i32
    %c0_i32_142 = arith.constant 0 : i32
    %192 = tpu.memref_slice %arg6[%c0_i32_141, %c0_i32_142] : memref<256x128xbf16, #tpu.memory_space<any>> -> memref<256x128xbf16, #tpu.memory_space<any>>
    %c0_i32_143 = arith.constant 0 : i32
    %c0_i32_144 = arith.constant 0 : i32
    %193 = tpu.memref_slice %arg16[%c1_i32_139, %c0_i32_143, %c0_i32_144] : memref<2x512x1024xbf16, #tpu.memory_space<vmem>> -> memref<1x256x128xbf16, #tpu.memory_space<vmem>>
    %194 = tpu.memref_squeeze %193 : memref<1x256x128xbf16, #tpu.memory_space<vmem>> -> memref<256x128xbf16, #tpu.memory_space<vmem>>
    %195 = tpu.memref_slice %arg17[%c1_i32_140] : memref<2x!tpu.dma_semaphore, #tpu.memory_space<semaphore_mem>> -> memref<1x!tpu.dma_semaphore, #tpu.memory_space<semaphore_mem>>
    %196 = tpu.memref_squeeze %195 : memref<1x!tpu.dma_semaphore, #tpu.memory_space<semaphore_mem>> -> memref<!tpu.dma_semaphore, #tpu.memory_space<semaphore_mem>>
    tpu.wait_dma2 semaphore(%196 : memref<!tpu.dma_semaphore, #tpu.memory_space<semaphore_mem>>) src(%192 : memref<256x128xbf16, #tpu.memory_space<any>>) dst(%194 : memref<256x128xbf16, #tpu.memory_space<vmem>>)
    %c0_i32_145 = arith.constant 0 : i32
    %c0_i32_146 = arith.constant 0 : i32
    %c0_i32_147 = arith.constant 0 : i32
    %c0_i32_148 = arith.constant 0 : i32
    %197 = tpu.memref_slice %arg7[%c0_i32_147, %c0_i32_148] : memref<128x256xbf16, #tpu.memory_space<any>> -> memref<128x256xbf16, #tpu.memory_space<any>>
    %c0_i32_149 = arith.constant 0 : i32
    %c0_i32_150 = arith.constant 0 : i32
    %198 = tpu.memref_slice %arg16[%c0_i32_145, %c0_i32_149, %c0_i32_150] : memref<2x512x1024xbf16, #tpu.memory_space<vmem>> -> memref<1x128x256xbf16, #tpu.memory_space<vmem>>
    %199 = tpu.memref_squeeze %198 : memref<1x128x256xbf16, #tpu.memory_space<vmem>> -> memref<128x256xbf16, #tpu.memory_space<vmem>>
    %200 = tpu.memref_slice %arg17[%c0_i32_146] : memref<2x!tpu.dma_semaphore, #tpu.memory_space<semaphore_mem>> -> memref<1x!tpu.dma_semaphore, #tpu.memory_space<semaphore_mem>>
    %201 = tpu.memref_squeeze %200 : memref<1x!tpu.dma_semaphore, #tpu.memory_space<semaphore_mem>> -> memref<!tpu.dma_semaphore, #tpu.memory_space<semaphore_mem>>
    tpu.enqueue_dma source(%197 : memref<128x256xbf16, #tpu.memory_space<any>>) target(%199 : memref<128x256xbf16, #tpu.memory_space<vmem>>) target_semaphore(%201 : memref<!tpu.dma_semaphore, #tpu.memory_space<semaphore_mem>>)
    %202 = arith.truncf %191 : vector<8x256xf32> to vector<8x256xbf16>
    %c1_151 = arith.constant 1 : index
    %c0_152 = arith.constant 0 : index
    %c0_153 = arith.constant 0 : index
    %203 = vector.load %arg16[%c1_151, %c0_152, %c0_153] : memref<2x512x1024xbf16, #tpu.memory_space<vmem>>, vector<1x256x128xbf16>
    %204 = vector.shape_cast %203 : vector<1x256x128xbf16> to vector<256x128xbf16>
    %cst_154 = arith.constant dense<0.000000e+00> : vector<8x128xf32>
    %205 = tpu.matmul %202, %204, %cst_154 {dimension_numbers = #tpu.dot_dimension_numbers<[1], [0], [0], [1], [0, 0, 1, 1], [], []>} : vector<8x256xbf16>, vector<256x128xbf16>, vector<8x128xf32> -> vector<8x128xf32>
    %c1_155 = arith.constant 1 : index
    %c1792 = arith.constant 1792 : index
    %206 = vector.load %arg2[%c1_155, %c1792] : memref<3x4224xf32, #tpu.memory_space<vmem>>, vector<1x128xf32>
    %c2_156 = arith.constant 2 : index
    %c1792_157 = arith.constant 1792 : index
    %207 = vector.load %arg2[%c2_156, %c1792_157] : memref<3x4224xf32, #tpu.memory_space<vmem>>, vector<1x128xf32>
    %cst_158 = arith.constant dense<0.000000e+00> : vector<128xf32>
    %208 = vector.multi_reduction <add>, %205, %cst_158 [0] : vector<8x128xf32> to vector<128xf32>
    %209 = vector.shape_cast %208 : vector<128xf32> to vector<1x128xf32>
    %cst_159 = arith.constant 8.000000e+00 : f32
    %210 = vector.broadcast %cst_159 : f32 to vector<1x128xf32>
    %211 = arith.divf %209, %210 : vector<1x128xf32>
    %212 = vector.broadcast %211 : vector<1x128xf32> to vector<8x128xf32>
    %213 = arith.subf %205, %212 : vector<8x128xf32>
    %214 = arith.mulf %213, %213 : vector<8x128xf32>
    %cst_160 = arith.constant dense<0.000000e+00> : vector<128xf32>
    %215 = vector.multi_reduction <add>, %214, %cst_160 [0] : vector<8x128xf32> to vector<128xf32>
    %216 = vector.shape_cast %215 : vector<128xf32> to vector<1x128xf32>
    %cst_161 = arith.constant 8.000000e+00 : f32
    %217 = vector.broadcast %cst_161 : f32 to vector<1x128xf32>
    %218 = arith.divf %216, %217 : vector<1x128xf32>
    %219 = vector.broadcast %211 : vector<1x128xf32> to vector<8x128xf32>
    %220 = arith.subf %205, %219 : vector<8x128xf32>
    %cst_162 = arith.constant 9.99999974E-6 : f32
    %221 = vector.broadcast %cst_162 : f32 to vector<1x128xf32>
    %222 = arith.addf %218, %221 : vector<1x128xf32>
    %223 = math.rsqrt %222 : vector<1x128xf32>
    %224 = vector.broadcast %223 : vector<1x128xf32> to vector<8x128xf32>
    %225 = arith.mulf %220, %224 : vector<8x128xf32>
    %226 = vector.broadcast %206 : vector<1x128xf32> to vector<8x128xf32>
    %227 = arith.mulf %225, %226 : vector<8x128xf32>
    %228 = vector.broadcast %207 : vector<1x128xf32> to vector<8x128xf32>
    %229 = arith.addf %227, %228 : vector<8x128xf32>
    %cst_163 = arith.constant 0.000000e+00 : f32
    %230 = vector.broadcast %cst_163 : f32 to vector<8x128xf32>
    %231 = arith.maximumf %229, %230 : vector<8x128xf32>
    %c0_i32_164 = arith.constant 0 : i32
    %c0_i32_165 = arith.constant 0 : i32
    %c0_i32_166 = arith.constant 0 : i32
    %c0_i32_167 = arith.constant 0 : i32
    %232 = tpu.memref_slice %arg7[%c0_i32_166, %c0_i32_167] : memref<128x256xbf16, #tpu.memory_space<any>> -> memref<128x256xbf16, #tpu.memory_space<any>>
    %c0_i32_168 = arith.constant 0 : i32
    %c0_i32_169 = arith.constant 0 : i32
    %233 = tpu.memref_slice %arg16[%c0_i32_164, %c0_i32_168, %c0_i32_169] : memref<2x512x1024xbf16, #tpu.memory_space<vmem>> -> memref<1x128x256xbf16, #tpu.memory_space<vmem>>
    %234 = tpu.memref_squeeze %233 : memref<1x128x256xbf16, #tpu.memory_space<vmem>> -> memref<128x256xbf16, #tpu.memory_space<vmem>>
    %235 = tpu.memref_slice %arg17[%c0_i32_165] : memref<2x!tpu.dma_semaphore, #tpu.memory_space<semaphore_mem>> -> memref<1x!tpu.dma_semaphore, #tpu.memory_space<semaphore_mem>>
    %236 = tpu.memref_squeeze %235 : memref<1x!tpu.dma_semaphore, #tpu.memory_space<semaphore_mem>> -> memref<!tpu.dma_semaphore, #tpu.memory_space<semaphore_mem>>
    tpu.wait_dma2 semaphore(%236 : memref<!tpu.dma_semaphore, #tpu.memory_space<semaphore_mem>>) src(%232 : memref<128x256xbf16, #tpu.memory_space<any>>) dst(%234 : memref<128x256xbf16, #tpu.memory_space<vmem>>)
    %c1_i32_170 = arith.constant 1 : i32
    %c1_i32_171 = arith.constant 1 : i32
    %c0_i32_172 = arith.constant 0 : i32
    %c0_i32_173 = arith.constant 0 : i32
    %237 = tpu.memref_slice %arg8[%c0_i32_172, %c0_i32_173] : memref<256x512xbf16, #tpu.memory_space<any>> -> memref<256x512xbf16, #tpu.memory_space<any>>
    %c0_i32_174 = arith.constant 0 : i32
    %c0_i32_175 = arith.constant 0 : i32
    %238 = tpu.memref_slice %arg16[%c1_i32_170, %c0_i32_174, %c0_i32_175] : memref<2x512x1024xbf16, #tpu.memory_space<vmem>> -> memref<1x256x512xbf16, #tpu.memory_space<vmem>>
    %239 = tpu.memref_squeeze %238 : memref<1x256x512xbf16, #tpu.memory_space<vmem>> -> memref<256x512xbf16, #tpu.memory_space<vmem>>
    %240 = tpu.memref_slice %arg17[%c1_i32_171] : memref<2x!tpu.dma_semaphore, #tpu.memory_space<semaphore_mem>> -> memref<1x!tpu.dma_semaphore, #tpu.memory_space<semaphore_mem>>
    %241 = tpu.memref_squeeze %240 : memref<1x!tpu.dma_semaphore, #tpu.memory_space<semaphore_mem>> -> memref<!tpu.dma_semaphore, #tpu.memory_space<semaphore_mem>>
    tpu.enqueue_dma source(%237 : memref<256x512xbf16, #tpu.memory_space<any>>) target(%239 : memref<256x512xbf16, #tpu.memory_space<vmem>>) target_semaphore(%241 : memref<!tpu.dma_semaphore, #tpu.memory_space<semaphore_mem>>)
    %242 = arith.truncf %231 : vector<8x128xf32> to vector<8x128xbf16>
    %c0_176 = arith.constant 0 : index
    %c0_177 = arith.constant 0 : index
    %c0_178 = arith.constant 0 : index
    %243 = vector.load %arg16[%c0_176, %c0_177, %c0_178] : memref<2x512x1024xbf16, #tpu.memory_space<vmem>>, vector<1x128x256xbf16>
    %244 = vector.shape_cast %243 : vector<1x128x256xbf16> to vector<128x256xbf16>
    %cst_179 = arith.constant dense<0.000000e+00> : vector<8x256xf32>
    %245 = tpu.matmul %242, %244, %cst_179 {dimension_numbers = #tpu.dot_dimension_numbers<[1], [0], [0], [1], [0, 0, 1, 1], [], []>} : vector<8x128xbf16>, vector<128x256xbf16>, vector<8x256xf32> -> vector<8x256xf32>
    %c1_180 = arith.constant 1 : index
    %c1920 = arith.constant 1920 : index
    %246 = vector.load %arg2[%c1_180, %c1920] : memref<3x4224xf32, #tpu.memory_space<vmem>>, vector<1x256xf32>
    %c2_181 = arith.constant 2 : index
    %c1920_182 = arith.constant 1920 : index
    %247 = vector.load %arg2[%c2_181, %c1920_182] : memref<3x4224xf32, #tpu.memory_space<vmem>>, vector<1x256xf32>
    %cst_183 = arith.constant dense<0.000000e+00> : vector<256xf32>
    %248 = vector.multi_reduction <add>, %245, %cst_183 [0] : vector<8x256xf32> to vector<256xf32>
    %249 = vector.shape_cast %248 : vector<256xf32> to vector<1x256xf32>
    %cst_184 = arith.constant 8.000000e+00 : f32
    %250 = vector.broadcast %cst_184 : f32 to vector<1x256xf32>
    %251 = arith.divf %249, %250 : vector<1x256xf32>
    %252 = vector.broadcast %251 : vector<1x256xf32> to vector<8x256xf32>
    %253 = arith.subf %245, %252 : vector<8x256xf32>
    %254 = arith.mulf %253, %253 : vector<8x256xf32>
    %cst_185 = arith.constant dense<0.000000e+00> : vector<256xf32>
    %255 = vector.multi_reduction <add>, %254, %cst_185 [0] : vector<8x256xf32> to vector<256xf32>
    %256 = vector.shape_cast %255 : vector<256xf32> to vector<1x256xf32>
    %cst_186 = arith.constant 8.000000e+00 : f32
    %257 = vector.broadcast %cst_186 : f32 to vector<1x256xf32>
    %258 = arith.divf %256, %257 : vector<1x256xf32>
    %259 = vector.broadcast %251 : vector<1x256xf32> to vector<8x256xf32>
    %260 = arith.subf %245, %259 : vector<8x256xf32>
    %cst_187 = arith.constant 9.99999974E-6 : f32
    %261 = vector.broadcast %cst_187 : f32 to vector<1x256xf32>
    %262 = arith.addf %258, %261 : vector<1x256xf32>
    %263 = math.rsqrt %262 : vector<1x256xf32>
    %264 = vector.broadcast %263 : vector<1x256xf32> to vector<8x256xf32>
    %265 = arith.mulf %260, %264 : vector<8x256xf32>
    %266 = vector.broadcast %246 : vector<1x256xf32> to vector<8x256xf32>
    %267 = arith.mulf %265, %266 : vector<8x256xf32>
    %268 = vector.broadcast %247 : vector<1x256xf32> to vector<8x256xf32>
    %269 = arith.addf %267, %268 : vector<8x256xf32>
    %cst_188 = arith.constant 0.000000e+00 : f32
    %270 = vector.broadcast %cst_188 : f32 to vector<8x256xf32>
    %271 = arith.maximumf %269, %270 : vector<8x256xf32>
    %c1_i32_189 = arith.constant 1 : i32
    %c1_i32_190 = arith.constant 1 : i32
    %c0_i32_191 = arith.constant 0 : i32
    %c0_i32_192 = arith.constant 0 : i32
    %272 = tpu.memref_slice %arg8[%c0_i32_191, %c0_i32_192] : memref<256x512xbf16, #tpu.memory_space<any>> -> memref<256x512xbf16, #tpu.memory_space<any>>
    %c0_i32_193 = arith.constant 0 : i32
    %c0_i32_194 = arith.constant 0 : i32
    %273 = tpu.memref_slice %arg16[%c1_i32_189, %c0_i32_193, %c0_i32_194] : memref<2x512x1024xbf16, #tpu.memory_space<vmem>> -> memref<1x256x512xbf16, #tpu.memory_space<vmem>>
    %274 = tpu.memref_squeeze %273 : memref<1x256x512xbf16, #tpu.memory_space<vmem>> -> memref<256x512xbf16, #tpu.memory_space<vmem>>
    %275 = tpu.memref_slice %arg17[%c1_i32_190] : memref<2x!tpu.dma_semaphore, #tpu.memory_space<semaphore_mem>> -> memref<1x!tpu.dma_semaphore, #tpu.memory_space<semaphore_mem>>
    %276 = tpu.memref_squeeze %275 : memref<1x!tpu.dma_semaphore, #tpu.memory_space<semaphore_mem>> -> memref<!tpu.dma_semaphore, #tpu.memory_space<semaphore_mem>>
    tpu.wait_dma2 semaphore(%276 : memref<!tpu.dma_semaphore, #tpu.memory_space<semaphore_mem>>) src(%272 : memref<256x512xbf16, #tpu.memory_space<any>>) dst(%274 : memref<256x512xbf16, #tpu.memory_space<vmem>>)
    %c0_i32_195 = arith.constant 0 : i32
    %c0_i32_196 = arith.constant 0 : i32
    %c0_i32_197 = arith.constant 0 : i32
    %c0_i32_198 = arith.constant 0 : i32
    %277 = tpu.memref_slice %arg9[%c0_i32_197, %c0_i32_198] : memref<512x256xbf16, #tpu.memory_space<any>> -> memref<512x256xbf16, #tpu.memory_space<any>>
    %c0_i32_199 = arith.constant 0 : i32
    %c0_i32_200 = arith.constant 0 : i32
    %278 = tpu.memref_slice %arg16[%c0_i32_195, %c0_i32_199, %c0_i32_200] : memref<2x512x1024xbf16, #tpu.memory_space<vmem>> -> memref<1x512x256xbf16, #tpu.memory_space<vmem>>
    %279 = tpu.memref_squeeze %278 : memref<1x512x256xbf16, #tpu.memory_space<vmem>> -> memref<512x256xbf16, #tpu.memory_space<vmem>>
    %280 = tpu.memref_slice %arg17[%c0_i32_196] : memref<2x!tpu.dma_semaphore, #tpu.memory_space<semaphore_mem>> -> memref<1x!tpu.dma_semaphore, #tpu.memory_space<semaphore_mem>>
    %281 = tpu.memref_squeeze %280 : memref<1x!tpu.dma_semaphore, #tpu.memory_space<semaphore_mem>> -> memref<!tpu.dma_semaphore, #tpu.memory_space<semaphore_mem>>
    tpu.enqueue_dma source(%277 : memref<512x256xbf16, #tpu.memory_space<any>>) target(%279 : memref<512x256xbf16, #tpu.memory_space<vmem>>) target_semaphore(%281 : memref<!tpu.dma_semaphore, #tpu.memory_space<semaphore_mem>>)
    %282 = arith.truncf %271 : vector<8x256xf32> to vector<8x256xbf16>
    %c1_201 = arith.constant 1 : index
    %c0_202 = arith.constant 0 : index
    %c0_203 = arith.constant 0 : index
    %283 = vector.load %arg16[%c1_201, %c0_202, %c0_203] : memref<2x512x1024xbf16, #tpu.memory_space<vmem>>, vector<1x256x512xbf16>
    %284 = vector.shape_cast %283 : vector<1x256x512xbf16> to vector<256x512xbf16>
    %cst_204 = arith.constant dense<0.000000e+00> : vector<8x512xf32>
    %285 = tpu.matmul %282, %284, %cst_204 {dimension_numbers = #tpu.dot_dimension_numbers<[1], [0], [0], [1], [0, 0, 1, 1], [], []>} : vector<8x256xbf16>, vector<256x512xbf16>, vector<8x512xf32> -> vector<8x512xf32>
    %c0_205 = arith.constant 0 : index
    %c2176 = arith.constant 2176 : index
    %286 = vector.load %arg2[%c0_205, %c2176] : memref<3x4224xf32, #tpu.memory_space<vmem>>, vector<1x512xf32>
    %287 = vector.broadcast %286 : vector<1x512xf32> to vector<8x512xf32>
    %288 = arith.addf %285, %287 : vector<8x512xf32>
    %c0_206 = arith.constant 0 : index
    %c0_207 = arith.constant 0 : index
    %289 = vector.load %arg1[%c0_206, %c0_207] : memref<8x512xf32, #tpu.memory_space<vmem>>, vector<8x512xf32>
    %c0_i32_208 = arith.constant 0 : i32
    %c0_i32_209 = arith.constant 0 : i32
    %c0_i32_210 = arith.constant 0 : i32
    %c0_i32_211 = arith.constant 0 : i32
    %290 = tpu.memref_slice %arg9[%c0_i32_210, %c0_i32_211] : memref<512x256xbf16, #tpu.memory_space<any>> -> memref<512x256xbf16, #tpu.memory_space<any>>
    %c0_i32_212 = arith.constant 0 : i32
    %c0_i32_213 = arith.constant 0 : i32
    %291 = tpu.memref_slice %arg16[%c0_i32_208, %c0_i32_212, %c0_i32_213] : memref<2x512x1024xbf16, #tpu.memory_space<vmem>> -> memref<1x512x256xbf16, #tpu.memory_space<vmem>>
    %292 = tpu.memref_squeeze %291 : memref<1x512x256xbf16, #tpu.memory_space<vmem>> -> memref<512x256xbf16, #tpu.memory_space<vmem>>
    %293 = tpu.memref_slice %arg17[%c0_i32_209] : memref<2x!tpu.dma_semaphore, #tpu.memory_space<semaphore_mem>> -> memref<1x!tpu.dma_semaphore, #tpu.memory_space<semaphore_mem>>
    %294 = tpu.memref_squeeze %293 : memref<1x!tpu.dma_semaphore, #tpu.memory_space<semaphore_mem>> -> memref<!tpu.dma_semaphore, #tpu.memory_space<semaphore_mem>>
    tpu.wait_dma2 semaphore(%294 : memref<!tpu.dma_semaphore, #tpu.memory_space<semaphore_mem>>) src(%290 : memref<512x256xbf16, #tpu.memory_space<any>>) dst(%292 : memref<512x256xbf16, #tpu.memory_space<vmem>>)
    %c1_i32_214 = arith.constant 1 : i32
    %c1_i32_215 = arith.constant 1 : i32
    %c0_i32_216 = arith.constant 0 : i32
    %c0_i32_217 = arith.constant 0 : i32
    %295 = tpu.memref_slice %arg10[%c0_i32_216, %c0_i32_217] : memref<256x128xbf16, #tpu.memory_space<any>> -> memref<256x128xbf16, #tpu.memory_space<any>>
    %c0_i32_218 = arith.constant 0 : i32
    %c0_i32_219 = arith.constant 0 : i32
    %296 = tpu.memref_slice %arg16[%c1_i32_214, %c0_i32_218, %c0_i32_219] : memref<2x512x1024xbf16, #tpu.memory_space<vmem>> -> memref<1x256x128xbf16, #tpu.memory_space<vmem>>
    %297 = tpu.memref_squeeze %296 : memref<1x256x128xbf16, #tpu.memory_space<vmem>> -> memref<256x128xbf16, #tpu.memory_space<vmem>>
    %298 = tpu.memref_slice %arg17[%c1_i32_215] : memref<2x!tpu.dma_semaphore, #tpu.memory_space<semaphore_mem>> -> memref<1x!tpu.dma_semaphore, #tpu.memory_space<semaphore_mem>>
    %299 = tpu.memref_squeeze %298 : memref<1x!tpu.dma_semaphore, #tpu.memory_space<semaphore_mem>> -> memref<!tpu.dma_semaphore, #tpu.memory_space<semaphore_mem>>
    tpu.enqueue_dma source(%295 : memref<256x128xbf16, #tpu.memory_space<any>>) target(%297 : memref<256x128xbf16, #tpu.memory_space<vmem>>) target_semaphore(%299 : memref<!tpu.dma_semaphore, #tpu.memory_space<semaphore_mem>>)
    %300 = arith.truncf %289 : vector<8x512xf32> to vector<8x512xbf16>
    %c0_220 = arith.constant 0 : index
    %c0_221 = arith.constant 0 : index
    %c0_222 = arith.constant 0 : index
    %301 = vector.load %arg16[%c0_220, %c0_221, %c0_222] : memref<2x512x1024xbf16, #tpu.memory_space<vmem>>, vector<1x512x256xbf16>
    %302 = vector.shape_cast %301 : vector<1x512x256xbf16> to vector<512x256xbf16>
    %cst_223 = arith.constant dense<0.000000e+00> : vector<8x256xf32>
    %303 = tpu.matmul %300, %302, %cst_223 {dimension_numbers = #tpu.dot_dimension_numbers<[1], [0], [0], [1], [0, 0, 1, 1], [], []>} : vector<8x512xbf16>, vector<512x256xbf16>, vector<8x256xf32> -> vector<8x256xf32>
    %c1_224 = arith.constant 1 : index
    %c2688 = arith.constant 2688 : index
    %304 = vector.load %arg2[%c1_224, %c2688] : memref<3x4224xf32, #tpu.memory_space<vmem>>, vector<1x256xf32>
    %c2_225 = arith.constant 2 : index
    %c2688_226 = arith.constant 2688 : index
    %305 = vector.load %arg2[%c2_225, %c2688_226] : memref<3x4224xf32, #tpu.memory_space<vmem>>, vector<1x256xf32>
    %cst_227 = arith.constant dense<0.000000e+00> : vector<256xf32>
    %306 = vector.multi_reduction <add>, %303, %cst_227 [0] : vector<8x256xf32> to vector<256xf32>
    %307 = vector.shape_cast %306 : vector<256xf32> to vector<1x256xf32>
    %cst_228 = arith.constant 8.000000e+00 : f32
    %308 = vector.broadcast %cst_228 : f32 to vector<1x256xf32>
    %309 = arith.divf %307, %308 : vector<1x256xf32>
    %310 = vector.broadcast %309 : vector<1x256xf32> to vector<8x256xf32>
    %311 = arith.subf %303, %310 : vector<8x256xf32>
    %312 = arith.mulf %311, %311 : vector<8x256xf32>
    %cst_229 = arith.constant dense<0.000000e+00> : vector<256xf32>
    %313 = vector.multi_reduction <add>, %312, %cst_229 [0] : vector<8x256xf32> to vector<256xf32>
    %314 = vector.shape_cast %313 : vector<256xf32> to vector<1x256xf32>
    %cst_230 = arith.constant 8.000000e+00 : f32
    %315 = vector.broadcast %cst_230 : f32 to vector<1x256xf32>
    %316 = arith.divf %314, %315 : vector<1x256xf32>
    %317 = vector.broadcast %309 : vector<1x256xf32> to vector<8x256xf32>
    %318 = arith.subf %303, %317 : vector<8x256xf32>
    %cst_231 = arith.constant 9.99999974E-6 : f32
    %319 = vector.broadcast %cst_231 : f32 to vector<1x256xf32>
    %320 = arith.addf %316, %319 : vector<1x256xf32>
    %321 = math.rsqrt %320 : vector<1x256xf32>
    %322 = vector.broadcast %321 : vector<1x256xf32> to vector<8x256xf32>
    %323 = arith.mulf %318, %322 : vector<8x256xf32>
    %324 = vector.broadcast %304 : vector<1x256xf32> to vector<8x256xf32>
    %325 = arith.mulf %323, %324 : vector<8x256xf32>
    %326 = vector.broadcast %305 : vector<1x256xf32> to vector<8x256xf32>
    %327 = arith.addf %325, %326 : vector<8x256xf32>
    %cst_232 = arith.constant 0.000000e+00 : f32
    %328 = vector.broadcast %cst_232 : f32 to vector<8x256xf32>
    %329 = arith.maximumf %327, %328 : vector<8x256xf32>
    %c1_i32_233 = arith.constant 1 : i32
    %c1_i32_234 = arith.constant 1 : i32
    %c0_i32_235 = arith.constant 0 : i32
    %c0_i32_236 = arith.constant 0 : i32
    %330 = tpu.memref_slice %arg10[%c0_i32_235, %c0_i32_236] : memref<256x128xbf16, #tpu.memory_space<any>> -> memref<256x128xbf16, #tpu.memory_space<any>>
    %c0_i32_237 = arith.constant 0 : i32
    %c0_i32_238 = arith.constant 0 : i32
    %331 = tpu.memref_slice %arg16[%c1_i32_233, %c0_i32_237, %c0_i32_238] : memref<2x512x1024xbf16, #tpu.memory_space<vmem>> -> memref<1x256x128xbf16, #tpu.memory_space<vmem>>
    %332 = tpu.memref_squeeze %331 : memref<1x256x128xbf16, #tpu.memory_space<vmem>> -> memref<256x128xbf16, #tpu.memory_space<vmem>>
    %333 = tpu.memref_slice %arg17[%c1_i32_234] : memref<2x!tpu.dma_semaphore, #tpu.memory_space<semaphore_mem>> -> memref<1x!tpu.dma_semaphore, #tpu.memory_space<semaphore_mem>>
    %334 = tpu.memref_squeeze %333 : memref<1x!tpu.dma_semaphore, #tpu.memory_space<semaphore_mem>> -> memref<!tpu.dma_semaphore, #tpu.memory_space<semaphore_mem>>
    tpu.wait_dma2 semaphore(%334 : memref<!tpu.dma_semaphore, #tpu.memory_space<semaphore_mem>>) src(%330 : memref<256x128xbf16, #tpu.memory_space<any>>) dst(%332 : memref<256x128xbf16, #tpu.memory_space<vmem>>)
    %c0_i32_239 = arith.constant 0 : i32
    %c0_i32_240 = arith.constant 0 : i32
    %c0_i32_241 = arith.constant 0 : i32
    %c0_i32_242 = arith.constant 0 : i32
    %335 = tpu.memref_slice %arg11[%c0_i32_241, %c0_i32_242] : memref<128x256xbf16, #tpu.memory_space<any>> -> memref<128x256xbf16, #tpu.memory_space<any>>
    %c0_i32_243 = arith.constant 0 : i32
    %c0_i32_244 = arith.constant 0 : i32
    %336 = tpu.memref_slice %arg16[%c0_i32_239, %c0_i32_243, %c0_i32_244] : memref<2x512x1024xbf16, #tpu.memory_space<vmem>> -> memref<1x128x256xbf16, #tpu.memory_space<vmem>>
    %337 = tpu.memref_squeeze %336 : memref<1x128x256xbf16, #tpu.memory_space<vmem>> -> memref<128x256xbf16, #tpu.memory_space<vmem>>
    %338 = tpu.memref_slice %arg17[%c0_i32_240] : memref<2x!tpu.dma_semaphore, #tpu.memory_space<semaphore_mem>> -> memref<1x!tpu.dma_semaphore, #tpu.memory_space<semaphore_mem>>
    %339 = tpu.memref_squeeze %338 : memref<1x!tpu.dma_semaphore, #tpu.memory_space<semaphore_mem>> -> memref<!tpu.dma_semaphore, #tpu.memory_space<semaphore_mem>>
    tpu.enqueue_dma source(%335 : memref<128x256xbf16, #tpu.memory_space<any>>) target(%337 : memref<128x256xbf16, #tpu.memory_space<vmem>>) target_semaphore(%339 : memref<!tpu.dma_semaphore, #tpu.memory_space<semaphore_mem>>)
    %340 = arith.truncf %329 : vector<8x256xf32> to vector<8x256xbf16>
    %c1_245 = arith.constant 1 : index
    %c0_246 = arith.constant 0 : index
    %c0_247 = arith.constant 0 : index
    %341 = vector.load %arg16[%c1_245, %c0_246, %c0_247] : memref<2x512x1024xbf16, #tpu.memory_space<vmem>>, vector<1x256x128xbf16>
    %342 = vector.shape_cast %341 : vector<1x256x128xbf16> to vector<256x128xbf16>
    %cst_248 = arith.constant dense<0.000000e+00> : vector<8x128xf32>
    %343 = tpu.matmul %340, %342, %cst_248 {dimension_numbers = #tpu.dot_dimension_numbers<[1], [0], [0], [1], [0, 0, 1, 1], [], []>} : vector<8x256xbf16>, vector<256x128xbf16>, vector<8x128xf32> -> vector<8x128xf32>
    %c1_249 = arith.constant 1 : index
    %c2944 = arith.constant 2944 : index
    %344 = vector.load %arg2[%c1_249, %c2944] : memref<3x4224xf32, #tpu.memory_space<vmem>>, vector<1x128xf32>
    %c2_250 = arith.constant 2 : index
    %c2944_251 = arith.constant 2944 : index
    %345 = vector.load %arg2[%c2_250, %c2944_251] : memref<3x4224xf32, #tpu.memory_space<vmem>>, vector<1x128xf32>
    %cst_252 = arith.constant dense<0.000000e+00> : vector<128xf32>
    %346 = vector.multi_reduction <add>, %343, %cst_252 [0] : vector<8x128xf32> to vector<128xf32>
    %347 = vector.shape_cast %346 : vector<128xf32> to vector<1x128xf32>
    %cst_253 = arith.constant 8.000000e+00 : f32
    %348 = vector.broadcast %cst_253 : f32 to vector<1x128xf32>
    %349 = arith.divf %347, %348 : vector<1x128xf32>
    %350 = vector.broadcast %349 : vector<1x128xf32> to vector<8x128xf32>
    %351 = arith.subf %343, %350 : vector<8x128xf32>
    %352 = arith.mulf %351, %351 : vector<8x128xf32>
    %cst_254 = arith.constant dense<0.000000e+00> : vector<128xf32>
    %353 = vector.multi_reduction <add>, %352, %cst_254 [0] : vector<8x128xf32> to vector<128xf32>
    %354 = vector.shape_cast %353 : vector<128xf32> to vector<1x128xf32>
    %cst_255 = arith.constant 8.000000e+00 : f32
    %355 = vector.broadcast %cst_255 : f32 to vector<1x128xf32>
    %356 = arith.divf %354, %355 : vector<1x128xf32>
    %357 = vector.broadcast %349 : vector<1x128xf32> to vector<8x128xf32>
    %358 = arith.subf %343, %357 : vector<8x128xf32>
    %cst_256 = arith.constant 9.99999974E-6 : f32
    %359 = vector.broadcast %cst_256 : f32 to vector<1x128xf32>
    %360 = arith.addf %356, %359 : vector<1x128xf32>
    %361 = math.rsqrt %360 : vector<1x128xf32>
    %362 = vector.broadcast %361 : vector<1x128xf32> to vector<8x128xf32>
    %363 = arith.mulf %358, %362 : vector<8x128xf32>
    %364 = vector.broadcast %344 : vector<1x128xf32> to vector<8x128xf32>
    %365 = arith.mulf %363, %364 : vector<8x128xf32>
    %366 = vector.broadcast %345 : vector<1x128xf32> to vector<8x128xf32>
    %367 = arith.addf %365, %366 : vector<8x128xf32>
    %cst_257 = arith.constant 0.000000e+00 : f32
    %368 = vector.broadcast %cst_257 : f32 to vector<8x128xf32>
    %369 = arith.maximumf %367, %368 : vector<8x128xf32>
    %c0_i32_258 = arith.constant 0 : i32
    %c0_i32_259 = arith.constant 0 : i32
    %c0_i32_260 = arith.constant 0 : i32
    %c0_i32_261 = arith.constant 0 : i32
    %370 = tpu.memref_slice %arg11[%c0_i32_260, %c0_i32_261] : memref<128x256xbf16, #tpu.memory_space<any>> -> memref<128x256xbf16, #tpu.memory_space<any>>
    %c0_i32_262 = arith.constant 0 : i32
    %c0_i32_263 = arith.constant 0 : i32
    %371 = tpu.memref_slice %arg16[%c0_i32_258, %c0_i32_262, %c0_i32_263] : memref<2x512x1024xbf16, #tpu.memory_space<vmem>> -> memref<1x128x256xbf16, #tpu.memory_space<vmem>>
    %372 = tpu.memref_squeeze %371 : memref<1x128x256xbf16, #tpu.memory_space<vmem>> -> memref<128x256xbf16, #tpu.memory_space<vmem>>
    %373 = tpu.memref_slice %arg17[%c0_i32_259] : memref<2x!tpu.dma_semaphore, #tpu.memory_space<semaphore_mem>> -> memref<1x!tpu.dma_semaphore, #tpu.memory_space<semaphore_mem>>
    %374 = tpu.memref_squeeze %373 : memref<1x!tpu.dma_semaphore, #tpu.memory_space<semaphore_mem>> -> memref<!tpu.dma_semaphore, #tpu.memory_space<semaphore_mem>>
    tpu.wait_dma2 semaphore(%374 : memref<!tpu.dma_semaphore, #tpu.memory_space<semaphore_mem>>) src(%370 : memref<128x256xbf16, #tpu.memory_space<any>>) dst(%372 : memref<128x256xbf16, #tpu.memory_space<vmem>>)
    %c1_i32_264 = arith.constant 1 : i32
    %c1_i32_265 = arith.constant 1 : i32
    %c0_i32_266 = arith.constant 0 : i32
    %c0_i32_267 = arith.constant 0 : i32
    %375 = tpu.memref_slice %arg12[%c0_i32_266, %c0_i32_267] : memref<256x512xbf16, #tpu.memory_space<any>> -> memref<256x512xbf16, #tpu.memory_space<any>>
    %c0_i32_268 = arith.constant 0 : i32
    %c0_i32_269 = arith.constant 0 : i32
    %376 = tpu.memref_slice %arg16[%c1_i32_264, %c0_i32_268, %c0_i32_269] : memref<2x512x1024xbf16, #tpu.memory_space<vmem>> -> memref<1x256x512xbf16, #tpu.memory_space<vmem>>
    %377 = tpu.memref_squeeze %376 : memref<1x256x512xbf16, #tpu.memory_space<vmem>> -> memref<256x512xbf16, #tpu.memory_space<vmem>>
    %378 = tpu.memref_slice %arg17[%c1_i32_265] : memref<2x!tpu.dma_semaphore, #tpu.memory_space<semaphore_mem>> -> memref<1x!tpu.dma_semaphore, #tpu.memory_space<semaphore_mem>>
    %379 = tpu.memref_squeeze %378 : memref<1x!tpu.dma_semaphore, #tpu.memory_space<semaphore_mem>> -> memref<!tpu.dma_semaphore, #tpu.memory_space<semaphore_mem>>
    tpu.enqueue_dma source(%375 : memref<256x512xbf16, #tpu.memory_space<any>>) target(%377 : memref<256x512xbf16, #tpu.memory_space<vmem>>) target_semaphore(%379 : memref<!tpu.dma_semaphore, #tpu.memory_space<semaphore_mem>>)
    %380 = arith.truncf %369 : vector<8x128xf32> to vector<8x128xbf16>
    %c0_270 = arith.constant 0 : index
    %c0_271 = arith.constant 0 : index
    %c0_272 = arith.constant 0 : index
    %381 = vector.load %arg16[%c0_270, %c0_271, %c0_272] : memref<2x512x1024xbf16, #tpu.memory_space<vmem>>, vector<1x128x256xbf16>
    %382 = vector.shape_cast %381 : vector<1x128x256xbf16> to vector<128x256xbf16>
    %cst_273 = arith.constant dense<0.000000e+00> : vector<8x256xf32>
    %383 = tpu.matmul %380, %382, %cst_273 {dimension_numbers = #tpu.dot_dimension_numbers<[1], [0], [0], [1], [0, 0, 1, 1], [], []>} : vector<8x128xbf16>, vector<128x256xbf16>, vector<8x256xf32> -> vector<8x256xf32>
    %c1_274 = arith.constant 1 : index
    %c3072 = arith.constant 3072 : index
    %384 = vector.load %arg2[%c1_274, %c3072] : memref<3x4224xf32, #tpu.memory_space<vmem>>, vector<1x256xf32>
    %c2_275 = arith.constant 2 : index
    %c3072_276 = arith.constant 3072 : index
    %385 = vector.load %arg2[%c2_275, %c3072_276] : memref<3x4224xf32, #tpu.memory_space<vmem>>, vector<1x256xf32>
    %cst_277 = arith.constant dense<0.000000e+00> : vector<256xf32>
    %386 = vector.multi_reduction <add>, %383, %cst_277 [0] : vector<8x256xf32> to vector<256xf32>
    %387 = vector.shape_cast %386 : vector<256xf32> to vector<1x256xf32>
    %cst_278 = arith.constant 8.000000e+00 : f32
    %388 = vector.broadcast %cst_278 : f32 to vector<1x256xf32>
    %389 = arith.divf %387, %388 : vector<1x256xf32>
    %390 = vector.broadcast %389 : vector<1x256xf32> to vector<8x256xf32>
    %391 = arith.subf %383, %390 : vector<8x256xf32>
    %392 = arith.mulf %391, %391 : vector<8x256xf32>
    %cst_279 = arith.constant dense<0.000000e+00> : vector<256xf32>
    %393 = vector.multi_reduction <add>, %392, %cst_279 [0] : vector<8x256xf32> to vector<256xf32>
    %394 = vector.shape_cast %393 : vector<256xf32> to vector<1x256xf32>
    %cst_280 = arith.constant 8.000000e+00 : f32
    %395 = vector.broadcast %cst_280 : f32 to vector<1x256xf32>
    %396 = arith.divf %394, %395 : vector<1x256xf32>
    %397 = vector.broadcast %389 : vector<1x256xf32> to vector<8x256xf32>
    %398 = arith.subf %383, %397 : vector<8x256xf32>
    %cst_281 = arith.constant 9.99999974E-6 : f32
    %399 = vector.broadcast %cst_281 : f32 to vector<1x256xf32>
    %400 = arith.addf %396, %399 : vector<1x256xf32>
    %401 = math.rsqrt %400 : vector<1x256xf32>
    %402 = vector.broadcast %401 : vector<1x256xf32> to vector<8x256xf32>
    %403 = arith.mulf %398, %402 : vector<8x256xf32>
    %404 = vector.broadcast %384 : vector<1x256xf32> to vector<8x256xf32>
    %405 = arith.mulf %403, %404 : vector<8x256xf32>
    %406 = vector.broadcast %385 : vector<1x256xf32> to vector<8x256xf32>
    %407 = arith.addf %405, %406 : vector<8x256xf32>
    %cst_282 = arith.constant 0.000000e+00 : f32
    %408 = vector.broadcast %cst_282 : f32 to vector<8x256xf32>
    %409 = arith.maximumf %407, %408 : vector<8x256xf32>
    %c1_i32_283 = arith.constant 1 : i32
    %c1_i32_284 = arith.constant 1 : i32
    %c0_i32_285 = arith.constant 0 : i32
    %c0_i32_286 = arith.constant 0 : i32
    %410 = tpu.memref_slice %arg12[%c0_i32_285, %c0_i32_286] : memref<256x512xbf16, #tpu.memory_space<any>> -> memref<256x512xbf16, #tpu.memory_space<any>>
    %c0_i32_287 = arith.constant 0 : i32
    %c0_i32_288 = arith.constant 0 : i32
    %411 = tpu.memref_slice %arg16[%c1_i32_283, %c0_i32_287, %c0_i32_288] : memref<2x512x1024xbf16, #tpu.memory_space<vmem>> -> memref<1x256x512xbf16, #tpu.memory_space<vmem>>
    %412 = tpu.memref_squeeze %411 : memref<1x256x512xbf16, #tpu.memory_space<vmem>> -> memref<256x512xbf16, #tpu.memory_space<vmem>>
    %413 = tpu.memref_slice %arg17[%c1_i32_284] : memref<2x!tpu.dma_semaphore, #tpu.memory_space<semaphore_mem>> -> memref<1x!tpu.dma_semaphore, #tpu.memory_space<semaphore_mem>>
    %414 = tpu.memref_squeeze %413 : memref<1x!tpu.dma_semaphore, #tpu.memory_space<semaphore_mem>> -> memref<!tpu.dma_semaphore, #tpu.memory_space<semaphore_mem>>
    tpu.wait_dma2 semaphore(%414 : memref<!tpu.dma_semaphore, #tpu.memory_space<semaphore_mem>>) src(%410 : memref<256x512xbf16, #tpu.memory_space<any>>) dst(%412 : memref<256x512xbf16, #tpu.memory_space<vmem>>)
    %c0_i32_289 = arith.constant 0 : i32
    %c0_i32_290 = arith.constant 0 : i32
    %c0_i32_291 = arith.constant 0 : i32
    %c0_i32_292 = arith.constant 0 : i32
    %415 = tpu.memref_slice %arg13[%c0_i32_291, %c0_i32_292] : memref<512x256xbf16, #tpu.memory_space<any>> -> memref<512x256xbf16, #tpu.memory_space<any>>
    %c0_i32_293 = arith.constant 0 : i32
    %c0_i32_294 = arith.constant 0 : i32
    %416 = tpu.memref_slice %arg16[%c0_i32_289, %c0_i32_293, %c0_i32_294] : memref<2x512x1024xbf16, #tpu.memory_space<vmem>> -> memref<1x512x256xbf16, #tpu.memory_space<vmem>>
    %417 = tpu.memref_squeeze %416 : memref<1x512x256xbf16, #tpu.memory_space<vmem>> -> memref<512x256xbf16, #tpu.memory_space<vmem>>
    %418 = tpu.memref_slice %arg17[%c0_i32_290] : memref<2x!tpu.dma_semaphore, #tpu.memory_space<semaphore_mem>> -> memref<1x!tpu.dma_semaphore, #tpu.memory_space<semaphore_mem>>
    %419 = tpu.memref_squeeze %418 : memref<1x!tpu.dma_semaphore, #tpu.memory_space<semaphore_mem>> -> memref<!tpu.dma_semaphore, #tpu.memory_space<semaphore_mem>>
    tpu.enqueue_dma source(%415 : memref<512x256xbf16, #tpu.memory_space<any>>) target(%417 : memref<512x256xbf16, #tpu.memory_space<vmem>>) target_semaphore(%419 : memref<!tpu.dma_semaphore, #tpu.memory_space<semaphore_mem>>)
    %420 = arith.truncf %409 : vector<8x256xf32> to vector<8x256xbf16>
    %c1_295 = arith.constant 1 : index
    %c0_296 = arith.constant 0 : index
    %c0_297 = arith.constant 0 : index
    %421 = vector.load %arg16[%c1_295, %c0_296, %c0_297] : memref<2x512x1024xbf16, #tpu.memory_space<vmem>>, vector<1x256x512xbf16>
    %422 = vector.shape_cast %421 : vector<1x256x512xbf16> to vector<256x512xbf16>
    %cst_298 = arith.constant dense<0.000000e+00> : vector<8x512xf32>
    %423 = tpu.matmul %420, %422, %cst_298 {dimension_numbers = #tpu.dot_dimension_numbers<[1], [0], [0], [1], [0, 0, 1, 1], [], []>} : vector<8x256xbf16>, vector<256x512xbf16>, vector<8x512xf32> -> vector<8x512xf32>
    %c0_299 = arith.constant 0 : index
    %c3328 = arith.constant 3328 : index
    %424 = vector.load %arg2[%c0_299, %c3328] : memref<3x4224xf32, #tpu.memory_space<vmem>>, vector<1x512xf32>
    %425 = vector.broadcast %424 : vector<1x512xf32> to vector<8x512xf32>
    %426 = arith.addf %423, %425 : vector<8x512xf32>
    %427 = tpu.concatenate %288, %426 in 0 : vector<8x512xf32>, vector<8x512xf32> -> vector<16x512xf32>
    %c0_i32_300 = arith.constant 0 : i32
    %c0_i32_301 = arith.constant 0 : i32
    %c0_i32_302 = arith.constant 0 : i32
    %c0_i32_303 = arith.constant 0 : i32
    %428 = tpu.memref_slice %arg13[%c0_i32_302, %c0_i32_303] : memref<512x256xbf16, #tpu.memory_space<any>> -> memref<512x256xbf16, #tpu.memory_space<any>>
    %c0_i32_304 = arith.constant 0 : i32
    %c0_i32_305 = arith.constant 0 : i32
    %429 = tpu.memref_slice %arg16[%c0_i32_300, %c0_i32_304, %c0_i32_305] : memref<2x512x1024xbf16, #tpu.memory_space<vmem>> -> memref<1x512x256xbf16, #tpu.memory_space<vmem>>
    %430 = tpu.memref_squeeze %429 : memref<1x512x256xbf16, #tpu.memory_space<vmem>> -> memref<512x256xbf16, #tpu.memory_space<vmem>>
    %431 = tpu.memref_slice %arg17[%c0_i32_301] : memref<2x!tpu.dma_semaphore, #tpu.memory_space<semaphore_mem>> -> memref<1x!tpu.dma_semaphore, #tpu.memory_space<semaphore_mem>>
    %432 = tpu.memref_squeeze %431 : memref<1x!tpu.dma_semaphore, #tpu.memory_space<semaphore_mem>> -> memref<!tpu.dma_semaphore, #tpu.memory_space<semaphore_mem>>
    tpu.wait_dma2 semaphore(%432 : memref<!tpu.dma_semaphore, #tpu.memory_space<semaphore_mem>>) src(%428 : memref<512x256xbf16, #tpu.memory_space<any>>) dst(%430 : memref<512x256xbf16, #tpu.memory_space<vmem>>)
    %c1_i32_306 = arith.constant 1 : i32
    %c1_i32_307 = arith.constant 1 : i32
    %c0_i32_308 = arith.constant 0 : i32
    %c0_i32_309 = arith.constant 0 : i32
    %433 = tpu.memref_slice %arg14[%c0_i32_308, %c0_i32_309] : memref<256x128xbf16, #tpu.memory_space<any>> -> memref<256x128xbf16, #tpu.memory_space<any>>
    %c0_i32_310 = arith.constant 0 : i32
    %c0_i32_311 = arith.constant 0 : i32
    %434 = tpu.memref_slice %arg16[%c1_i32_306, %c0_i32_310, %c0_i32_311] : memref<2x512x1024xbf16, #tpu.memory_space<vmem>> -> memref<1x256x128xbf16, #tpu.memory_space<vmem>>
    %435 = tpu.memref_squeeze %434 : memref<1x256x128xbf16, #tpu.memory_space<vmem>> -> memref<256x128xbf16, #tpu.memory_space<vmem>>
    %436 = tpu.memref_slice %arg17[%c1_i32_307] : memref<2x!tpu.dma_semaphore, #tpu.memory_space<semaphore_mem>> -> memref<1x!tpu.dma_semaphore, #tpu.memory_space<semaphore_mem>>
    %437 = tpu.memref_squeeze %436 : memref<1x!tpu.dma_semaphore, #tpu.memory_space<semaphore_mem>> -> memref<!tpu.dma_semaphore, #tpu.memory_space<semaphore_mem>>
    tpu.enqueue_dma source(%433 : memref<256x128xbf16, #tpu.memory_space<any>>) target(%435 : memref<256x128xbf16, #tpu.memory_space<vmem>>) target_semaphore(%437 : memref<!tpu.dma_semaphore, #tpu.memory_space<semaphore_mem>>)
    %438 = arith.truncf %427 : vector<16x512xf32> to vector<16x512xbf16>
    %c0_312 = arith.constant 0 : index
    %c0_313 = arith.constant 0 : index
    %c0_314 = arith.constant 0 : index
    %439 = vector.load %arg16[%c0_312, %c0_313, %c0_314] : memref<2x512x1024xbf16, #tpu.memory_space<vmem>>, vector<1x512x256xbf16>
    %440 = vector.shape_cast %439 : vector<1x512x256xbf16> to vector<512x256xbf16>
    %cst_315 = arith.constant dense<0.000000e+00> : vector<16x256xf32>
    %441 = tpu.matmul %438, %440, %cst_315 {dimension_numbers = #tpu.dot_dimension_numbers<[1], [0], [0], [1], [0, 0, 1, 1], [], []>} : vector<16x512xbf16>, vector<512x256xbf16>, vector<16x256xf32> -> vector<16x256xf32>
    %c1_316 = arith.constant 1 : index
    %c3840 = arith.constant 3840 : index
    %442 = vector.load %arg2[%c1_316, %c3840] : memref<3x4224xf32, #tpu.memory_space<vmem>>, vector<1x256xf32>
    %c2_317 = arith.constant 2 : index
    %c3840_318 = arith.constant 3840 : index
    %443 = vector.load %arg2[%c2_317, %c3840_318] : memref<3x4224xf32, #tpu.memory_space<vmem>>, vector<1x256xf32>
    %444 = vector.extract_strided_slice %441 {offsets = [0, 0], sizes = [8, 256], strides = [1, 1]} : vector<16x256xf32> to vector<8x256xf32>
    %cst_319 = arith.constant dense<0.000000e+00> : vector<256xf32>
    %445 = vector.multi_reduction <add>, %444, %cst_319 [0] : vector<8x256xf32> to vector<256xf32>
    %446 = vector.shape_cast %445 : vector<256xf32> to vector<1x256xf32>
    %cst_320 = arith.constant 8.000000e+00 : f32
    %447 = vector.broadcast %cst_320 : f32 to vector<1x256xf32>
    %448 = arith.divf %446, %447 : vector<1x256xf32>
    %449 = vector.broadcast %448 : vector<1x256xf32> to vector<8x256xf32>
    %450 = arith.subf %444, %449 : vector<8x256xf32>
    %451 = arith.mulf %450, %450 : vector<8x256xf32>
    %cst_321 = arith.constant dense<0.000000e+00> : vector<256xf32>
    %452 = vector.multi_reduction <add>, %451, %cst_321 [0] : vector<8x256xf32> to vector<256xf32>
    %453 = vector.shape_cast %452 : vector<256xf32> to vector<1x256xf32>
    %cst_322 = arith.constant 8.000000e+00 : f32
    %454 = vector.broadcast %cst_322 : f32 to vector<1x256xf32>
    %455 = arith.divf %453, %454 : vector<1x256xf32>
    %456 = vector.broadcast %448 : vector<1x256xf32> to vector<8x256xf32>
    %457 = arith.subf %444, %456 : vector<8x256xf32>
    %cst_323 = arith.constant 9.99999974E-6 : f32
    %458 = vector.broadcast %cst_323 : f32 to vector<1x256xf32>
    %459 = arith.addf %455, %458 : vector<1x256xf32>
    %460 = math.rsqrt %459 : vector<1x256xf32>
    %461 = vector.broadcast %460 : vector<1x256xf32> to vector<8x256xf32>
    %462 = arith.mulf %457, %461 : vector<8x256xf32>
    %463 = vector.broadcast %442 : vector<1x256xf32> to vector<8x256xf32>
    %464 = arith.mulf %462, %463 : vector<8x256xf32>
    %465 = vector.broadcast %443 : vector<1x256xf32> to vector<8x256xf32>
    %466 = arith.addf %464, %465 : vector<8x256xf32>
    %467 = vector.extract_strided_slice %441 {offsets = [8, 0], sizes = [8, 256], strides = [1, 1]} : vector<16x256xf32> to vector<8x256xf32>
    %cst_324 = arith.constant dense<0.000000e+00> : vector<256xf32>
    %468 = vector.multi_reduction <add>, %467, %cst_324 [0] : vector<8x256xf32> to vector<256xf32>
    %469 = vector.shape_cast %468 : vector<256xf32> to vector<1x256xf32>
    %cst_325 = arith.constant 8.000000e+00 : f32
    %470 = vector.broadcast %cst_325 : f32 to vector<1x256xf32>
    %471 = arith.divf %469, %470 : vector<1x256xf32>
    %472 = vector.broadcast %471 : vector<1x256xf32> to vector<8x256xf32>
    %473 = arith.subf %467, %472 : vector<8x256xf32>
    %474 = arith.mulf %473, %473 : vector<8x256xf32>
    %cst_326 = arith.constant dense<0.000000e+00> : vector<256xf32>
    %475 = vector.multi_reduction <add>, %474, %cst_326 [0] : vector<8x256xf32> to vector<256xf32>
    %476 = vector.shape_cast %475 : vector<256xf32> to vector<1x256xf32>
    %cst_327 = arith.constant 8.000000e+00 : f32
    %477 = vector.broadcast %cst_327 : f32 to vector<1x256xf32>
    %478 = arith.divf %476, %477 : vector<1x256xf32>
    %479 = vector.broadcast %471 : vector<1x256xf32> to vector<8x256xf32>
    %480 = arith.subf %467, %479 : vector<8x256xf32>
    %cst_328 = arith.constant 9.99999974E-6 : f32
    %481 = vector.broadcast %cst_328 : f32 to vector<1x256xf32>
    %482 = arith.addf %478, %481 : vector<1x256xf32>
    %483 = math.rsqrt %482 : vector<1x256xf32>
    %484 = vector.broadcast %483 : vector<1x256xf32> to vector<8x256xf32>
    %485 = arith.mulf %480, %484 : vector<8x256xf32>
    %486 = vector.broadcast %442 : vector<1x256xf32> to vector<8x256xf32>
    %487 = arith.mulf %485, %486 : vector<8x256xf32>
    %488 = vector.broadcast %443 : vector<1x256xf32> to vector<8x256xf32>
    %489 = arith.addf %487, %488 : vector<8x256xf32>
    %490 = tpu.concatenate %466, %489 in 0 : vector<8x256xf32>, vector<8x256xf32> -> vector<16x256xf32>
    %cst_329 = arith.constant 0.000000e+00 : f32
    %491 = vector.broadcast %cst_329 : f32 to vector<16x256xf32>
    %492 = arith.maximumf %490, %491 : vector<16x256xf32>
    %c1_i32_330 = arith.constant 1 : i32
    %c1_i32_331 = arith.constant 1 : i32
    %c0_i32_332 = arith.constant 0 : i32
    %c0_i32_333 = arith.constant 0 : i32
    %493 = tpu.memref_slice %arg14[%c0_i32_332, %c0_i32_333] : memref<256x128xbf16, #tpu.memory_space<any>> -> memref<256x128xbf16, #tpu.memory_space<any>>
    %c0_i32_334 = arith.constant 0 : i32
    %c0_i32_335 = arith.constant 0 : i32
    %494 = tpu.memref_slice %arg16[%c1_i32_330, %c0_i32_334, %c0_i32_335] : memref<2x512x1024xbf16, #tpu.memory_space<vmem>> -> memref<1x256x128xbf16, #tpu.memory_space<vmem>>
    %495 = tpu.memref_squeeze %494 : memref<1x256x128xbf16, #tpu.memory_space<vmem>> -> memref<256x128xbf16, #tpu.memory_space<vmem>>
    %496 = tpu.memref_slice %arg17[%c1_i32_331] : memref<2x!tpu.dma_semaphore, #tpu.memory_space<semaphore_mem>> -> memref<1x!tpu.dma_semaphore, #tpu.memory_space<semaphore_mem>>
    %497 = tpu.memref_squeeze %496 : memref<1x!tpu.dma_semaphore, #tpu.memory_space<semaphore_mem>> -> memref<!tpu.dma_semaphore, #tpu.memory_space<semaphore_mem>>
    tpu.wait_dma2 semaphore(%497 : memref<!tpu.dma_semaphore, #tpu.memory_space<semaphore_mem>>) src(%493 : memref<256x128xbf16, #tpu.memory_space<any>>) dst(%495 : memref<256x128xbf16, #tpu.memory_space<vmem>>)
    %498 = arith.truncf %492 : vector<16x256xf32> to vector<16x256xbf16>
    %c1_336 = arith.constant 1 : index
    %c0_337 = arith.constant 0 : index
    %c0_338 = arith.constant 0 : index
    %499 = vector.load %arg16[%c1_336, %c0_337, %c0_338] : memref<2x512x1024xbf16, #tpu.memory_space<vmem>>, vector<1x256x128xbf16>
    %500 = vector.shape_cast %499 : vector<1x256x128xbf16> to vector<256x128xbf16>
    %cst_339 = arith.constant dense<0.000000e+00> : vector<16x128xf32>
    %501 = tpu.matmul %498, %500, %cst_339 {dimension_numbers = #tpu.dot_dimension_numbers<[1], [0], [0], [1], [0, 0, 1, 1], [], []>} : vector<16x256xbf16>, vector<256x128xbf16>, vector<16x128xf32> -> vector<16x128xf32>
    %502 = vector.extract_strided_slice %501 {offsets = [0, 0], sizes = [8, 128], strides = [1, 1]} : vector<16x128xf32> to vector<8x128xf32>
    %cst_340 = arith.constant dense<0.000000e+00> : vector<128xf32>
    %503 = vector.multi_reduction <add>, %502, %cst_340 [0] : vector<8x128xf32> to vector<128xf32>
    %504 = vector.shape_cast %503 : vector<128xf32> to vector<1x128xf32>
    %cst_341 = arith.constant 8.000000e+00 : f32
    %505 = vector.broadcast %cst_341 : f32 to vector<1x128xf32>
    %506 = arith.divf %504, %505 : vector<1x128xf32>
    %507 = vector.broadcast %506 : vector<1x128xf32> to vector<8x128xf32>
    %508 = arith.subf %502, %507 : vector<8x128xf32>
    %509 = arith.mulf %508, %508 : vector<8x128xf32>
    %cst_342 = arith.constant dense<0.000000e+00> : vector<128xf32>
    %510 = vector.multi_reduction <add>, %509, %cst_342 [0] : vector<8x128xf32> to vector<128xf32>
    %511 = vector.shape_cast %510 : vector<128xf32> to vector<1x128xf32>
    %cst_343 = arith.constant 8.000000e+00 : f32
    %512 = vector.broadcast %cst_343 : f32 to vector<1x128xf32>
    %513 = arith.divf %511, %512 : vector<1x128xf32>
    %514 = vector.broadcast %506 : vector<1x128xf32> to vector<8x128xf32>
    %515 = arith.subf %502, %514 : vector<8x128xf32>
    %cst_344 = arith.constant 9.99999974E-6 : f32
    %516 = vector.broadcast %cst_344 : f32 to vector<1x128xf32>
    %517 = arith.addf %513, %516 : vector<1x128xf32>
    %518 = math.rsqrt %517 : vector<1x128xf32>
    %519 = vector.broadcast %518 : vector<1x128xf32> to vector<8x128xf32>
    %520 = arith.mulf %515, %519 : vector<8x128xf32>
    %521 = vector.extract_strided_slice %501 {offsets = [8, 0], sizes = [8, 128], strides = [1, 1]} : vector<16x128xf32> to vector<8x128xf32>
    %cst_345 = arith.constant dense<0.000000e+00> : vector<128xf32>
    %522 = vector.multi_reduction <add>, %521, %cst_345 [0] : vector<8x128xf32> to vector<128xf32>
    %523 = vector.shape_cast %522 : vector<128xf32> to vector<1x128xf32>
    %cst_346 = arith.constant 8.000000e+00 : f32
    %524 = vector.broadcast %cst_346 : f32 to vector<1x128xf32>
    %525 = arith.divf %523, %524 : vector<1x128xf32>
    %526 = vector.broadcast %525 : vector<1x128xf32> to vector<8x128xf32>
    %527 = arith.subf %521, %526 : vector<8x128xf32>
    %528 = arith.mulf %527, %527 : vector<8x128xf32>
    %cst_347 = arith.constant dense<0.000000e+00> : vector<128xf32>
    %529 = vector.multi_reduction <add>, %528, %cst_347 [0] : vector<8x128xf32> to vector<128xf32>
    %530 = vector.shape_cast %529 : vector<128xf32> to vector<1x128xf32>
    %cst_348 = arith.constant 8.000000e+00 : f32
    %531 = vector.broadcast %cst_348 : f32 to vector<1x128xf32>
    %532 = arith.divf %530, %531 : vector<1x128xf32>
    %533 = vector.broadcast %525 : vector<1x128xf32> to vector<8x128xf32>
    %534 = arith.subf %521, %533 : vector<8x128xf32>
    %cst_349 = arith.constant 9.99999974E-6 : f32
    %535 = vector.broadcast %cst_349 : f32 to vector<1x128xf32>
    %536 = arith.addf %532, %535 : vector<1x128xf32>
    %537 = math.rsqrt %536 : vector<1x128xf32>
    %538 = vector.broadcast %537 : vector<1x128xf32> to vector<8x128xf32>
    %539 = arith.mulf %534, %538 : vector<8x128xf32>
    %cst_350 = arith.constant dense<0.000000e+00> : vector<128x128xf32>
    %540 = tpu.matmul %520, %539, %cst_350 {dimension_numbers = #tpu.dot_dimension_numbers<[0], [0], [1], [1], [0, 1, 1, 1], [], []>} : vector<8x128xf32>, vector<8x128xf32>, vector<128x128xf32> -> vector<128x128xf32>
    %541 = tpu.iota {dimensions = array<i32: 0>} : vector<128x128xi32>
    %542 = tpu.iota {dimensions = array<i32: 1>} : vector<128x128xi32>
    %543 = arith.cmpi eq, %541, %542 : vector<128x128xi32>
    %cst_351 = arith.constant 1.000000e+00 : f32
    %544 = vector.broadcast %cst_351 : f32 to vector<128x128xf32>
    %545 = arith.subf %540, %544 : vector<128x128xf32>
    %546 = arith.mulf %545, %545 : vector<128x128xf32>
    %547 = arith.mulf %540, %540 : vector<128x128xf32>
    %cst_352 = arith.constant 5.100000e-03 : f32
    %548 = vector.broadcast %cst_352 : f32 to vector<128x128xf32>
    %549 = arith.mulf %548, %547 : vector<128x128xf32>
    %550 = arith.select %543, %546, %549 : vector<128x128xi1>, vector<128x128xf32>
    %551 = vector.shape_cast %550 : vector<128x128xf32> to vector<1x128x128xf32>
    %cst_353 = arith.constant dense<0.000000e+00> : vector<1xf32>
    %552 = vector.multi_reduction <add>, %551, %cst_353 [1, 2] : vector<1x128x128xf32> to vector<1xf32>
    %553 = vector.shape_cast %552 : vector<1xf32> to vector<1x1x1xf32>
    %554 = vector.extract %553[0, 0, 0] : f32 from vector<1x1x1xf32>
    %c0_354 = arith.constant 0 : index
    %c0_355 = arith.constant 0 : index
    %555 = memref.load %arg15[%c0_354, %c0_355] : memref<1x1xf32, #tpu.memory_space<smem>>
    memref.store %554, %arg15[%c0_354, %c0_355] : memref<1x1xf32, #tpu.memory_space<smem>>
    return
  }
}

</mosaic_0001>

<bundles_post_ra>
// kernel: forward.1
= control target key start
LH: loop header
LB: loop body
LE: loop exit
PB: predicated region body
PF: predicated region fallthrough
CT: control target
= control target key end

     0   :  { %20 = vsyncpa [#allocation5], 0  ;;  %s8508_s0 = inlined_call_operand.hbm [shape: f32[8,2048], index: 0, kind: input, shape index: {}]   ;;  %s8509_s1 = inlined_call_operand.hbm [shape: f32[8,512], index: 1, kind: input, shape index: {}]   ;;  %s8510_s2 = inlined_call_operand.hbm [shape: f32[3,4224], index: 2, kind: input, shape index: {}]   ;;  %s8511_s3 = inlined_call_operand.hbm [shape: bf16[2048,1024], index: 3, kind: input, shape index: {}]   ;;  %s8512_s4 = inlined_call_operand.hbm [shape: bf16[1024,512], index: 4, kind: input, shape index: {}]   ;;  %s8513_s5 = inlined_call_operand.hbm [shape: bf16[512,256], index: 5, kind: input, shape index: {}]   ;;  %s8514_s6 = inlined_call_operand.hbm [shape: bf16[256,128], index: 6, kind: input, shape index: {}]   ;;  %s8515_s7 = inlined_call_operand.hbm [shape: bf16[128,256], index: 7, kind: input, shape index: {}]   ;;  %s8516_s8 = inlined_call_operand.hbm [shape: bf16[256,512], index: 8, kind: input, shape index: {}]   ;;  %s8517_s9 = inlined_call_operand.hbm [shape: bf16[512,256], index: 9, kind: input, shape index: {}]   ;;  %s8518_s10 = inlined_call_operand.hbm [shape: bf16[256,128], index: 10, kind: input, shape index: {}]   ;;  %s8519_s11 = inlined_call_operand.hbm [shape: bf16[128,256], index: 11, kind: input, shape index: {}]   ;;  %s8520_s12 = inlined_call_operand.hbm [shape: bf16[256,512], index: 12, kind: input, shape index: {}]   ;;  %s8521_s13 = inlined_call_operand.hbm [shape: bf16[512,256], index: 13, kind: input, shape index: {}]   ;;  %s8522_s14 = inlined_call_operand.hbm [shape: bf16[256,128], index: 14, kind: input, shape index: {}]   ;;  %s8523_s15 = inlined_call_operand.hbm [shape: f32[1,1], index: 15, kind: output, shape index: {}]  }
   0x1   :  { %21 = vsyncpa [#allocation8], 0 }
   0x2   :  { %22 = vsyncpa [#allocation6], 0  ;;  %s6513_s18 = smov [#allocation7]   ;;  %s6514_s20 = smov [#allocation4]  }
   0x3   :  { %s39_s19 = sshll.u32 %s6513_s18, 4  ;;  %s29_s21 = sshll.u32 %s6514_s20, 4  ;;  %s40_s19 = int_to_ptr.vmem [resolvable:$true] %s39_s19  ;;  %s30_s21 = int_to_ptr.vmem [resolvable:$true] %s29_s21 }
   0x4   :  { %s6333_s24 = scalar_lea.hbm %s8509_s1, 512 }
   0x5   :  { %p6334_p0 = scmp.ne.s32.totalorder %s8509_s1, %s6333_s24  ;;  %p6337_p1 = scmp.lt.u32.totalorder %s6333_s24, %s8509_s1 }
   0x7   :  { %p6339_p2 = pnand %p6337_p1, %p6334_p0 }
   0x9   :  { %6342 = shalt.err (!%p6339_p2)
}
   0xa   :  { %s6343_s29 = scalar_lea.vmem %s40_s19, 512  ;;  %p6348_p4 = scmp.lt.s32.totalorder %s40_s19, %s40_s19 }
   0xb   :  { %p6344_p3 = scmp.ne.s32.totalorder %s40_s19, %s6343_s29  ;;  %p6349_p5 = scmp.lt.s32.totalorder %s6343_s29, %s6343_s29 }
   0xd   :  { %p6350_p6 = por %p6349_p5, %p6348_p4 }
   0xf   :  { %p6351_p7 = pnand %p6350_p6, %p6344_p3 }
  0x11   :  { %6354 = shalt.err (!%p6351_p7)
}
  0x12   :  { %42 = dma.hbm_to_vmem [thread:$0]  %s8509_s1, 512, %s40_s19, [#allocation8]  }
  0x13   :  { %s6355_s20 = scalar_lea.hbm %s8508_s0, 2048 }
  0x14   :  { %p6356_p8 = scmp.ne.s32.totalorder %s8508_s0, %s6355_s20  ;;  %p6359_p9 = scmp.lt.u32.totalorder %s6355_s20, %s8508_s0 }
  0x16   :  { %p6361_p10 = pnand %p6359_p9, %p6356_p8 }
  0x18   :  { %6364 = shalt.err (!%p6361_p10)
}
  0x19   :  { %s6365_s26 = scalar_lea.vmem %s30_s21, 2048  ;;  %p6370_p12 = scmp.lt.s32.totalorder %s30_s21, %s30_s21 }
  0x1a   :  { %p6366_p11 = scmp.ne.s32.totalorder %s30_s21, %s6365_s26  ;;  %p6371_p13 = scmp.lt.s32.totalorder %s6365_s26, %s6365_s26 }
  0x1c   :  { %p6372_p0 = por %p6371_p13, %p6370_p12 }
  0x1e   :  { %p6373_p1 = pnand %p6372_p0, %p6366_p11 }
  0x20   :  { %6376 = shalt.err (!%p6373_p1)
}
  0x21   :  { %32 = dma.hbm_to_vmem [thread:$0]  %s8508_s0, 2048, %s30_s21, [#allocation5]  }
  0x22   :  { %s6515_s27 = smov [#allocation9]   ;;  %s6377_s16 = scalar_lea.hbm %s8510_s2, 2112 }
  0x23   :  { %s49_s28 = sshll.u32 %s6515_s27, 4  ;;  %p6378_p2 = scmp.ne.s32.totalorder %s8510_s2, %s6377_s16  ;;  %s50_s28 = int_to_ptr.vmem [resolvable:$true] %s49_s28 }
  0x24   :  { %p6381_p3 = scmp.lt.u32.totalorder %s6377_s16, %s8510_s2 }
  0x26   :  { %p6383_p4 = pnand %p6381_p3, %p6378_p2 }
  0x28   :  { %6386 = shalt.err (!%p6383_p4)
}
  0x29   :  { %s6387_s23 = scalar_lea.vmem %s50_s28, 2112  ;;  %p6392_p6 = scmp.lt.s32.totalorder %s50_s28, %s50_s28 }
  0x2a   :  { %p6388_p5 = scmp.ne.s32.totalorder %s50_s28, %s6387_s23  ;;  %p6393_p7 = scmp.lt.s32.totalorder %s6387_s23, %s6387_s23 }
  0x2c   :  { %p6394_p8 = por %p6393_p7, %p6392_p6 }
  0x2e   :  { %p6395_p9 = pnand %p6394_p8, %p6388_p5 }
  0x30   :  { %6398 = shalt.err (!%p6395_p9)
}
  0x31   :  { %52 = dma.hbm_to_vmem [thread:$0]  %s8510_s2, 2112, %s50_s28, [#allocation8]  }
  0x32   :  { %6475 = dma.done.wait [#allocation5], 2048  }
  0x33   :  { %6476 = vsyncadd [#allocation5], 4294965248 }
  0x34   :  { %6477 = dma.done.wait [#allocation8], 2624  }
  0x35   :  { %6478 = vsyncadd [#allocation8], 4294964672  ;;  %s67_s24 = sld [smem:[#allocation0]]   ;;  %s6516_s25 = smov 1024  }
  0x36   :  { %79 = sst [smem:[#allocation12]] %s6516_s25  ;;  %s6517_s26 = smov 8  }
  0x37   :  { %81 = sst [smem:[#allocation12 + $0x1]] %s6516_s25  ;;  %s6518_s1 = smov 64  }
  0x38   :  { %83 = sst [smem:[#allocation12 + $0x2]] %s6517_s26  ;;  %s6519_s19 = smov 128  }
  0x39   :  { %85 = sst [smem:[#allocation12 + $0x3]] %s6518_s1  ;;  %s6520_s2 = smov 2  }
  0x3a   :  { %87 = sst [smem:[#allocation12 + $0x4]] %s6519_s19  ;;  %s6521_s28 = smov 512  }
  0x3b   :  { %89 = sst [smem:[#allocation12 + $0x5]] %s6520_s2  ;;  %s5923_s27 = sshll.u32 %s67_s24, 26 }
  0x3c   :  { %91 = sst [smem:[#allocation12 + $0x6]] %s6521_s28  ;;  %s6666_s29 = sadd.s32 134217728, %s5923_s27 }
  0x3d   :  { %93 = sst [smem:[#allocation12 + $0x7]] %s6518_s1  ;;  %s6522_s30 = smov 4  }
  0x3e   :  { %95 = sst [smem:[#allocation12 + $0x8]] %s6522_s30  ;;  %s6523_s16 = smov [#allocation2]  }
  0x3f   :  { %s75_s17 = sshll.u32 %s6523_s16, 4  ;;  %s6524_s18 = smov [#allocation3]   ;;  %s6670_s17 = int_to_ptr.vmem [resolvable:$true] %s75_s17 }
  0x40   :  { %s6525_s20 = smov [#allocation11]  }
  0x41   :  { %97 = dma.general %s8511_s3, 32768, %s6670_s17, %s6524_s18, %s6525_s20, [#allocation12], %s6666_s29, 0  }
  0x42   :  { %v98_v0 = vld [vmem:[#allocation4] sm:$0xff]  ;;  %v99_v1 = vld [vmem:[#allocation4 + $0x8] sm:$0xff]  ;;  %v100_v2 = vld [vmem:[#allocation4 + $0x10] sm:$0xff] }
  0x43   :  { %v101_v3 = vld [vmem:[#allocation4 + $0x18] sm:$0xff]  ;;  %v6678_v4 = vld [vmem:[#allocation4 + $0x20] sm:$0xff]  ;;  %v6680_v5 = vld [vmem:[#allocation4 + $0x28] sm:$0xff] }
  0x44   :  { %v6682_v6 = vld [vmem:[#allocation4 + $0x30] sm:$0xff]  ;;  %v6684_v7 = vld [vmem:[#allocation4 + $0x38] sm:$0xff]  ;;  %v6686_v8 = vld [vmem:[#allocation4 + $0x40] sm:$0xff] }
  0x45   :  { %8543 = vst [vmem:[#allocation59_spill] sm:$0xff] %v6686_v8  ;;  %v6688_v9 = vld [vmem:[#allocation4 + $0x48] sm:$0xff]  ;;  %v6690_v10 = vld [vmem:[#allocation4 + $0x50] sm:$0xff]  ;;  %v6692_v11 = vld [vmem:[#allocation4 + $0x58] sm:$0xff] }
  0x46   :  { %8544 = vst [vmem:[#allocation60_spill] sm:$0xff] %v6688_v9  ;;  %8545 = vst [vmem:[#allocation61_spill] sm:$0xff] %v6690_v10  ;;  %v6694_v12 = vld [vmem:[#allocation4 + $0x60] sm:$0xff]  ;;  %v6696_v13 = vld [vmem:[#allocation4 + $0x68] sm:$0xff] }
  0x47   :  { %8546 = vst [vmem:[#allocation62_spill] sm:$0xff] %v6692_v11  ;;  %8547 = vst [vmem:[#allocation63_spill] sm:$0xff] %v6694_v12  ;;  %v6698_v14 = vld [vmem:[#allocation4 + $0x70] sm:$0xff]  ;;  %v6700_v15 = vld [vmem:[#allocation4 + $0x78] sm:$0xff] }
  0x48   :  { %8548 = vst [vmem:[#allocation64_spill] sm:$0xff] %v6696_v13  ;;  %8549 = vst [vmem:[#allocation65_spill] sm:$0xff] %v6698_v14 }
  0x49   :  { %8550 = vst [vmem:[#allocation66_spill] sm:$0xff] %v6700_v15 }
  0x4a   :  { %6479 = dma.done.wait [#allocation3], 32768 }
  0x4b   :  { %6480 = vsyncadd [#allocation3], 4294934528  ;;  %v6702_v16 = vpack.c.bf16 %v98_v0, %v98_v0  ;;  %v6704_v17 = vpack.c.bf16 %v99_v1, %v99_v1  ;;  %v6706_v18 = vpack.c.bf16 %v100_v2, %v100_v2  ;;  %v6708_v19 = vpack.c.bf16 %v101_v3, %v101_v3  ;;  %136 = sst [smem:[#allocation14]] %s6516_s25  ;;  %s6526_s0 = smov [#allocation2 + $0x800]  }
  0x4c   :  { %s132_s21 = sshll.u32 %s6526_s0, 4  ;;  %138 = sst [smem:[#allocation14 + $0x1]] %s6516_s25  ;;  %s6717_s21 = int_to_ptr.vmem [resolvable:$true] %s132_s21 }
  0x4d   :  { %8551 = vst [vmem:[#allocation67_spill] sm:$0xff] %v6702_v16  ;;  %8552 = vst [vmem:[#allocation68_spill] sm:$0xff] %v6706_v18  ;;  %140 = sst [smem:[#allocation14 + $0x2]] %s6517_s26  ;;  %s118_s16 = scalar_lea.hbm %s8511_s3, 32768 }
  0x4e   :  { %8553 = vst [vmem:[#allocation69_spill] sm:$0xff] %v6708_v19  ;;  %142 = sst [smem:[#allocation14 + $0x3]] %s6518_s1  ;;  %s8541_s20 = smov [#allocation3 + $0x1]  }
  0x4f   :  { %144 = sst [smem:[#allocation14 + $0x4]] %s6519_s19  ;;  %s6528_s22 = smov [#allocation13]  }
  0x50   :  { %146 = sst [smem:[#allocation14 + $0x5]] %s6520_s2 }
  0x51   :  { %148 = sst [smem:[#allocation14 + $0x6]] %s6521_s28 }
  0x52   :  { %150 = sst [smem:[#allocation14 + $0x7]] %s6518_s1 }
  0x53   :  { %152 = sst [smem:[#allocation14 + $0x8]] %s6522_s30 }
  0x54   :  { %154 = dma.general %s118_s16, 32768, %s6717_s21, %s8541_s20, %s6528_s22, [#allocation14], %s6666_s29, 0  }
  0x55   :  { %v6727_v20 = vld [vmem:[#allocation2] sm:$0xff]  ;;  %v6729_v21 = vld [vmem:[#allocation2 + $0x8] sm:$0xff]  ;;  %v6731_v22 = vld [vmem:[#allocation2 + $0x10] sm:$0xff] }
  0x56   :  { %v6733_v23 = vld [vmem:[#allocation2 + $0x18] sm:$0xff]  ;;  %v6735_v24 = vld [vmem:[#allocation2 + $0x20] sm:$0xff]  ;;  %v6737_v25 = vld [vmem:[#allocation2 + $0x28] sm:$0xff] }
  0x57   :  { %8554 = vst [vmem:[#allocation70_spill] sm:$0xff] %v6735_v24  ;;  %8555 = vst [vmem:[#allocation71_spill] sm:$0xff] %v6737_v25  ;;  %v6739_v26 = vld [vmem:[#allocation2 + $0x30] sm:$0xff]  ;;  %v6741_v27 = vld [vmem:[#allocation2 + $0x38] sm:$0xff] }
  0x58   :  { %8556 = vst [vmem:[#allocation72_spill] sm:$0xff] %v6739_v26  ;;  %8557 = vst [vmem:[#allocation73_spill] sm:$0xff] %v6741_v27  ;;  %v6743_v28 = vld [vmem:[#allocation2 + $0x40] sm:$0xff]  ;;  %v6745_v29 = vld [vmem:[#allocation2 + $0x48] sm:$0xff] }
  0x59   :  { %v6747_v30 = vld [vmem:[#allocation2 + $0x50] sm:$0xff]  ;;  %v6749_v31 = vld [vmem:[#allocation2 + $0x58] sm:$0xff]  ;;  %v6751_v32 = vld [vmem:[#allocation2 + $0x60] sm:$0xff] }
  0x5a   :  { %8558 = vst [vmem:[#allocation74_spill] sm:$0xff] %v6751_v32  ;;  %v6753_v33 = vld [vmem:[#allocation2 + $0x68] sm:$0xff]  ;;  %v6755_v34 = vld [vmem:[#allocation2 + $0x70] sm:$0xff]  ;;  %v6757_v35 = vld [vmem:[#allocation2 + $0x78] sm:$0xff] }
  0x5b   :  { %8559 = vst [vmem:[#allocation75_spill] sm:$0xff] %v6753_v33  ;;  %8560 = vst [vmem:[#allocation76_spill] sm:$0xff] %v6755_v34  ;;  %v6759_v36 = vld [vmem:[#allocation2 + $0x80] sm:$0xff]  ;;  %v6761_v37 = vld [vmem:[#allocation2 + $0x88] sm:$0xff] }
  0x5c   :  { %8561 = vst [vmem:[#allocation77_spill] sm:$0xff] %v6757_v35  ;;  %v6763_v38 = vld [vmem:[#allocation2 + $0x90] sm:$0xff]  ;;  %v6765_v39 = vld [vmem:[#allocation2 + $0x98] sm:$0xff]  ;;  %v6767_v40 = vld [vmem:[#allocation2 + $0xa0] sm:$0xff] }
  0x5d   :  { %8562 = vst [vmem:[#allocation78_spill] sm:$0xff] %v6767_v40  ;;  %v6769_v41 = vld [vmem:[#allocation2 + $0xa8] sm:$0xff]  ;;  %v6771_v42 = vld [vmem:[#allocation2 + $0xb0] sm:$0xff]  ;;  %v6773_v43 = vld [vmem:[#allocation2 + $0xb8] sm:$0xff] }
  0x5e   :  { %8563 = vst [vmem:[#allocation79_spill] sm:$0xff] %v6769_v41  ;;  %8564 = vst [vmem:[#allocation80_spill] sm:$0xff] %v6771_v42  ;;  %v6775_v44 = vld [vmem:[#allocation2 + $0xc0] sm:$0xff]  ;;  %v6777_v45 = vld [vmem:[#allocation2 + $0xc8] sm:$0xff] }
  0x5f   :  { %8565 = vst [vmem:[#allocation81_spill] sm:$0xff] %v6773_v43  ;;  %v6779_v46 = vld [vmem:[#allocation2 + $0xd0] sm:$0xff]  ;;  %v6781_v47 = vld [vmem:[#allocation2 + $0xd8] sm:$0xff]  ;;  %v6783_v48 = vld [vmem:[#allocation2 + $0xe0] sm:$0xff] }
  0x60   :  { %8566 = vst [vmem:[#allocation82_spill] sm:$0xff] %v6783_v48  ;;  %v6785_v49 = vld [vmem:[#allocation2 + $0xe8] sm:$0xff]  ;;  %v6787_v50 = vld [vmem:[#allocation2 + $0xf0] sm:$0xff]  ;;  %v6789_v51 = vld [vmem:[#allocation2 + $0xf8] sm:$0xff] }
  0x61   :  { %8567 = vst [vmem:[#allocation83_spill] sm:$0xff] %v6785_v49  ;;  %8568 = vst [vmem:[#allocation84_spill] sm:$0xff] %v6787_v50  ;;  %v6791_v52 = vld [vmem:[#allocation2 + $0x100] sm:$0xff]  ;;  %v6793_v53 = vld [vmem:[#allocation2 + $0x108] sm:$0xff] }
  0x62   :  { %8569 = vst [vmem:[#allocation85_spill] sm:$0xff] %v6789_v51  ;;  %v6795_v54 = vld [vmem:[#allocation2 + $0x110] sm:$0xff]  ;;  %v6797_v55 = vld [vmem:[#allocation2 + $0x118] sm:$0xff]  ;;  %v6799_v56 = vld [vmem:[#allocation2 + $0x120] sm:$0xff] }
  0x63   :  { %8570 = vst [vmem:[#allocation86_spill] sm:$0xff] %v6799_v56  ;;  %v6801_v57 = vld [vmem:[#allocation2 + $0x128] sm:$0xff]  ;;  %v6803_v58 = vld [vmem:[#allocation2 + $0x130] sm:$0xff]  ;;  %v6805_v59 = vld [vmem:[#allocation2 + $0x138] sm:$0xff] }
  0x64   :  { %8571 = vst [vmem:[#allocation87_spill] sm:$0xff] %v6801_v57  ;;  %8572 = vst [vmem:[#allocation88_spill] sm:$0xff] %v6803_v58  ;;  %v6807_v60 = vld [vmem:[#allocation2 + $0x140] sm:$0xff]  ;;  %v6809_v61 = vld [vmem:[#allocation2 + $0x148] sm:$0xff] }
  0x65   :  { %8573 = vst [vmem:[#allocation89_spill] sm:$0xff] %v6805_v59  ;;  %v6811_v62 = vld [vmem:[#allocation2 + $0x150] sm:$0xff]  ;;  %v6813_v63 = vld [vmem:[#allocation2 + $0x158] sm:$0xff]  ;;  %v6815_v0 = vld [vmem:[#allocation2 + $0x160] sm:$0xff] }
  0x66   :  { %8574 = vst [vmem:[#allocation90_spill] sm:$0xff] %v6815_v0  ;;  %v6817_v1 = vld [vmem:[#allocation2 + $0x168] sm:$0xff]  ;;  %v6819_v2 = vld [vmem:[#allocation2 + $0x170] sm:$0xff]  ;;  %v6821_v3 = vld [vmem:[#allocation2 + $0x178] sm:$0xff] }
  0x67   :  { %8575 = vst [vmem:[#allocation91_spill] sm:$0xff] %v6817_v1  ;;  %8576 = vst [vmem:[#allocation92_spill] sm:$0xff] %v6819_v2  ;;  %v6823_v14 = vld [vmem:[#allocation2 + $0x180] sm:$0xff]  ;;  %v6825_v15 = vld [vmem:[#allocation2 + $0x188] sm:$0xff] }
  0x68   :  { %8577 = vst [vmem:[#allocation93_spill] sm:$0xff] %v6821_v3  ;;  %v6827_v12 = vld [vmem:[#allocation2 + $0x190] sm:$0xff]  ;;  %v6829_v13 = vld [vmem:[#allocation2 + $0x198] sm:$0xff]  ;;  %v6831_v10 = vld [vmem:[#allocation2 + $0x1a0] sm:$0xff] }
  0x69   :  { %8578 = vst [vmem:[#allocation94_spill] sm:$0xff] %v6831_v10  ;;  %v6833_v11 = vld [vmem:[#allocation2 + $0x1a8] sm:$0xff]  ;;  %v6835_v8 = vld [vmem:[#allocation2 + $0x1b0] sm:$0xff]  ;;  %v6837_v9 = vld [vmem:[#allocation2 + $0x1b8] sm:$0xff] }
  0x6a   :  { %8579 = vst [vmem:[#allocation95_spill] sm:$0xff] %v6833_v11  ;;  %8580 = vst [vmem:[#allocation96_spill] sm:$0xff] %v6835_v8  ;;  %v6839_v0 = vld [vmem:[#allocation2 + $0x1c0] sm:$0xff]  ;;  %v6841_v2 = vld [vmem:[#allocation2 + $0x1c8] sm:$0xff] }
  0x6b   :  { %8581 = vst [vmem:[#allocation97_spill] sm:$0xff] %v6837_v9  ;;  %v6843_v3 = vld [vmem:[#allocation2 + $0x1d0] sm:$0xff]  ;;  %v6845_v1 = vld [vmem:[#allocation2 + $0x1d8] sm:$0xff]  ;;  %v6847_v58 = vld [vmem:[#allocation2 + $0x1e0] sm:$0xff] }
  0x6c   :  { %8582 = vst [vmem:[#allocation98_spill] sm:$0xff] %v6847_v58  ;;  %v6849_v56 = vld [vmem:[#allocation2 + $0x1e8] sm:$0xff]  ;;  %v6851_v59 = vld [vmem:[#allocation2 + $0x1f0] sm:$0xff]  ;;  %v6853_v10 = vld [vmem:[#allocation2 + $0x1f8] sm:$0xff] }
  0x6d   :  { %8583 = vst [vmem:[#allocation99_spill] sm:$0xff] %v6849_v56  ;;  %8584 = vst [vmem:[#allocation100_spill] sm:$0xff] %v6851_v59  ;;  %v6855_v11 = vld [vmem:[#allocation2 + $0x200] sm:$0xff]  ;;  %v6857_v8 = vld [vmem:[#allocation2 + $0x208] sm:$0xff] }
  0x6e   :  { %8585 = vst [vmem:[#allocation101_spill] sm:$0xff] %v6853_v10  ;;  %v6859_v9 = vld [vmem:[#allocation2 + $0x210] sm:$0xff]  ;;  %v6861_v57 = vld [vmem:[#allocation2 + $0x218] sm:$0xff]  ;;  %v6863_v50 = vld [vmem:[#allocation2 + $0x220] sm:$0xff] }
  0x6f   :  { %8586 = vst [vmem:[#allocation102_spill] sm:$0xff] %v6863_v50  ;;  %v6865_v48 = vld [vmem:[#allocation2 + $0x228] sm:$0xff]  ;;  %v6867_v51 = vld [vmem:[#allocation2 + $0x230] sm:$0xff]  ;;  %v6869_v58 = vld [vmem:[#allocation2 + $0x238] sm:$0xff] }
  0x70   :  { %8587 = vst [vmem:[#allocation103_spill] sm:$0xff] %v6865_v48  ;;  %8588 = vst [vmem:[#allocation104_spill] sm:$0xff] %v6867_v51  ;;  %v6871_v56 = vld [vmem:[#allocation2 + $0x240] sm:$0xff]  ;;  %v6873_v59 = vld [vmem:[#allocation2 + $0x248] sm:$0xff] }
  0x71   :  { %8589 = vst [vmem:[#allocation105_spill] sm:$0xff] %v6869_v58  ;;  %v6875_v10 = vld [vmem:[#allocation2 + $0x250] sm:$0xff]  ;;  %v6877_v49 = vld [vmem:[#allocation2 + $0x258] sm:$0xff]  ;;  %v6879_v42 = vld [vmem:[#allocation2 + $0x260] sm:$0xff] }
  0x72   :  { %8590 = vst [vmem:[#allocation106_spill] sm:$0xff] %v6879_v42  ;;  %v6881_v40 = vld [vmem:[#allocation2 + $0x268] sm:$0xff]  ;;  %v6883_v43 = vld [vmem:[#allocation2 + $0x270] sm:$0xff]  ;;  %v6885_v50 = vld [vmem:[#allocation2 + $0x278] sm:$0xff] }
  0x73   :  { %8591 = vst [vmem:[#allocation107_spill] sm:$0xff] %v6881_v40  ;;  %8592 = vst [vmem:[#allocation108_spill] sm:$0xff] %v6883_v43  ;;  %v6887_v48 = vld [vmem:[#allocation2 + $0x280] sm:$0xff]  ;;  %v6889_v51 = vld [vmem:[#allocation2 + $0x288] sm:$0xff] }
  0x74   :  { %8593 = vst [vmem:[#allocation109_spill] sm:$0xff] %v6885_v50  ;;  %v6891_v58 = vld [vmem:[#allocation2 + $0x290] sm:$0xff]  ;;  %v6893_v41 = vld [vmem:[#allocation2 + $0x298] sm:$0xff]  ;;  %v6895_v34 = vld [vmem:[#allocation2 + $0x2a0] sm:$0xff] }
  0x75   :  { %8594 = vst [vmem:[#allocation110_spill] sm:$0xff] %v6895_v34  ;;  %v6897_v32 = vld [vmem:[#allocation2 + $0x2a8] sm:$0xff]  ;;  %v6899_v35 = vld [vmem:[#allocation2 + $0x2b0] sm:$0xff]  ;;  %v6901_v42 = vld [vmem:[#allocation2 + $0x2b8] sm:$0xff] }
  0x76   :  { %8595 = vst [vmem:[#allocation111_spill] sm:$0xff] %v6897_v32  ;;  %8596 = vst [vmem:[#allocation112_spill] sm:$0xff] %v6899_v35  ;;  %v6903_v40 = vld [vmem:[#allocation2 + $0x2c0] sm:$0xff]  ;;  %v6905_v43 = vld [vmem:[#allocation2 + $0x2c8] sm:$0xff] }
  0x77   :  { %8597 = vst [vmem:[#allocation113_spill] sm:$0xff] %v6901_v42  ;;  %8598 = vst [vmem:[#allocation114_spill] sm:$0xff] %v6903_v40  ;;  %v6907_v50 = vld [vmem:[#allocation2 + $0x2d0] sm:$0xff]  ;;  %v6909_v33 = vld [vmem:[#allocation2 + $0x2d8] sm:$0xff] }
  0x78   :  { %8599 = vst [vmem:[#allocation115_spill] sm:$0xff] %v6907_v50  ;;  %v6911_v26 = vld [vmem:[#allocation2 + $0x2e0] sm:$0xff]  ;;  %v6913_v24 = vld [vmem:[#allocation2 + $0x2e8] sm:$0xff]  ;;  %v6915_v18 = vld [vmem:[#allocation2 + $0x2f0] sm:$0xff] }
  0x79   :  { %8600 = vst [vmem:[#allocation116_spill] sm:$0xff] %v6911_v26  ;;  %8601 = vst [vmem:[#allocation117_spill] sm:$0xff] %v6913_v24  ;;  %v6917_v34 = vld [vmem:[#allocation2 + $0x2f8] sm:$0xff]  ;;  %v6919_v32 = vld [vmem:[#allocation2 + $0x300] sm:$0xff] }
  0x7a   :  { %8602 = vst [vmem:[#allocation118_spill] sm:$0xff] %v6915_v18  ;;  %8603 = vst [vmem:[#allocation119_spill] sm:$0xff] %v6917_v34  ;;  %v6921_v35 = vld [vmem:[#allocation2 + $0x308] sm:$0xff]  ;;  %v6923_v42 = vld [vmem:[#allocation2 + $0x310] sm:$0xff] }
  0x7b   :  { %8604 = vst [vmem:[#allocation120_spill] sm:$0xff] %v6919_v32  ;;  %8605 = vst [vmem:[#allocation121_spill] sm:$0xff] %v6921_v35  ;;  %v6925_v27 = vld [vmem:[#allocation2 + $0x318] sm:$0xff]  ;;  %v6927_v25 = vld [vmem:[#allocation2 + $0x320] sm:$0xff] }
  0x7c   :  { %8606 = vst [vmem:[#allocation122_spill] sm:$0xff] %v6923_v42  ;;  %8607 = vst [vmem:[#allocation123_spill] sm:$0xff] %v6925_v27  ;;  %v6929_v19 = vld [vmem:[#allocation2 + $0x328] sm:$0xff]  ;;  %v6931_v16 = vld [vmem:[#allocation2 + $0x330] sm:$0xff] }
  0x7d   :  { %8608 = vst [vmem:[#allocation124_spill] sm:$0xff] %v6927_v25  ;;  %8609 = vst [vmem:[#allocation125_spill] sm:$0xff] %v6929_v19  ;;  %v6933_v26 = vld [vmem:[#allocation2 + $0x338] sm:$0xff]  ;;  %v6935_v24 = vld [vmem:[#allocation2 + $0x340] sm:$0xff] }
  0x7e   :  { %8610 = vst [vmem:[#allocation126_spill] sm:$0xff] %v6931_v16  ;;  %8611 = vst [vmem:[#allocation127_spill] sm:$0xff] %v6933_v26  ;;  %v6937_v18 = vld [vmem:[#allocation2 + $0x348] sm:$0xff]  ;;  %v6939_v34 = vld [vmem:[#allocation2 + $0x350] sm:$0xff] }
  0x7f   :  { %8612 = vst [vmem:[#allocation128_spill] sm:$0xff] %v6935_v24  ;;  %8613 = vst [vmem:[#allocation129_spill] sm:$0xff] %v6937_v18  ;;  %v6941_v32 = vld [vmem:[#allocation2 + $0x358] sm:$0xff]  ;;  %v6943_v35 = vld [vmem:[#allocation2 + $0x360] sm:$0xff] }
  0x80   :  { %8614 = vst [vmem:[#allocation130_spill] sm:$0xff] %v6939_v34  ;;  %8615 = vst [vmem:[#allocation131_spill] sm:$0xff] %v6941_v32  ;;  %v6945_v42 = vld [vmem:[#allocation2 + $0x368] sm:$0xff]  ;;  %v6947_v27 = vld [vmem:[#allocation2 + $0x370] sm:$0xff] }
  0x81   :  { %8616 = vst [vmem:[#allocation132_spill] sm:$0xff] %v6943_v35  ;;  %8617 = vst [vmem:[#allocation133_spill] sm:$0xff] %v6945_v42  ;;  %v6949_v25 = vld [vmem:[#allocation2 + $0x378] sm:$0xff]  ;;  %v6951_v19 = vld [vmem:[#allocation2 + $0x380] sm:$0xff] }
  0x82   :  { %8618 = vst [vmem:[#allocation134_spill] sm:$0xff] %v6947_v27  ;;  %8619 = vst [vmem:[#allocation135_spill] sm:$0xff] %v6949_v25  ;;  %v6953_v16 = vld [vmem:[#allocation2 + $0x388] sm:$0xff]  ;;  %v6955_v26 = vld [vmem:[#allocation2 + $0x390] sm:$0xff] }
  0x83   :  { %8620 = vst [vmem:[#allocation136_spill] sm:$0xff] %v6951_v19  ;;  %8621 = vst [vmem:[#allocation137_spill] sm:$0xff] %v6953_v16  ;;  %v6957_v24 = vld [vmem:[#allocation2 + $0x398] sm:$0xff]  ;;  %v6959_v18 = vld [vmem:[#allocation2 + $0x3a0] sm:$0xff] }
  0x84   :  { %8622 = vst [vmem:[#allocation138_spill] sm:$0xff] %v6955_v26  ;;  %8623 = vst [vmem:[#allocation139_spill] sm:$0xff] %v6957_v24  ;;  %v6961_v34 = vld [vmem:[#allocation2 + $0x3a8] sm:$0xff]  ;;  %v6963_v32 = vld [vmem:[#allocation2 + $0x3b0] sm:$0xff] }
  0x85   :  { %8624 = vst [vmem:[#allocation140_spill] sm:$0xff] %v6959_v18  ;;  %8625 = vst [vmem:[#allocation141_spill] sm:$0xff] %v6961_v34  ;;  %v6965_v35 = vld [vmem:[#allocation2 + $0x3b8] sm:$0xff]  ;;  %v6967_v42 = vld [vmem:[#allocation2 + $0x3c0] sm:$0xff] }
  0x86   :  { %8626 = vst [vmem:[#allocation142_spill] sm:$0xff] %v6963_v32  ;;  %8627 = vst [vmem:[#allocation143_spill] sm:$0xff] %v6965_v35  ;;  %v6969_v27 = vld [vmem:[#allocation2 + $0x3c8] sm:$0xff]  ;;  %v6971_v25 = vld [vmem:[#allocation2 + $0x3d0] sm:$0xff] }
  0x87   :  { %8628 = vst [vmem:[#allocation144_spill] sm:$0xff] %v6967_v42  ;;  %8629 = vst [vmem:[#allocation145_spill] sm:$0xff] %v6969_v27  ;;  %v6973_v19 = vld [vmem:[#allocation2 + $0x3d8] sm:$0xff]  ;;  %v6975_v16 = vld [vmem:[#allocation2 + $0x3e0] sm:$0xff] }
  0x88   :  { %8630 = vst [vmem:[#allocation146_spill] sm:$0xff] %v6971_v25  ;;  %8631 = vst [vmem:[#allocation147_spill] sm:$0xff] %v6973_v19  ;;  %v6977_v26 = vld [vmem:[#allocation2 + $0x3e8] sm:$0xff]  ;;  %v6979_v24 = vld [vmem:[#allocation2 + $0x3f0] sm:$0xff] }
  0x89   :  { %8632 = vst [vmem:[#allocation148_spill] sm:$0xff] %v6975_v16  ;;  %8633 = vst [vmem:[#allocation149_spill] sm:$0xff] %v6977_v26  ;;  %v6981_v18 = vld [vmem:[#allocation2 + $0x3f8] sm:$0xff]  ;;  %v6983_v34 = vld [vmem:[#allocation2 + $0x400] sm:$0xff] }
  0x8a   :  { %8634 = vst [vmem:[#allocation150_spill] sm:$0xff] %v6979_v24  ;;  %8635 = vst [vmem:[#allocation151_spill] sm:$0xff] %v6981_v18  ;;  %v6985_v32 = vld [vmem:[#allocation2 + $0x408] sm:$0xff]  ;;  %v6987_v35 = vld [vmem:[#allocation2 + $0x410] sm:$0xff] }
  0x8b   :  { %8636 = vst [vmem:[#allocation152_spill] sm:$0xff] %v6983_v34  ;;  %8637 = vst [vmem:[#allocation153_spill] sm:$0xff] %v6985_v32  ;;  %v6989_v42 = vld [vmem:[#allocation2 + $0x418] sm:$0xff]  ;;  %v6991_v27 = vld [vmem:[#allocation2 + $0x420] sm:$0xff] }
  0x8c   :  { %8638 = vst [vmem:[#allocation154_spill] sm:$0xff] %v6987_v35  ;;  %8639 = vst [vmem:[#allocation155_spill] sm:$0xff] %v6989_v42  ;;  %v6993_v25 = vld [vmem:[#allocation2 + $0x428] sm:$0xff]  ;;  %v6995_v19 = vld [vmem:[#allocation2 + $0x430] sm:$0xff] }
  0x8d   :  { %8640 = vst [vmem:[#allocation156_spill] sm:$0xff] %v6991_v27  ;;  %8641 = vst [vmem:[#allocation157_spill] sm:$0xff] %v6993_v25  ;;  %v6997_v16 = vld [vmem:[#allocation2 + $0x438] sm:$0xff]  ;;  %v6999_v26 = vld [vmem:[#allocation2 + $0x440] sm:$0xff] }
  0x8e   :  { %8642 = vst [vmem:[#allocation158_spill] sm:$0xff] %v6995_v19  ;;  %8643 = vst [vmem:[#allocation159_spill] sm:$0xff] %v6997_v16  ;;  %v7001_v24 = vld [vmem:[#allocation2 + $0x448] sm:$0xff]  ;;  %v7003_v18 = vld [vmem:[#allocation2 + $0x450] sm:$0xff] }
  0x8f   :  { %8644 = vst [vmem:[#allocation160_spill] sm:$0xff] %v6999_v26  ;;  %8645 = vst [vmem:[#allocation161_spill] sm:$0xff] %v7001_v24  ;;  %v7005_v34 = vld [vmem:[#allocation2 + $0x458] sm:$0xff]  ;;  %v7007_v32 = vld [vmem:[#allocation2 + $0x460] sm:$0xff] }
  0x90   :  { %8646 = vst [vmem:[#allocation162_spill] sm:$0xff] %v7003_v18  ;;  %8647 = vst [vmem:[#allocation163_spill] sm:$0xff] %v7005_v34  ;;  %v7009_v35 = vld [vmem:[#allocation2 + $0x468] sm:$0xff]  ;;  %v7011_v42 = vld [vmem:[#allocation2 + $0x470] sm:$0xff] }
  0x91   :  { %8648 = vst [vmem:[#allocation164_spill] sm:$0xff] %v7007_v32  ;;  %8649 = vst [vmem:[#allocation165_spill] sm:$0xff] %v7009_v35  ;;  %v7013_v27 = vld [vmem:[#allocation2 + $0x478] sm:$0xff]  ;;  %v7015_v25 = vld [vmem:[#allocation2 + $0x480] sm:$0xff] }
  0x92   :  { %8650 = vst [vmem:[#allocation166_spill] sm:$0xff] %v7011_v42  ;;  %8651 = vst [vmem:[#allocation167_spill] sm:$0xff] %v7013_v27  ;;  %v7017_v19 = vld [vmem:[#allocation2 + $0x488] sm:$0xff]  ;;  %v7019_v16 = vld [vmem:[#allocation2 + $0x490] sm:$0xff] }
  0x93   :  { %8652 = vst [vmem:[#allocation168_spill] sm:$0xff] %v7015_v25  ;;  %8653 = vst [vmem:[#allocation169_spill] sm:$0xff] %v7017_v19  ;;  %v7021_v26 = vld [vmem:[#allocation2 + $0x498] sm:$0xff]  ;;  %v7023_v24 = vld [vmem:[#allocation2 + $0x4a0] sm:$0xff] }
  0x94   :  { %8654 = vst [vmem:[#allocation170_spill] sm:$0xff] %v7019_v16  ;;  %8655 = vst [vmem:[#allocation171_spill] sm:$0xff] %v7021_v26  ;;  %v7025_v18 = vld [vmem:[#allocation2 + $0x4a8] sm:$0xff]  ;;  %v7027_v34 = vld [vmem:[#allocation2 + $0x4b0] sm:$0xff] }
  0x95   :  { %8656 = vst [vmem:[#allocation172_spill] sm:$0xff] %v7023_v24  ;;  %8657 = vst [vmem:[#allocation173_spill] sm:$0xff] %v7025_v18  ;;  %v7029_v32 = vld [vmem:[#allocation2 + $0x4b8] sm:$0xff]  ;;  %v7031_v35 = vld [vmem:[#allocation2 + $0x4c0] sm:$0xff] }
  0x96   :  { %8658 = vst [vmem:[#allocation174_spill] sm:$0xff] %v7027_v34  ;;  %8659 = vst [vmem:[#allocation175_spill] sm:$0xff] %v7029_v32  ;;  %v7033_v42 = vld [vmem:[#allocation2 + $0x4c8] sm:$0xff]  ;;  %v7035_v27 = vld [vmem:[#allocation2 + $0x4d0] sm:$0xff] }
  0x97   :  { %8660 = vst [vmem:[#allocation176_spill] sm:$0xff] %v7031_v35  ;;  %8661 = vst [vmem:[#allocation177_spill] sm:$0xff] %v7033_v42  ;;  %v7037_v25 = vld [vmem:[#allocation2 + $0x4d8] sm:$0xff]  ;;  %v7039_v19 = vld [vmem:[#allocation2 + $0x4e0] sm:$0xff] }
  0x98   :  { %8662 = vst [vmem:[#allocation178_spill] sm:$0xff] %v7035_v27  ;;  %8663 = vst [vmem:[#allocation179_spill] sm:$0xff] %v7037_v25  ;;  %v7041_v16 = vld [vmem:[#allocation2 + $0x4e8] sm:$0xff]  ;;  %v7043_v26 = vld [vmem:[#allocation2 + $0x4f0] sm:$0xff] }
  0x99   :  { %8664 = vst [vmem:[#allocation180_spill] sm:$0xff] %v7039_v19  ;;  %8665 = vst [vmem:[#allocation181_spill] sm:$0xff] %v7041_v16  ;;  %v7045_v24 = vld [vmem:[#allocation2 + $0x4f8] sm:$0xff]  ;;  %v7047_v18 = vld [vmem:[#allocation2 + $0x500] sm:$0xff] }
  0x9a   :  { %8666 = vst [vmem:[#allocation182_spill] sm:$0xff] %v7043_v26  ;;  %8667 = vst [vmem:[#allocation183_spill] sm:$0xff] %v7045_v24  ;;  %v7049_v34 = vld [vmem:[#allocation2 + $0x508] sm:$0xff]  ;;  %v7051_v32 = vld [vmem:[#allocation2 + $0x510] sm:$0xff] }
  0x9b   :  { %8668 = vst [vmem:[#allocation184_spill] sm:$0xff] %v7047_v18  ;;  %8669 = vst [vmem:[#allocation185_spill] sm:$0xff] %v7049_v34  ;;  %v7053_v35 = vld [vmem:[#allocation2 + $0x518] sm:$0xff]  ;;  %v7055_v42 = vld [vmem:[#allocation2 + $0x520] sm:$0xff] }
  0x9c   :  { %8670 = vst [vmem:[#allocation186_spill] sm:$0xff] %v7051_v32  ;;  %8671 = vst [vmem:[#allocation187_spill] sm:$0xff] %v7053_v35  ;;  %v7057_v27 = vld [vmem:[#allocation2 + $0x528] sm:$0xff]  ;;  %v7059_v25 = vld [vmem:[#allocation2 + $0x530] sm:$0xff] }
  0x9d   :  { %8672 = vst [vmem:[#allocation188_spill] sm:$0xff] %v7055_v42  ;;  %8673 = vst [vmem:[#allocation189_spill] sm:$0xff] %v7057_v27  ;;  %v7061_v19 = vld [vmem:[#allocation2 + $0x538] sm:$0xff]  ;;  %v7063_v16 = vld [vmem:[#allocation2 + $0x540] sm:$0xff] }
  0x9e   :  { %8674 = vst [vmem:[#allocation190_spill] sm:$0xff] %v7059_v25  ;;  %8675 = vst [vmem:[#allocation191_spill] sm:$0xff] %v7061_v19  ;;  %v7065_v26 = vld [vmem:[#allocation2 + $0x548] sm:$0xff]  ;;  %v7067_v24 = vld [vmem:[#allocation2 + $0x550] sm:$0xff] }
  0x9f   :  { %8676 = vst [vmem:[#allocation192_spill] sm:$0xff] %v7063_v16  ;;  %8677 = vst [vmem:[#allocation193_spill] sm:$0xff] %v7065_v26  ;;  %v7069_v18 = vld [vmem:[#allocation2 + $0x558] sm:$0xff]  ;;  %v7071_v34 = vld [vmem:[#allocation2 + $0x560] sm:$0xff] }
  0xa0   :  { %8678 = vst [vmem:[#allocation194_spill] sm:$0xff] %v7067_v24  ;;  %8679 = vst [vmem:[#allocation195_spill] sm:$0xff] %v7069_v18  ;;  %v7073_v32 = vld [vmem:[#allocation2 + $0x568] sm:$0xff]  ;;  %v7075_v35 = vld [vmem:[#allocation2 + $0x570] sm:$0xff] }
  0xa1   :  { %8680 = vst [vmem:[#allocation196_spill] sm:$0xff] %v7071_v34  ;;  %8681 = vst [vmem:[#allocation197_spill] sm:$0xff] %v7073_v32  ;;  %v7077_v42 = vld [vmem:[#allocation2 + $0x578] sm:$0xff]  ;;  %v7079_v27 = vld [vmem:[#allocation2 + $0x580] sm:$0xff] }
  0xa2   :  { %8682 = vst [vmem:[#allocation198_spill] sm:$0xff] %v7075_v35  ;;  %8683 = vst [vmem:[#allocation199_spill] sm:$0xff] %v7077_v42  ;;  %v7081_v25 = vld [vmem:[#allocation2 + $0x588] sm:$0xff]  ;;  %v7083_v19 = vld [vmem:[#allocation2 + $0x590] sm:$0xff] }
  0xa3   :  { %8684 = vst [vmem:[#allocation200_spill] sm:$0xff] %v7079_v27  ;;  %8685 = vst [vmem:[#allocation201_spill] sm:$0xff] %v7081_v25  ;;  %v7085_v16 = vld [vmem:[#allocation2 + $0x598] sm:$0xff]  ;;  %v7087_v26 = vld [vmem:[#allocation2 + $0x5a0] sm:$0xff] }
  0xa4   :  { %8686 = vst [vmem:[#allocation202_spill] sm:$0xff] %v7083_v19  ;;  %8687 = vst [vmem:[#allocation203_spill] sm:$0xff] %v7085_v16  ;;  %v7089_v24 = vld [vmem:[#allocation2 + $0x5a8] sm:$0xff]  ;;  %v7091_v18 = vld [vmem:[#allocation2 + $0x5b0] sm:$0xff] }
  0xa5   :  { %8688 = vst [vmem:[#allocation204_spill] sm:$0xff] %v7087_v26  ;;  %8689 = vst [vmem:[#allocation205_spill] sm:$0xff] %v7089_v24  ;;  %v7093_v34 = vld [vmem:[#allocation2 + $0x5b8] sm:$0xff]  ;;  %v7095_v32 = vld [vmem:[#allocation2 + $0x5c0] sm:$0xff] }
  0xa6   :  { %8690 = vst [vmem:[#allocation206_spill] sm:$0xff] %v7091_v18  ;;  %8691 = vst [vmem:[#allocation207_spill] sm:$0xff] %v7093_v34  ;;  %v7097_v35 = vld [vmem:[#allocation2 + $0x5c8] sm:$0xff]  ;;  %v7099_v42 = vld [vmem:[#allocation2 + $0x5d0] sm:$0xff] }
  0xa7   :  { %8692 = vst [vmem:[#allocation208_spill] sm:$0xff] %v7095_v32  ;;  %8693 = vst [vmem:[#allocation209_spill] sm:$0xff] %v7097_v35  ;;  %v7101_v27 = vld [vmem:[#allocation2 + $0x5d8] sm:$0xff]  ;;  %v7103_v25 = vld [vmem:[#allocation2 + $0x5e0] sm:$0xff] }
  0xa8   :  { %8694 = vst [vmem:[#allocation210_spill] sm:$0xff] %v7099_v42  ;;  %8695 = vst [vmem:[#allocation211_spill] sm:$0xff] %v7101_v27  ;;  %v7105_v19 = vld [vmem:[#allocation2 + $0x5e8] sm:$0xff]  ;;  %v7107_v16 = vld [vmem:[#allocation2 + $0x5f0] sm:$0xff] }
  0xa9   :  { %8696 = vst [vmem:[#allocation212_spill] sm:$0xff] %v7103_v25  ;;  %8697 = vst [vmem:[#allocation213_spill] sm:$0xff] %v7105_v19  ;;  %v7109_v26 = vld [vmem:[#allocation2 + $0x5f8] sm:$0xff]  ;;  %v7111_v24 = vld [vmem:[#allocation2 + $0x600] sm:$0xff] }
  0xaa   :  { %8698 = vst [vmem:[#allocation214_spill] sm:$0xff] %v7107_v16  ;;  %8699 = vst [vmem:[#allocation215_spill] sm:$0xff] %v7109_v26  ;;  %v7113_v18 = vld [vmem:[#allocation2 + $0x608] sm:$0xff]  ;;  %v7115_v34 = vld [vmem:[#allocation2 + $0x610] sm:$0xff] }
  0xab   :  { %8700 = vst [vmem:[#allocation216_spill] sm:$0xff] %v7111_v24  ;;  %8701 = vst [vmem:[#allocation217_spill] sm:$0xff] %v7113_v18  ;;  %v7117_v32 = vld [vmem:[#allocation2 + $0x618] sm:$0xff]  ;;  %v7119_v35 = vld [vmem:[#allocation2 + $0x620] sm:$0xff] }
  0xac   :  { %8702 = vst [vmem:[#allocation218_spill] sm:$0xff] %v7115_v34  ;;  %8703 = vst [vmem:[#allocation219_spill] sm:$0xff] %v7117_v32  ;;  %v7121_v42 = vld [vmem:[#allocation2 + $0x628] sm:$0xff]  ;;  %v7123_v27 = vld [vmem:[#allocation2 + $0x630] sm:$0xff] }
  0xad   :  { %8704 = vst [vmem:[#allocation220_spill] sm:$0xff] %v7119_v35  ;;  %8705 = vst [vmem:[#allocation221_spill] sm:$0xff] %v7121_v42  ;;  %v7125_v25 = vld [vmem:[#allocation2 + $0x638] sm:$0xff]  ;;  %v7127_v19 = vld [vmem:[#allocation2 + $0x640] sm:$0xff] }
  0xae   :  { %8706 = vst [vmem:[#allocation222_spill] sm:$0xff] %v7123_v27  ;;  %8707 = vst [vmem:[#allocation223_spill] sm:$0xff] %v7125_v25  ;;  %v7129_v16 = vld [vmem:[#allocation2 + $0x648] sm:$0xff]  ;;  %v7131_v26 = vld [vmem:[#allocation2 + $0x650] sm:$0xff] }
  0xaf   :  { %8708 = vst [vmem:[#allocation224_spill] sm:$0xff] %v7127_v19  ;;  %8709 = vst [vmem:[#allocation225_spill] sm:$0xff] %v7129_v16  ;;  %v7133_v24 = vld [vmem:[#allocation2 + $0x658] sm:$0xff]  ;;  %v7135_v18 = vld [vmem:[#allocation2 + $0x660] sm:$0xff] }
  0xb0   :  { %8710 = vst [vmem:[#allocation226_spill] sm:$0xff] %v7131_v26  ;;  %8711 = vst [vmem:[#allocation227_spill] sm:$0xff] %v7133_v24  ;;  %v7137_v34 = vld [vmem:[#allocation2 + $0x668] sm:$0xff]  ;;  %v7139_v32 = vld [vmem:[#allocation2 + $0x670] sm:$0xff] }
  0xb1   :  { %8712 = vst [vmem:[#allocation228_spill] sm:$0xff] %v7135_v18  ;;  %8713 = vst [vmem:[#allocation229_spill] sm:$0xff] %v7137_v34  ;;  %v7141_v35 = vld [vmem:[#allocation2 + $0x678] sm:$0xff]  ;;  %v7143_v42 = vld [vmem:[#allocation2 + $0x680] sm:$0xff] }
  0xb2   :  { %8714 = vst [vmem:[#allocation230_spill] sm:$0xff] %v7139_v32  ;;  %8715 = vst [vmem:[#allocation231_spill] sm:$0xff] %v7141_v35  ;;  %v7145_v27 = vld [vmem:[#allocation2 + $0x688] sm:$0xff]  ;;  %v7147_v25 = vld [vmem:[#allocation2 + $0x690] sm:$0xff] }
  0xb3   :  { %8716 = vst [vmem:[#allocation232_spill] sm:$0xff] %v7143_v42  ;;  %8717 = vst [vmem:[#allocation233_spill] sm:$0xff] %v7145_v27  ;;  %v7149_v19 = vld [vmem:[#allocation2 + $0x698] sm:$0xff]  ;;  %v7151_v16 = vld [vmem:[#allocation2 + $0x6a0] sm:$0xff] }
  0xb4   :  { %8718 = vst [vmem:[#allocation234_spill] sm:$0xff] %v7147_v25  ;;  %8719 = vst [vmem:[#allocation235_spill] sm:$0xff] %v7149_v19  ;;  %v7153_v26 = vld [vmem:[#allocation2 + $0x6a8] sm:$0xff]  ;;  %v7155_v24 = vld [vmem:[#allocation2 + $0x6b0] sm:$0xff] }
  0xb5   :  { %8720 = vst [vmem:[#allocation236_spill] sm:$0xff] %v7151_v16  ;;  %8721 = vst [vmem:[#allocation237_spill] sm:$0xff] %v7153_v26  ;;  %v7157_v18 = vld [vmem:[#allocation2 + $0x6b8] sm:$0xff]  ;;  %v7159_v34 = vld [vmem:[#allocation2 + $0x6c0] sm:$0xff] }
  0xb6   :  { %8722 = vst [vmem:[#allocation238_spill] sm:$0xff] %v7155_v24  ;;  %8723 = vst [vmem:[#allocation239_spill] sm:$0xff] %v7157_v18  ;;  %v7161_v32 = vld [vmem:[#allocation2 + $0x6c8] sm:$0xff]  ;;  %v7163_v35 = vld [vmem:[#allocation2 + $0x6d0] sm:$0xff] }
  0xb7   :  { %8724 = vst [vmem:[#allocation240_spill] sm:$0xff] %v7159_v34  ;;  %8725 = vst [vmem:[#allocation241_spill] sm:$0xff] %v7161_v32  ;;  %v7165_v42 = vld [vmem:[#allocation2 + $0x6d8] sm:$0xff]  ;;  %v7167_v27 = vld [vmem:[#allocation2 + $0x6e0] sm:$0xff] }
  0xb8   :  { %8726 = vst [vmem:[#allocation242_spill] sm:$0xff] %v7163_v35  ;;  %8727 = vst [vmem:[#allocation243_spill] sm:$0xff] %v7165_v42  ;;  %v7169_v25 = vld [vmem:[#allocation2 + $0x6e8] sm:$0xff]  ;;  %v7171_v19 = vld [vmem:[#allocation2 + $0x6f0] sm:$0xff] }
  0xb9   :  { %8728 = vst [vmem:[#allocation244_spill] sm:$0xff] %v7167_v27  ;;  %8729 = vst [vmem:[#allocation245_spill] sm:$0xff] %v7169_v25  ;;  %v7173_v16 = vld [vmem:[#allocation2 + $0x6f8] sm:$0xff]  ;;  %v7175_v26 = vld [vmem:[#allocation2 + $0x700] sm:$0xff] }
  0xba   :  { %8730 = vst [vmem:[#allocation246_spill] sm:$0xff] %v7171_v19  ;;  %8731 = vst [vmem:[#allocation247_spill] sm:$0xff] %v7173_v16  ;;  %v7177_v24 = vld [vmem:[#allocation2 + $0x708] sm:$0xff]  ;;  %v7179_v18 = vld [vmem:[#allocation2 + $0x710] sm:$0xff] }
  0xbb   :  { %8732 = vst [vmem:[#allocation248_spill] sm:$0xff] %v7175_v26  ;;  %8733 = vst [vmem:[#allocation249_spill] sm:$0xff] %v7177_v24  ;;  %v7181_v34 = vld [vmem:[#allocation2 + $0x718] sm:$0xff]  ;;  %v7183_v32 = vld [vmem:[#allocation2 + $0x720] sm:$0xff] }
  0xbc   :  { %8734 = vst [vmem:[#allocation250_spill] sm:$0xff] %v7179_v18  ;;  %8735 = vst [vmem:[#allocation251_spill] sm:$0xff] %v7181_v34  ;;  %v7185_v35 = vld [vmem:[#allocation2 + $0x728] sm:$0xff]  ;;  %v7187_v42 = vld [vmem:[#allocation2 + $0x730] sm:$0xff] }
  0xbd   :  { %8736 = vst [vmem:[#allocation252_spill] sm:$0xff] %v7183_v32  ;;  %8737 = vst [vmem:[#allocation253_spill] sm:$0xff] %v7185_v35  ;;  %v7189_v27 = vld [vmem:[#allocation2 + $0x738] sm:$0xff]  ;;  %v7191_v25 = vld [vmem:[#allocation2 + $0x740] sm:$0xff] }
  0xbe   :  { %8738 = vst [vmem:[#allocation254_spill] sm:$0xff] %v7187_v42  ;;  %8739 = vst [vmem:[#allocation255_spill] sm:$0xff] %v7189_v27  ;;  %v7193_v19 = vld [vmem:[#allocation2 + $0x748] sm:$0xff]  ;;  %v7195_v16 = vld [vmem:[#allocation2 + $0x750] sm:$0xff] }
  0xbf   :  { %8740 = vst [vmem:[#allocation256_spill] sm:$0xff] %v7191_v25  ;;  %8741 = vst [vmem:[#allocation257_spill] sm:$0xff] %v7193_v19  ;;  %v7197_v26 = vld [vmem:[#allocation2 + $0x758] sm:$0xff]  ;;  %v7199_v24 = vld [vmem:[#allocation2 + $0x760] sm:$0xff] }
  0xc0   :  { %8742 = vst [vmem:[#allocation258_spill] sm:$0xff] %v7195_v16  ;;  %8743 = vst [vmem:[#allocation259_spill] sm:$0xff] %v7197_v26  ;;  %v7201_v18 = vld [vmem:[#allocation2 + $0x768] sm:$0xff]  ;;  %v7203_v34 = vld [vmem:[#allocation2 + $0x770] sm:$0xff] }
  0xc1   :  { %8744 = vst [vmem:[#allocation260_spill] sm:$0xff] %v7199_v24  ;;  %8745 = vst [vmem:[#allocation261_spill] sm:$0xff] %v7201_v18  ;;  %v7205_v32 = vld [vmem:[#allocation2 + $0x778] sm:$0xff]  ;;  %v7207_v35 = vld [vmem:[#allocation2 + $0x780] sm:$0xff] }
  0xc2   :  { %8746 = vst [vmem:[#allocation262_spill] sm:$0xff] %v7203_v34  ;;  %8747 = vst [vmem:[#allocation263_spill] sm:$0xff] %v7205_v32  ;;  %v7209_v42 = vld [vmem:[#allocation2 + $0x788] sm:$0xff]  ;;  %v7211_v27 = vld [vmem:[#allocation2 + $0x790] sm:$0xff] }
  0xc3   :  { %8748 = vst [vmem:[#allocation264_spill] sm:$0xff] %v7207_v35  ;;  %8749 = vst [vmem:[#allocation265_spill] sm:$0xff] %v7209_v42  ;;  %v7213_v25 = vld [vmem:[#allocation2 + $0x798] sm:$0xff]  ;;  %v7215_v19 = vld [vmem:[#allocation2 + $0x7a0] sm:$0xff] }
  0xc4   :  { %8750 = vst [vmem:[#allocation266_spill] sm:$0xff] %v7211_v27  ;;  %8751 = vst [vmem:[#allocation267_spill] sm:$0xff] %v7213_v25  ;;  %v7217_v16 = vld [vmem:[#allocation2 + $0x7a8] sm:$0xff]  ;;  %v7219_v26 = vld [vmem:[#allocation2 + $0x7b0] sm:$0xff] }
  0xc5   :  { %8752 = vst [vmem:[#allocation268_spill] sm:$0xff] %v7215_v19  ;;  %8753 = vst [vmem:[#allocation269_spill] sm:$0xff] %v7217_v16  ;;  %v7221_v24 = vld [vmem:[#allocation2 + $0x7b8] sm:$0xff]  ;;  %v7223_v18 = vld [vmem:[#allocation2 + $0x7c0] sm:$0xff] }
  0xc6   :  { %8754 = vst [vmem:[#allocation270_spill] sm:$0xff] %v7219_v26  ;;  %8755 = vst [vmem:[#allocation271_spill] sm:$0xff] %v7221_v24  ;;  %v7225_v34 = vld [vmem:[#allocation2 + $0x7c8] sm:$0xff]  ;;  %v7227_v32 = vld [vmem:[#allocation2 + $0x7d0] sm:$0xff] }
  0xc7   :  { %8756 = vst [vmem:[#allocation272_spill] sm:$0xff] %v7223_v18  ;;  %8757 = vst [vmem:[#allocation273_spill] sm:$0xff] %v7225_v34  ;;  %v7229_v35 = vld [vmem:[#allocation2 + $0x7d8] sm:$0xff]  ;;  %v7231_v42 = vld [vmem:[#allocation2 + $0x7e0] sm:$0xff] }
  0xc8   :  { %8758 = vst [vmem:[#allocation274_spill] sm:$0xff] %v7227_v32  ;;  %8759 = vst [vmem:[#allocation275_spill] sm:$0xff] %v7229_v35  ;;  %v7233_v27 = vld [vmem:[#allocation2 + $0x7e8] sm:$0xff]  ;;  %v7235_v25 = vld [vmem:[#allocation2 + $0x7f0] sm:$0xff] }
  0xc9   :  { %8760 = vst [vmem:[#allocation276_spill] sm:$0xff] %v7231_v42  ;;  %8761 = vst [vmem:[#allocation277_spill] sm:$0xff] %v7233_v27  ;;  %v7237_v19 = vld [vmem:[#allocation2 + $0x7f8] sm:$0xff] }
  0xca   :  { %8762 = vst [vmem:[#allocation278_spill] sm:$0xff] %v7235_v25  ;;  %8763 = vst [vmem:[#allocation279_spill] sm:$0xff] %v7237_v19 }
  0xcb   :  { %6481 = dma.done.wait [#allocation3 + $0x1], 32768 }
  0xcc   :  { %6482 = vsyncadd [#allocation3 + $0x1], 4294934528  ;;  %v7241_v26 = vpack.c.bf16 %v6680_v5, %v6680_v5  ;;  %433 = sst [smem:[#allocation16]] %s6516_s25  ;;  %s417_s24 = scalar_lea.hbm %s8511_s3, 65536 }
  0xcd   :  { %435 = sst [smem:[#allocation16 + $0x1]] %s6516_s25  ;;  %s6529_s27 = smov [#allocation15]  }
  0xce   :  { %744 = vmatprep.mubr.bf16.mxu0 %v7241_v26  ;;  %826 = vmatprep.mubr.bf16.mxu1 %v7241_v26  ;;  %437 = sst [smem:[#allocation16 + $0x2]] %s6517_s26 }
  0xcf   :  { %439 = sst [smem:[#allocation16 + $0x3]] %s6518_s1 }
  0xd0   :  { %441 = sst [smem:[#allocation16 + $0x4]] %s6519_s19 }
  0xd1   :  { %443 = sst [smem:[#allocation16 + $0x5]] %s6520_s2 }
  0xd2   :  { %445 = sst [smem:[#allocation16 + $0x6]] %s6521_s28 }
  0xd3   :  { %447 = sst [smem:[#allocation16 + $0x7]] %s6518_s1 }
  0xd4   :  { %449 = sst [smem:[#allocation16 + $0x8]] %s6522_s30 }
  0xd5   :  { %451 = dma.general %s417_s24, 32768, %s6670_s17, %s6524_s18, %s6529_s27, [#allocation16], %s6666_s29, 0  }
  0xd6   :  { %v457_v5 = vld [vmem:[#allocation2 + $0x808] sm:$0xff]  ;;  %v459_v25 = vld [vmem:[#allocation2 + $0x818] sm:$0xff]  ;;  %v456_v42 = vld [vmem:[#allocation2 + $0x800] sm:$0xff] }
  0xd7   :  { %712 = vmatprep.subr.bf16.mxu0 %v457_v5  ;;  %794 = vmatprep.subr.bf16.mxu1 %v459_v25  ;;  %v458_v19 = vld [vmem:[#allocation2 + $0x810] sm:$0xff]  ;;  %v465_v27 = vld [vmem:[#allocation2 + $0x848] sm:$0xff]  ;;  %v467_v24 = vld [vmem:[#allocation2 + $0x858] sm:$0xff] }
  0xd8   :  { %713 = vmatpush1.bf16.msra.mxu0 %v456_v42  ;;  %795 = vmatpush1.bf16.msra.mxu1 %v458_v19  ;;  %v464_v16 = vld [vmem:[#allocation2 + $0x840] sm:$0xff]  ;;  %v466_v32 = vld [vmem:[#allocation2 + $0x850] sm:$0xff]  ;;  %v473_v18 = vld [vmem:[#allocation2 + $0x888] sm:$0xff] }
  0xd9   :  { %714 = vmatprep.subr.bf16.mxu0 %v465_v27  ;;  %796 = vmatprep.subr.bf16.mxu1 %v467_v24  ;;  %v475_v35 = vld [vmem:[#allocation2 + $0x898] sm:$0xff]  ;;  %v472_v34 = vld [vmem:[#allocation2 + $0x880] sm:$0xff]  ;;  %v474_v50 = vld [vmem:[#allocation2 + $0x890] sm:$0xff] }
  0xda   :  { %v481_v40 = vld [vmem:[#allocation2 + $0x8c8] sm:$0xff]  ;;  %v483_v5 = vld [vmem:[#allocation2 + $0x8d8] sm:$0xff]  ;;  %v480_v25 = vld [vmem:[#allocation2 + $0x8c0] sm:$0xff] }
  0xdb   :  { %v482_v19 = vld [vmem:[#allocation2 + $0x8d0] sm:$0xff]  ;;  %v489_v27 = vld [vmem:[#allocation2 + $0x908] sm:$0xff]  ;;  %v491_v24 = vld [vmem:[#allocation2 + $0x918] sm:$0xff] }
  0xdc   :  { %715 = vmatpush1.bf16.msra.mxu0 %v464_v16  ;;  %797 = vmatpush1.bf16.msra.mxu1 %v466_v32  ;;  %v488_v16 = vld [vmem:[#allocation2 + $0x900] sm:$0xff]  ;;  %v490_v32 = vld [vmem:[#allocation2 + $0x910] sm:$0xff] }
  0xdd   :  { %716 = vmatprep.subr.bf16.mxu0 %v473_v18  ;;  %798 = vmatprep.subr.bf16.mxu1 %v475_v35  ;;  %v497_v18 = vld [vmem:[#allocation2 + $0x948] sm:$0xff]  ;;  %v499_v35 = vld [vmem:[#allocation2 + $0x958] sm:$0xff]  ;;  %v498_v42 = vld [vmem:[#allocation2 + $0x950] sm:$0xff] }
  0xe0   :  { %717 = vmatpush1.bf16.msra.mxu0 %v472_v34  ;;  %799 = vmatpush1.bf16.msra.mxu1 %v474_v50  ;;  %v496_v34 = vld [vmem:[#allocation2 + $0x940] sm:$0xff]  ;;  %v507_v50 = vld [vmem:[#allocation2 + $0x998] sm:$0xff] }
  0xe1   :  { %718 = vmatprep.subr.bf16.mxu0 %v481_v40  ;;  %800 = vmatprep.subr.bf16.mxu1 %v483_v5  ;;  %v505_v40 = vld [vmem:[#allocation2 + $0x988] sm:$0xff]  ;;  %v504_v5 = vld [vmem:[#allocation2 + $0x980] sm:$0xff] }
  0xe4   :  { %719 = vmatpush1.bf16.msra.mxu0 %v480_v25  ;;  %801 = vmatpush1.bf16.msra.mxu1 %v482_v19  ;;  %v506_v25 = vld [vmem:[#allocation2 + $0x990] sm:$0xff]  ;;  %v513_v19 = vld [vmem:[#allocation2 + $0x9c8] sm:$0xff] }
  0xe5   :  { %720 = vmatprep.subr.bf16.mxu0 %v489_v27  ;;  %802 = vmatprep.subr.bf16.mxu1 %v491_v24  ;;  %v515_v27 = vld [vmem:[#allocation2 + $0x9d8] sm:$0xff]  ;;  %v512_v24 = vld [vmem:[#allocation2 + $0x9c0] sm:$0xff] }
  0xe8   :  { %721 = vmatpush1.bf16.msra.mxu0 %v488_v16  ;;  %803 = vmatpush1.bf16.msra.mxu1 %v490_v32  ;;  %v514_v16 = vld [vmem:[#allocation2 + $0x9d0] sm:$0xff]  ;;  %v521_v32 = vld [vmem:[#allocation2 + $0xa08] sm:$0xff] }
  0xe9   :  { %722 = vmatprep.subr.bf16.mxu0 %v497_v18  ;;  %804 = vmatprep.subr.bf16.mxu1 %v499_v35  ;;  %v523_v18 = vld [vmem:[#allocation2 + $0xa18] sm:$0xff]  ;;  %v520_v35 = vld [vmem:[#allocation2 + $0xa00] sm:$0xff] }
  0xec   :  { %723 = vmatpush1.bf16.msra.mxu0 %v496_v34  ;;  %805 = vmatpush1.bf16.msra.mxu1 %v498_v42  ;;  %v522_v34 = vld [vmem:[#allocation2 + $0xa10] sm:$0xff]  ;;  %v529_v42 = vld [vmem:[#allocation2 + $0xa48] sm:$0xff] }
  0xed   :  { %724 = vmatprep.subr.bf16.mxu0 %v505_v40  ;;  %806 = vmatprep.subr.bf16.mxu1 %v507_v50  ;;  %v531_v40 = vld [vmem:[#allocation2 + $0xa58] sm:$0xff]  ;;  %v528_v50 = vld [vmem:[#allocation2 + $0xa40] sm:$0xff] }
  0xf0   :  { %725 = vmatpush1.bf16.msra.mxu0 %v504_v5  ;;  %807 = vmatpush1.bf16.msra.mxu1 %v506_v25  ;;  %v530_v5 = vld [vmem:[#allocation2 + $0xa50] sm:$0xff]  ;;  %v537_v25 = vld [vmem:[#allocation2 + $0xa88] sm:$0xff] }
  0xf1   :  { %726 = vmatprep.subr.bf16.mxu0 %v513_v19  ;;  %808 = vmatprep.subr.bf16.mxu1 %v515_v27  ;;  %v539_v19 = vld [vmem:[#allocation2 + $0xa98] sm:$0xff]  ;;  %v536_v27 = vld [vmem:[#allocation2 + $0xa80] sm:$0xff] }
  0xf4   :  { %727 = vmatpush1.bf16.msra.mxu0 %v512_v24  ;;  %809 = vmatpush1.bf16.msra.mxu1 %v514_v16  ;;  %v538_v24 = vld [vmem:[#allocation2 + $0xa90] sm:$0xff]  ;;  %v545_v16 = vld [vmem:[#allocation2 + $0xac8] sm:$0xff] }
  0xf5   :  { %728 = vmatprep.subr.bf16.mxu0 %v521_v32  ;;  %810 = vmatprep.subr.bf16.mxu1 %v523_v18  ;;  %v547_v32 = vld [vmem:[#allocation2 + $0xad8] sm:$0xff]  ;;  %v544_v18 = vld [vmem:[#allocation2 + $0xac0] sm:$0xff] }
  0xf8   :  { %729 = vmatpush1.bf16.msra.mxu0 %v520_v35  ;;  %811 = vmatpush1.bf16.msra.mxu1 %v522_v34  ;;  %v546_v35 = vld [vmem:[#allocation2 + $0xad0] sm:$0xff]  ;;  %v553_v34 = vld [vmem:[#allocation2 + $0xb08] sm:$0xff] }
  0xf9   :  { %730 = vmatprep.subr.bf16.mxu0 %v529_v42  ;;  %812 = vmatprep.subr.bf16.mxu1 %v531_v40  ;;  %v555_v42 = vld [vmem:[#allocation2 + $0xb18] sm:$0xff]  ;;  %v552_v40 = vld [vmem:[#allocation2 + $0xb00] sm:$0xff] }
  0xfc   :  { %731 = vmatpush1.bf16.msra.mxu0 %v528_v50  ;;  %813 = vmatpush1.bf16.msra.mxu1 %v530_v5  ;;  %v554_v50 = vld [vmem:[#allocation2 + $0xb10] sm:$0xff]  ;;  %v561_v5 = vld [vmem:[#allocation2 + $0xb48] sm:$0xff] }
  0xfd   :  { %732 = vmatprep.subr.bf16.mxu0 %v537_v25  ;;  %814 = vmatprep.subr.bf16.mxu1 %v539_v19  ;;  %v563_v25 = vld [vmem:[#allocation2 + $0xb58] sm:$0xff]  ;;  %v560_v19 = vld [vmem:[#allocation2 + $0xb40] sm:$0xff] }
 0x100   :  { %733 = vmatpush1.bf16.msra.mxu0 %v536_v27  ;;  %815 = vmatpush1.bf16.msra.mxu1 %v538_v24  ;;  %v562_v27 = vld [vmem:[#allocation2 + $0xb50] sm:$0xff]  ;;  %v569_v24 = vld [vmem:[#allocation2 + $0xb88] sm:$0xff] }
 0x101   :  { %734 = vmatprep.subr.bf16.mxu0 %v545_v16  ;;  %816 = vmatprep.subr.bf16.mxu1 %v547_v32  ;;  %v571_v16 = vld [vmem:[#allocation2 + $0xb98] sm:$0xff]  ;;  %v568_v32 = vld [vmem:[#allocation2 + $0xb80] sm:$0xff] }
 0x104   :  { %735 = vmatpush1.bf16.msra.mxu0 %v544_v18  ;;  %817 = vmatpush1.bf16.msra.mxu1 %v546_v35  ;;  %v570_v18 = vld [vmem:[#allocation2 + $0xb90] sm:$0xff]  ;;  %v577_v35 = vld [vmem:[#allocation2 + $0xbc8] sm:$0xff] }
 0x105   :  { %736 = vmatprep.subr.bf16.mxu0 %v553_v34  ;;  %818 = vmatprep.subr.bf16.mxu1 %v555_v42  ;;  %v579_v34 = vld [vmem:[#allocation2 + $0xbd8] sm:$0xff]  ;;  %v576_v42 = vld [vmem:[#allocation2 + $0xbc0] sm:$0xff] }
 0x108   :  { %737 = vmatpush1.bf16.msra.mxu0 %v552_v40  ;;  %819 = vmatpush1.bf16.msra.mxu1 %v554_v50  ;;  %v578_v40 = vld [vmem:[#allocation2 + $0xbd0] sm:$0xff]  ;;  %v585_v50 = vld [vmem:[#allocation2 + $0xc08] sm:$0xff] }
 0x109   :  { %738 = vmatprep.subr.bf16.mxu0 %v561_v5  ;;  %820 = vmatprep.subr.bf16.mxu1 %v563_v25  ;;  %v587_v5 = vld [vmem:[#allocation2 + $0xc18] sm:$0xff]  ;;  %v7262_v25 = vpack.c.bf16 %v6678_v4, %v6678_v4  ;;  %v592_v4 = vld [vmem:[#allocation2 + $0xc40] sm:$0xff] }
 0x10c   :  { %739 = vmatpush1.bf16.msra.mxu0 %v560_v19  ;;  %821 = vmatpush1.bf16.msra.mxu1 %v562_v27  ;;  %v584_v19 = vld [vmem:[#allocation2 + $0xc00] sm:$0xff]  ;;  %v586_v27 = vld [vmem:[#allocation2 + $0xc10] sm:$0xff] }
 0x10d   :  { %740 = vmatprep.subr.bf16.mxu0 %v569_v24  ;;  %822 = vmatprep.subr.bf16.mxu1 %v571_v16  ;;  %v593_v24 = vld [vmem:[#allocation2 + $0xc48] sm:$0xff]  ;;  %v595_v16 = vld [vmem:[#allocation2 + $0xc58] sm:$0xff] }
 0x110   :  { %741 = vmatpush1.bf16.msra.mxu0 %v568_v32  ;;  %823 = vmatpush1.bf16.msra.mxu1 %v570_v18  ;;  %v7266_v32 = vpack.c.bf16 %v6684_v7, %v6684_v7  ;;  %v594_v18 = vld [vmem:[#allocation2 + $0xc50] sm:$0xff]  ;;  %v600_v7 = vld [vmem:[#allocation2 + $0xc80] sm:$0xff] }
 0x111   :  { %742 = vmatprep.subr.bf16.mxu0 %v577_v35  ;;  %824 = vmatprep.subr.bf16.mxu1 %v579_v34  ;;  %v601_v35 = vld [vmem:[#allocation2 + $0xc88] sm:$0xff]  ;;  %v603_v34 = vld [vmem:[#allocation2 + $0xc98] sm:$0xff] }
 0x114   :  { %743 = vmatpush1.bf16.msra.mxu0 %v576_v42  ;;  %825 = vmatpush1.bf16.msra.mxu1 %v578_v40  ;;  %v602_v42 = vld [vmem:[#allocation2 + $0xc90] sm:$0xff]  ;;  %v609_v40 = vld [vmem:[#allocation2 + $0xcc8] sm:$0xff] }
 0x115   :  { %753 = vmatprep.subr.bf16.mxu0 %v585_v50  ;;  %835 = vmatprep.subr.bf16.mxu1 %v587_v5  ;;  %v611_v50 = vld [vmem:[#allocation2 + $0xcd8] sm:$0xff]  ;;  %v608_v5 = vld [vmem:[#allocation2 + $0xcc0] sm:$0xff] }
 0x117   :  { %745 = vmatmul.mubr.bf16.vlgmr.msra.gmra.mrb[0].mxu0 %v7262_v25  ;;  %827 = vmatmul.mubr.bf16.vlgmr.msra.gmra.mrb[0].mxu1 %v7262_v25 }
 0x118   :  { %754 = vmatpush1.bf16.msra.mxu0 %v584_v19  ;;  %836 = vmatpush1.bf16.msra.mxu1 %v586_v27  ;;  %v610_v19 = vld [vmem:[#allocation2 + $0xcd0] sm:$0xff]  ;;  %v617_v27 = vld [vmem:[#allocation2 + $0xd08] sm:$0xff] }
 0x119   :  { %755 = vmatprep.subr.bf16.mxu0 %v593_v24  ;;  %837 = vmatprep.subr.bf16.mxu1 %v595_v16  ;;  %v619_v24 = vld [vmem:[#allocation2 + $0xd18] sm:$0xff]  ;;  %v616_v16 = vld [vmem:[#allocation2 + $0xd00] sm:$0xff] }
 0x11a   :  { %785 = vmatprep.mubr.bf16.mxu0 %v7266_v32  ;;  %867 = vmatprep.mubr.bf16.mxu1 %v7266_v32 }
 0x11c   :  { %756 = vmatpush1.bf16.msra.mxu0 %v592_v4  ;;  %838 = vmatpush1.bf16.msra.mxu1 %v594_v18  ;;  %v618_v4 = vld [vmem:[#allocation2 + $0xd10] sm:$0xff]  ;;  %v625_v18 = vld [vmem:[#allocation2 + $0xd48] sm:$0xff] }
 0x11d   :  { %757 = vmatprep.subr.bf16.mxu0 %v601_v35  ;;  %839 = vmatprep.subr.bf16.mxu1 %v603_v34  ;;  %v627_v35 = vld [vmem:[#allocation2 + $0xd58] sm:$0xff]  ;;  %v624_v34 = vld [vmem:[#allocation2 + $0xd40] sm:$0xff] }
 0x120   :  { %758 = vmatpush1.bf16.msra.mxu0 %v600_v7  ;;  %840 = vmatpush1.bf16.msra.mxu1 %v602_v42  ;;  %v626_v7 = vld [vmem:[#allocation2 + $0xd50] sm:$0xff]  ;;  %v633_v42 = vld [vmem:[#allocation2 + $0xd88] sm:$0xff] }
 0x121   :  { %759 = vmatprep.subr.bf16.mxu0 %v609_v40  ;;  %841 = vmatprep.subr.bf16.mxu1 %v611_v50  ;;  %v635_v40 = vld [vmem:[#allocation2 + $0xd98] sm:$0xff]  ;;  %v632_v50 = vld [vmem:[#allocation2 + $0xd80] sm:$0xff] }
 0x124   :  { %760 = vmatpush1.bf16.msra.mxu0 %v608_v5  ;;  %842 = vmatpush1.bf16.msra.mxu1 %v610_v19  ;;  %v634_v5 = vld [vmem:[#allocation2 + $0xd90] sm:$0xff]  ;;  %v641_v19 = vld [vmem:[#allocation2 + $0xdc8] sm:$0xff] }
 0x125   :  { %761 = vmatprep.subr.bf16.mxu0 %v617_v27  ;;  %843 = vmatprep.subr.bf16.mxu1 %v619_v24  ;;  %v643_v27 = vld [vmem:[#allocation2 + $0xdd8] sm:$0xff]  ;;  %v640_v24 = vld [vmem:[#allocation2 + $0xdc0] sm:$0xff] }
 0x128   :  { %762 = vmatpush1.bf16.msra.mxu0 %v616_v16  ;;  %844 = vmatpush1.bf16.msra.mxu1 %v618_v4  ;;  %v642_v16 = vld [vmem:[#allocation2 + $0xdd0] sm:$0xff]  ;;  %v649_v4 = vld [vmem:[#allocation2 + $0xe08] sm:$0xff] }
 0x129   :  { %763 = vmatprep.subr.bf16.mxu0 %v625_v18  ;;  %845 = vmatprep.subr.bf16.mxu1 %v627_v35  ;;  %v651_v18 = vld [vmem:[#allocation2 + $0xe18] sm:$0xff]  ;;  %v648_v35 = vld [vmem:[#allocation2 + $0xe00] sm:$0xff] }
 0x12c   :  { %764 = vmatpush1.bf16.msra.mxu0 %v624_v34  ;;  %846 = vmatpush1.bf16.msra.mxu1 %v626_v7  ;;  %v650_v34 = vld [vmem:[#allocation2 + $0xe10] sm:$0xff]  ;;  %v657_v7 = vld [vmem:[#allocation2 + $0xe48] sm:$0xff] }
 0x12d   :  { %765 = vmatprep.subr.bf16.mxu0 %v633_v42  ;;  %847 = vmatprep.subr.bf16.mxu1 %v635_v40  ;;  %v659_v42 = vld [vmem:[#allocation2 + $0xe58] sm:$0xff]  ;;  %v656_v40 = vld [vmem:[#allocation2 + $0xe40] sm:$0xff] }
 0x130   :  { %766 = vmatpush1.bf16.msra.mxu0 %v632_v50  ;;  %848 = vmatpush1.bf16.msra.mxu1 %v634_v5  ;;  %v658_v50 = vld [vmem:[#allocation2 + $0xe50] sm:$0xff]  ;;  %v665_v5 = vld [vmem:[#allocation2 + $0xe88] sm:$0xff] }
 0x131   :  { %767 = vmatprep.subr.bf16.mxu0 %v641_v19  ;;  %849 = vmatprep.subr.bf16.mxu1 %v643_v27  ;;  %v667_v19 = vld [vmem:[#allocation2 + $0xe98] sm:$0xff]  ;;  %v664_v27 = vld [vmem:[#allocation2 + $0xe80] sm:$0xff] }
 0x134   :  { %768 = vmatpush1.bf16.msra.mxu0 %v640_v24  ;;  %850 = vmatpush1.bf16.msra.mxu1 %v642_v16  ;;  %v666_v24 = vld [vmem:[#allocation2 + $0xe90] sm:$0xff]  ;;  %v673_v16 = vld [vmem:[#allocation2 + $0xec8] sm:$0xff] }
 0x135   :  { %769 = vmatprep.subr.bf16.mxu0 %v649_v4  ;;  %851 = vmatprep.subr.bf16.mxu1 %v651_v18  ;;  %v675_v4 = vld [vmem:[#allocation2 + $0xed8] sm:$0xff]  ;;  %v672_v18 = vld [vmem:[#allocation2 + $0xec0] sm:$0xff] }
 0x138   :  { %770 = vmatpush1.bf16.msra.mxu0 %v648_v35  ;;  %852 = vmatpush1.bf16.msra.mxu1 %v650_v34  ;;  %v674_v35 = vld [vmem:[#allocation2 + $0xed0] sm:$0xff]  ;;  %v681_v34 = vld [vmem:[#allocation2 + $0xf08] sm:$0xff] }
 0x139   :  { %771 = vmatprep.subr.bf16.mxu0 %v657_v7  ;;  %853 = vmatprep.subr.bf16.mxu1 %v659_v42  ;;  %v683_v7 = vld [vmem:[#allocation2 + $0xf18] sm:$0xff]  ;;  %v680_v42 = vld [vmem:[#allocation2 + $0xf00] sm:$0xff] }
 0x13c   :  { %772 = vmatpush1.bf16.msra.mxu0 %v656_v40  ;;  %854 = vmatpush1.bf16.msra.mxu1 %v658_v50  ;;  %v682_v40 = vld [vmem:[#allocation2 + $0xf10] sm:$0xff]  ;;  %v689_v50 = vld [vmem:[#allocation2 + $0xf48] sm:$0xff] }
 0x13d   :  { %773 = vmatprep.subr.bf16.mxu0 %v665_v5  ;;  %855 = vmatprep.subr.bf16.mxu1 %v667_v19  ;;  %v691_v5 = vld [vmem:[#allocation2 + $0xf58] sm:$0xff]  ;;  %v688_v19 = vld [vmem:[#allocation2 + $0xf40] sm:$0xff] }
 0x140   :  { %774 = vmatpush1.bf16.msra.mxu0 %v664_v27  ;;  %856 = vmatpush1.bf16.msra.mxu1 %v666_v24  ;;  %v690_v27 = vld [vmem:[#allocation2 + $0xf50] sm:$0xff]  ;;  %v697_v24 = vld [vmem:[#allocation2 + $0xf88] sm:$0xff] }
 0x141   :  { %775 = vmatprep.subr.bf16.mxu0 %v673_v16  ;;  %857 = vmatprep.subr.bf16.mxu1 %v675_v4  ;;  %v699_v16 = vld [vmem:[#allocation2 + $0xf98] sm:$0xff]  ;;  %v696_v4 = vld [vmem:[#allocation2 + $0xf80] sm:$0xff] }
 0x144   :  { %776 = vmatpush1.bf16.msra.mxu0 %v672_v18  ;;  %858 = vmatpush1.bf16.msra.mxu1 %v674_v35  ;;  %v698_v18 = vld [vmem:[#allocation2 + $0xf90] sm:$0xff]  ;;  %v705_v35 = vld [vmem:[#allocation2 + $0xfc8] sm:$0xff] }
 0x145   :  { %777 = vmatprep.subr.bf16.mxu0 %v681_v34  ;;  %859 = vmatprep.subr.bf16.mxu1 %v683_v7  ;;  %v707_v34 = vld [vmem:[#allocation2 + $0xfd8] sm:$0xff]  ;;  %v704_v7 = vld [vmem:[#allocation2 + $0xfc0] sm:$0xff] }
 0x148   :  { %778 = vmatpush1.bf16.msra.mxu0 %v680_v42  ;;  %860 = vmatpush1.bf16.msra.mxu1 %v682_v40  ;;  %v706_v42 = vld [vmem:[#allocation2 + $0xfd0] sm:$0xff]  ;;  %v461_v40 = vld [vmem:[#allocation2 + $0x828] sm:$0xff] }
 0x149   :  { %779 = vmatprep.subr.bf16.mxu0 %v689_v50  ;;  %861 = vmatprep.subr.bf16.mxu1 %v691_v5  ;;  %v463_v50 = vld [vmem:[#allocation2 + $0x838] sm:$0xff]  ;;  %v7274_v5 = vpack.c.bf16 %v6682_v6, %v6682_v6  ;;  %v477_v6 = vld [vmem:[#allocation2 + $0x8a8] sm:$0xff] }
 0x14c   :  { %780 = vmatpush1.bf16.msra.mxu0 %v688_v19  ;;  %862 = vmatpush1.bf16.msra.mxu1 %v690_v27  ;;  %v460_v19 = vld [vmem:[#allocation2 + $0x820] sm:$0xff]  ;;  %v462_v27 = vld [vmem:[#allocation2 + $0x830] sm:$0xff] }
 0x14d   :  { %781 = vmatprep.subr.bf16.mxu0 %v697_v24  ;;  %863 = vmatprep.subr.bf16.mxu1 %v699_v16  ;;  %v469_v24 = vld [vmem:[#allocation2 + $0x868] sm:$0xff]  ;;  %v471_v16 = vld [vmem:[#allocation2 + $0x878] sm:$0xff] }
 0x150   :  { %782 = vmatpush1.bf16.msra.mxu0 %v696_v4  ;;  %864 = vmatpush1.bf16.msra.mxu1 %v698_v18  ;;  %v468_v4 = vld [vmem:[#allocation2 + $0x860] sm:$0xff]  ;;  %v470_v18 = vld [vmem:[#allocation2 + $0x870] sm:$0xff] }
 0x151   :  { %783 = vmatprep.subr.bf16.mxu0 %v705_v35  ;;  %865 = vmatprep.subr.bf16.mxu1 %v707_v34  ;;  %v479_v35 = vld [vmem:[#allocation2 + $0x8b8] sm:$0xff]  ;;  %v476_v34 = vld [vmem:[#allocation2 + $0x8a0] sm:$0xff] }
 0x154   :  { %784 = vmatpush1.bf16.msra.mxu0 %v704_v7  ;;  %866 = vmatpush1.bf16.msra.mxu1 %v706_v42  ;;  %v478_v7 = vld [vmem:[#allocation2 + $0x8b0] sm:$0xff]  ;;  %v485_v42 = vld [vmem:[#allocation2 + $0x8e8] sm:$0xff] }
 0x155   :  { %876 = vmatprep.subr.bf16.mxu0 %v461_v40  ;;  %958 = vmatprep.subr.bf16.mxu1 %v463_v50  ;;  %v487_v40 = vld [vmem:[#allocation2 + $0x8f8] sm:$0xff]  ;;  %v484_v50 = vld [vmem:[#allocation2 + $0x8e0] sm:$0xff] }
 0x157   :  { %786 = vmatmul.mubr.bf16.vlgmr.msra.gmra.mrb[0].mxu0 %v7274_v5  ;;  %868 = vmatmul.mubr.bf16.vlgmr.msra.gmra.mrb[0].mxu1 %v7274_v5 }
 0x158   :  { %877 = vmatpush1.bf16.msra.mxu0 %v460_v19  ;;  %959 = vmatpush1.bf16.msra.mxu1 %v462_v27  ;;  %v486_v19 = vld [vmem:[#allocation2 + $0x8f0] sm:$0xff]  ;;  %v493_v27 = vld [vmem:[#allocation2 + $0x928] sm:$0xff] }
 0x159   :  { %878 = vmatprep.subr.bf16.mxu0 %v469_v24  ;;  %960 = vmatprep.subr.bf16.mxu1 %v471_v16  ;;  %v495_v24 = vld [vmem:[#allocation2 + $0x938] sm:$0xff]  ;;  %v494_v16 = vld [vmem:[#allocation2 + $0x930] sm:$0xff] }
 0x15a   :  { %908 = vmatprep.mubr.bf16.mxu0 %v7241_v26  ;;  %990 = vmatprep.mubr.bf16.mxu1 %v7241_v26  ;;  %v492_v26 = vld [vmem:[#allocation2 + $0x920] sm:$0xff] }
 0x15c   :  { %879 = vmatpush1.bf16.msra.mxu0 %v468_v4  ;;  %961 = vmatpush1.bf16.msra.mxu1 %v470_v18  ;;  %v501_v4 = vld [vmem:[#allocation2 + $0x968] sm:$0xff]  ;;  %v503_v18 = vld [vmem:[#allocation2 + $0x978] sm:$0xff] }
 0x15d   :  { %880 = vmatprep.subr.bf16.mxu0 %v477_v6  ;;  %962 = vmatprep.subr.bf16.mxu1 %v479_v35  ;;  %v500_v6 = vld [vmem:[#allocation2 + $0x960] sm:$0xff]  ;;  %v502_v35 = vld [vmem:[#allocation2 + $0x970] sm:$0xff] }
 0x160   :  { %881 = vmatpush1.bf16.msra.mxu0 %v476_v34  ;;  %963 = vmatpush1.bf16.msra.mxu1 %v478_v7  ;;  %v509_v34 = vld [vmem:[#allocation2 + $0x9a8] sm:$0xff]  ;;  %v511_v7 = vld [vmem:[#allocation2 + $0x9b8] sm:$0xff] }
 0x161   :  { %882 = vmatprep.subr.bf16.mxu0 %v485_v42  ;;  %964 = vmatprep.subr.bf16.mxu1 %v487_v40  ;;  %v508_v42 = vld [vmem:[#allocation2 + $0x9a0] sm:$0xff]  ;;  %v510_v40 = vld [vmem:[#allocation2 + $0x9b0] sm:$0xff] }
 0x164   :  { %883 = vmatpush1.bf16.msra.mxu0 %v484_v50  ;;  %965 = vmatpush1.bf16.msra.mxu1 %v486_v19  ;;  %v517_v50 = vld [vmem:[#allocation2 + $0x9e8] sm:$0xff]  ;;  %v519_v19 = vld [vmem:[#allocation2 + $0x9f8] sm:$0xff] }
 0x165   :  { %884 = vmatprep.subr.bf16.mxu0 %v493_v27  ;;  %966 = vmatprep.subr.bf16.mxu1 %v495_v24  ;;  %v516_v27 = vld [vmem:[#allocation2 + $0x9e0] sm:$0xff]  ;;  %v518_v24 = vld [vmem:[#allocation2 + $0x9f0] sm:$0xff] }
 0x168   :  { %885 = vmatpush1.bf16.msra.mxu0 %v492_v26  ;;  %967 = vmatpush1.bf16.msra.mxu1 %v494_v16  ;;  %v525_v26 = vld [vmem:[#allocation2 + $0xa28] sm:$0xff]  ;;  %v527_v16 = vld [vmem:[#allocation2 + $0xa38] sm:$0xff] }
 0x169   :  { %886 = vmatprep.subr.bf16.mxu0 %v501_v4  ;;  %968 = vmatprep.subr.bf16.mxu1 %v503_v18  ;;  %v524_v4 = vld [vmem:[#allocation2 + $0xa20] sm:$0xff]  ;;  %v526_v18 = vld [vmem:[#allocation2 + $0xa30] sm:$0xff] }
 0x16c   :  { %887 = vmatpush1.bf16.msra.mxu0 %v500_v6  ;;  %969 = vmatpush1.bf16.msra.mxu1 %v502_v35  ;;  %v533_v6 = vld [vmem:[#allocation2 + $0xa68] sm:$0xff]  ;;  %v535_v35 = vld [vmem:[#allocation2 + $0xa78] sm:$0xff] }
 0x16d   :  { %888 = vmatprep.subr.bf16.mxu0 %v509_v34  ;;  %970 = vmatprep.subr.bf16.mxu1 %v511_v7  ;;  %v532_v34 = vld [vmem:[#allocation2 + $0xa60] sm:$0xff]  ;;  %v534_v7 = vld [vmem:[#allocation2 + $0xa70] sm:$0xff] }
 0x170   :  { %889 = vmatpush1.bf16.msra.mxu0 %v508_v42  ;;  %971 = vmatpush1.bf16.msra.mxu1 %v510_v40  ;;  %v541_v42 = vld [vmem:[#allocation2 + $0xaa8] sm:$0xff]  ;;  %v543_v40 = vld [vmem:[#allocation2 + $0xab8] sm:$0xff] }
 0x171   :  { %890 = vmatprep.subr.bf16.mxu0 %v517_v50  ;;  %972 = vmatprep.subr.bf16.mxu1 %v519_v19  ;;  %v540_v50 = vld [vmem:[#allocation2 + $0xaa0] sm:$0xff]  ;;  %v542_v19 = vld [vmem:[#allocation2 + $0xab0] sm:$0xff] }
 0x174   :  { %891 = vmatpush1.bf16.msra.mxu0 %v516_v27  ;;  %973 = vmatpush1.bf16.msra.mxu1 %v518_v24  ;;  %v549_v27 = vld [vmem:[#allocation2 + $0xae8] sm:$0xff]  ;;  %v551_v24 = vld [vmem:[#allocation2 + $0xaf8] sm:$0xff] }
 0x175   :  { %892 = vmatprep.subr.bf16.mxu0 %v525_v26  ;;  %974 = vmatprep.subr.bf16.mxu1 %v527_v16  ;;  %v548_v26 = vld [vmem:[#allocation2 + $0xae0] sm:$0xff]  ;;  %v550_v16 = vld [vmem:[#allocation2 + $0xaf0] sm:$0xff] }
 0x178   :  { %893 = vmatpush1.bf16.msra.mxu0 %v524_v4  ;;  %975 = vmatpush1.bf16.msra.mxu1 %v526_v18  ;;  %v557_v4 = vld [vmem:[#allocation2 + $0xb28] sm:$0xff]  ;;  %v559_v18 = vld [vmem:[#allocation2 + $0xb38] sm:$0xff] }
 0x179   :  { %894 = vmatprep.subr.bf16.mxu0 %v533_v6  ;;  %976 = vmatprep.subr.bf16.mxu1 %v535_v35  ;;  %v556_v6 = vld [vmem:[#allocation2 + $0xb20] sm:$0xff]  ;;  %v558_v35 = vld [vmem:[#allocation2 + $0xb30] sm:$0xff] }
 0x17c   :  { %895 = vmatpush1.bf16.msra.mxu0 %v532_v34  ;;  %977 = vmatpush1.bf16.msra.mxu1 %v534_v7  ;;  %v565_v34 = vld [vmem:[#allocation2 + $0xb68] sm:$0xff]  ;;  %v567_v7 = vld [vmem:[#allocation2 + $0xb78] sm:$0xff] }
 0x17d   :  { %896 = vmatprep.subr.bf16.mxu0 %v541_v42  ;;  %978 = vmatprep.subr.bf16.mxu1 %v543_v40  ;;  %v564_v42 = vld [vmem:[#allocation2 + $0xb60] sm:$0xff]  ;;  %v566_v40 = vld [vmem:[#allocation2 + $0xb70] sm:$0xff] }
 0x180   :  { %897 = vmatpush1.bf16.msra.mxu0 %v540_v50  ;;  %979 = vmatpush1.bf16.msra.mxu1 %v542_v19  ;;  %v573_v50 = vld [vmem:[#allocation2 + $0xba8] sm:$0xff]  ;;  %v575_v19 = vld [vmem:[#allocation2 + $0xbb8] sm:$0xff] }
 0x181   :  { %898 = vmatprep.subr.bf16.mxu0 %v549_v27  ;;  %980 = vmatprep.subr.bf16.mxu1 %v551_v24  ;;  %v572_v27 = vld [vmem:[#allocation2 + $0xba0] sm:$0xff]  ;;  %v574_v24 = vld [vmem:[#allocation2 + $0xbb0] sm:$0xff] }
 0x184   :  { %899 = vmatpush1.bf16.msra.mxu0 %v548_v26  ;;  %981 = vmatpush1.bf16.msra.mxu1 %v550_v16  ;;  %v581_v26 = vld [vmem:[#allocation2 + $0xbe8] sm:$0xff]  ;;  %v583_v16 = vld [vmem:[#allocation2 + $0xbf8] sm:$0xff] }
 0x185   :  { %900 = vmatprep.subr.bf16.mxu0 %v557_v4  ;;  %982 = vmatprep.subr.bf16.mxu1 %v559_v18  ;;  %v580_v4 = vld [vmem:[#allocation2 + $0xbe0] sm:$0xff]  ;;  %v582_v18 = vld [vmem:[#allocation2 + $0xbf0] sm:$0xff] }
 0x188   :  { %901 = vmatpush1.bf16.msra.mxu0 %v556_v6  ;;  %983 = vmatpush1.bf16.msra.mxu1 %v558_v35  ;;  %v589_v6 = vld [vmem:[#allocation2 + $0xc28] sm:$0xff]  ;;  %v591_v35 = vld [vmem:[#allocation2 + $0xc38] sm:$0xff] }
 0x189   :  { %902 = vmatprep.subr.bf16.mxu0 %v565_v34  ;;  %984 = vmatprep.subr.bf16.mxu1 %v567_v7  ;;  %v588_v34 = vld [vmem:[#allocation2 + $0xc20] sm:$0xff]  ;;  %v590_v7 = vld [vmem:[#allocation2 + $0xc30] sm:$0xff] }
 0x18c   :  { %903 = vmatpush1.bf16.msra.mxu0 %v564_v42  ;;  %985 = vmatpush1.bf16.msra.mxu1 %v566_v40  ;;  %v597_v42 = vld [vmem:[#allocation2 + $0xc68] sm:$0xff]  ;;  %v599_v40 = vld [vmem:[#allocation2 + $0xc78] sm:$0xff] }
 0x18d   :  { %904 = vmatprep.subr.bf16.mxu0 %v573_v50  ;;  %986 = vmatprep.subr.bf16.mxu1 %v575_v19  ;;  %v596_v50 = vld [vmem:[#allocation2 + $0xc60] sm:$0xff]  ;;  %v598_v19 = vld [vmem:[#allocation2 + $0xc70] sm:$0xff] }
 0x190   :  { %905 = vmatpush1.bf16.msra.mxu0 %v572_v27  ;;  %987 = vmatpush1.bf16.msra.mxu1 %v574_v24  ;;  %v605_v27 = vld [vmem:[#allocation2 + $0xca8] sm:$0xff]  ;;  %v607_v24 = vld [vmem:[#allocation2 + $0xcb8] sm:$0xff] }
 0x191   :  { %906 = vmatprep.subr.bf16.mxu0 %v581_v26  ;;  %988 = vmatprep.subr.bf16.mxu1 %v583_v16  ;;  %v604_v26 = vld [vmem:[#allocation2 + $0xca0] sm:$0xff]  ;;  %v606_v16 = vld [vmem:[#allocation2 + $0xcb0] sm:$0xff] }
 0x194   :  { %907 = vmatpush1.bf16.msra.mxu0 %v580_v4  ;;  %989 = vmatpush1.bf16.msra.mxu1 %v582_v18  ;;  %v613_v4 = vld [vmem:[#allocation2 + $0xce8] sm:$0xff]  ;;  %v612_v18 = vld [vmem:[#allocation2 + $0xce0] sm:$0xff] }
 0x195   :  { %917 = vmatprep.subr.bf16.mxu0 %v589_v6  ;;  %999 = vmatprep.subr.bf16.mxu1 %v591_v35  ;;  %v614_v6 = vld [vmem:[#allocation2 + $0xcf0] sm:$0xff]  ;;  %v621_v35 = vld [vmem:[#allocation2 + $0xd28] sm:$0xff] }
 0x197   :  { %909 = vmatmul.mubr.bf16.vlgmr.msra.gmra.mrb[4].mxu0 %v7262_v25  ;;  %991 = vmatmul.mubr.bf16.vlgmr.msra.gmra.mrb[4].mxu1 %v7262_v25  ;;  %v615_v25 = vld [vmem:[#allocation2 + $0xcf8] sm:$0xff] }
 0x198   :  { %918 = vmatpush1.bf16.msra.mxu0 %v588_v34  ;;  %1000 = vmatpush1.bf16.msra.mxu1 %v590_v7  ;;  %v623_v34 = vld [vmem:[#allocation2 + $0xd38] sm:$0xff]  ;;  %v622_v7 = vld [vmem:[#allocation2 + $0xd30] sm:$0xff] }
 0x199   :  { %919 = vmatprep.subr.bf16.mxu0 %v597_v42  ;;  %1001 = vmatprep.subr.bf16.mxu1 %v599_v40  ;;  %v629_v42 = vld [vmem:[#allocation2 + $0xd68] sm:$0xff]  ;;  %v631_v40 = vld [vmem:[#allocation2 + $0xd78] sm:$0xff] }
 0x19a   :  { %949 = vmatprep.mubr.bf16.mxu0 %v7266_v32  ;;  %1031 = vmatprep.mubr.bf16.mxu1 %v7266_v32  ;;  %v620_v32 = vld [vmem:[#allocation2 + $0xd20] sm:$0xff] }
 0x19c   :  { %920 = vmatpush1.bf16.msra.mxu0 %v596_v50  ;;  %1002 = vmatpush1.bf16.msra.mxu1 %v598_v19  ;;  %v628_v50 = vld [vmem:[#allocation2 + $0xd60] sm:$0xff]  ;;  %v630_v19 = vld [vmem:[#allocation2 + $0xd70] sm:$0xff] }
 0x19d   :  { %921 = vmatprep.subr.bf16.mxu0 %v605_v27  ;;  %1003 = vmatprep.subr.bf16.mxu1 %v607_v24  ;;  %v637_v27 = vld [vmem:[#allocation2 + $0xda8] sm:$0xff]  ;;  %v639_v24 = vld [vmem:[#allocation2 + $0xdb8] sm:$0xff] }
 0x1a0   :  { %922 = vmatpush1.bf16.msra.mxu0 %v604_v26  ;;  %1004 = vmatpush1.bf16.msra.mxu1 %v606_v16  ;;  %v636_v26 = vld [vmem:[#allocation2 + $0xda0] sm:$0xff]  ;;  %v638_v16 = vld [vmem:[#allocation2 + $0xdb0] sm:$0xff] }
 0x1a1   :  { %923 = vmatprep.subr.bf16.mxu0 %v613_v4  ;;  %1005 = vmatprep.subr.bf16.mxu1 %v615_v25  ;;  %v645_v4 = vld [vmem:[#allocation2 + $0xde8] sm:$0xff]  ;;  %v647_v25 = vld [vmem:[#allocation2 + $0xdf8] sm:$0xff] }
 0x1a4   :  { %924 = vmatpush1.bf16.msra.mxu0 %v612_v18  ;;  %1006 = vmatpush1.bf16.msra.mxu1 %v614_v6  ;;  %v644_v18 = vld [vmem:[#allocation2 + $0xde0] sm:$0xff]  ;;  %v646_v6 = vld [vmem:[#allocation2 + $0xdf0] sm:$0xff] }
 0x1a5   :  { %925 = vmatprep.subr.bf16.mxu0 %v621_v35  ;;  %1007 = vmatprep.subr.bf16.mxu1 %v623_v34  ;;  %v653_v35 = vld [vmem:[#allocation2 + $0xe28] sm:$0xff]  ;;  %v655_v34 = vld [vmem:[#allocation2 + $0xe38] sm:$0xff] }
 0x1a8   :  { %926 = vmatpush1.bf16.msra.mxu0 %v620_v32  ;;  %1008 = vmatpush1.bf16.msra.mxu1 %v622_v7  ;;  %v652_v32 = vld [vmem:[#allocation2 + $0xe20] sm:$0xff]  ;;  %v654_v7 = vld [vmem:[#allocation2 + $0xe30] sm:$0xff] }
 0x1a9   :  { %927 = vmatprep.subr.bf16.mxu0 %v629_v42  ;;  %1009 = vmatprep.subr.bf16.mxu1 %v631_v40  ;;  %v661_v42 = vld [vmem:[#allocation2 + $0xe68] sm:$0xff]  ;;  %v663_v40 = vld [vmem:[#allocation2 + $0xe78] sm:$0xff] }
 0x1ac   :  { %928 = vmatpush1.bf16.msra.mxu0 %v628_v50  ;;  %1010 = vmatpush1.bf16.msra.mxu1 %v630_v19  ;;  %v660_v50 = vld [vmem:[#allocation2 + $0xe60] sm:$0xff]  ;;  %v662_v19 = vld [vmem:[#allocation2 + $0xe70] sm:$0xff] }
 0x1ad   :  { %929 = vmatprep.subr.bf16.mxu0 %v637_v27  ;;  %1011 = vmatprep.subr.bf16.mxu1 %v639_v24  ;;  %v669_v27 = vld [vmem:[#allocation2 + $0xea8] sm:$0xff]  ;;  %v671_v24 = vld [vmem:[#allocation2 + $0xeb8] sm:$0xff] }
 0x1b0   :  { %930 = vmatpush1.bf16.msra.mxu0 %v636_v26  ;;  %1012 = vmatpush1.bf16.msra.mxu1 %v638_v16  ;;  %v668_v26 = vld [vmem:[#allocation2 + $0xea0] sm:$0xff]  ;;  %v670_v16 = vld [vmem:[#allocation2 + $0xeb0] sm:$0xff] }
 0x1b1   :  { %931 = vmatprep.subr.bf16.mxu0 %v645_v4  ;;  %1013 = vmatprep.subr.bf16.mxu1 %v647_v25  ;;  %v677_v4 = vld [vmem:[#allocation2 + $0xee8] sm:$0xff]  ;;  %v679_v25 = vld [vmem:[#allocation2 + $0xef8] sm:$0xff] }
 0x1b4   :  { %932 = vmatpush1.bf16.msra.mxu0 %v644_v18  ;;  %1014 = vmatpush1.bf16.msra.mxu1 %v646_v6  ;;  %v676_v18 = vld [vmem:[#allocation2 + $0xee0] sm:$0xff]  ;;  %v678_v6 = vld [vmem:[#allocation2 + $0xef0] sm:$0xff] }
 0x1b5   :  { %933 = vmatprep.subr.bf16.mxu0 %v653_v35  ;;  %1015 = vmatprep.subr.bf16.mxu1 %v655_v34  ;;  %v685_v35 = vld [vmem:[#allocation2 + $0xf28] sm:$0xff]  ;;  %v687_v34 = vld [vmem:[#allocation2 + $0xf38] sm:$0xff] }
 0x1b8   :  { %934 = vmatpush1.bf16.msra.mxu0 %v652_v32  ;;  %1016 = vmatpush1.bf16.msra.mxu1 %v654_v7  ;;  %v684_v32 = vld [vmem:[#allocation2 + $0xf20] sm:$0xff]  ;;  %v686_v7 = vld [vmem:[#allocation2 + $0xf30] sm:$0xff] }
 0x1b9   :  { %935 = vmatprep.subr.bf16.mxu0 %v661_v42  ;;  %1017 = vmatprep.subr.bf16.mxu1 %v663_v40  ;;  %v693_v42 = vld [vmem:[#allocation2 + $0xf68] sm:$0xff]  ;;  %v695_v40 = vld [vmem:[#allocation2 + $0xf78] sm:$0xff] }
 0x1bc   :  { %936 = vmatpush1.bf16.msra.mxu0 %v660_v50  ;;  %1018 = vmatpush1.bf16.msra.mxu1 %v662_v19  ;;  %v692_v50 = vld [vmem:[#allocation2 + $0xf60] sm:$0xff]  ;;  %v694_v19 = vld [vmem:[#allocation2 + $0xf70] sm:$0xff] }
 0x1bd   :  { %937 = vmatprep.subr.bf16.mxu0 %v669_v27  ;;  %1019 = vmatprep.subr.bf16.mxu1 %v671_v24  ;;  %v701_v27 = vld [vmem:[#allocation2 + $0xfa8] sm:$0xff]  ;;  %v703_v24 = vld [vmem:[#allocation2 + $0xfb8] sm:$0xff] }
 0x1c0   :  { %938 = vmatpush1.bf16.msra.mxu0 %v668_v26  ;;  %1020 = vmatpush1.bf16.msra.mxu1 %v670_v16  ;;  %v700_v26 = vld [vmem:[#allocation2 + $0xfa0] sm:$0xff]  ;;  %v702_v16 = vld [vmem:[#allocation2 + $0xfb0] sm:$0xff] }
 0x1c1   :  { %939 = vmatprep.subr.bf16.mxu0 %v677_v4  ;;  %1021 = vmatprep.subr.bf16.mxu1 %v679_v25  ;;  %v709_v4 = vld [vmem:[#allocation2 + $0xfe8] sm:$0xff]  ;;  %v711_v25 = vld [vmem:[#allocation2 + $0xff8] sm:$0xff] }
 0x1c4   :  { %940 = vmatpush1.bf16.msra.mxu0 %v676_v18  ;;  %1022 = vmatpush1.bf16.msra.mxu1 %v678_v6  ;;  %v708_v18 = vld [vmem:[#allocation2 + $0xfe0] sm:$0xff]  ;;  %v710_v6 = vld [vmem:[#allocation2 + $0xff0] sm:$0xff] }
 0x1c5   :  { %941 = vmatprep.subr.bf16.mxu0 %v685_v35  ;;  %1023 = vmatprep.subr.bf16.mxu1 %v687_v34  ;;  %v8811_v35 = vld [vmem:[#allocation202_spill] sm:$0xff]  ;;  %v8812_v34 = vld [vmem:[#allocation209_spill] sm:$0xff] }
 0x1c8   :  { %942 = vmatpush1.bf16.msra.mxu0 %v684_v32  ;;  %1024 = vmatpush1.bf16.msra.mxu1 %v686_v7  ;;  %v8813_v32 = vld [vmem:[#allocation211_spill] sm:$0xff]  ;;  %v8814_v7 = vld [vmem:[#allocation208_spill] sm:$0xff] }
 0x1c9   :  { %943 = vmatprep.subr.bf16.mxu0 %v693_v42  ;;  %1025 = vmatprep.subr.bf16.mxu1 %v695_v40  ;;  %v8815_v42 = vld [vmem:[#allocation210_spill] sm:$0xff]  ;;  %v8816_v40 = vld [vmem:[#allocation217_spill] sm:$0xff] }
 0x1cc   :  { %944 = vmatpush1.bf16.msra.mxu0 %v692_v50  ;;  %1026 = vmatpush1.bf16.msra.mxu1 %v694_v19  ;;  %v8817_v50 = vld [vmem:[#allocation219_spill] sm:$0xff]  ;;  %v8818_v19 = vld [vmem:[#allocation216_spill] sm:$0xff] }
 0x1cd   :  { %945 = vmatprep.subr.bf16.mxu0 %v701_v27  ;;  %1027 = vmatprep.subr.bf16.mxu1 %v703_v24  ;;  %v8819_v27 = vld [vmem:[#allocation218_spill] sm:$0xff]  ;;  %v8820_v24 = vld [vmem:[#allocation225_spill] sm:$0xff] }
 0x1d0   :  { %946 = vmatpush1.bf16.msra.mxu0 %v700_v26  ;;  %1028 = vmatpush1.bf16.msra.mxu1 %v702_v16  ;;  %v8821_v26 = vld [vmem:[#allocation227_spill] sm:$0xff]  ;;  %v8822_v16 = vld [vmem:[#allocation224_spill] sm:$0xff] }
 0x1d1   :  { %947 = vmatprep.subr.bf16.mxu0 %v709_v4  ;;  %1029 = vmatprep.subr.bf16.mxu1 %v711_v25  ;;  %v8823_v4 = vld [vmem:[#allocation226_spill] sm:$0xff]  ;;  %v8824_v25 = vld [vmem:[#allocation233_spill] sm:$0xff] }
 0x1d4   :  { %948 = vmatpush1.bf16.msra.mxu0 %v708_v18  ;;  %1030 = vmatpush1.bf16.msra.mxu1 %v710_v6  ;;  %v8825_v18 = vld [vmem:[#allocation235_spill] sm:$0xff]  ;;  %v8826_v6 = vld [vmem:[#allocation232_spill] sm:$0xff] }
 0x1d5   :  { %1040 = vmatprep.subr.bf16.mxu0 %v6729_v21  ;;  %1122 = vmatprep.subr.bf16.mxu1 %v6733_v23  ;;  %v8773_v21 = vld [vmem:[#allocation130_spill] sm:$0xff]  ;;  %v8775_v23 = vld [vmem:[#allocation139_spill] sm:$0xff] }
 0x1d7   :  { %950 = vmatmul.mubr.bf16.vlgmr.msra.gmra.mrb[4].mxu0 %v7274_v5  ;;  %1032 = vmatmul.mubr.bf16.vlgmr.msra.gmra.mrb[4].mxu1 %v7274_v5  ;;  %v8810_v5 = vld [vmem:[#allocation200_spill] sm:$0xff] }
 0x1d8   :  { %1041 = vmatpush1.bf16.msra.mxu0 %v6727_v20  ;;  %1123 = vmatpush1.bf16.msra.mxu1 %v6731_v22  ;;  %v8772_v20 = vld [vmem:[#allocation128_spill] sm:$0xff]  ;;  %v8774_v22 = vld [vmem:[#allocation137_spill] sm:$0xff] }
 0x1d9   :  { %1042 = vmatprep.subr.bf16.mxu0 %v6745_v29  ;;  %1124 = vmatprep.subr.bf16.mxu1 %v6749_v31  ;;  %v8777_v29 = vld [vmem:[#allocation138_spill] sm:$0xff]  ;;  %v8779_v31 = vld [vmem:[#allocation147_spill] sm:$0xff] }
 0x1da   :  { %1072 = vmatprep.mubr.bf16.mxu0 %v6704_v17  ;;  %1154 = vmatprep.mubr.bf16.mxu1 %v6704_v17 }
 0x1dc   :  { %1043 = vmatpush1.bf16.msra.mxu0 %v6743_v28  ;;  %1125 = vmatpush1.bf16.msra.mxu1 %v6747_v30  ;;  %v8776_v28 = vld [vmem:[#allocation136_spill] sm:$0xff]  ;;  %v8778_v30 = vld [vmem:[#allocation145_spill] sm:$0xff] }
 0x1dd   :  { %1044 = vmatprep.subr.bf16.mxu0 %v6761_v37  ;;  %1126 = vmatprep.subr.bf16.mxu1 %v6765_v39  ;;  %v8782_v37 = vld [vmem:[#allocation153_spill] sm:$0xff]  ;;  %v8784_v39 = vld [vmem:[#allocation67_spill] sm:$0xff] }
 0x1e0   :  { %1045 = vmatpush1.bf16.msra.mxu0 %v6759_v36  ;;  %1127 = vmatpush1.bf16.msra.mxu1 %v6763_v38  ;;  %v8781_v36 = vld [vmem:[#allocation146_spill] sm:$0xff]  ;;  %v8783_v38 = vld [vmem:[#allocation155_spill] sm:$0xff] }
 0x1e1   :  { %1046 = vmatprep.subr.bf16.mxu0 %v6777_v45  ;;  %1128 = vmatprep.subr.bf16.mxu1 %v6781_v47  ;;  %v8788_v45 = vld [vmem:[#allocation163_spill] sm:$0xff]  ;;  %v8790_v47 = vld [vmem:[#allocation160_spill] sm:$0xff] }
 0x1e4   :  { %1047 = vmatpush1.bf16.msra.mxu0 %v6775_v44  ;;  %1129 = vmatpush1.bf16.msra.mxu1 %v6779_v46  ;;  %v8787_v44 = vld [vmem:[#allocation161_spill] sm:$0xff] }
 0x1e5   :  { %1048 = vmatprep.subr.bf16.mxu0 %v6793_v53  ;;  %1130 = vmatprep.subr.bf16.mxu1 %v6797_v55  ;;  %v8789_v46 = vld [vmem:[#allocation69_spill] sm:$0xff]  ;;  %v8795_v53 = vld [vmem:[#allocation170_spill] sm:$0xff]  ;;  %v8797_v55 = vld [vmem:[#allocation179_spill] sm:$0xff] }
 0x1e8   :  { %1049 = vmatpush1.bf16.msra.mxu0 %v6791_v52  ;;  %1131 = vmatpush1.bf16.msra.mxu1 %v6795_v54  ;;  %v8794_v52 = vld [vmem:[#allocation168_spill] sm:$0xff]  ;;  %v8796_v54 = vld [vmem:[#allocation177_spill] sm:$0xff] }
 0x1e9   :  { %1050 = vmatprep.subr.bf16.mxu0 %v6809_v61  ;;  %1132 = vmatprep.subr.bf16.mxu1 %v6813_v63  ;;  %v8803_v61 = vld [vmem:[#allocation186_spill] sm:$0xff]  ;;  %v8805_v63 = vld [vmem:[#allocation195_spill] sm:$0xff] }
 0x1ec   :  { %1051 = vmatpush1.bf16.msra.mxu0 %v6807_v60  ;;  %1133 = vmatpush1.bf16.msra.mxu1 %v6811_v62  ;;  %v8802_v60 = vld [vmem:[#allocation184_spill] sm:$0xff]  ;;  %v8804_v62 = vld [vmem:[#allocation193_spill] sm:$0xff] }
 0x1ed   :  { %1052 = vmatprep.subr.bf16.mxu0 %v6825_v15  ;;  %1134 = vmatprep.subr.bf16.mxu1 %v6829_v13  ;;  %v8769_v13 = vld [vmem:[#allocation122_spill] sm:$0xff]  ;;  %v8771_v15 = vld [vmem:[#allocation131_spill] sm:$0xff] }
 0x1f0   :  { %1053 = vmatpush1.bf16.msra.mxu0 %v6823_v14  ;;  %1135 = vmatpush1.bf16.msra.mxu1 %v6827_v12  ;;  %v8767_v12 = vld [vmem:[#allocation123_spill] sm:$0xff]  ;;  %v8770_v14 = vld [vmem:[#allocation129_spill] sm:$0xff] }
 0x1f1   :  { %1054 = vmatprep.subr.bf16.mxu0 %v6841_v2  ;;  %1136 = vmatprep.subr.bf16.mxu1 %v6845_v1  ;;  %v8807_v1 = vld [vmem:[#allocation194_spill] sm:$0xff]  ;;  %v8808_v2 = vld [vmem:[#allocation201_spill] sm:$0xff] }
 0x1f4   :  { %1055 = vmatpush1.bf16.msra.mxu0 %v6839_v0  ;;  %1137 = vmatpush1.bf16.msra.mxu1 %v6843_v3  ;;  %v8806_v0 = vld [vmem:[#allocation192_spill] sm:$0xff]  ;;  %v8809_v3 = vld [vmem:[#allocation203_spill] sm:$0xff] }
 0x1f5   :  { %1056 = vmatprep.subr.bf16.mxu0 %v6857_v8  ;;  %1138 = vmatprep.subr.bf16.mxu1 %v6861_v57  ;;  %v8764_v8 = vld [vmem:[#allocation114_spill] sm:$0xff] }
 0x1f6   :  { %v8799_v57 = vld [vmem:[#allocation178_spill] sm:$0xff] }
 0x1f8   :  { %1057 = vmatpush1.bf16.msra.mxu0 %v6855_v11  ;;  %1139 = vmatpush1.bf16.msra.mxu1 %v6859_v9  ;;  %v8765_v9 = vld [vmem:[#allocation115_spill] sm:$0xff]  ;;  %v8766_v11 = vld [vmem:[#allocation121_spill] sm:$0xff] }
 0x1f9   :  { %1058 = vmatprep.subr.bf16.mxu0 %v6873_v59  ;;  %1140 = vmatprep.subr.bf16.mxu1 %v6877_v49  ;;  %v8792_v49 = vld [vmem:[#allocation169_spill] sm:$0xff]  ;;  %v8801_v59 = vld [vmem:[#allocation187_spill] sm:$0xff] }
 0x1fc   :  { %1059 = vmatpush1.bf16.msra.mxu0 %v6871_v56  ;;  %1141 = vmatpush1.bf16.msra.mxu1 %v6875_v10  ;;  %v8768_v10 = vld [vmem:[#allocation120_spill] sm:$0xff] }
 0x1fd   :  { %1060 = vmatprep.subr.bf16.mxu0 %v6889_v51  ;;  %1142 = vmatprep.subr.bf16.mxu1 %v6893_v41  ;;  %v8785_v41 = vld [vmem:[#allocation152_spill] sm:$0xff]  ;;  %v8793_v51 = vld [vmem:[#allocation171_spill] sm:$0xff] }
 0x1fe   :  { %v8798_v56 = vld [vmem:[#allocation176_spill] sm:$0xff] }
 0x200   :  { %1061 = vmatpush1.bf16.msra.mxu0 %v6887_v48  ;;  %1143 = vmatpush1.bf16.msra.mxu1 %v6891_v58  ;;  %v8791_v48 = vld [vmem:[#allocation162_spill] sm:$0xff]  ;;  %v8800_v58 = vld [vmem:[#allocation185_spill] sm:$0xff] }
 0x201   :  { %1062 = vmatprep.subr.bf16.mxu0 %v6905_v43  ;;  %1144 = vmatprep.subr.bf16.mxu1 %v6909_v33  ;;  %v8780_v33 = vld [vmem:[#allocation144_spill] sm:$0xff]  ;;  %v8786_v43 = vld [vmem:[#allocation154_spill] sm:$0xff] }
 0x204   :  { %1063 = vmatpush1.bf16.msra.mxu0 %v8764_v8  ;;  %1145 = vmatpush1.bf16.msra.mxu1 %v8765_v9  ;;  %v8827_v8 = vld [vmem:[#allocation234_spill] sm:$0xff]  ;;  %v8828_v9 = vld [vmem:[#allocation241_spill] sm:$0xff] }
 0x205   :  { %1064 = vmatprep.subr.bf16.mxu0 %v8766_v11  ;;  %1146 = vmatprep.subr.bf16.mxu1 %v8767_v12  ;;  %v8829_v11 = vld [vmem:[#allocation243_spill] sm:$0xff]  ;;  %v8830_v12 = vld [vmem:[#allocation240_spill] sm:$0xff] }
 0x208   :  { %1065 = vmatpush1.bf16.msra.mxu0 %v8768_v10  ;;  %1147 = vmatpush1.bf16.msra.mxu1 %v8769_v13  ;;  %v8831_v10 = vld [vmem:[#allocation242_spill] sm:$0xff]  ;;  %v8832_v13 = vld [vmem:[#allocation249_spill] sm:$0xff] }
 0x209   :  { %1066 = vmatprep.subr.bf16.mxu0 %v8770_v14  ;;  %1148 = vmatprep.subr.bf16.mxu1 %v8771_v15  ;;  %v8833_v14 = vld [vmem:[#allocation251_spill] sm:$0xff]  ;;  %v8834_v15 = vld [vmem:[#allocation248_spill] sm:$0xff] }
 0x20c   :  { %1067 = vmatpush1.bf16.msra.mxu0 %v8772_v20  ;;  %1149 = vmatpush1.bf16.msra.mxu1 %v8773_v21  ;;  %v8835_v20 = vld [vmem:[#allocation250_spill] sm:$0xff]  ;;  %v8836_v21 = vld [vmem:[#allocation257_spill] sm:$0xff] }
 0x20d   :  { %1068 = vmatprep.subr.bf16.mxu0 %v8774_v22  ;;  %1150 = vmatprep.subr.bf16.mxu1 %v8775_v23  ;;  %v8837_v22 = vld [vmem:[#allocation259_spill] sm:$0xff]  ;;  %v8838_v23 = vld [vmem:[#allocation256_spill] sm:$0xff] }
 0x210   :  { %1069 = vmatpush1.bf16.msra.mxu0 %v8776_v28  ;;  %1151 = vmatpush1.bf16.msra.mxu1 %v8777_v29  ;;  %v8839_v28 = vld [vmem:[#allocation258_spill] sm:$0xff]  ;;  %v8840_v29 = vld [vmem:[#allocation265_spill] sm:$0xff] }
 0x211   :  { %1070 = vmatprep.subr.bf16.mxu0 %v8778_v30  ;;  %1152 = vmatprep.subr.bf16.mxu1 %v8779_v31  ;;  %v8841_v30 = vld [vmem:[#allocation267_spill] sm:$0xff]  ;;  %v8842_v31 = vld [vmem:[#allocation264_spill] sm:$0xff] }
 0x214   :  { %1071 = vmatpush1.bf16.msra.mxu0 %v8780_v33  ;;  %1153 = vmatpush1.bf16.msra.mxu1 %v8781_v36  ;;  %v8843_v33 = vld [vmem:[#allocation266_spill] sm:$0xff]  ;;  %v8844_v36 = vld [vmem:[#allocation273_spill] sm:$0xff] }
 0x215   :  { %1081 = vmatprep.subr.bf16.mxu0 %v8782_v37  ;;  %1163 = vmatprep.subr.bf16.mxu1 %v8783_v38  ;;  %v8845_v37 = vld [vmem:[#allocation275_spill] sm:$0xff]  ;;  %v8846_v38 = vld [vmem:[#allocation272_spill] sm:$0xff] }
 0x217   :  { %1073 = vmatmul.mubr.bf16.vlgmr.msra.gmra.mrb[0].mxu0 %v8784_v39  ;;  %1155 = vmatmul.mubr.bf16.vlgmr.msra.gmra.mrb[0].mxu1 %v8784_v39 }
 0x218   :  { %1082 = vmatpush1.bf16.msra.mxu0 %v8785_v41  ;;  %1164 = vmatpush1.bf16.msra.mxu1 %v8786_v43  ;;  %v8847_v41 = vld [vmem:[#allocation274_spill] sm:$0xff]  ;;  %v8848_v43 = vld [vmem:[#allocation71_spill] sm:$0xff] }
 0x219   :  { %1083 = vmatprep.subr.bf16.mxu0 %v8787_v44  ;;  %1165 = vmatprep.subr.bf16.mxu1 %v8788_v45  ;;  %v8849_v44 = vld [vmem:[#allocation73_spill] sm:$0xff]  ;;  %v8850_v45 = vld [vmem:[#allocation68_spill] sm:$0xff] }
 0x21a   :  { %1113 = vmatprep.mubr.bf16.mxu0 %v8789_v46  ;;  %1195 = vmatprep.mubr.bf16.mxu1 %v8789_v46 }
 0x21c   :  { %1084 = vmatpush1.bf16.msra.mxu0 %v8790_v47  ;;  %1166 = vmatpush1.bf16.msra.mxu1 %v8791_v48  ;;  %v8851_v47 = vld [vmem:[#allocation70_spill] sm:$0xff]  ;;  %v8852_v48 = vld [vmem:[#allocation72_spill] sm:$0xff] }
 0x21d   :  { %1085 = vmatprep.subr.bf16.mxu0 %v8792_v49  ;;  %1167 = vmatprep.subr.bf16.mxu1 %v8793_v51  ;;  %v8853_v49 = vld [vmem:[#allocation75_spill] sm:$0xff]  ;;  %v8854_v51 = vld [vmem:[#allocation77_spill] sm:$0xff] }
 0x220   :  { %1086 = vmatpush1.bf16.msra.mxu0 %v8794_v52  ;;  %1168 = vmatpush1.bf16.msra.mxu1 %v8795_v53  ;;  %v8855_v52 = vld [vmem:[#allocation74_spill] sm:$0xff]  ;;  %v8856_v53 = vld [vmem:[#allocation76_spill] sm:$0xff] }
 0x221   :  { %1087 = vmatprep.subr.bf16.mxu0 %v8796_v54  ;;  %1169 = vmatprep.subr.bf16.mxu1 %v8797_v55  ;;  %v8857_v54 = vld [vmem:[#allocation79_spill] sm:$0xff]  ;;  %v8858_v55 = vld [vmem:[#allocation81_spill] sm:$0xff] }
 0x224   :  { %1088 = vmatpush1.bf16.msra.mxu0 %v8798_v56  ;;  %1170 = vmatpush1.bf16.msra.mxu1 %v8799_v57  ;;  %v8859_v56 = vld [vmem:[#allocation78_spill] sm:$0xff]  ;;  %v8860_v57 = vld [vmem:[#allocation80_spill] sm:$0xff] }
 0x225   :  { %1089 = vmatprep.subr.bf16.mxu0 %v8800_v58  ;;  %1171 = vmatprep.subr.bf16.mxu1 %v8801_v59  ;;  %v8861_v58 = vld [vmem:[#allocation83_spill] sm:$0xff]  ;;  %v8862_v59 = vld [vmem:[#allocation85_spill] sm:$0xff] }
 0x228   :  { %1090 = vmatpush1.bf16.msra.mxu0 %v8802_v60  ;;  %1172 = vmatpush1.bf16.msra.mxu1 %v8803_v61  ;;  %v8863_v60 = vld [vmem:[#allocation82_spill] sm:$0xff]  ;;  %v8864_v61 = vld [vmem:[#allocation84_spill] sm:$0xff] }
 0x229   :  { %1091 = vmatprep.subr.bf16.mxu0 %v8804_v62  ;;  %1173 = vmatprep.subr.bf16.mxu1 %v8805_v63  ;;  %v8866_v62 = vld [vmem:[#allocation89_spill] sm:$0xff]  ;;  %v8867_v63 = vld [vmem:[#allocation86_spill] sm:$0xff] }
 0x22c   :  { %1092 = vmatpush1.bf16.msra.mxu0 %v8806_v0  ;;  %1174 = vmatpush1.bf16.msra.mxu1 %v8807_v1  ;;  %v8868_v0 = vld [vmem:[#allocation88_spill] sm:$0xff]  ;;  %v8869_v1 = vld [vmem:[#allocation91_spill] sm:$0xff] }
 0x22d   :  { %1093 = vmatprep.subr.bf16.mxu0 %v8808_v2  ;;  %1175 = vmatprep.subr.bf16.mxu1 %v8809_v3  ;;  %v8870_v2 = vld [vmem:[#allocation93_spill] sm:$0xff]  ;;  %v8871_v3 = vld [vmem:[#allocation90_spill] sm:$0xff] }
 0x230   :  { %1094 = vmatpush1.bf16.msra.mxu0 %v8810_v5  ;;  %1176 = vmatpush1.bf16.msra.mxu1 %v8811_v35  ;;  %v8872_v5 = vld [vmem:[#allocation92_spill] sm:$0xff]  ;;  %v8873_v35 = vld [vmem:[#allocation95_spill] sm:$0xff] }
 0x231   :  { %1095 = vmatprep.subr.bf16.mxu0 %v8812_v34  ;;  %1177 = vmatprep.subr.bf16.mxu1 %v8813_v32  ;;  %v8874_v34 = vld [vmem:[#allocation97_spill] sm:$0xff]  ;;  %v8875_v32 = vld [vmem:[#allocation94_spill] sm:$0xff] }
 0x234   :  { %1096 = vmatpush1.bf16.msra.mxu0 %v8814_v7  ;;  %1178 = vmatpush1.bf16.msra.mxu1 %v8815_v42  ;;  %v8876_v7 = vld [vmem:[#allocation96_spill] sm:$0xff]  ;;  %v8877_v42 = vld [vmem:[#allocation99_spill] sm:$0xff] }
 0x235   :  { %1097 = vmatprep.subr.bf16.mxu0 %v8816_v40  ;;  %1179 = vmatprep.subr.bf16.mxu1 %v8817_v50  ;;  %v8878_v40 = vld [vmem:[#allocation101_spill] sm:$0xff]  ;;  %v8879_v50 = vld [vmem:[#allocation98_spill] sm:$0xff] }
 0x238   :  { %1098 = vmatpush1.bf16.msra.mxu0 %v8818_v19  ;;  %1180 = vmatpush1.bf16.msra.mxu1 %v8819_v27  ;;  %v8880_v19 = vld [vmem:[#allocation100_spill] sm:$0xff]  ;;  %v8881_v27 = vld [vmem:[#allocation103_spill] sm:$0xff] }
 0x239   :  { %1099 = vmatprep.subr.bf16.mxu0 %v8820_v24  ;;  %1181 = vmatprep.subr.bf16.mxu1 %v8821_v26  ;;  %v8882_v24 = vld [vmem:[#allocation105_spill] sm:$0xff]  ;;  %v8883_v26 = vld [vmem:[#allocation102_spill] sm:$0xff] }
 0x23c   :  { %1100 = vmatpush1.bf16.msra.mxu0 %v8822_v16  ;;  %1182 = vmatpush1.bf16.msra.mxu1 %v8823_v4  ;;  %v8884_v16 = vld [vmem:[#allocation104_spill] sm:$0xff]  ;;  %v8885_v4 = vld [vmem:[#allocation107_spill] sm:$0xff] }
 0x23d   :  { %1101 = vmatprep.subr.bf16.mxu0 %v8824_v25  ;;  %1183 = vmatprep.subr.bf16.mxu1 %v8825_v18  ;;  %v8886_v25 = vld [vmem:[#allocation109_spill] sm:$0xff]  ;;  %v8887_v18 = vld [vmem:[#allocation106_spill] sm:$0xff] }
 0x240   :  { %1102 = vmatpush1.bf16.msra.mxu0 %v8826_v6  ;;  %1184 = vmatpush1.bf16.msra.mxu1 %v8827_v8  ;;  %v8888_v6 = vld [vmem:[#allocation108_spill] sm:$0xff]  ;;  %v8889_v8 = vld [vmem:[#allocation111_spill] sm:$0xff] }
 0x241   :  { %1103 = vmatprep.subr.bf16.mxu0 %v8828_v9  ;;  %1185 = vmatprep.subr.bf16.mxu1 %v8829_v11  ;;  %v8890_v9 = vld [vmem:[#allocation113_spill] sm:$0xff]  ;;  %v8891_v11 = vld [vmem:[#allocation110_spill] sm:$0xff] }
 0x244   :  { %1104 = vmatpush1.bf16.msra.mxu0 %v8830_v12  ;;  %1186 = vmatpush1.bf16.msra.mxu1 %v8831_v10  ;;  %v8892_v12 = vld [vmem:[#allocation112_spill] sm:$0xff]  ;;  %v8893_v10 = vld [vmem:[#allocation117_spill] sm:$0xff] }
 0x245   :  { %1105 = vmatprep.subr.bf16.mxu0 %v8832_v13  ;;  %1187 = vmatprep.subr.bf16.mxu1 %v8833_v14  ;;  %v8894_v13 = vld [vmem:[#allocation119_spill] sm:$0xff]  ;;  %v8895_v14 = vld [vmem:[#allocation116_spill] sm:$0xff] }
 0x248   :  { %1106 = vmatpush1.bf16.msra.mxu0 %v8834_v15  ;;  %1188 = vmatpush1.bf16.msra.mxu1 %v8835_v20  ;;  %v8896_v15 = vld [vmem:[#allocation118_spill] sm:$0xff]  ;;  %v8897_v20 = vld [vmem:[#allocation125_spill] sm:$0xff] }
 0x249   :  { %1107 = vmatprep.subr.bf16.mxu0 %v8836_v21  ;;  %1189 = vmatprep.subr.bf16.mxu1 %v8837_v22  ;;  %v8898_v21 = vld [vmem:[#allocation127_spill] sm:$0xff]  ;;  %v8899_v22 = vld [vmem:[#allocation124_spill] sm:$0xff] }
 0x24c   :  { %1108 = vmatpush1.bf16.msra.mxu0 %v8838_v23  ;;  %1190 = vmatpush1.bf16.msra.mxu1 %v8839_v28  ;;  %v8900_v23 = vld [vmem:[#allocation126_spill] sm:$0xff]  ;;  %v8901_v28 = vld [vmem:[#allocation133_spill] sm:$0xff] }
 0x24d   :  { %1109 = vmatprep.subr.bf16.mxu0 %v8840_v29  ;;  %1191 = vmatprep.subr.bf16.mxu1 %v8841_v30  ;;  %v8902_v29 = vld [vmem:[#allocation135_spill] sm:$0xff]  ;;  %v8903_v30 = vld [vmem:[#allocation132_spill] sm:$0xff] }
 0x250   :  { %1110 = vmatpush1.bf16.msra.mxu0 %v8842_v31  ;;  %1192 = vmatpush1.bf16.msra.mxu1 %v8843_v33  ;;  %v8904_v31 = vld [vmem:[#allocation134_spill] sm:$0xff]  ;;  %v8905_v33 = vld [vmem:[#allocation141_spill] sm:$0xff] }
 0x251   :  { %1111 = vmatprep.subr.bf16.mxu0 %v8844_v36  ;;  %1193 = vmatprep.subr.bf16.mxu1 %v8845_v37  ;;  %v8906_v36 = vld [vmem:[#allocation143_spill] sm:$0xff]  ;;  %v8907_v37 = vld [vmem:[#allocation140_spill] sm:$0xff] }
 0x254   :  { %1112 = vmatpush1.bf16.msra.mxu0 %v8846_v38  ;;  %1194 = vmatpush1.bf16.msra.mxu1 %v8847_v41  ;;  %v8908_v38 = vld [vmem:[#allocation142_spill] sm:$0xff]  ;;  %v8909_v41 = vld [vmem:[#allocation149_spill] sm:$0xff] }
 0x255   :  { %1204 = vmatprep.subr.bf16.mxu0 %v8848_v43  ;;  %1286 = vmatprep.subr.bf16.mxu1 %v8849_v44  ;;  %v8910_v43 = vld [vmem:[#allocation151_spill] sm:$0xff]  ;;  %v8911_v44 = vld [vmem:[#allocation148_spill] sm:$0xff] }
 0x257   :  { %1114 = vmatmul.mubr.bf16.vlgmr.msra.gmra.mrb[0].mxu0 %v8850_v45  ;;  %1196 = vmatmul.mubr.bf16.vlgmr.msra.gmra.mrb[0].mxu1 %v8850_v45 }
 0x258   :  { %1205 = vmatpush1.bf16.msra.mxu0 %v8851_v47  ;;  %1287 = vmatpush1.bf16.msra.mxu1 %v8852_v48  ;;  %v8912_v47 = vld [vmem:[#allocation150_spill] sm:$0xff]  ;;  %v8913_v48 = vld [vmem:[#allocation157_spill] sm:$0xff] }
 0x259   :  { %1206 = vmatprep.subr.bf16.mxu0 %v8853_v49  ;;  %1288 = vmatprep.subr.bf16.mxu1 %v8854_v51  ;;  %v8914_v49 = vld [vmem:[#allocation159_spill] sm:$0xff]  ;;  %v8915_v51 = vld [vmem:[#allocation156_spill] sm:$0xff] }
 0x25a   :  { %1236 = vmatprep.mubr.bf16.mxu0 %v6704_v17  ;;  %1318 = vmatprep.mubr.bf16.mxu1 %v6704_v17  ;;  %v8865_v17 = vld [vmem:[#allocation87_spill] sm:$0xff] }
 0x25c   :  { %1207 = vmatpush1.bf16.msra.mxu0 %v8855_v52  ;;  %1289 = vmatpush1.bf16.msra.mxu1 %v8856_v53  ;;  %v8916_v52 = vld [vmem:[#allocation158_spill] sm:$0xff]  ;;  %v8917_v53 = vld [vmem:[#allocation165_spill] sm:$0xff] }
 0x25d   :  { %1208 = vmatprep.subr.bf16.mxu0 %v8857_v54  ;;  %1290 = vmatprep.subr.bf16.mxu1 %v8858_v55  ;;  %v8918_v54 = vld [vmem:[#allocation167_spill] sm:$0xff]  ;;  %v8919_v55 = vld [vmem:[#allocation164_spill] sm:$0xff] }
 0x260   :  { %1209 = vmatpush1.bf16.msra.mxu0 %v8859_v56  ;;  %1291 = vmatpush1.bf16.msra.mxu1 %v8860_v57  ;;  %v8920_v56 = vld [vmem:[#allocation166_spill] sm:$0xff]  ;;  %v8921_v57 = vld [vmem:[#allocation173_spill] sm:$0xff] }
 0x261   :  { %1210 = vmatprep.subr.bf16.mxu0 %v8861_v58  ;;  %1292 = vmatprep.subr.bf16.mxu1 %v8862_v59  ;;  %v8922_v58 = vld [vmem:[#allocation175_spill] sm:$0xff]  ;;  %v8924_v59 = vld [vmem:[#allocation174_spill] sm:$0xff] }
 0x264   :  { %1211 = vmatpush1.bf16.msra.mxu0 %v8863_v60  ;;  %1293 = vmatpush1.bf16.msra.mxu1 %v8864_v61  ;;  %v8925_v60 = vld [vmem:[#allocation181_spill] sm:$0xff]  ;;  %v8926_v61 = vld [vmem:[#allocation183_spill] sm:$0xff] }
 0x265   :  { %1212 = vmatprep.subr.bf16.mxu0 %v8865_v17  ;;  %1294 = vmatprep.subr.bf16.mxu1 %v8866_v62  ;;  %v8927_v17 = vld [vmem:[#allocation180_spill] sm:$0xff]  ;;  %v8928_v62 = vld [vmem:[#allocation182_spill] sm:$0xff] }
 0x268   :  { %1213 = vmatpush1.bf16.msra.mxu0 %v8867_v63  ;;  %1295 = vmatpush1.bf16.msra.mxu1 %v8868_v0  ;;  %v8930_v63 = vld [vmem:[#allocation191_spill] sm:$0xff]  ;;  %v8931_v0 = vld [vmem:[#allocation188_spill] sm:$0xff] }
 0x269   :  { %1214 = vmatprep.subr.bf16.mxu0 %v8869_v1  ;;  %1296 = vmatprep.subr.bf16.mxu1 %v8870_v2  ;;  %v8932_v1 = vld [vmem:[#allocation190_spill] sm:$0xff]  ;;  %v8933_v2 = vld [vmem:[#allocation197_spill] sm:$0xff] }
 0x26c   :  { %1215 = vmatpush1.bf16.msra.mxu0 %v8871_v3  ;;  %1297 = vmatpush1.bf16.msra.mxu1 %v8872_v5  ;;  %v8934_v3 = vld [vmem:[#allocation199_spill] sm:$0xff]  ;;  %v8935_v5 = vld [vmem:[#allocation196_spill] sm:$0xff] }
 0x26d   :  { %1216 = vmatprep.subr.bf16.mxu0 %v8873_v35  ;;  %1298 = vmatprep.subr.bf16.mxu1 %v8874_v34  ;;  %v8936_v35 = vld [vmem:[#allocation198_spill] sm:$0xff]  ;;  %v8937_v34 = vld [vmem:[#allocation205_spill] sm:$0xff] }
 0x270   :  { %1217 = vmatpush1.bf16.msra.mxu0 %v8875_v32  ;;  %1299 = vmatpush1.bf16.msra.mxu1 %v8876_v7  ;;  %v8938_v32 = vld [vmem:[#allocation207_spill] sm:$0xff]  ;;  %v8939_v7 = vld [vmem:[#allocation204_spill] sm:$0xff] }
 0x271   :  { %1218 = vmatprep.subr.bf16.mxu0 %v8877_v42  ;;  %1300 = vmatprep.subr.bf16.mxu1 %v8878_v40  ;;  %v8940_v42 = vld [vmem:[#allocation206_spill] sm:$0xff]  ;;  %v8941_v40 = vld [vmem:[#allocation213_spill] sm:$0xff] }
 0x274   :  { %1219 = vmatpush1.bf16.msra.mxu0 %v8879_v50  ;;  %1301 = vmatpush1.bf16.msra.mxu1 %v8880_v19  ;;  %v8942_v50 = vld [vmem:[#allocation215_spill] sm:$0xff]  ;;  %v8943_v19 = vld [vmem:[#allocation212_spill] sm:$0xff] }
 0x275   :  { %1220 = vmatprep.subr.bf16.mxu0 %v8881_v27  ;;  %1302 = vmatprep.subr.bf16.mxu1 %v8882_v24  ;;  %v8944_v27 = vld [vmem:[#allocation214_spill] sm:$0xff]  ;;  %v8945_v24 = vld [vmem:[#allocation221_spill] sm:$0xff] }
 0x278   :  { %1221 = vmatpush1.bf16.msra.mxu0 %v8883_v26  ;;  %1303 = vmatpush1.bf16.msra.mxu1 %v8884_v16  ;;  %v8946_v26 = vld [vmem:[#allocation223_spill] sm:$0xff]  ;;  %v8947_v16 = vld [vmem:[#allocation220_spill] sm:$0xff] }
 0x279   :  { %1222 = vmatprep.subr.bf16.mxu0 %v8885_v4  ;;  %1304 = vmatprep.subr.bf16.mxu1 %v8886_v25  ;;  %v8948_v4 = vld [vmem:[#allocation222_spill] sm:$0xff]  ;;  %v8949_v25 = vld [vmem:[#allocation229_spill] sm:$0xff] }
 0x27c   :  { %1223 = vmatpush1.bf16.msra.mxu0 %v8887_v18  ;;  %1305 = vmatpush1.bf16.msra.mxu1 %v8888_v6  ;;  %v8950_v18 = vld [vmem:[#allocation231_spill] sm:$0xff]  ;;  %v8951_v6 = vld [vmem:[#allocation228_spill] sm:$0xff] }
 0x27d   :  { %1224 = vmatprep.subr.bf16.mxu0 %v8889_v8  ;;  %1306 = vmatprep.subr.bf16.mxu1 %v8890_v9  ;;  %v8952_v8 = vld [vmem:[#allocation230_spill] sm:$0xff]  ;;  %v8953_v9 = vld [vmem:[#allocation237_spill] sm:$0xff] }
 0x280   :  { %1225 = vmatpush1.bf16.msra.mxu0 %v8891_v11  ;;  %1307 = vmatpush1.bf16.msra.mxu1 %v8892_v12  ;;  %v8954_v11 = vld [vmem:[#allocation239_spill] sm:$0xff]  ;;  %v8955_v12 = vld [vmem:[#allocation236_spill] sm:$0xff] }
 0x281   :  { %1226 = vmatprep.subr.bf16.mxu0 %v8893_v10  ;;  %1308 = vmatprep.subr.bf16.mxu1 %v8894_v13  ;;  %v8956_v10 = vld [vmem:[#allocation238_spill] sm:$0xff]  ;;  %v8957_v13 = vld [vmem:[#allocation245_spill] sm:$0xff] }
 0x284   :  { %1227 = vmatpush1.bf16.msra.mxu0 %v8895_v14  ;;  %1309 = vmatpush1.bf16.msra.mxu1 %v8896_v15  ;;  %v8958_v14 = vld [vmem:[#allocation247_spill] sm:$0xff]  ;;  %v8959_v15 = vld [vmem:[#allocation244_spill] sm:$0xff] }
 0x285   :  { %1228 = vmatprep.subr.bf16.mxu0 %v8897_v20  ;;  %1310 = vmatprep.subr.bf16.mxu1 %v8898_v21  ;;  %v8960_v20 = vld [vmem:[#allocation246_spill] sm:$0xff]  ;;  %v8961_v21 = vld [vmem:[#allocation253_spill] sm:$0xff] }
 0x288   :  { %1229 = vmatpush1.bf16.msra.mxu0 %v8899_v22  ;;  %1311 = vmatpush1.bf16.msra.mxu1 %v8900_v23  ;;  %v8962_v22 = vld [vmem:[#allocation255_spill] sm:$0xff]  ;;  %v8963_v23 = vld [vmem:[#allocation252_spill] sm:$0xff] }
 0x289   :  { %1230 = vmatprep.subr.bf16.mxu0 %v8901_v28  ;;  %1312 = vmatprep.subr.bf16.mxu1 %v8902_v29  ;;  %v8964_v28 = vld [vmem:[#allocation254_spill] sm:$0xff]  ;;  %v8965_v29 = vld [vmem:[#allocation261_spill] sm:$0xff] }
 0x28c   :  { %1231 = vmatpush1.bf16.msra.mxu0 %v8903_v30  ;;  %1313 = vmatpush1.bf16.msra.mxu1 %v8904_v31  ;;  %v8966_v30 = vld [vmem:[#allocation263_spill] sm:$0xff]  ;;  %v8967_v31 = vld [vmem:[#allocation260_spill] sm:$0xff] }
 0x28d   :  { %1232 = vmatprep.subr.bf16.mxu0 %v8905_v33  ;;  %1314 = vmatprep.subr.bf16.mxu1 %v8906_v36  ;;  %v8968_v33 = vld [vmem:[#allocation262_spill] sm:$0xff]  ;;  %v8969_v36 = vld [vmem:[#allocation269_spill] sm:$0xff] }
 0x290   :  { %1233 = vmatpush1.bf16.msra.mxu0 %v8907_v37  ;;  %1315 = vmatpush1.bf16.msra.mxu1 %v8908_v38  ;;  %v8970_v37 = vld [vmem:[#allocation271_spill] sm:$0xff]  ;;  %v8971_v38 = vld [vmem:[#allocation268_spill] sm:$0xff] }
 0x291   :  { %1234 = vmatprep.subr.bf16.mxu0 %v8909_v41  ;;  %1316 = vmatprep.subr.bf16.mxu1 %v8910_v43  ;;  %v8972_v41 = vld [vmem:[#allocation270_spill] sm:$0xff]  ;;  %v8973_v43 = vld [vmem:[#allocation277_spill] sm:$0xff] }
 0x294   :  { %1235 = vmatpush1.bf16.msra.mxu0 %v8911_v44  ;;  %1317 = vmatpush1.bf16.msra.mxu1 %v8912_v47  ;;  %v8974_v44 = vld [vmem:[#allocation279_spill] sm:$0xff]  ;;  %v8975_v47 = vld [vmem:[#allocation276_spill] sm:$0xff] }
 0x295   :  { %1245 = vmatprep.subr.bf16.mxu0 %v8913_v48  ;;  %1327 = vmatprep.subr.bf16.mxu1 %v8914_v49  ;;  %v8976_v48 = vld [vmem:[#allocation278_spill] sm:$0xff] }
 0x297   :  { %1237 = vmatmul.mubr.bf16.vlgmr.msra.gmra.mrb[4].mxu0 %v8784_v39  ;;  %1319 = vmatmul.mubr.bf16.vlgmr.msra.gmra.mrb[4].mxu1 %v8784_v39  ;;  %v8923_v39 = vld [vmem:[#allocation172_spill] sm:$0xff] }
 0x298   :  { %1246 = vmatpush1.bf16.msra.mxu0 %v8915_v51  ;;  %1328 = vmatpush1.bf16.msra.mxu1 %v8916_v52 }
 0x299   :  { %1247 = vmatprep.subr.bf16.mxu0 %v8917_v53  ;;  %1329 = vmatprep.subr.bf16.mxu1 %v8918_v54 }
 0x29a   :  { %1277 = vmatprep.mubr.bf16.mxu0 %v8789_v46  ;;  %1359 = vmatprep.mubr.bf16.mxu1 %v8789_v46  ;;  %v8929_v46 = vld [vmem:[#allocation189_spill] sm:$0xff] }
 0x29c   :  { %1248 = vmatpush1.bf16.msra.mxu0 %v8919_v55  ;;  %1330 = vmatpush1.bf16.msra.mxu1 %v8920_v56 }
 0x29d   :  { %1249 = vmatprep.subr.bf16.mxu0 %v8921_v57  ;;  %1331 = vmatprep.subr.bf16.mxu1 %v8922_v58 }
 0x2a0   :  { %1250 = vmatpush1.bf16.msra.mxu0 %v8923_v39  ;;  %1332 = vmatpush1.bf16.msra.mxu1 %v8924_v59 }
 0x2a1   :  { %1251 = vmatprep.subr.bf16.mxu0 %v8925_v60  ;;  %1333 = vmatprep.subr.bf16.mxu1 %v8926_v61 }
 0x2a4   :  { %1252 = vmatpush1.bf16.msra.mxu0 %v8927_v17  ;;  %1334 = vmatpush1.bf16.msra.mxu1 %v8928_v62 }
 0x2a5   :  { %1253 = vmatprep.subr.bf16.mxu0 %v8929_v46  ;;  %1335 = vmatprep.subr.bf16.mxu1 %v8930_v63 }
 0x2a8   :  { %1254 = vmatpush1.bf16.msra.mxu0 %v8931_v0  ;;  %1336 = vmatpush1.bf16.msra.mxu1 %v8932_v1 }
 0x2a9   :  { %1255 = vmatprep.subr.bf16.mxu0 %v8933_v2  ;;  %1337 = vmatprep.subr.bf16.mxu1 %v8934_v3 }
 0x2ac   :  { %1256 = vmatpush1.bf16.msra.mxu0 %v8935_v5  ;;  %1338 = vmatpush1.bf16.msra.mxu1 %v8936_v35 }
 0x2ad   :  { %1257 = vmatprep.subr.bf16.mxu0 %v8937_v34  ;;  %1339 = vmatprep.subr.bf16.mxu1 %v8938_v32 }
 0x2b0   :  { %1258 = vmatpush1.bf16.msra.mxu0 %v8939_v7  ;;  %1340 = vmatpush1.bf16.msra.mxu1 %v8940_v42 }
 0x2b1   :  { %1259 = vmatprep.subr.bf16.mxu0 %v8941_v40  ;;  %1341 = vmatprep.subr.bf16.mxu1 %v8942_v50 }
 0x2b4   :  { %1260 = vmatpush1.bf16.msra.mxu0 %v8943_v19  ;;  %1342 = vmatpush1.bf16.msra.mxu1 %v8944_v27 }
 0x2b5   :  { %1261 = vmatprep.subr.bf16.mxu0 %v8945_v24  ;;  %1343 = vmatprep.subr.bf16.mxu1 %v8946_v26 }
 0x2b8   :  { %1262 = vmatpush1.bf16.msra.mxu0 %v8947_v16  ;;  %1344 = vmatpush1.bf16.msra.mxu1 %v8948_v4 }
 0x2b9   :  { %1263 = vmatprep.subr.bf16.mxu0 %v8949_v25  ;;  %1345 = vmatprep.subr.bf16.mxu1 %v8950_v18 }
 0x2bc   :  { %1264 = vmatpush1.bf16.msra.mxu0 %v8951_v6  ;;  %1346 = vmatpush1.bf16.msra.mxu1 %v8952_v8 }
 0x2bd   :  { %1265 = vmatprep.subr.bf16.mxu0 %v8953_v9  ;;  %1347 = vmatprep.subr.bf16.mxu1 %v8954_v11 }
 0x2c0   :  { %1266 = vmatpush1.bf16.msra.mxu0 %v8955_v12  ;;  %1348 = vmatpush1.bf16.msra.mxu1 %v8956_v10 }
 0x2c1   :  { %1267 = vmatprep.subr.bf16.mxu0 %v8957_v13  ;;  %1349 = vmatprep.subr.bf16.mxu1 %v8958_v14 }
 0x2c4   :  { %1268 = vmatpush1.bf16.msra.mxu0 %v8959_v15  ;;  %1350 = vmatpush1.bf16.msra.mxu1 %v8960_v20 }
 0x2c5   :  { %1269 = vmatprep.subr.bf16.mxu0 %v8961_v21  ;;  %1351 = vmatprep.subr.bf16.mxu1 %v8962_v22 }
 0x2c8   :  { %1270 = vmatpush1.bf16.msra.mxu0 %v8963_v23  ;;  %1352 = vmatpush1.bf16.msra.mxu1 %v8964_v28 }
 0x2c9   :  { %1271 = vmatprep.subr.bf16.mxu0 %v8965_v29  ;;  %1353 = vmatprep.subr.bf16.mxu1 %v8966_v30 }
 0x2cc   :  { %1272 = vmatpush1.bf16.msra.mxu0 %v8967_v31  ;;  %1354 = vmatpush1.bf16.msra.mxu1 %v8968_v33 }
 0x2cd   :  { %1273 = vmatprep.subr.bf16.mxu0 %v8969_v36  ;;  %1355 = vmatprep.subr.bf16.mxu1 %v8970_v37 }
 0x2d0   :  { %1274 = vmatpush1.bf16.msra.mxu0 %v8971_v38  ;;  %1356 = vmatpush1.bf16.msra.mxu1 %v8972_v41 }
 0x2d1   :  { %1275 = vmatprep.subr.bf16.mxu0 %v8973_v43  ;;  %1357 = vmatprep.subr.bf16.mxu1 %v8974_v44 }
 0x2d4   :  { %1276 = vmatpush1.bf16.msra.mxu0 %v8975_v47  ;;  %1358 = vmatpush1.bf16.msra.mxu1 %v8976_v48 }
 0x2d7   :  { %1278 = vmatmul.mubr.bf16.vlgmr.msra.gmra.mrb[4].mxu0 %v8850_v45  ;;  %1360 = vmatmul.mubr.bf16.vlgmr.msra.gmra.mrb[4].mxu1 %v8850_v45 }
 0x2d8   :  { %6483 = dma.done.wait [#allocation3], 32768 }
 0x2d9   :  { %6484 = vsyncadd [#allocation3], 4294934528  ;;  %v8977_v49 = vld [vmem:[#allocation60_spill] sm:$0xff]  ;;  %1386 = sst [smem:[#allocation18]] %s6516_s25  ;;  %s1370_s23 = scalar_lea.hbm %s8511_s3, 98304 }
 0x2da   :  { %v7560_v51 = vpack.c.bf16 %v8977_v49, %v8977_v49  ;;  %1388 = sst [smem:[#allocation18 + $0x1]] %s6516_s25  ;;  %s6530_s0 = smov [#allocation17]  }
 0x2db   :  { %1390 = sst [smem:[#allocation18 + $0x2]] %s6517_s26 }
 0x2dc   :  { %1697 = vmatprep.mubr.bf16.mxu0 %v7560_v51  ;;  %1779 = vmatprep.mubr.bf16.mxu1 %v7560_v51  ;;  %1392 = sst [smem:[#allocation18 + $0x3]] %s6518_s1 }
 0x2dd   :  { %1394 = sst [smem:[#allocation18 + $0x4]] %s6519_s19 }
 0x2de   :  { %1396 = sst [smem:[#allocation18 + $0x5]] %s6520_s2 }
 0x2df   :  { %1398 = sst [smem:[#allocation18 + $0x6]] %s6521_s28 }
 0x2e0   :  { %1400 = sst [smem:[#allocation18 + $0x7]] %s6518_s1 }
 0x2e1   :  { %1402 = sst [smem:[#allocation18 + $0x8]] %s6522_s30 }
 0x2e2   :  { %1404 = dma.general %s1370_s23, 32768, %s6717_s21, %s8541_s20, %s6530_s0, [#allocation18], %s6666_s29, 0  }
 0x2e3   :  { %v1410_v45 = vld [vmem:[#allocation2 + $0x8] sm:$0xff]  ;;  %v1412_v52 = vld [vmem:[#allocation2 + $0x18] sm:$0xff]  ;;  %v1409_v53 = vld [vmem:[#allocation2] sm:$0xff] }
 0x2e4   :  { %1665 = vmatprep.subr.bf16.mxu0 %v1410_v45  ;;  %1747 = vmatprep.subr.bf16.mxu1 %v1412_v52  ;;  %v1411_v54 = vld [vmem:[#allocation2 + $0x10] sm:$0xff]  ;;  %v1418_v55 = vld [vmem:[#allocation2 + $0x48] sm:$0xff]  ;;  %v1420_v56 = vld [vmem:[#allocation2 + $0x58] sm:$0xff] }
 0x2e5   :  { %1666 = vmatpush1.bf16.msra.mxu0 %v1409_v53  ;;  %1748 = vmatpush1.bf16.msra.mxu1 %v1411_v54  ;;  %v1417_v57 = vld [vmem:[#allocation2 + $0x40] sm:$0xff]  ;;  %v1419_v58 = vld [vmem:[#allocation2 + $0x50] sm:$0xff]  ;;  %v1426_v39 = vld [vmem:[#allocation2 + $0x88] sm:$0xff] }
 0x2e6   :  { %1667 = vmatprep.subr.bf16.mxu0 %v1418_v55  ;;  %1749 = vmatprep.subr.bf16.mxu1 %v1420_v56  ;;  %v1428_v59 = vld [vmem:[#allocation2 + $0x98] sm:$0xff]  ;;  %v1425_v60 = vld [vmem:[#allocation2 + $0x80] sm:$0xff]  ;;  %v1427_v61 = vld [vmem:[#allocation2 + $0x90] sm:$0xff] }
 0x2e7   :  { %v1434_v17 = vld [vmem:[#allocation2 + $0xc8] sm:$0xff]  ;;  %v1436_v62 = vld [vmem:[#allocation2 + $0xd8] sm:$0xff]  ;;  %v1433_v46 = vld [vmem:[#allocation2 + $0xc0] sm:$0xff] }
 0x2e8   :  { %v1435_v63 = vld [vmem:[#allocation2 + $0xd0] sm:$0xff]  ;;  %v1442_v0 = vld [vmem:[#allocation2 + $0x108] sm:$0xff]  ;;  %v1444_v1 = vld [vmem:[#allocation2 + $0x118] sm:$0xff] }
 0x2e9   :  { %1668 = vmatpush1.bf16.msra.mxu0 %v1417_v57  ;;  %1750 = vmatpush1.bf16.msra.mxu1 %v1419_v58  ;;  %v1441_v2 = vld [vmem:[#allocation2 + $0x100] sm:$0xff]  ;;  %v1443_v3 = vld [vmem:[#allocation2 + $0x110] sm:$0xff]  ;;  %v1450_v5 = vld [vmem:[#allocation2 + $0x148] sm:$0xff] }
 0x2ea   :  { %1669 = vmatprep.subr.bf16.mxu0 %v1426_v39  ;;  %1751 = vmatprep.subr.bf16.mxu1 %v1428_v59  ;;  %v1452_v35 = vld [vmem:[#allocation2 + $0x158] sm:$0xff]  ;;  %v1449_v34 = vld [vmem:[#allocation2 + $0x140] sm:$0xff]  ;;  %v1451_v32 = vld [vmem:[#allocation2 + $0x150] sm:$0xff] }
 0x2eb   :  { %v1458_v7 = vld [vmem:[#allocation2 + $0x188] sm:$0xff]  ;;  %v1460_v42 = vld [vmem:[#allocation2 + $0x198] sm:$0xff]  ;;  %v1457_v40 = vld [vmem:[#allocation2 + $0x180] sm:$0xff] }
 0x2ec   :  { %v1459_v50 = vld [vmem:[#allocation2 + $0x190] sm:$0xff]  ;;  %v1466_v19 = vld [vmem:[#allocation2 + $0x1c8] sm:$0xff]  ;;  %v1468_v27 = vld [vmem:[#allocation2 + $0x1d8] sm:$0xff] }
 0x2ed   :  { %1670 = vmatpush1.bf16.msra.mxu0 %v1425_v60  ;;  %1752 = vmatpush1.bf16.msra.mxu1 %v1427_v61  ;;  %v1465_v24 = vld [vmem:[#allocation2 + $0x1c0] sm:$0xff]  ;;  %v1467_v26 = vld [vmem:[#allocation2 + $0x1d0] sm:$0xff]  ;;  %v1474_v16 = vld [vmem:[#allocation2 + $0x208] sm:$0xff] }
 0x2ee   :  { %1671 = vmatprep.subr.bf16.mxu0 %v1434_v17  ;;  %1753 = vmatprep.subr.bf16.mxu1 %v1436_v62  ;;  %v1476_v4 = vld [vmem:[#allocation2 + $0x218] sm:$0xff]  ;;  %v1473_v25 = vld [vmem:[#allocation2 + $0x200] sm:$0xff]  ;;  %v1475_v18 = vld [vmem:[#allocation2 + $0x210] sm:$0xff] }
 0x2ef   :  { %v1482_v6 = vld [vmem:[#allocation2 + $0x248] sm:$0xff]  ;;  %v1484_v8 = vld [vmem:[#allocation2 + $0x258] sm:$0xff]  ;;  %v1481_v9 = vld [vmem:[#allocation2 + $0x240] sm:$0xff] }
 0x2f0   :  { %v1483_v11 = vld [vmem:[#allocation2 + $0x250] sm:$0xff]  ;;  %v1490_v12 = vld [vmem:[#allocation2 + $0x288] sm:$0xff]  ;;  %v1492_v10 = vld [vmem:[#allocation2 + $0x298] sm:$0xff] }
 0x2f1   :  { %1672 = vmatpush1.bf16.msra.mxu0 %v1433_v46  ;;  %1754 = vmatpush1.bf16.msra.mxu1 %v1435_v63  ;;  %v1489_v13 = vld [vmem:[#allocation2 + $0x280] sm:$0xff]  ;;  %v1491_v14 = vld [vmem:[#allocation2 + $0x290] sm:$0xff]  ;;  %v1498_v15 = vld [vmem:[#allocation2 + $0x2c8] sm:$0xff] }
 0x2f2   :  { %1673 = vmatprep.subr.bf16.mxu0 %v1442_v0  ;;  %1755 = vmatprep.subr.bf16.mxu1 %v1444_v1  ;;  %v1500_v20 = vld [vmem:[#allocation2 + $0x2d8] sm:$0xff]  ;;  %v1497_v21 = vld [vmem:[#allocation2 + $0x2c0] sm:$0xff]  ;;  %v1499_v22 = vld [vmem:[#allocation2 + $0x2d0] sm:$0xff] }
 0x2f3   :  { %v1506_v23 = vld [vmem:[#allocation2 + $0x308] sm:$0xff]  ;;  %v1508_v28 = vld [vmem:[#allocation2 + $0x318] sm:$0xff]  ;;  %v1505_v29 = vld [vmem:[#allocation2 + $0x300] sm:$0xff] }
 0x2f4   :  { %v1507_v30 = vld [vmem:[#allocation2 + $0x310] sm:$0xff]  ;;  %v1514_v31 = vld [vmem:[#allocation2 + $0x348] sm:$0xff]  ;;  %v1516_v33 = vld [vmem:[#allocation2 + $0x358] sm:$0xff] }
 0x2f5   :  { %1674 = vmatpush1.bf16.msra.mxu0 %v1441_v2  ;;  %1756 = vmatpush1.bf16.msra.mxu1 %v1443_v3  ;;  %v1513_v36 = vld [vmem:[#allocation2 + $0x340] sm:$0xff]  ;;  %v1515_v37 = vld [vmem:[#allocation2 + $0x350] sm:$0xff]  ;;  %v1522_v38 = vld [vmem:[#allocation2 + $0x388] sm:$0xff] }
 0x2f6   :  { %1675 = vmatprep.subr.bf16.mxu0 %v1450_v5  ;;  %1757 = vmatprep.subr.bf16.mxu1 %v1452_v35  ;;  %v1524_v41 = vld [vmem:[#allocation2 + $0x398] sm:$0xff]  ;;  %v1521_v43 = vld [vmem:[#allocation2 + $0x380] sm:$0xff]  ;;  %v1523_v44 = vld [vmem:[#allocation2 + $0x390] sm:$0xff] }
 0x2f7   :  { %v1530_v47 = vld [vmem:[#allocation2 + $0x3c8] sm:$0xff]  ;;  %v1532_v48 = vld [vmem:[#allocation2 + $0x3d8] sm:$0xff]  ;;  %v1529_v49 = vld [vmem:[#allocation2 + $0x3c0] sm:$0xff] }
 0x2f8   :  { %v1531_v45 = vld [vmem:[#allocation2 + $0x3d0] sm:$0xff]  ;;  %v1538_v52 = vld [vmem:[#allocation2 + $0x408] sm:$0xff]  ;;  %v1540_v53 = vld [vmem:[#allocation2 + $0x418] sm:$0xff] }
 0x2f9   :  { %1676 = vmatpush1.bf16.msra.mxu0 %v1449_v34  ;;  %1758 = vmatpush1.bf16.msra.mxu1 %v1451_v32  ;;  %v8978_v54 = vld [vmem:[#allocation59_spill] sm:$0xff]  ;;  %v1539_v57 = vld [vmem:[#allocation2 + $0x410] sm:$0xff]  ;;  %v1548_v39 = vld [vmem:[#allocation2 + $0x458] sm:$0xff] }
 0x2fa   :  { %1677 = vmatprep.subr.bf16.mxu0 %v1458_v7  ;;  %1759 = vmatprep.subr.bf16.mxu1 %v1460_v42  ;;  %v7581_v55 = vpack.c.bf16 %v8978_v54, %v8978_v54  ;;  %v1537_v56 = vld [vmem:[#allocation2 + $0x400] sm:$0xff]  ;;  %v1546_v58 = vld [vmem:[#allocation2 + $0x448] sm:$0xff]  ;;  %v1547_v17 = vld [vmem:[#allocation2 + $0x450] sm:$0xff] }
 0x2fb   :  { %v8979_v59 = vld [vmem:[#allocation62_spill] sm:$0xff]  ;;  %v1554_v62 = vld [vmem:[#allocation2 + $0x488] sm:$0xff]  ;;  %v1555_v0 = vld [vmem:[#allocation2 + $0x490] sm:$0xff] }
 0x2fc   :  { %v7585_v60 = vpack.c.bf16 %v8979_v59, %v8979_v59  ;;  %v1545_v61 = vld [vmem:[#allocation2 + $0x440] sm:$0xff]  ;;  %v1556_v46 = vld [vmem:[#allocation2 + $0x498] sm:$0xff]  ;;  %v1562_v1 = vld [vmem:[#allocation2 + $0x4c8] sm:$0xff] }
 0x2fd   :  { %1678 = vmatpush1.bf16.msra.mxu0 %v1457_v40  ;;  %1760 = vmatpush1.bf16.msra.mxu1 %v1459_v50  ;;  %v1553_v63 = vld [vmem:[#allocation2 + $0x480] sm:$0xff]  ;;  %v1564_v2 = vld [vmem:[#allocation2 + $0x4d8] sm:$0xff]  ;;  %v1563_v5 = vld [vmem:[#allocation2 + $0x4d0] sm:$0xff] }
 0x2fe   :  { %1679 = vmatprep.subr.bf16.mxu0 %v1466_v19  ;;  %1761 = vmatprep.subr.bf16.mxu1 %v1468_v27  ;;  %v1561_v3 = vld [vmem:[#allocation2 + $0x4c0] sm:$0xff]  ;;  %v1570_v35 = vld [vmem:[#allocation2 + $0x508] sm:$0xff]  ;;  %v1572_v34 = vld [vmem:[#allocation2 + $0x518] sm:$0xff] }
 0x2ff   :  { %v1569_v32 = vld [vmem:[#allocation2 + $0x500] sm:$0xff]  ;;  %v1571_v7 = vld [vmem:[#allocation2 + $0x510] sm:$0xff]  ;;  %v1578_v42 = vld [vmem:[#allocation2 + $0x548] sm:$0xff] }
 0x300   :  { %v1580_v40 = vld [vmem:[#allocation2 + $0x558] sm:$0xff]  ;;  %v1577_v50 = vld [vmem:[#allocation2 + $0x540] sm:$0xff]  ;;  %v1579_v19 = vld [vmem:[#allocation2 + $0x550] sm:$0xff] }
 0x301   :  { %1680 = vmatpush1.bf16.msra.mxu0 %v1465_v24  ;;  %1762 = vmatpush1.bf16.msra.mxu1 %v1467_v26  ;;  %v1586_v27 = vld [vmem:[#allocation2 + $0x588] sm:$0xff]  ;;  %v1588_v24 = vld [vmem:[#allocation2 + $0x598] sm:$0xff]  ;;  %v1585_v26 = vld [vmem:[#allocation2 + $0x580] sm:$0xff] }
 0x302   :  { %1681 = vmatprep.subr.bf16.mxu0 %v1474_v16  ;;  %1763 = vmatprep.subr.bf16.mxu1 %v1476_v4  ;;  %v1587_v16 = vld [vmem:[#allocation2 + $0x590] sm:$0xff]  ;;  %v1594_v4 = vld [vmem:[#allocation2 + $0x5c8] sm:$0xff]  ;;  %v1660_v54 = vld [vmem:[#allocation2 + $0x7d8] sm:$0xff] }
 0x303   :  { %v8980_v59 = vld [vmem:[#allocation61_spill] sm:$0xff] }
 0x305   :  { %1682 = vmatpush1.bf16.msra.mxu0 %v1473_v25  ;;  %1764 = vmatpush1.bf16.msra.mxu1 %v1475_v18  ;;  %v1596_v25 = vld [vmem:[#allocation2 + $0x5d8] sm:$0xff]  ;;  %v1593_v18 = vld [vmem:[#allocation2 + $0x5c0] sm:$0xff] }
 0x306   :  { %1683 = vmatprep.subr.bf16.mxu0 %v1482_v6  ;;  %1765 = vmatprep.subr.bf16.mxu1 %v1484_v8  ;;  %v1595_v6 = vld [vmem:[#allocation2 + $0x5d0] sm:$0xff]  ;;  %v1602_v8 = vld [vmem:[#allocation2 + $0x608] sm:$0xff] }
 0x309   :  { %1684 = vmatpush1.bf16.msra.mxu0 %v1481_v9  ;;  %1766 = vmatpush1.bf16.msra.mxu1 %v1483_v11  ;;  %v1604_v9 = vld [vmem:[#allocation2 + $0x618] sm:$0xff]  ;;  %v1601_v11 = vld [vmem:[#allocation2 + $0x600] sm:$0xff] }
 0x30a   :  { %1685 = vmatprep.subr.bf16.mxu0 %v1490_v12  ;;  %1767 = vmatprep.subr.bf16.mxu1 %v1492_v10  ;;  %v1603_v12 = vld [vmem:[#allocation2 + $0x610] sm:$0xff]  ;;  %v1610_v10 = vld [vmem:[#allocation2 + $0x648] sm:$0xff] }
 0x30d   :  { %1686 = vmatpush1.bf16.msra.mxu0 %v1489_v13  ;;  %1768 = vmatpush1.bf16.msra.mxu1 %v1491_v14  ;;  %v1612_v13 = vld [vmem:[#allocation2 + $0x658] sm:$0xff]  ;;  %v1609_v14 = vld [vmem:[#allocation2 + $0x640] sm:$0xff] }
 0x30e   :  { %1687 = vmatprep.subr.bf16.mxu0 %v1498_v15  ;;  %1769 = vmatprep.subr.bf16.mxu1 %v1500_v20  ;;  %v1611_v15 = vld [vmem:[#allocation2 + $0x650] sm:$0xff]  ;;  %v1618_v20 = vld [vmem:[#allocation2 + $0x688] sm:$0xff] }
 0x311   :  { %1688 = vmatpush1.bf16.msra.mxu0 %v1497_v21  ;;  %1770 = vmatpush1.bf16.msra.mxu1 %v1499_v22  ;;  %v1620_v21 = vld [vmem:[#allocation2 + $0x698] sm:$0xff]  ;;  %v1617_v22 = vld [vmem:[#allocation2 + $0x680] sm:$0xff] }
 0x312   :  { %1689 = vmatprep.subr.bf16.mxu0 %v1506_v23  ;;  %1771 = vmatprep.subr.bf16.mxu1 %v1508_v28  ;;  %v1619_v23 = vld [vmem:[#allocation2 + $0x690] sm:$0xff]  ;;  %v1626_v28 = vld [vmem:[#allocation2 + $0x6c8] sm:$0xff] }
 0x315   :  { %1690 = vmatpush1.bf16.msra.mxu0 %v1505_v29  ;;  %1772 = vmatpush1.bf16.msra.mxu1 %v1507_v30  ;;  %v1628_v29 = vld [vmem:[#allocation2 + $0x6d8] sm:$0xff]  ;;  %v1625_v30 = vld [vmem:[#allocation2 + $0x6c0] sm:$0xff] }
 0x316   :  { %1691 = vmatprep.subr.bf16.mxu0 %v1514_v31  ;;  %1773 = vmatprep.subr.bf16.mxu1 %v1516_v33  ;;  %v1627_v31 = vld [vmem:[#allocation2 + $0x6d0] sm:$0xff]  ;;  %v1634_v33 = vld [vmem:[#allocation2 + $0x708] sm:$0xff] }
 0x319   :  { %1692 = vmatpush1.bf16.msra.mxu0 %v1513_v36  ;;  %1774 = vmatpush1.bf16.msra.mxu1 %v1515_v37  ;;  %v1636_v36 = vld [vmem:[#allocation2 + $0x718] sm:$0xff]  ;;  %v1633_v37 = vld [vmem:[#allocation2 + $0x700] sm:$0xff] }
 0x31a   :  { %1693 = vmatprep.subr.bf16.mxu0 %v1522_v38  ;;  %1775 = vmatprep.subr.bf16.mxu1 %v1524_v41  ;;  %v1635_v38 = vld [vmem:[#allocation2 + $0x710] sm:$0xff]  ;;  %v1642_v41 = vld [vmem:[#allocation2 + $0x748] sm:$0xff] }
 0x31d   :  { %1694 = vmatpush1.bf16.msra.mxu0 %v1521_v43  ;;  %1776 = vmatpush1.bf16.msra.mxu1 %v1523_v44  ;;  %v1644_v43 = vld [vmem:[#allocation2 + $0x758] sm:$0xff]  ;;  %v1641_v44 = vld [vmem:[#allocation2 + $0x740] sm:$0xff] }
 0x31e   :  { %1695 = vmatprep.subr.bf16.mxu0 %v1530_v47  ;;  %1777 = vmatprep.subr.bf16.mxu1 %v1532_v48  ;;  %v1643_v47 = vld [vmem:[#allocation2 + $0x750] sm:$0xff]  ;;  %v1650_v48 = vld [vmem:[#allocation2 + $0x788] sm:$0xff] }
 0x321   :  { %1696 = vmatpush1.bf16.msra.mxu0 %v1529_v49  ;;  %1778 = vmatpush1.bf16.msra.mxu1 %v1531_v45  ;;  %v1652_v49 = vld [vmem:[#allocation2 + $0x798] sm:$0xff]  ;;  %v1649_v45 = vld [vmem:[#allocation2 + $0x780] sm:$0xff] }
 0x322   :  { %1706 = vmatprep.subr.bf16.mxu0 %v1538_v52  ;;  %1788 = vmatprep.subr.bf16.mxu1 %v1540_v53  ;;  %v1651_v52 = vld [vmem:[#allocation2 + $0x790] sm:$0xff]  ;;  %v1658_v53 = vld [vmem:[#allocation2 + $0x7c8] sm:$0xff] }
 0x324   :  { %1698 = vmatmul.mubr.bf16.vlgmr.msra.gmra.mrb[0].mxu0 %v7581_v55  ;;  %1780 = vmatmul.mubr.bf16.vlgmr.msra.gmra.mrb[0].mxu1 %v7581_v55 }
 0x325   :  { %1707 = vmatpush1.bf16.msra.mxu0 %v1537_v56  ;;  %1789 = vmatpush1.bf16.msra.mxu1 %v1539_v57  ;;  %v1657_v56 = vld [vmem:[#allocation2 + $0x7c0] sm:$0xff]  ;;  %v1659_v57 = vld [vmem:[#allocation2 + $0x7d0] sm:$0xff] }
 0x326   :  { %1708 = vmatprep.subr.bf16.mxu0 %v1546_v58  ;;  %1790 = vmatprep.subr.bf16.mxu1 %v1548_v39  ;;  %v1414_v58 = vld [vmem:[#allocation2 + $0x28] sm:$0xff]  ;;  %v1416_v39 = vld [vmem:[#allocation2 + $0x38] sm:$0xff] }
 0x327   :  { %1738 = vmatprep.mubr.bf16.mxu0 %v7585_v60  ;;  %1820 = vmatprep.mubr.bf16.mxu1 %v7585_v60 }
 0x329   :  { %1709 = vmatpush1.bf16.msra.mxu0 %v1545_v61  ;;  %1791 = vmatpush1.bf16.msra.mxu1 %v1547_v17  ;;  %v7593_v61 = vpack.c.bf16 %v8980_v59, %v8980_v59  ;;  %v1413_v17 = vld [vmem:[#allocation2 + $0x20] sm:$0xff] }
 0x32a   :  { %1710 = vmatprep.subr.bf16.mxu0 %v1554_v62  ;;  %1792 = vmatprep.subr.bf16.mxu1 %v1556_v46  ;;  %v1415_v62 = vld [vmem:[#allocation2 + $0x30] sm:$0xff]  ;;  %v1422_v46 = vld [vmem:[#allocation2 + $0x68] sm:$0xff]  ;;  %v1533_v59 = vld [vmem:[#allocation2 + $0x3e0] sm:$0xff] }
 0x32d   :  { %1711 = vmatpush1.bf16.msra.mxu0 %v1553_v63  ;;  %1793 = vmatpush1.bf16.msra.mxu1 %v1555_v0  ;;  %v1424_v63 = vld [vmem:[#allocation2 + $0x78] sm:$0xff]  ;;  %v1421_v0 = vld [vmem:[#allocation2 + $0x60] sm:$0xff] }
 0x32e   :  { %1712 = vmatprep.subr.bf16.mxu0 %v1562_v1  ;;  %1794 = vmatprep.subr.bf16.mxu1 %v1564_v2  ;;  %v1423_v1 = vld [vmem:[#allocation2 + $0x70] sm:$0xff]  ;;  %v1430_v2 = vld [vmem:[#allocation2 + $0xa8] sm:$0xff] }
 0x331   :  { %1713 = vmatpush1.bf16.msra.mxu0 %v1561_v3  ;;  %1795 = vmatpush1.bf16.msra.mxu1 %v1563_v5  ;;  %v1432_v3 = vld [vmem:[#allocation2 + $0xb8] sm:$0xff]  ;;  %v1429_v5 = vld [vmem:[#allocation2 + $0xa0] sm:$0xff] }
 0x332   :  { %1714 = vmatprep.subr.bf16.mxu0 %v1570_v35  ;;  %1796 = vmatprep.subr.bf16.mxu1 %v1572_v34  ;;  %v1431_v35 = vld [vmem:[#allocation2 + $0xb0] sm:$0xff]  ;;  %v1438_v34 = vld [vmem:[#allocation2 + $0xe8] sm:$0xff] }
 0x335   :  { %1715 = vmatpush1.bf16.msra.mxu0 %v1569_v32  ;;  %1797 = vmatpush1.bf16.msra.mxu1 %v1571_v7  ;;  %v1440_v32 = vld [vmem:[#allocation2 + $0xf8] sm:$0xff]  ;;  %v1437_v7 = vld [vmem:[#allocation2 + $0xe0] sm:$0xff] }
 0x336   :  { %1716 = vmatprep.subr.bf16.mxu0 %v1578_v42  ;;  %1798 = vmatprep.subr.bf16.mxu1 %v1580_v40  ;;  %v1439_v42 = vld [vmem:[#allocation2 + $0xf0] sm:$0xff]  ;;  %v1446_v40 = vld [vmem:[#allocation2 + $0x128] sm:$0xff] }
 0x339   :  { %1717 = vmatpush1.bf16.msra.mxu0 %v1577_v50  ;;  %1799 = vmatpush1.bf16.msra.mxu1 %v1579_v19  ;;  %v1448_v50 = vld [vmem:[#allocation2 + $0x138] sm:$0xff]  ;;  %v1447_v19 = vld [vmem:[#allocation2 + $0x130] sm:$0xff] }
 0x33a   :  { %1718 = vmatprep.subr.bf16.mxu0 %v1586_v27  ;;  %1800 = vmatprep.subr.bf16.mxu1 %v1588_v24  ;;  %v1454_v27 = vld [vmem:[#allocation2 + $0x168] sm:$0xff]  ;;  %v1456_v24 = vld [vmem:[#allocation2 + $0x178] sm:$0xff] }
 0x33d   :  { %1719 = vmatpush1.bf16.msra.mxu0 %v1585_v26  ;;  %1801 = vmatpush1.bf16.msra.mxu1 %v1587_v16  ;;  %v1453_v26 = vld [vmem:[#allocation2 + $0x160] sm:$0xff]  ;;  %v1455_v16 = vld [vmem:[#allocation2 + $0x170] sm:$0xff] }
 0x33e   :  { %1720 = vmatprep.subr.bf16.mxu0 %v1594_v4  ;;  %1802 = vmatprep.subr.bf16.mxu1 %v1596_v25  ;;  %v1462_v4 = vld [vmem:[#allocation2 + $0x1a8] sm:$0xff]  ;;  %v1464_v25 = vld [vmem:[#allocation2 + $0x1b8] sm:$0xff] }
 0x341   :  { %1721 = vmatpush1.bf16.msra.mxu0 %v1593_v18  ;;  %1803 = vmatpush1.bf16.msra.mxu1 %v1595_v6  ;;  %v1461_v18 = vld [vmem:[#allocation2 + $0x1a0] sm:$0xff]  ;;  %v1463_v6 = vld [vmem:[#allocation2 + $0x1b0] sm:$0xff] }
 0x342   :  { %1722 = vmatprep.subr.bf16.mxu0 %v1602_v8  ;;  %1804 = vmatprep.subr.bf16.mxu1 %v1604_v9  ;;  %v1470_v8 = vld [vmem:[#allocation2 + $0x1e8] sm:$0xff]  ;;  %v1472_v9 = vld [vmem:[#allocation2 + $0x1f8] sm:$0xff] }
 0x345   :  { %1723 = vmatpush1.bf16.msra.mxu0 %v1601_v11  ;;  %1805 = vmatpush1.bf16.msra.mxu1 %v1603_v12  ;;  %v1469_v11 = vld [vmem:[#allocation2 + $0x1e0] sm:$0xff]  ;;  %v1471_v12 = vld [vmem:[#allocation2 + $0x1f0] sm:$0xff] }
 0x346   :  { %1724 = vmatprep.subr.bf16.mxu0 %v1610_v10  ;;  %1806 = vmatprep.subr.bf16.mxu1 %v1612_v13  ;;  %v1478_v10 = vld [vmem:[#allocation2 + $0x228] sm:$0xff]  ;;  %v1480_v13 = vld [vmem:[#allocation2 + $0x238] sm:$0xff] }
 0x349   :  { %1725 = vmatpush1.bf16.msra.mxu0 %v1609_v14  ;;  %1807 = vmatpush1.bf16.msra.mxu1 %v1611_v15  ;;  %v1477_v14 = vld [vmem:[#allocation2 + $0x220] sm:$0xff]  ;;  %v1479_v15 = vld [vmem:[#allocation2 + $0x230] sm:$0xff] }
 0x34a   :  { %1726 = vmatprep.subr.bf16.mxu0 %v1618_v20  ;;  %1808 = vmatprep.subr.bf16.mxu1 %v1620_v21  ;;  %v1486_v20 = vld [vmem:[#allocation2 + $0x268] sm:$0xff]  ;;  %v1488_v21 = vld [vmem:[#allocation2 + $0x278] sm:$0xff] }
 0x34d   :  { %1727 = vmatpush1.bf16.msra.mxu0 %v1617_v22  ;;  %1809 = vmatpush1.bf16.msra.mxu1 %v1619_v23  ;;  %v1485_v22 = vld [vmem:[#allocation2 + $0x260] sm:$0xff]  ;;  %v1487_v23 = vld [vmem:[#allocation2 + $0x270] sm:$0xff] }
 0x34e   :  { %1728 = vmatprep.subr.bf16.mxu0 %v1626_v28  ;;  %1810 = vmatprep.subr.bf16.mxu1 %v1628_v29  ;;  %v1494_v28 = vld [vmem:[#allocation2 + $0x2a8] sm:$0xff]  ;;  %v1496_v29 = vld [vmem:[#allocation2 + $0x2b8] sm:$0xff] }
 0x351   :  { %1729 = vmatpush1.bf16.msra.mxu0 %v1625_v30  ;;  %1811 = vmatpush1.bf16.msra.mxu1 %v1627_v31  ;;  %v1493_v30 = vld [vmem:[#allocation2 + $0x2a0] sm:$0xff]  ;;  %v1495_v31 = vld [vmem:[#allocation2 + $0x2b0] sm:$0xff] }
 0x352   :  { %1730 = vmatprep.subr.bf16.mxu0 %v1634_v33  ;;  %1812 = vmatprep.subr.bf16.mxu1 %v1636_v36  ;;  %v1502_v33 = vld [vmem:[#allocation2 + $0x2e8] sm:$0xff]  ;;  %v1504_v36 = vld [vmem:[#allocation2 + $0x2f8] sm:$0xff] }
 0x355   :  { %1731 = vmatpush1.bf16.msra.mxu0 %v1633_v37  ;;  %1813 = vmatpush1.bf16.msra.mxu1 %v1635_v38  ;;  %v1501_v37 = vld [vmem:[#allocation2 + $0x2e0] sm:$0xff]  ;;  %v1503_v38 = vld [vmem:[#allocation2 + $0x2f0] sm:$0xff] }
 0x356   :  { %1732 = vmatprep.subr.bf16.mxu0 %v1642_v41  ;;  %1814 = vmatprep.subr.bf16.mxu1 %v1644_v43  ;;  %v1510_v41 = vld [vmem:[#allocation2 + $0x328] sm:$0xff]  ;;  %v1512_v43 = vld [vmem:[#allocation2 + $0x338] sm:$0xff] }
 0x359   :  { %1733 = vmatpush1.bf16.msra.mxu0 %v1641_v44  ;;  %1815 = vmatpush1.bf16.msra.mxu1 %v1643_v47  ;;  %v1509_v44 = vld [vmem:[#allocation2 + $0x320] sm:$0xff]  ;;  %v1511_v47 = vld [vmem:[#allocation2 + $0x330] sm:$0xff] }
 0x35a   :  { %1734 = vmatprep.subr.bf16.mxu0 %v1650_v48  ;;  %1816 = vmatprep.subr.bf16.mxu1 %v1652_v49  ;;  %v1518_v48 = vld [vmem:[#allocation2 + $0x368] sm:$0xff]  ;;  %v1520_v49 = vld [vmem:[#allocation2 + $0x378] sm:$0xff] }
 0x35d   :  { %1735 = vmatpush1.bf16.msra.mxu0 %v1649_v45  ;;  %1817 = vmatpush1.bf16.msra.mxu1 %v1651_v52  ;;  %v1517_v45 = vld [vmem:[#allocation2 + $0x360] sm:$0xff]  ;;  %v1519_v52 = vld [vmem:[#allocation2 + $0x370] sm:$0xff] }
 0x35e   :  { %1736 = vmatprep.subr.bf16.mxu0 %v1658_v53  ;;  %1818 = vmatprep.subr.bf16.mxu1 %v1660_v54  ;;  %v1526_v53 = vld [vmem:[#allocation2 + $0x3a8] sm:$0xff]  ;;  %v1528_v54 = vld [vmem:[#allocation2 + $0x3b8] sm:$0xff] }
 0x361   :  { %1737 = vmatpush1.bf16.msra.mxu0 %v1657_v56  ;;  %1819 = vmatpush1.bf16.msra.mxu1 %v1659_v57  ;;  %v1525_v56 = vld [vmem:[#allocation2 + $0x3a0] sm:$0xff]  ;;  %v1527_v57 = vld [vmem:[#allocation2 + $0x3b0] sm:$0xff] }
 0x362   :  { %1829 = vmatprep.subr.bf16.mxu0 %v1414_v58  ;;  %1911 = vmatprep.subr.bf16.mxu1 %v1416_v39  ;;  %v1534_v58 = vld [vmem:[#allocation2 + $0x3e8] sm:$0xff]  ;;  %v1536_v39 = vld [vmem:[#allocation2 + $0x3f8] sm:$0xff] }
 0x364   :  { %1739 = vmatmul.mubr.bf16.vlgmr.msra.gmra.mrb[0].mxu0 %v7593_v61  ;;  %1821 = vmatmul.mubr.bf16.vlgmr.msra.gmra.mrb[0].mxu1 %v7593_v61 }
 0x365   :  { %1830 = vmatpush1.bf16.msra.mxu0 %v1413_v17  ;;  %1912 = vmatpush1.bf16.msra.mxu1 %v1415_v62  ;;  %v1535_v17 = vld [vmem:[#allocation2 + $0x3f0] sm:$0xff]  ;;  %v1542_v62 = vld [vmem:[#allocation2 + $0x428] sm:$0xff] }
 0x366   :  { %1831 = vmatprep.subr.bf16.mxu0 %v1422_v46  ;;  %1913 = vmatprep.subr.bf16.mxu1 %v1424_v63  ;;  %v1544_v46 = vld [vmem:[#allocation2 + $0x438] sm:$0xff]  ;;  %v1541_v63 = vld [vmem:[#allocation2 + $0x420] sm:$0xff] }
 0x367   :  { %1861 = vmatprep.mubr.bf16.mxu0 %v7560_v51  ;;  %1943 = vmatprep.mubr.bf16.mxu1 %v7560_v51  ;;  %v1445_v51 = vld [vmem:[#allocation2 + $0x120] sm:$0xff] }
 0x369   :  { %1832 = vmatpush1.bf16.msra.mxu0 %v1421_v0  ;;  %1914 = vmatpush1.bf16.msra.mxu1 %v1423_v1  ;;  %v1543_v0 = vld [vmem:[#allocation2 + $0x430] sm:$0xff]  ;;  %v1550_v1 = vld [vmem:[#allocation2 + $0x468] sm:$0xff] }
 0x36a   :  { %1833 = vmatprep.subr.bf16.mxu0 %v1430_v2  ;;  %1915 = vmatprep.subr.bf16.mxu1 %v1432_v3  ;;  %v1552_v2 = vld [vmem:[#allocation2 + $0x478] sm:$0xff]  ;;  %v1549_v3 = vld [vmem:[#allocation2 + $0x460] sm:$0xff] }
 0x36d   :  { %1834 = vmatpush1.bf16.msra.mxu0 %v1429_v5  ;;  %1916 = vmatpush1.bf16.msra.mxu1 %v1431_v35  ;;  %v1551_v5 = vld [vmem:[#allocation2 + $0x470] sm:$0xff]  ;;  %v1558_v35 = vld [vmem:[#allocation2 + $0x4a8] sm:$0xff] }
 0x36e   :  { %1835 = vmatprep.subr.bf16.mxu0 %v1438_v34  ;;  %1917 = vmatprep.subr.bf16.mxu1 %v1440_v32  ;;  %v1560_v34 = vld [vmem:[#allocation2 + $0x4b8] sm:$0xff]  ;;  %v1557_v32 = vld [vmem:[#allocation2 + $0x4a0] sm:$0xff] }
 0x371   :  { %1836 = vmatpush1.bf16.msra.mxu0 %v1437_v7  ;;  %1918 = vmatpush1.bf16.msra.mxu1 %v1439_v42  ;;  %v1559_v7 = vld [vmem:[#allocation2 + $0x4b0] sm:$0xff]  ;;  %v1566_v42 = vld [vmem:[#allocation2 + $0x4e8] sm:$0xff] }
 0x372   :  { %1837 = vmatprep.subr.bf16.mxu0 %v1446_v40  ;;  %1919 = vmatprep.subr.bf16.mxu1 %v1448_v50  ;;  %v1565_v40 = vld [vmem:[#allocation2 + $0x4e0] sm:$0xff]  ;;  %v1567_v50 = vld [vmem:[#allocation2 + $0x4f0] sm:$0xff] }
 0x375   :  { %1838 = vmatpush1.bf16.msra.mxu0 %v1445_v51  ;;  %1920 = vmatpush1.bf16.msra.mxu1 %v1447_v19  ;;  %v1574_v51 = vld [vmem:[#allocation2 + $0x528] sm:$0xff]  ;;  %v1576_v19 = vld [vmem:[#allocation2 + $0x538] sm:$0xff] }
 0x376   :  { %1839 = vmatprep.subr.bf16.mxu0 %v1454_v27  ;;  %1921 = vmatprep.subr.bf16.mxu1 %v1456_v24  ;;  %v1575_v27 = vld [vmem:[#allocation2 + $0x530] sm:$0xff]  ;;  %v1582_v24 = vld [vmem:[#allocation2 + $0x568] sm:$0xff] }
 0x379   :  { %1840 = vmatpush1.bf16.msra.mxu0 %v1453_v26  ;;  %1922 = vmatpush1.bf16.msra.mxu1 %v1455_v16  ;;  %v1584_v26 = vld [vmem:[#allocation2 + $0x578] sm:$0xff]  ;;  %v1581_v16 = vld [vmem:[#allocation2 + $0x560] sm:$0xff] }
 0x37a   :  { %1841 = vmatprep.subr.bf16.mxu0 %v1462_v4  ;;  %1923 = vmatprep.subr.bf16.mxu1 %v1464_v25  ;;  %v1583_v4 = vld [vmem:[#allocation2 + $0x570] sm:$0xff]  ;;  %v1590_v25 = vld [vmem:[#allocation2 + $0x5a8] sm:$0xff] }
 0x37d   :  { %1842 = vmatpush1.bf16.msra.mxu0 %v1461_v18  ;;  %1924 = vmatpush1.bf16.msra.mxu1 %v1463_v6  ;;  %v1592_v18 = vld [vmem:[#allocation2 + $0x5b8] sm:$0xff]  ;;  %v1589_v6 = vld [vmem:[#allocation2 + $0x5a0] sm:$0xff] }
 0x37e   :  { %1843 = vmatprep.subr.bf16.mxu0 %v1470_v8  ;;  %1925 = vmatprep.subr.bf16.mxu1 %v1472_v9  ;;  %v1591_v8 = vld [vmem:[#allocation2 + $0x5b0] sm:$0xff]  ;;  %v1598_v9 = vld [vmem:[#allocation2 + $0x5e8] sm:$0xff] }
 0x381   :  { %1844 = vmatpush1.bf16.msra.mxu0 %v1469_v11  ;;  %1926 = vmatpush1.bf16.msra.mxu1 %v1471_v12  ;;  %v1600_v11 = vld [vmem:[#allocation2 + $0x5f8] sm:$0xff]  ;;  %v1597_v12 = vld [vmem:[#allocation2 + $0x5e0] sm:$0xff] }
 0x382   :  { %1845 = vmatprep.subr.bf16.mxu0 %v1478_v10  ;;  %1927 = vmatprep.subr.bf16.mxu1 %v1480_v13  ;;  %v1599_v10 = vld [vmem:[#allocation2 + $0x5f0] sm:$0xff]  ;;  %v1606_v13 = vld [vmem:[#allocation2 + $0x628] sm:$0xff] }
 0x385   :  { %1846 = vmatpush1.bf16.msra.mxu0 %v1477_v14  ;;  %1928 = vmatpush1.bf16.msra.mxu1 %v1479_v15  ;;  %v1608_v14 = vld [vmem:[#allocation2 + $0x638] sm:$0xff]  ;;  %v1605_v15 = vld [vmem:[#allocation2 + $0x620] sm:$0xff] }
 0x386   :  { %1847 = vmatprep.subr.bf16.mxu0 %v1486_v20  ;;  %1929 = vmatprep.subr.bf16.mxu1 %v1488_v21  ;;  %v1607_v20 = vld [vmem:[#allocation2 + $0x630] sm:$0xff]  ;;  %v1614_v21 = vld [vmem:[#allocation2 + $0x668] sm:$0xff] }
 0x389   :  { %1848 = vmatpush1.bf16.msra.mxu0 %v1485_v22  ;;  %1930 = vmatpush1.bf16.msra.mxu1 %v1487_v23  ;;  %v1616_v22 = vld [vmem:[#allocation2 + $0x678] sm:$0xff]  ;;  %v1613_v23 = vld [vmem:[#allocation2 + $0x660] sm:$0xff] }
 0x38a   :  { %1849 = vmatprep.subr.bf16.mxu0 %v1494_v28  ;;  %1931 = vmatprep.subr.bf16.mxu1 %v1496_v29  ;;  %v1615_v28 = vld [vmem:[#allocation2 + $0x670] sm:$0xff]  ;;  %v1622_v29 = vld [vmem:[#allocation2 + $0x6a8] sm:$0xff] }
 0x38d   :  { %1850 = vmatpush1.bf16.msra.mxu0 %v1493_v30  ;;  %1932 = vmatpush1.bf16.msra.mxu1 %v1495_v31  ;;  %v1624_v30 = vld [vmem:[#allocation2 + $0x6b8] sm:$0xff]  ;;  %v1621_v31 = vld [vmem:[#allocation2 + $0x6a0] sm:$0xff] }
 0x38e   :  { %1851 = vmatprep.subr.bf16.mxu0 %v1502_v33  ;;  %1933 = vmatprep.subr.bf16.mxu1 %v1504_v36  ;;  %v1623_v33 = vld [vmem:[#allocation2 + $0x6b0] sm:$0xff]  ;;  %v1630_v36 = vld [vmem:[#allocation2 + $0x6e8] sm:$0xff] }
 0x391   :  { %1852 = vmatpush1.bf16.msra.mxu0 %v1501_v37  ;;  %1934 = vmatpush1.bf16.msra.mxu1 %v1503_v38  ;;  %v1632_v37 = vld [vmem:[#allocation2 + $0x6f8] sm:$0xff]  ;;  %v1629_v38 = vld [vmem:[#allocation2 + $0x6e0] sm:$0xff] }
 0x392   :  { %1853 = vmatprep.subr.bf16.mxu0 %v1510_v41  ;;  %1935 = vmatprep.subr.bf16.mxu1 %v1512_v43  ;;  %v1631_v41 = vld [vmem:[#allocation2 + $0x6f0] sm:$0xff]  ;;  %v1638_v43 = vld [vmem:[#allocation2 + $0x728] sm:$0xff] }
 0x395   :  { %1854 = vmatpush1.bf16.msra.mxu0 %v1509_v44  ;;  %1936 = vmatpush1.bf16.msra.mxu1 %v1511_v47  ;;  %v1640_v44 = vld [vmem:[#allocation2 + $0x738] sm:$0xff]  ;;  %v1637_v47 = vld [vmem:[#allocation2 + $0x720] sm:$0xff] }
 0x396   :  { %1855 = vmatprep.subr.bf16.mxu0 %v1518_v48  ;;  %1937 = vmatprep.subr.bf16.mxu1 %v1520_v49  ;;  %v1639_v48 = vld [vmem:[#allocation2 + $0x730] sm:$0xff]  ;;  %v1646_v49 = vld [vmem:[#allocation2 + $0x768] sm:$0xff] }
 0x399   :  { %1856 = vmatpush1.bf16.msra.mxu0 %v1517_v45  ;;  %1938 = vmatpush1.bf16.msra.mxu1 %v1519_v52  ;;  %v1648_v45 = vld [vmem:[#allocation2 + $0x778] sm:$0xff]  ;;  %v1645_v52 = vld [vmem:[#allocation2 + $0x760] sm:$0xff] }
 0x39a   :  { %1857 = vmatprep.subr.bf16.mxu0 %v1526_v53  ;;  %1939 = vmatprep.subr.bf16.mxu1 %v1528_v54  ;;  %v1647_v53 = vld [vmem:[#allocation2 + $0x770] sm:$0xff]  ;;  %v1654_v54 = vld [vmem:[#allocation2 + $0x7a8] sm:$0xff] }
 0x39d   :  { %1858 = vmatpush1.bf16.msra.mxu0 %v1525_v56  ;;  %1940 = vmatpush1.bf16.msra.mxu1 %v1527_v57  ;;  %v1656_v56 = vld [vmem:[#allocation2 + $0x7b8] sm:$0xff]  ;;  %v1653_v57 = vld [vmem:[#allocation2 + $0x7a0] sm:$0xff] }
 0x39e   :  { %1859 = vmatprep.subr.bf16.mxu0 %v1534_v58  ;;  %1941 = vmatprep.subr.bf16.mxu1 %v1536_v39  ;;  %v1655_v58 = vld [vmem:[#allocation2 + $0x7b0] sm:$0xff]  ;;  %v1662_v39 = vld [vmem:[#allocation2 + $0x7e8] sm:$0xff] }
 0x3a1   :  { %1860 = vmatpush1.bf16.msra.mxu0 %v1533_v59  ;;  %1942 = vmatpush1.bf16.msra.mxu1 %v1535_v17  ;;  %v1664_v59 = vld [vmem:[#allocation2 + $0x7f8] sm:$0xff]  ;;  %v1661_v17 = vld [vmem:[#allocation2 + $0x7e0] sm:$0xff] }
 0x3a2   :  { %1870 = vmatprep.subr.bf16.mxu0 %v1542_v62  ;;  %1952 = vmatprep.subr.bf16.mxu1 %v1544_v46  ;;  %v1663_v62 = vld [vmem:[#allocation2 + $0x7f0] sm:$0xff] }
 0x3a4   :  { %1862 = vmatmul.mubr.bf16.vlgmr.msra.gmra.mrb[4].mxu0 %v7581_v55  ;;  %1944 = vmatmul.mubr.bf16.vlgmr.msra.gmra.mrb[4].mxu1 %v7581_v55  ;;  %v1568_v55 = vld [vmem:[#allocation2 + $0x4f8] sm:$0xff] }
 0x3a5   :  { %1871 = vmatpush1.bf16.msra.mxu0 %v1541_v63  ;;  %1953 = vmatpush1.bf16.msra.mxu1 %v1543_v0 }
 0x3a6   :  { %1872 = vmatprep.subr.bf16.mxu0 %v1550_v1  ;;  %1954 = vmatprep.subr.bf16.mxu1 %v1552_v2 }
 0x3a7   :  { %1902 = vmatprep.mubr.bf16.mxu0 %v7585_v60  ;;  %1984 = vmatprep.mubr.bf16.mxu1 %v7585_v60  ;;  %v1573_v60 = vld [vmem:[#allocation2 + $0x520] sm:$0xff] }
 0x3a9   :  { %1873 = vmatpush1.bf16.msra.mxu0 %v1549_v3  ;;  %1955 = vmatpush1.bf16.msra.mxu1 %v1551_v5 }
 0x3aa   :  { %1874 = vmatprep.subr.bf16.mxu0 %v1558_v35  ;;  %1956 = vmatprep.subr.bf16.mxu1 %v1560_v34 }
 0x3ad   :  { %1875 = vmatpush1.bf16.msra.mxu0 %v1557_v32  ;;  %1957 = vmatpush1.bf16.msra.mxu1 %v1559_v7 }
 0x3ae   :  { %1876 = vmatprep.subr.bf16.mxu0 %v1566_v42  ;;  %1958 = vmatprep.subr.bf16.mxu1 %v1568_v55 }
 0x3b1   :  { %1877 = vmatpush1.bf16.msra.mxu0 %v1565_v40  ;;  %1959 = vmatpush1.bf16.msra.mxu1 %v1567_v50 }
 0x3b2   :  { %1878 = vmatprep.subr.bf16.mxu0 %v1574_v51  ;;  %1960 = vmatprep.subr.bf16.mxu1 %v1576_v19 }
 0x3b5   :  { %1879 = vmatpush1.bf16.msra.mxu0 %v1573_v60  ;;  %1961 = vmatpush1.bf16.msra.mxu1 %v1575_v27 }
 0x3b6   :  { %1880 = vmatprep.subr.bf16.mxu0 %v1582_v24  ;;  %1962 = vmatprep.subr.bf16.mxu1 %v1584_v26 }
 0x3b9   :  { %1881 = vmatpush1.bf16.msra.mxu0 %v1581_v16  ;;  %1963 = vmatpush1.bf16.msra.mxu1 %v1583_v4 }
 0x3ba   :  { %1882 = vmatprep.subr.bf16.mxu0 %v1590_v25  ;;  %1964 = vmatprep.subr.bf16.mxu1 %v1592_v18 }
 0x3bd   :  { %1883 = vmatpush1.bf16.msra.mxu0 %v1589_v6  ;;  %1965 = vmatpush1.bf16.msra.mxu1 %v1591_v8 }
 0x3be   :  { %1884 = vmatprep.subr.bf16.mxu0 %v1598_v9  ;;  %1966 = vmatprep.subr.bf16.mxu1 %v1600_v11 }
 0x3c1   :  { %1885 = vmatpush1.bf16.msra.mxu0 %v1597_v12  ;;  %1967 = vmatpush1.bf16.msra.mxu1 %v1599_v10 }
 0x3c2   :  { %1886 = vmatprep.subr.bf16.mxu0 %v1606_v13  ;;  %1968 = vmatprep.subr.bf16.mxu1 %v1608_v14 }
 0x3c5   :  { %1887 = vmatpush1.bf16.msra.mxu0 %v1605_v15  ;;  %1969 = vmatpush1.bf16.msra.mxu1 %v1607_v20 }
 0x3c6   :  { %1888 = vmatprep.subr.bf16.mxu0 %v1614_v21  ;;  %1970 = vmatprep.subr.bf16.mxu1 %v1616_v22 }
 0x3c9   :  { %1889 = vmatpush1.bf16.msra.mxu0 %v1613_v23  ;;  %1971 = vmatpush1.bf16.msra.mxu1 %v1615_v28 }
 0x3ca   :  { %1890 = vmatprep.subr.bf16.mxu0 %v1622_v29  ;;  %1972 = vmatprep.subr.bf16.mxu1 %v1624_v30 }
 0x3cd   :  { %1891 = vmatpush1.bf16.msra.mxu0 %v1621_v31  ;;  %1973 = vmatpush1.bf16.msra.mxu1 %v1623_v33 }
 0x3ce   :  { %1892 = vmatprep.subr.bf16.mxu0 %v1630_v36  ;;  %1974 = vmatprep.subr.bf16.mxu1 %v1632_v37 }
 0x3d1   :  { %1893 = vmatpush1.bf16.msra.mxu0 %v1629_v38  ;;  %1975 = vmatpush1.bf16.msra.mxu1 %v1631_v41 }
 0x3d2   :  { %1894 = vmatprep.subr.bf16.mxu0 %v1638_v43  ;;  %1976 = vmatprep.subr.bf16.mxu1 %v1640_v44 }
 0x3d5   :  { %1895 = vmatpush1.bf16.msra.mxu0 %v1637_v47  ;;  %1977 = vmatpush1.bf16.msra.mxu1 %v1639_v48 }
 0x3d6   :  { %1896 = vmatprep.subr.bf16.mxu0 %v1646_v49  ;;  %1978 = vmatprep.subr.bf16.mxu1 %v1648_v45 }
 0x3d9   :  { %1897 = vmatpush1.bf16.msra.mxu0 %v1645_v52  ;;  %1979 = vmatpush1.bf16.msra.mxu1 %v1647_v53 }
 0x3da   :  { %1898 = vmatprep.subr.bf16.mxu0 %v1654_v54  ;;  %1980 = vmatprep.subr.bf16.mxu1 %v1656_v56 }
 0x3dd   :  { %1899 = vmatpush1.bf16.msra.mxu0 %v1653_v57  ;;  %1981 = vmatpush1.bf16.msra.mxu1 %v1655_v58 }
 0x3de   :  { %1900 = vmatprep.subr.bf16.mxu0 %v1662_v39  ;;  %1982 = vmatprep.subr.bf16.mxu1 %v1664_v59 }
 0x3e1   :  { %1901 = vmatpush1.bf16.msra.mxu0 %v1661_v17  ;;  %1983 = vmatpush1.bf16.msra.mxu1 %v1663_v62 }
 0x3e4   :  { %1903 = vmatmul.mubr.bf16.vlgmr.msra.gmra.mrb[4].mxu0 %v7593_v61  ;;  %1985 = vmatmul.mubr.bf16.vlgmr.msra.gmra.mrb[4].mxu1 %v7593_v61 }
 0x3e5   :  { %6485 = dma.done.wait [#allocation3 + $0x1], 32768 }
 0x3e6   :  { %6486 = vsyncadd [#allocation3 + $0x1], 4294934528  ;;  %v8981_v46 = vld [vmem:[#allocation64_spill] sm:$0xff]  ;;  %2018 = sst [smem:[#allocation20]] %s6521_s28  ;;  %s6531_s3 = smov 256  }
 0x3e7   :  { %v7607_v63 = vpack.c.bf16 %v8981_v46, %v8981_v46  ;;  %2020 = sst [smem:[#allocation20 + $0x1]] %s6516_s25  ;;  %s6532_s24 = smov [#allocation19]  }
 0x3e8   :  { %2022 = sst [smem:[#allocation20 + $0x2]] %s6522_s30 }
 0x3e9   :  { %2329 = vmatprep.mubr.bf16.mxu0 %v7607_v63  ;;  %2411 = vmatprep.mubr.bf16.mxu1 %v7607_v63  ;;  %2024 = sst [smem:[#allocation20 + $0x3]] %s6518_s1 }
 0x3ea   :  { %2026 = sst [smem:[#allocation20 + $0x4]] %s6519_s19 }
 0x3eb   :  { %2028 = sst [smem:[#allocation20 + $0x5]] %s6520_s2 }
 0x3ec   :  { %2030 = sst [smem:[#allocation20 + $0x6]] %s6531_s3 }
 0x3ed   :  { %2032 = sst [smem:[#allocation20 + $0x7]] %s6518_s1 }
 0x3ee   :  { %2034 = sst [smem:[#allocation20 + $0x8]] %s6522_s30 }
 0x3ef   :  { %2036 = dma.general %s8512_s4, 16384, %s6670_s17, %s6524_s18, %s6532_s24, [#allocation20], %s6666_s29, 0  }
 0x3f0   :  { %v2042_v61 = vld [vmem:[#allocation2 + $0x808] sm:$0xff]  ;;  %v2044_v0 = vld [vmem:[#allocation2 + $0x818] sm:$0xff]  ;;  %v2041_v1 = vld [vmem:[#allocation2 + $0x800] sm:$0xff] }
 0x3f1   :  { %2297 = vmatprep.subr.bf16.mxu0 %v2042_v61  ;;  %2379 = vmatprep.subr.bf16.mxu1 %v2044_v0  ;;  %v2043_v2 = vld [vmem:[#allocation2 + $0x810] sm:$0xff]  ;;  %v2050_v3 = vld [vmem:[#allocation2 + $0x848] sm:$0xff]  ;;  %v2052_v5 = vld [vmem:[#allocation2 + $0x858] sm:$0xff] }
 0x3f2   :  { %2298 = vmatpush1.bf16.msra.mxu0 %v2041_v1  ;;  %2380 = vmatpush1.bf16.msra.mxu1 %v2043_v2  ;;  %v2049_v35 = vld [vmem:[#allocation2 + $0x840] sm:$0xff]  ;;  %v2051_v34 = vld [vmem:[#allocation2 + $0x850] sm:$0xff]  ;;  %v2058_v32 = vld [vmem:[#allocation2 + $0x888] sm:$0xff] }
 0x3f3   :  { %2299 = vmatprep.subr.bf16.mxu0 %v2050_v3  ;;  %2381 = vmatprep.subr.bf16.mxu1 %v2052_v5  ;;  %v2060_v7 = vld [vmem:[#allocation2 + $0x898] sm:$0xff]  ;;  %v2057_v42 = vld [vmem:[#allocation2 + $0x880] sm:$0xff]  ;;  %v2059_v55 = vld [vmem:[#allocation2 + $0x890] sm:$0xff] }
 0x3f4   :  { %v2066_v40 = vld [vmem:[#allocation2 + $0x8c8] sm:$0xff]  ;;  %v2068_v50 = vld [vmem:[#allocation2 + $0x8d8] sm:$0xff]  ;;  %v2065_v51 = vld [vmem:[#allocation2 + $0x8c0] sm:$0xff] }
 0x3f5   :  { %v2067_v19 = vld [vmem:[#allocation2 + $0x8d0] sm:$0xff]  ;;  %v2074_v60 = vld [vmem:[#allocation2 + $0x908] sm:$0xff]  ;;  %v2076_v27 = vld [vmem:[#allocation2 + $0x918] sm:$0xff] }
 0x3f6   :  { %2300 = vmatpush1.bf16.msra.mxu0 %v2049_v35  ;;  %2382 = vmatpush1.bf16.msra.mxu1 %v2051_v34  ;;  %v2073_v24 = vld [vmem:[#allocation2 + $0x900] sm:$0xff]  ;;  %v2075_v26 = vld [vmem:[#allocation2 + $0x910] sm:$0xff]  ;;  %v2082_v16 = vld [vmem:[#allocation2 + $0x948] sm:$0xff] }
 0x3f7   :  { %2301 = vmatprep.subr.bf16.mxu0 %v2058_v32  ;;  %2383 = vmatprep.subr.bf16.mxu1 %v2060_v7  ;;  %v2084_v4 = vld [vmem:[#allocation2 + $0x958] sm:$0xff]  ;;  %v2081_v25 = vld [vmem:[#allocation2 + $0x940] sm:$0xff]  ;;  %v2083_v18 = vld [vmem:[#allocation2 + $0x950] sm:$0xff] }
 0x3f8   :  { %v2090_v6 = vld [vmem:[#allocation2 + $0x988] sm:$0xff]  ;;  %v2092_v8 = vld [vmem:[#allocation2 + $0x998] sm:$0xff]  ;;  %v2089_v9 = vld [vmem:[#allocation2 + $0x980] sm:$0xff] }
 0x3f9   :  { %v2091_v11 = vld [vmem:[#allocation2 + $0x990] sm:$0xff]  ;;  %v2098_v12 = vld [vmem:[#allocation2 + $0x9c8] sm:$0xff]  ;;  %v2100_v10 = vld [vmem:[#allocation2 + $0x9d8] sm:$0xff] }
 0x3fa   :  { %2302 = vmatpush1.bf16.msra.mxu0 %v2057_v42  ;;  %2384 = vmatpush1.bf16.msra.mxu1 %v2059_v55  ;;  %v2097_v13 = vld [vmem:[#allocation2 + $0x9c0] sm:$0xff]  ;;  %v2099_v14 = vld [vmem:[#allocation2 + $0x9d0] sm:$0xff]  ;;  %v2106_v15 = vld [vmem:[#allocation2 + $0xa08] sm:$0xff] }
 0x3fb   :  { %2303 = vmatprep.subr.bf16.mxu0 %v2066_v40  ;;  %2385 = vmatprep.subr.bf16.mxu1 %v2068_v50  ;;  %v2108_v20 = vld [vmem:[#allocation2 + $0xa18] sm:$0xff]  ;;  %v2105_v21 = vld [vmem:[#allocation2 + $0xa00] sm:$0xff]  ;;  %v2107_v22 = vld [vmem:[#allocation2 + $0xa10] sm:$0xff] }
 0x3fc   :  { %v2114_v23 = vld [vmem:[#allocation2 + $0xa48] sm:$0xff]  ;;  %v2116_v28 = vld [vmem:[#allocation2 + $0xa58] sm:$0xff]  ;;  %v2113_v29 = vld [vmem:[#allocation2 + $0xa40] sm:$0xff] }
 0x3fd   :  { %v2115_v30 = vld [vmem:[#allocation2 + $0xa50] sm:$0xff]  ;;  %v2122_v31 = vld [vmem:[#allocation2 + $0xa88] sm:$0xff]  ;;  %v2124_v33 = vld [vmem:[#allocation2 + $0xa98] sm:$0xff] }
 0x3fe   :  { %2304 = vmatpush1.bf16.msra.mxu0 %v2065_v51  ;;  %2386 = vmatpush1.bf16.msra.mxu1 %v2067_v19  ;;  %v2121_v36 = vld [vmem:[#allocation2 + $0xa80] sm:$0xff]  ;;  %v2123_v37 = vld [vmem:[#allocation2 + $0xa90] sm:$0xff]  ;;  %v2130_v38 = vld [vmem:[#allocation2 + $0xac8] sm:$0xff] }
 0x3ff   :  { %2305 = vmatprep.subr.bf16.mxu0 %v2074_v60  ;;  %2387 = vmatprep.subr.bf16.mxu1 %v2076_v27  ;;  %v2132_v41 = vld [vmem:[#allocation2 + $0xad8] sm:$0xff]  ;;  %v2129_v43 = vld [vmem:[#allocation2 + $0xac0] sm:$0xff]  ;;  %v2131_v44 = vld [vmem:[#allocation2 + $0xad0] sm:$0xff] }
 0x400   :  { %v2138_v47 = vld [vmem:[#allocation2 + $0xb08] sm:$0xff]  ;;  %v2140_v48 = vld [vmem:[#allocation2 + $0xb18] sm:$0xff]  ;;  %v2137_v49 = vld [vmem:[#allocation2 + $0xb00] sm:$0xff] }
 0x401   :  { %v2139_v45 = vld [vmem:[#allocation2 + $0xb10] sm:$0xff]  ;;  %v2146_v52 = vld [vmem:[#allocation2 + $0xb48] sm:$0xff]  ;;  %v2148_v53 = vld [vmem:[#allocation2 + $0xb58] sm:$0xff] }
 0x402   :  { %2306 = vmatpush1.bf16.msra.mxu0 %v2073_v24  ;;  %2388 = vmatpush1.bf16.msra.mxu1 %v2075_v26  ;;  %v2145_v54 = vld [vmem:[#allocation2 + $0xb40] sm:$0xff]  ;;  %v2147_v56 = vld [vmem:[#allocation2 + $0xb50] sm:$0xff]  ;;  %v2154_v57 = vld [vmem:[#allocation2 + $0xb88] sm:$0xff] }
 0x403   :  { %2307 = vmatprep.subr.bf16.mxu0 %v2082_v16  ;;  %2389 = vmatprep.subr.bf16.mxu1 %v2084_v4  ;;  %v2156_v58 = vld [vmem:[#allocation2 + $0xb98] sm:$0xff]  ;;  %v2153_v39 = vld [vmem:[#allocation2 + $0xb80] sm:$0xff]  ;;  %v2155_v59 = vld [vmem:[#allocation2 + $0xb90] sm:$0xff] }
 0x404   :  { %v2162_v17 = vld [vmem:[#allocation2 + $0xbc8] sm:$0xff]  ;;  %v2164_v62 = vld [vmem:[#allocation2 + $0xbd8] sm:$0xff]  ;;  %v2161_v46 = vld [vmem:[#allocation2 + $0xbc0] sm:$0xff] }
 0x405   :  { %v2163_v61 = vld [vmem:[#allocation2 + $0xbd0] sm:$0xff]  ;;  %v2170_v0 = vld [vmem:[#allocation2 + $0xc08] sm:$0xff]  ;;  %v2172_v1 = vld [vmem:[#allocation2 + $0xc18] sm:$0xff] }
 0x406   :  { %2308 = vmatpush1.bf16.msra.mxu0 %v2081_v25  ;;  %2390 = vmatpush1.bf16.msra.mxu1 %v2083_v18  ;;  %v8982_v2 = vld [vmem:[#allocation63_spill] sm:$0xff]  ;;  %v2171_v35 = vld [vmem:[#allocation2 + $0xc10] sm:$0xff]  ;;  %v2180_v32 = vld [vmem:[#allocation2 + $0xc58] sm:$0xff] }
 0x407   :  { %2309 = vmatprep.subr.bf16.mxu0 %v2090_v6  ;;  %2391 = vmatprep.subr.bf16.mxu1 %v2092_v8  ;;  %v7628_v3 = vpack.c.bf16 %v8982_v2, %v8982_v2  ;;  %v2169_v5 = vld [vmem:[#allocation2 + $0xc00] sm:$0xff]  ;;  %v2178_v34 = vld [vmem:[#allocation2 + $0xc48] sm:$0xff]  ;;  %v2179_v40 = vld [vmem:[#allocation2 + $0xc50] sm:$0xff] }
 0x408   :  { %v8983_v7 = vld [vmem:[#allocation66_spill] sm:$0xff]  ;;  %v2186_v50 = vld [vmem:[#allocation2 + $0xc88] sm:$0xff]  ;;  %v2187_v60 = vld [vmem:[#allocation2 + $0xc90] sm:$0xff] }
 0x409   :  { %v7632_v42 = vpack.c.bf16 %v8983_v7, %v8983_v7  ;;  %v2177_v55 = vld [vmem:[#allocation2 + $0xc40] sm:$0xff]  ;;  %v2188_v51 = vld [vmem:[#allocation2 + $0xc98] sm:$0xff]  ;;  %v2194_v27 = vld [vmem:[#allocation2 + $0xcc8] sm:$0xff] }
 0x40a   :  { %2310 = vmatpush1.bf16.msra.mxu0 %v2089_v9  ;;  %2392 = vmatpush1.bf16.msra.mxu1 %v2091_v11  ;;  %v2185_v19 = vld [vmem:[#allocation2 + $0xc80] sm:$0xff]  ;;  %v2196_v24 = vld [vmem:[#allocation2 + $0xcd8] sm:$0xff]  ;;  %v2195_v16 = vld [vmem:[#allocation2 + $0xcd0] sm:$0xff] }
 0x40b   :  { %2311 = vmatprep.subr.bf16.mxu0 %v2098_v12  ;;  %2393 = vmatprep.subr.bf16.mxu1 %v2100_v10  ;;  %v2193_v26 = vld [vmem:[#allocation2 + $0xcc0] sm:$0xff]  ;;  %v2202_v4 = vld [vmem:[#allocation2 + $0xd08] sm:$0xff]  ;;  %v2204_v25 = vld [vmem:[#allocation2 + $0xd18] sm:$0xff] }
 0x40c   :  { %v2201_v18 = vld [vmem:[#allocation2 + $0xd00] sm:$0xff]  ;;  %v2203_v6 = vld [vmem:[#allocation2 + $0xd10] sm:$0xff]  ;;  %v2210_v8 = vld [vmem:[#allocation2 + $0xd48] sm:$0xff] }
 0x40d   :  { %v2212_v9 = vld [vmem:[#allocation2 + $0xd58] sm:$0xff]  ;;  %v2209_v11 = vld [vmem:[#allocation2 + $0xd40] sm:$0xff]  ;;  %v2211_v12 = vld [vmem:[#allocation2 + $0xd50] sm:$0xff] }
 0x40e   :  { %2312 = vmatpush1.bf16.msra.mxu0 %v2097_v13  ;;  %2394 = vmatpush1.bf16.msra.mxu1 %v2099_v14  ;;  %v2218_v10 = vld [vmem:[#allocation2 + $0xd88] sm:$0xff]  ;;  %v2220_v13 = vld [vmem:[#allocation2 + $0xd98] sm:$0xff]  ;;  %v2217_v14 = vld [vmem:[#allocation2 + $0xd80] sm:$0xff] }
 0x40f   :  { %2313 = vmatprep.subr.bf16.mxu0 %v2106_v15  ;;  %2395 = vmatprep.subr.bf16.mxu1 %v2108_v20  ;;  %v2219_v15 = vld [vmem:[#allocation2 + $0xd90] sm:$0xff]  ;;  %v2226_v20 = vld [vmem:[#allocation2 + $0xdc8] sm:$0xff]  ;;  %v2292_v2 = vld [vmem:[#allocation2 + $0xfd8] sm:$0xff] }
 0x410   :  { %v8984_v7 = vld [vmem:[#allocation65_spill] sm:$0xff] }
 0x412   :  { %2314 = vmatpush1.bf16.msra.mxu0 %v2105_v21  ;;  %2396 = vmatpush1.bf16.msra.mxu1 %v2107_v22  ;;  %v2228_v21 = vld [vmem:[#allocation2 + $0xdd8] sm:$0xff]  ;;  %v2225_v22 = vld [vmem:[#allocation2 + $0xdc0] sm:$0xff] }
 0x413   :  { %2315 = vmatprep.subr.bf16.mxu0 %v2114_v23  ;;  %2397 = vmatprep.subr.bf16.mxu1 %v2116_v28  ;;  %v2227_v23 = vld [vmem:[#allocation2 + $0xdd0] sm:$0xff]  ;;  %v2234_v28 = vld [vmem:[#allocation2 + $0xe08] sm:$0xff] }
 0x416   :  { %2316 = vmatpush1.bf16.msra.mxu0 %v2113_v29  ;;  %2398 = vmatpush1.bf16.msra.mxu1 %v2115_v30  ;;  %v2236_v29 = vld [vmem:[#allocation2 + $0xe18] sm:$0xff]  ;;  %v2233_v30 = vld [vmem:[#allocation2 + $0xe00] sm:$0xff] }
 0x417   :  { %2317 = vmatprep.subr.bf16.mxu0 %v2122_v31  ;;  %2399 = vmatprep.subr.bf16.mxu1 %v2124_v33  ;;  %v2235_v31 = vld [vmem:[#allocation2 + $0xe10] sm:$0xff]  ;;  %v2242_v33 = vld [vmem:[#allocation2 + $0xe48] sm:$0xff] }
 0x41a   :  { %2318 = vmatpush1.bf16.msra.mxu0 %v2121_v36  ;;  %2400 = vmatpush1.bf16.msra.mxu1 %v2123_v37  ;;  %v2244_v36 = vld [vmem:[#allocation2 + $0xe58] sm:$0xff]  ;;  %v2241_v37 = vld [vmem:[#allocation2 + $0xe40] sm:$0xff] }
 0x41b   :  { %2319 = vmatprep.subr.bf16.mxu0 %v2130_v38  ;;  %2401 = vmatprep.subr.bf16.mxu1 %v2132_v41  ;;  %v2243_v38 = vld [vmem:[#allocation2 + $0xe50] sm:$0xff]  ;;  %v2250_v41 = vld [vmem:[#allocation2 + $0xe88] sm:$0xff] }
 0x41e   :  { %2320 = vmatpush1.bf16.msra.mxu0 %v2129_v43  ;;  %2402 = vmatpush1.bf16.msra.mxu1 %v2131_v44  ;;  %v2252_v43 = vld [vmem:[#allocation2 + $0xe98] sm:$0xff]  ;;  %v2249_v44 = vld [vmem:[#allocation2 + $0xe80] sm:$0xff] }
 0x41f   :  { %2321 = vmatprep.subr.bf16.mxu0 %v2138_v47  ;;  %2403 = vmatprep.subr.bf16.mxu1 %v2140_v48  ;;  %v2251_v47 = vld [vmem:[#allocation2 + $0xe90] sm:$0xff]  ;;  %v2258_v48 = vld [vmem:[#allocation2 + $0xec8] sm:$0xff] }
 0x422   :  { %2322 = vmatpush1.bf16.msra.mxu0 %v2137_v49  ;;  %2404 = vmatpush1.bf16.msra.mxu1 %v2139_v45  ;;  %v2260_v49 = vld [vmem:[#allocation2 + $0xed8] sm:$0xff]  ;;  %v2257_v45 = vld [vmem:[#allocation2 + $0xec0] sm:$0xff] }
 0x423   :  { %2323 = vmatprep.subr.bf16.mxu0 %v2146_v52  ;;  %2405 = vmatprep.subr.bf16.mxu1 %v2148_v53  ;;  %v2259_v52 = vld [vmem:[#allocation2 + $0xed0] sm:$0xff]  ;;  %v2266_v53 = vld [vmem:[#allocation2 + $0xf08] sm:$0xff] }
 0x426   :  { %2324 = vmatpush1.bf16.msra.mxu0 %v2145_v54  ;;  %2406 = vmatpush1.bf16.msra.mxu1 %v2147_v56  ;;  %v2268_v54 = vld [vmem:[#allocation2 + $0xf18] sm:$0xff]  ;;  %v2265_v56 = vld [vmem:[#allocation2 + $0xf00] sm:$0xff] }
 0x427   :  { %2325 = vmatprep.subr.bf16.mxu0 %v2154_v57  ;;  %2407 = vmatprep.subr.bf16.mxu1 %v2156_v58  ;;  %v2267_v57 = vld [vmem:[#allocation2 + $0xf10] sm:$0xff]  ;;  %v2274_v58 = vld [vmem:[#allocation2 + $0xf48] sm:$0xff] }
 0x42a   :  { %2326 = vmatpush1.bf16.msra.mxu0 %v2153_v39  ;;  %2408 = vmatpush1.bf16.msra.mxu1 %v2155_v59  ;;  %v2276_v39 = vld [vmem:[#allocation2 + $0xf58] sm:$0xff]  ;;  %v2273_v59 = vld [vmem:[#allocation2 + $0xf40] sm:$0xff] }
 0x42b   :  { %2327 = vmatprep.subr.bf16.mxu0 %v2162_v17  ;;  %2409 = vmatprep.subr.bf16.mxu1 %v2164_v62  ;;  %v2275_v17 = vld [vmem:[#allocation2 + $0xf50] sm:$0xff]  ;;  %v2282_v62 = vld [vmem:[#allocation2 + $0xf88] sm:$0xff] }
 0x42e   :  { %2328 = vmatpush1.bf16.msra.mxu0 %v2161_v46  ;;  %2410 = vmatpush1.bf16.msra.mxu1 %v2163_v61  ;;  %v2284_v46 = vld [vmem:[#allocation2 + $0xf98] sm:$0xff]  ;;  %v2281_v61 = vld [vmem:[#allocation2 + $0xf80] sm:$0xff] }
 0x42f   :  { %2338 = vmatprep.subr.bf16.mxu0 %v2170_v0  ;;  %2420 = vmatprep.subr.bf16.mxu1 %v2172_v1  ;;  %v2283_v0 = vld [vmem:[#allocation2 + $0xf90] sm:$0xff]  ;;  %v2290_v1 = vld [vmem:[#allocation2 + $0xfc8] sm:$0xff] }
 0x431   :  { %2330 = vmatmul.mubr.bf16.vlgmr.msra.gmra.mrb[0].mxu0 %v7628_v3  ;;  %2412 = vmatmul.mubr.bf16.vlgmr.msra.gmra.mrb[0].mxu1 %v7628_v3 }
 0x432   :  { %2339 = vmatpush1.bf16.msra.mxu0 %v2169_v5  ;;  %2421 = vmatpush1.bf16.msra.mxu1 %v2171_v35  ;;  %v2289_v5 = vld [vmem:[#allocation2 + $0xfc0] sm:$0xff]  ;;  %v2291_v35 = vld [vmem:[#allocation2 + $0xfd0] sm:$0xff] }
 0x433   :  { %2340 = vmatprep.subr.bf16.mxu0 %v2178_v34  ;;  %2422 = vmatprep.subr.bf16.mxu1 %v2180_v32  ;;  %v2046_v34 = vld [vmem:[#allocation2 + $0x828] sm:$0xff]  ;;  %v2048_v32 = vld [vmem:[#allocation2 + $0x838] sm:$0xff] }
 0x434   :  { %2370 = vmatprep.mubr.bf16.mxu0 %v7632_v42  ;;  %2452 = vmatprep.mubr.bf16.mxu1 %v7632_v42 }
 0x436   :  { %2341 = vmatpush1.bf16.msra.mxu0 %v2177_v55  ;;  %2423 = vmatpush1.bf16.msra.mxu1 %v2179_v40  ;;  %v7640_v55 = vpack.c.bf16 %v8984_v7, %v8984_v7  ;;  %v2045_v40 = vld [vmem:[#allocation2 + $0x820] sm:$0xff] }
 0x437   :  { %2342 = vmatprep.subr.bf16.mxu0 %v2186_v50  ;;  %2424 = vmatprep.subr.bf16.mxu1 %v2188_v51  ;;  %v2047_v50 = vld [vmem:[#allocation2 + $0x830] sm:$0xff]  ;;  %v2054_v51 = vld [vmem:[#allocation2 + $0x868] sm:$0xff]  ;;  %v2165_v7 = vld [vmem:[#allocation2 + $0xbe0] sm:$0xff] }
 0x43a   :  { %2343 = vmatpush1.bf16.msra.mxu0 %v2185_v19  ;;  %2425 = vmatpush1.bf16.msra.mxu1 %v2187_v60  ;;  %v2056_v19 = vld [vmem:[#allocation2 + $0x878] sm:$0xff]  ;;  %v2053_v60 = vld [vmem:[#allocation2 + $0x860] sm:$0xff] }
 0x43b   :  { %2344 = vmatprep.subr.bf16.mxu0 %v2194_v27  ;;  %2426 = vmatprep.subr.bf16.mxu1 %v2196_v24  ;;  %v2055_v27 = vld [vmem:[#allocation2 + $0x870] sm:$0xff]  ;;  %v2062_v24 = vld [vmem:[#allocation2 + $0x8a8] sm:$0xff] }
 0x43e   :  { %2345 = vmatpush1.bf16.msra.mxu0 %v2193_v26  ;;  %2427 = vmatpush1.bf16.msra.mxu1 %v2195_v16  ;;  %v2064_v26 = vld [vmem:[#allocation2 + $0x8b8] sm:$0xff]  ;;  %v2061_v16 = vld [vmem:[#allocation2 + $0x8a0] sm:$0xff] }
 0x43f   :  { %2346 = vmatprep.subr.bf16.mxu0 %v2202_v4  ;;  %2428 = vmatprep.subr.bf16.mxu1 %v2204_v25  ;;  %v2063_v4 = vld [vmem:[#allocation2 + $0x8b0] sm:$0xff]  ;;  %v2070_v25 = vld [vmem:[#allocation2 + $0x8e8] sm:$0xff] }
 0x442   :  { %2347 = vmatpush1.bf16.msra.mxu0 %v2201_v18  ;;  %2429 = vmatpush1.bf16.msra.mxu1 %v2203_v6  ;;  %v2072_v18 = vld [vmem:[#allocation2 + $0x8f8] sm:$0xff]  ;;  %v2069_v6 = vld [vmem:[#allocation2 + $0x8e0] sm:$0xff] }
 0x443   :  { %2348 = vmatprep.subr.bf16.mxu0 %v2210_v8  ;;  %2430 = vmatprep.subr.bf16.mxu1 %v2212_v9  ;;  %v2071_v8 = vld [vmem:[#allocation2 + $0x8f0] sm:$0xff]  ;;  %v2078_v9 = vld [vmem:[#allocation2 + $0x928] sm:$0xff] }
 0x446   :  { %2349 = vmatpush1.bf16.msra.mxu0 %v2209_v11  ;;  %2431 = vmatpush1.bf16.msra.mxu1 %v2211_v12  ;;  %v2080_v11 = vld [vmem:[#allocation2 + $0x938] sm:$0xff]  ;;  %v2079_v12 = vld [vmem:[#allocation2 + $0x930] sm:$0xff] }
 0x447   :  { %2350 = vmatprep.subr.bf16.mxu0 %v2218_v10  ;;  %2432 = vmatprep.subr.bf16.mxu1 %v2220_v13  ;;  %v2086_v10 = vld [vmem:[#allocation2 + $0x968] sm:$0xff]  ;;  %v2088_v13 = vld [vmem:[#allocation2 + $0x978] sm:$0xff] }
 0x44a   :  { %2351 = vmatpush1.bf16.msra.mxu0 %v2217_v14  ;;  %2433 = vmatpush1.bf16.msra.mxu1 %v2219_v15  ;;  %v2085_v14 = vld [vmem:[#allocation2 + $0x960] sm:$0xff]  ;;  %v2087_v15 = vld [vmem:[#allocation2 + $0x970] sm:$0xff] }
 0x44b   :  { %2352 = vmatprep.subr.bf16.mxu0 %v2226_v20  ;;  %2434 = vmatprep.subr.bf16.mxu1 %v2228_v21  ;;  %v2094_v20 = vld [vmem:[#allocation2 + $0x9a8] sm:$0xff]  ;;  %v2096_v21 = vld [vmem:[#allocation2 + $0x9b8] sm:$0xff] }
 0x44e   :  { %2353 = vmatpush1.bf16.msra.mxu0 %v2225_v22  ;;  %2435 = vmatpush1.bf16.msra.mxu1 %v2227_v23  ;;  %v2093_v22 = vld [vmem:[#allocation2 + $0x9a0] sm:$0xff]  ;;  %v2095_v23 = vld [vmem:[#allocation2 + $0x9b0] sm:$0xff] }
 0x44f   :  { %2354 = vmatprep.subr.bf16.mxu0 %v2234_v28  ;;  %2436 = vmatprep.subr.bf16.mxu1 %v2236_v29  ;;  %v2102_v28 = vld [vmem:[#allocation2 + $0x9e8] sm:$0xff]  ;;  %v2104_v29 = vld [vmem:[#allocation2 + $0x9f8] sm:$0xff] }
 0x452   :  { %2355 = vmatpush1.bf16.msra.mxu0 %v2233_v30  ;;  %2437 = vmatpush1.bf16.msra.mxu1 %v2235_v31  ;;  %v2101_v30 = vld [vmem:[#allocation2 + $0x9e0] sm:$0xff]  ;;  %v2103_v31 = vld [vmem:[#allocation2 + $0x9f0] sm:$0xff] }
 0x453   :  { %2356 = vmatprep.subr.bf16.mxu0 %v2242_v33  ;;  %2438 = vmatprep.subr.bf16.mxu1 %v2244_v36  ;;  %v2110_v33 = vld [vmem:[#allocation2 + $0xa28] sm:$0xff]  ;;  %v2112_v36 = vld [vmem:[#allocation2 + $0xa38] sm:$0xff] }
 0x456   :  { %2357 = vmatpush1.bf16.msra.mxu0 %v2241_v37  ;;  %2439 = vmatpush1.bf16.msra.mxu1 %v2243_v38  ;;  %v2109_v37 = vld [vmem:[#allocation2 + $0xa20] sm:$0xff]  ;;  %v2111_v38 = vld [vmem:[#allocation2 + $0xa30] sm:$0xff] }
 0x457   :  { %2358 = vmatprep.subr.bf16.mxu0 %v2250_v41  ;;  %2440 = vmatprep.subr.bf16.mxu1 %v2252_v43  ;;  %v2118_v41 = vld [vmem:[#allocation2 + $0xa68] sm:$0xff]  ;;  %v2120_v43 = vld [vmem:[#allocation2 + $0xa78] sm:$0xff] }
 0x45a   :  { %2359 = vmatpush1.bf16.msra.mxu0 %v2249_v44  ;;  %2441 = vmatpush1.bf16.msra.mxu1 %v2251_v47  ;;  %v2117_v44 = vld [vmem:[#allocation2 + $0xa60] sm:$0xff]  ;;  %v2119_v47 = vld [vmem:[#allocation2 + $0xa70] sm:$0xff] }
 0x45b   :  { %2360 = vmatprep.subr.bf16.mxu0 %v2258_v48  ;;  %2442 = vmatprep.subr.bf16.mxu1 %v2260_v49  ;;  %v2126_v48 = vld [vmem:[#allocation2 + $0xaa8] sm:$0xff]  ;;  %v2128_v49 = vld [vmem:[#allocation2 + $0xab8] sm:$0xff] }
 0x45e   :  { %2361 = vmatpush1.bf16.msra.mxu0 %v2257_v45  ;;  %2443 = vmatpush1.bf16.msra.mxu1 %v2259_v52  ;;  %v2125_v45 = vld [vmem:[#allocation2 + $0xaa0] sm:$0xff]  ;;  %v2127_v52 = vld [vmem:[#allocation2 + $0xab0] sm:$0xff] }
 0x45f   :  { %2362 = vmatprep.subr.bf16.mxu0 %v2266_v53  ;;  %2444 = vmatprep.subr.bf16.mxu1 %v2268_v54  ;;  %v2134_v53 = vld [vmem:[#allocation2 + $0xae8] sm:$0xff]  ;;  %v2136_v54 = vld [vmem:[#allocation2 + $0xaf8] sm:$0xff] }
 0x462   :  { %2363 = vmatpush1.bf16.msra.mxu0 %v2265_v56  ;;  %2445 = vmatpush1.bf16.msra.mxu1 %v2267_v57  ;;  %v2133_v56 = vld [vmem:[#allocation2 + $0xae0] sm:$0xff]  ;;  %v2135_v57 = vld [vmem:[#allocation2 + $0xaf0] sm:$0xff] }
 0x463   :  { %2364 = vmatprep.subr.bf16.mxu0 %v2274_v58  ;;  %2446 = vmatprep.subr.bf16.mxu1 %v2276_v39  ;;  %v2142_v58 = vld [vmem:[#allocation2 + $0xb28] sm:$0xff]  ;;  %v2144_v39 = vld [vmem:[#allocation2 + $0xb38] sm:$0xff] }
 0x466   :  { %2365 = vmatpush1.bf16.msra.mxu0 %v2273_v59  ;;  %2447 = vmatpush1.bf16.msra.mxu1 %v2275_v17  ;;  %v2141_v59 = vld [vmem:[#allocation2 + $0xb20] sm:$0xff]  ;;  %v2143_v17 = vld [vmem:[#allocation2 + $0xb30] sm:$0xff] }
 0x467   :  { %2366 = vmatprep.subr.bf16.mxu0 %v2282_v62  ;;  %2448 = vmatprep.subr.bf16.mxu1 %v2284_v46  ;;  %v2150_v62 = vld [vmem:[#allocation2 + $0xb68] sm:$0xff]  ;;  %v2152_v46 = vld [vmem:[#allocation2 + $0xb78] sm:$0xff] }
 0x46a   :  { %2367 = vmatpush1.bf16.msra.mxu0 %v2281_v61  ;;  %2449 = vmatpush1.bf16.msra.mxu1 %v2283_v0  ;;  %v2149_v61 = vld [vmem:[#allocation2 + $0xb60] sm:$0xff]  ;;  %v2151_v0 = vld [vmem:[#allocation2 + $0xb70] sm:$0xff] }
 0x46b   :  { %2368 = vmatprep.subr.bf16.mxu0 %v2290_v1  ;;  %2450 = vmatprep.subr.bf16.mxu1 %v2292_v2  ;;  %v2158_v1 = vld [vmem:[#allocation2 + $0xba8] sm:$0xff]  ;;  %v2160_v2 = vld [vmem:[#allocation2 + $0xbb8] sm:$0xff] }
 0x46e   :  { %2369 = vmatpush1.bf16.msra.mxu0 %v2289_v5  ;;  %2451 = vmatpush1.bf16.msra.mxu1 %v2291_v35  ;;  %v2157_v5 = vld [vmem:[#allocation2 + $0xba0] sm:$0xff]  ;;  %v2159_v35 = vld [vmem:[#allocation2 + $0xbb0] sm:$0xff] }
 0x46f   :  { %2461 = vmatprep.subr.bf16.mxu0 %v2046_v34  ;;  %2543 = vmatprep.subr.bf16.mxu1 %v2048_v32  ;;  %v2166_v34 = vld [vmem:[#allocation2 + $0xbe8] sm:$0xff]  ;;  %v2168_v32 = vld [vmem:[#allocation2 + $0xbf8] sm:$0xff] }
 0x471   :  { %2371 = vmatmul.mubr.bf16.vlgmr.msra.gmra.mrb[0].mxu0 %v7640_v55  ;;  %2453 = vmatmul.mubr.bf16.vlgmr.msra.gmra.mrb[0].mxu1 %v7640_v55 }
 0x472   :  { %2462 = vmatpush1.bf16.msra.mxu0 %v2045_v40  ;;  %2544 = vmatpush1.bf16.msra.mxu1 %v2047_v50  ;;  %v2167_v40 = vld [vmem:[#allocation2 + $0xbf0] sm:$0xff]  ;;  %v2174_v50 = vld [vmem:[#allocation2 + $0xc28] sm:$0xff] }
 0x473   :  { %2463 = vmatprep.subr.bf16.mxu0 %v2054_v51  ;;  %2545 = vmatprep.subr.bf16.mxu1 %v2056_v19  ;;  %v2176_v51 = vld [vmem:[#allocation2 + $0xc38] sm:$0xff]  ;;  %v2173_v19 = vld [vmem:[#allocation2 + $0xc20] sm:$0xff] }
 0x474   :  { %2493 = vmatprep.mubr.bf16.mxu0 %v7607_v63  ;;  %2575 = vmatprep.mubr.bf16.mxu1 %v7607_v63  ;;  %v2077_v63 = vld [vmem:[#allocation2 + $0x920] sm:$0xff] }
 0x476   :  { %2464 = vmatpush1.bf16.msra.mxu0 %v2053_v60  ;;  %2546 = vmatpush1.bf16.msra.mxu1 %v2055_v27  ;;  %v2175_v60 = vld [vmem:[#allocation2 + $0xc30] sm:$0xff]  ;;  %v2182_v27 = vld [vmem:[#allocation2 + $0xc68] sm:$0xff] }
 0x477   :  { %2465 = vmatprep.subr.bf16.mxu0 %v2062_v24  ;;  %2547 = vmatprep.subr.bf16.mxu1 %v2064_v26  ;;  %v2184_v24 = vld [vmem:[#allocation2 + $0xc78] sm:$0xff]  ;;  %v2181_v26 = vld [vmem:[#allocation2 + $0xc60] sm:$0xff] }
 0x47a   :  { %2466 = vmatpush1.bf16.msra.mxu0 %v2061_v16  ;;  %2548 = vmatpush1.bf16.msra.mxu1 %v2063_v4  ;;  %v2183_v16 = vld [vmem:[#allocation2 + $0xc70] sm:$0xff]  ;;  %v2190_v4 = vld [vmem:[#allocation2 + $0xca8] sm:$0xff] }
 0x47b   :  { %2467 = vmatprep.subr.bf16.mxu0 %v2070_v25  ;;  %2549 = vmatprep.subr.bf16.mxu1 %v2072_v18  ;;  %v2192_v25 = vld [vmem:[#allocation2 + $0xcb8] sm:$0xff]  ;;  %v2189_v18 = vld [vmem:[#allocation2 + $0xca0] sm:$0xff] }
 0x47e   :  { %2468 = vmatpush1.bf16.msra.mxu0 %v2069_v6  ;;  %2550 = vmatpush1.bf16.msra.mxu1 %v2071_v8  ;;  %v2191_v6 = vld [vmem:[#allocation2 + $0xcb0] sm:$0xff]  ;;  %v2198_v8 = vld [vmem:[#allocation2 + $0xce8] sm:$0xff] }
 0x47f   :  { %2469 = vmatprep.subr.bf16.mxu0 %v2078_v9  ;;  %2551 = vmatprep.subr.bf16.mxu1 %v2080_v11  ;;  %v2197_v9 = vld [vmem:[#allocation2 + $0xce0] sm:$0xff]  ;;  %v2199_v11 = vld [vmem:[#allocation2 + $0xcf0] sm:$0xff] }
 0x482   :  { %2470 = vmatpush1.bf16.msra.mxu0 %v2077_v63  ;;  %2552 = vmatpush1.bf16.msra.mxu1 %v2079_v12  ;;  %v2206_v63 = vld [vmem:[#allocation2 + $0xd28] sm:$0xff]  ;;  %v2208_v12 = vld [vmem:[#allocation2 + $0xd38] sm:$0xff] }
 0x483   :  { %2471 = vmatprep.subr.bf16.mxu0 %v2086_v10  ;;  %2553 = vmatprep.subr.bf16.mxu1 %v2088_v13  ;;  %v2207_v10 = vld [vmem:[#allocation2 + $0xd30] sm:$0xff]  ;;  %v2214_v13 = vld [vmem:[#allocation2 + $0xd68] sm:$0xff] }
 0x486   :  { %2472 = vmatpush1.bf16.msra.mxu0 %v2085_v14  ;;  %2554 = vmatpush1.bf16.msra.mxu1 %v2087_v15  ;;  %v2216_v14 = vld [vmem:[#allocation2 + $0xd78] sm:$0xff]  ;;  %v2213_v15 = vld [vmem:[#allocation2 + $0xd60] sm:$0xff] }
 0x487   :  { %2473 = vmatprep.subr.bf16.mxu0 %v2094_v20  ;;  %2555 = vmatprep.subr.bf16.mxu1 %v2096_v21  ;;  %v2215_v20 = vld [vmem:[#allocation2 + $0xd70] sm:$0xff]  ;;  %v2222_v21 = vld [vmem:[#allocation2 + $0xda8] sm:$0xff] }
 0x48a   :  { %2474 = vmatpush1.bf16.msra.mxu0 %v2093_v22  ;;  %2556 = vmatpush1.bf16.msra.mxu1 %v2095_v23  ;;  %v2224_v22 = vld [vmem:[#allocation2 + $0xdb8] sm:$0xff]  ;;  %v2221_v23 = vld [vmem:[#allocation2 + $0xda0] sm:$0xff] }
 0x48b   :  { %2475 = vmatprep.subr.bf16.mxu0 %v2102_v28  ;;  %2557 = vmatprep.subr.bf16.mxu1 %v2104_v29  ;;  %v2223_v28 = vld [vmem:[#allocation2 + $0xdb0] sm:$0xff]  ;;  %v2230_v29 = vld [vmem:[#allocation2 + $0xde8] sm:$0xff] }
 0x48e   :  { %2476 = vmatpush1.bf16.msra.mxu0 %v2101_v30  ;;  %2558 = vmatpush1.bf16.msra.mxu1 %v2103_v31  ;;  %v2232_v30 = vld [vmem:[#allocation2 + $0xdf8] sm:$0xff]  ;;  %v2229_v31 = vld [vmem:[#allocation2 + $0xde0] sm:$0xff] }
 0x48f   :  { %2477 = vmatprep.subr.bf16.mxu0 %v2110_v33  ;;  %2559 = vmatprep.subr.bf16.mxu1 %v2112_v36  ;;  %v2231_v33 = vld [vmem:[#allocation2 + $0xdf0] sm:$0xff]  ;;  %v2238_v36 = vld [vmem:[#allocation2 + $0xe28] sm:$0xff] }
 0x492   :  { %2478 = vmatpush1.bf16.msra.mxu0 %v2109_v37  ;;  %2560 = vmatpush1.bf16.msra.mxu1 %v2111_v38  ;;  %v2240_v37 = vld [vmem:[#allocation2 + $0xe38] sm:$0xff]  ;;  %v2237_v38 = vld [vmem:[#allocation2 + $0xe20] sm:$0xff] }
 0x493   :  { %2479 = vmatprep.subr.bf16.mxu0 %v2118_v41  ;;  %2561 = vmatprep.subr.bf16.mxu1 %v2120_v43  ;;  %v2239_v41 = vld [vmem:[#allocation2 + $0xe30] sm:$0xff]  ;;  %v2246_v43 = vld [vmem:[#allocation2 + $0xe68] sm:$0xff] }
 0x496   :  { %2480 = vmatpush1.bf16.msra.mxu0 %v2117_v44  ;;  %2562 = vmatpush1.bf16.msra.mxu1 %v2119_v47  ;;  %v2248_v44 = vld [vmem:[#allocation2 + $0xe78] sm:$0xff]  ;;  %v2245_v47 = vld [vmem:[#allocation2 + $0xe60] sm:$0xff] }
 0x497   :  { %2481 = vmatprep.subr.bf16.mxu0 %v2126_v48  ;;  %2563 = vmatprep.subr.bf16.mxu1 %v2128_v49  ;;  %v2247_v48 = vld [vmem:[#allocation2 + $0xe70] sm:$0xff]  ;;  %v2254_v49 = vld [vmem:[#allocation2 + $0xea8] sm:$0xff] }
 0x49a   :  { %2482 = vmatpush1.bf16.msra.mxu0 %v2125_v45  ;;  %2564 = vmatpush1.bf16.msra.mxu1 %v2127_v52  ;;  %v2256_v45 = vld [vmem:[#allocation2 + $0xeb8] sm:$0xff]  ;;  %v2253_v52 = vld [vmem:[#allocation2 + $0xea0] sm:$0xff] }
 0x49b   :  { %2483 = vmatprep.subr.bf16.mxu0 %v2134_v53  ;;  %2565 = vmatprep.subr.bf16.mxu1 %v2136_v54  ;;  %v2255_v53 = vld [vmem:[#allocation2 + $0xeb0] sm:$0xff]  ;;  %v2262_v54 = vld [vmem:[#allocation2 + $0xee8] sm:$0xff] }
 0x49e   :  { %2484 = vmatpush1.bf16.msra.mxu0 %v2133_v56  ;;  %2566 = vmatpush1.bf16.msra.mxu1 %v2135_v57  ;;  %v2264_v56 = vld [vmem:[#allocation2 + $0xef8] sm:$0xff]  ;;  %v2261_v57 = vld [vmem:[#allocation2 + $0xee0] sm:$0xff] }
 0x49f   :  { %2485 = vmatprep.subr.bf16.mxu0 %v2142_v58  ;;  %2567 = vmatprep.subr.bf16.mxu1 %v2144_v39  ;;  %v2263_v58 = vld [vmem:[#allocation2 + $0xef0] sm:$0xff]  ;;  %v2270_v39 = vld [vmem:[#allocation2 + $0xf28] sm:$0xff] }
 0x4a2   :  { %2486 = vmatpush1.bf16.msra.mxu0 %v2141_v59  ;;  %2568 = vmatpush1.bf16.msra.mxu1 %v2143_v17  ;;  %v2272_v59 = vld [vmem:[#allocation2 + $0xf38] sm:$0xff]  ;;  %v2269_v17 = vld [vmem:[#allocation2 + $0xf20] sm:$0xff] }
 0x4a3   :  { %2487 = vmatprep.subr.bf16.mxu0 %v2150_v62  ;;  %2569 = vmatprep.subr.bf16.mxu1 %v2152_v46  ;;  %v2271_v62 = vld [vmem:[#allocation2 + $0xf30] sm:$0xff]  ;;  %v2278_v46 = vld [vmem:[#allocation2 + $0xf68] sm:$0xff] }
 0x4a6   :  { %2488 = vmatpush1.bf16.msra.mxu0 %v2149_v61  ;;  %2570 = vmatpush1.bf16.msra.mxu1 %v2151_v0  ;;  %v2280_v61 = vld [vmem:[#allocation2 + $0xf78] sm:$0xff]  ;;  %v2277_v0 = vld [vmem:[#allocation2 + $0xf60] sm:$0xff] }
 0x4a7   :  { %2489 = vmatprep.subr.bf16.mxu0 %v2158_v1  ;;  %2571 = vmatprep.subr.bf16.mxu1 %v2160_v2  ;;  %v2279_v1 = vld [vmem:[#allocation2 + $0xf70] sm:$0xff]  ;;  %v2286_v2 = vld [vmem:[#allocation2 + $0xfa8] sm:$0xff] }
 0x4aa   :  { %2490 = vmatpush1.bf16.msra.mxu0 %v2157_v5  ;;  %2572 = vmatpush1.bf16.msra.mxu1 %v2159_v35  ;;  %v2288_v5 = vld [vmem:[#allocation2 + $0xfb8] sm:$0xff]  ;;  %v2285_v35 = vld [vmem:[#allocation2 + $0xfa0] sm:$0xff] }
 0x4ab   :  { %2491 = vmatprep.subr.bf16.mxu0 %v2166_v34  ;;  %2573 = vmatprep.subr.bf16.mxu1 %v2168_v32  ;;  %v2287_v34 = vld [vmem:[#allocation2 + $0xfb0] sm:$0xff]  ;;  %v2294_v32 = vld [vmem:[#allocation2 + $0xfe8] sm:$0xff] }
 0x4ae   :  { %2492 = vmatpush1.bf16.msra.mxu0 %v2165_v7  ;;  %2574 = vmatpush1.bf16.msra.mxu1 %v2167_v40  ;;  %v2296_v7 = vld [vmem:[#allocation2 + $0xff8] sm:$0xff]  ;;  %v2293_v40 = vld [vmem:[#allocation2 + $0xfe0] sm:$0xff] }
 0x4af   :  { %2502 = vmatprep.subr.bf16.mxu0 %v2174_v50  ;;  %2584 = vmatprep.subr.bf16.mxu1 %v2176_v51  ;;  %v2295_v50 = vld [vmem:[#allocation2 + $0xff0] sm:$0xff] }
 0x4b1   :  { %2494 = vmatmul.mubr.bf16.vlgmr.msra.gmra.mrb[4].mxu0 %v7628_v3  ;;  %2576 = vmatmul.mubr.bf16.vlgmr.msra.gmra.mrb[4].mxu1 %v7628_v3  ;;  %v2200_v3 = vld [vmem:[#allocation2 + $0xcf8] sm:$0xff] }
 0x4b2   :  { %2503 = vmatpush1.bf16.msra.mxu0 %v2173_v19  ;;  %2585 = vmatpush1.bf16.msra.mxu1 %v2175_v60 }
 0x4b3   :  { %2504 = vmatprep.subr.bf16.mxu0 %v2182_v27  ;;  %2586 = vmatprep.subr.bf16.mxu1 %v2184_v24 }
 0x4b4   :  { %2534 = vmatprep.mubr.bf16.mxu0 %v7632_v42  ;;  %2616 = vmatprep.mubr.bf16.mxu1 %v7632_v42  ;;  %v2205_v42 = vld [vmem:[#allocation2 + $0xd20] sm:$0xff] }
 0x4b6   :  { %2505 = vmatpush1.bf16.msra.mxu0 %v2181_v26  ;;  %2587 = vmatpush1.bf16.msra.mxu1 %v2183_v16 }
 0x4b7   :  { %2506 = vmatprep.subr.bf16.mxu0 %v2190_v4  ;;  %2588 = vmatprep.subr.bf16.mxu1 %v2192_v25 }
 0x4ba   :  { %2507 = vmatpush1.bf16.msra.mxu0 %v2189_v18  ;;  %2589 = vmatpush1.bf16.msra.mxu1 %v2191_v6 }
 0x4bb   :  { %2508 = vmatprep.subr.bf16.mxu0 %v2198_v8  ;;  %2590 = vmatprep.subr.bf16.mxu1 %v2200_v3 }
 0x4be   :  { %2509 = vmatpush1.bf16.msra.mxu0 %v2197_v9  ;;  %2591 = vmatpush1.bf16.msra.mxu1 %v2199_v11 }
 0x4bf   :  { %2510 = vmatprep.subr.bf16.mxu0 %v2206_v63  ;;  %2592 = vmatprep.subr.bf16.mxu1 %v2208_v12 }
 0x4c2   :  { %2511 = vmatpush1.bf16.msra.mxu0 %v2205_v42  ;;  %2593 = vmatpush1.bf16.msra.mxu1 %v2207_v10 }
 0x4c3   :  { %2512 = vmatprep.subr.bf16.mxu0 %v2214_v13  ;;  %2594 = vmatprep.subr.bf16.mxu1 %v2216_v14 }
 0x4c6   :  { %2513 = vmatpush1.bf16.msra.mxu0 %v2213_v15  ;;  %2595 = vmatpush1.bf16.msra.mxu1 %v2215_v20 }
 0x4c7   :  { %2514 = vmatprep.subr.bf16.mxu0 %v2222_v21  ;;  %2596 = vmatprep.subr.bf16.mxu1 %v2224_v22 }
 0x4ca   :  { %2515 = vmatpush1.bf16.msra.mxu0 %v2221_v23  ;;  %2597 = vmatpush1.bf16.msra.mxu1 %v2223_v28 }
 0x4cb   :  { %2516 = vmatprep.subr.bf16.mxu0 %v2230_v29  ;;  %2598 = vmatprep.subr.bf16.mxu1 %v2232_v30 }
 0x4ce   :  { %2517 = vmatpush1.bf16.msra.mxu0 %v2229_v31  ;;  %2599 = vmatpush1.bf16.msra.mxu1 %v2231_v33 }
 0x4cf   :  { %2518 = vmatprep.subr.bf16.mxu0 %v2238_v36  ;;  %2600 = vmatprep.subr.bf16.mxu1 %v2240_v37 }
 0x4d2   :  { %2519 = vmatpush1.bf16.msra.mxu0 %v2237_v38  ;;  %2601 = vmatpush1.bf16.msra.mxu1 %v2239_v41 }
 0x4d3   :  { %2520 = vmatprep.subr.bf16.mxu0 %v2246_v43  ;;  %2602 = vmatprep.subr.bf16.mxu1 %v2248_v44 }
 0x4d6   :  { %2521 = vmatpush1.bf16.msra.mxu0 %v2245_v47  ;;  %2603 = vmatpush1.bf16.msra.mxu1 %v2247_v48 }
 0x4d7   :  { %2522 = vmatprep.subr.bf16.mxu0 %v2254_v49  ;;  %2604 = vmatprep.subr.bf16.mxu1 %v2256_v45 }
 0x4da   :  { %2523 = vmatpush1.bf16.msra.mxu0 %v2253_v52  ;;  %2605 = vmatpush1.bf16.msra.mxu1 %v2255_v53 }
 0x4db   :  { %2524 = vmatprep.subr.bf16.mxu0 %v2262_v54  ;;  %2606 = vmatprep.subr.bf16.mxu1 %v2264_v56 }
 0x4de   :  { %2525 = vmatpush1.bf16.msra.mxu0 %v2261_v57  ;;  %2607 = vmatpush1.bf16.msra.mxu1 %v2263_v58 }
 0x4df   :  { %2526 = vmatprep.subr.bf16.mxu0 %v2270_v39  ;;  %2608 = vmatprep.subr.bf16.mxu1 %v2272_v59 }
 0x4e2   :  { %2527 = vmatpush1.bf16.msra.mxu0 %v2269_v17  ;;  %2609 = vmatpush1.bf16.msra.mxu1 %v2271_v62 }
 0x4e3   :  { %2528 = vmatprep.subr.bf16.mxu0 %v2278_v46  ;;  %2610 = vmatprep.subr.bf16.mxu1 %v2280_v61 }
 0x4e6   :  { %2529 = vmatpush1.bf16.msra.mxu0 %v2277_v0  ;;  %2611 = vmatpush1.bf16.msra.mxu1 %v2279_v1 }
 0x4e7   :  { %2530 = vmatprep.subr.bf16.mxu0 %v2286_v2  ;;  %2612 = vmatprep.subr.bf16.mxu1 %v2288_v5 }
 0x4ea   :  { %2531 = vmatpush1.bf16.msra.mxu0 %v2285_v35  ;;  %2613 = vmatpush1.bf16.msra.mxu1 %v2287_v34 }
 0x4eb   :  { %2532 = vmatprep.subr.bf16.mxu0 %v2294_v32  ;;  %2614 = vmatprep.subr.bf16.mxu1 %v2296_v7 }
 0x4ee   :  { %2533 = vmatpush1.bf16.msra.mxu0 %v2293_v40  ;;  %2615 = vmatpush1.bf16.msra.mxu1 %v2295_v50 }
 0x4f1   :  { %2535 = vmatmul.mubr.bf16.vlgmr.msra.gmra.mrb[4].mxu0 %v7640_v55  ;;  %2617 = vmatmul.mubr.bf16.vlgmr.msra.gmra.mrb[4].mxu1 %v7640_v55 }
 0x544   :  { %v2372_v51 = vpop.f32.mrb[0].mxu0  ;;  %v2454_v19 = vpop.f32.mrb[0].mxu1 }
 0x545   :  { %v2637_v60 = vrot.slane %v2372_v51, 4  ;;  %v2649_v27 = vrot.slane %v2454_v19, 4  ;;  %v2374_v24 = vpop.f32.mrb[1].mxu0  ;;  %v2456_v26 = vpop.f32.mrb[1].mxu1 }
 0x546   :  { %v2643_v16 = vrot.slane %v2374_v24, 4  ;;  %v2655_v4 = vrot.slane %v2456_v26, 4  ;;  %v2376_v25 = vpop.f32.mrb[2].mxu0  ;;  %v2458_v18 = vpop.f32.mrb[2].mxu1 }
 0x547   :  { %v2638_v6 = vadd.f32 %v2637_v60, %v2372_v51  ;;  %v2650_v8 = vadd.f32 %v2649_v27, %v2454_v19  ;;  %v2377_v3 = vpop.f32.mrb[3].mxu0  ;;  %v2459_v9 = vpop.f32.mrb[3].mxu1 }
 0x548   :  { %v2644_v11 = vadd.f32 %v2643_v16, %v2374_v24  ;;  %v2656_v63 = vadd.f32 %v2655_v4, %v2456_v26  ;;  %v8527_v16 = vlaneseq }
 0x549   :  { %v2639_v12 = vrot.slane %v2638_v6, 2  ;;  %v2651_v42 = vrot.slane %v2650_v8, 2 }
 0x54a   :  { %v2645_v10 = vrot.slane %v2644_v11, 2  ;;  %v2657_v55 = vrot.slane %v2656_v63, 2  ;;  %v7661_v9 = vshrl.u32 %v8527_v16, 7 }
 0x54b   :  { %v2640_v13 = vadd.f32 %v2639_v12, %v2638_v6  ;;  %v2652_v14 = vadd.f32 %v2651_v42, %v2650_v8 }
 0x54c   :  { %v2646_v15 = vadd.f32 %v2645_v10, %v2644_v11  ;;  %v2658_v20 = vadd.f32 %v2657_v55, %v2656_v63  ;;  %8985 = vst [vmem:[#allocation114_spill] sm:$0xff] %v7661_v9  ;;  %v7664_v11 = vsub.s32 0, %v7661_v9  ;;  %v7666_v63 = vld [vmem:[#allocation9 + $0x1] ss:$4 sm:$0xff]  ;;  %v7669_v12 = vsub.s32 2, %v7661_v9 }
 0x54d   :  { %v2641_v21 = vrot.slane %v2640_v13, 1  ;;  %v2653_v22 = vrot.slane %v2652_v14, 1  ;;  %v7672_v42 = vsub.s32 1, %v7661_v9  ;;  %v7674_v10 = vld [vmem:[#allocation9 + $0x2] ss:$4 sm:$0xff]  ;;  %v7677_v55 = vsub.s32 3, %v7661_v9 }
 0x54e   :  { %v2647_v23 = vrot.slane %v2646_v15, 1  ;;  %v2659_v28 = vrot.slane %v2658_v20, 1  ;;  %8986 = vst [vmem:[#allocation115_spill] sm:$0xff] %v7664_v11  ;;  %8987 = vst [vmem:[#allocation121_spill] sm:$0xff] %v7669_v12 }
 0x54f   :  { %v2642_v29 = vadd.f32 %v2641_v21, %v2640_v13  ;;  %v2654_v30 = vadd.f32 %v2653_v22, %v2652_v14  ;;  %8988 = vst [vmem:[#allocation123_spill] sm:$0xff] %v7672_v42  ;;  %8989 = vst [vmem:[#allocation120_spill] sm:$0xff] %v7677_v55  ;;  %v2794_v13 = vrot.slane %v7666_v63, %v7664_v11 }
 0x550   :  { %v2648_v31 = vadd.f32 %v2647_v23, %v2646_v15  ;;  %v2660_v33 = vadd.f32 %v2659_v28, %v2658_v20  ;;  %v2802_v15 = vrot.slane %v7666_v63, %v7669_v12  ;;  %v2843_v22 = vrot.slane %v7674_v10, %v7664_v11 }
 0x551   :  { %v2686_v36 = vmul.f32 0.125, %v2642_v29  ;;  %v2688_v37 = vmul.f32 0.125, %v2654_v30  ;;  %v2798_v23 = vrot.slane %v7666_v63, %v7672_v42  ;;  %v2851_v30 = vrot.slane %v7674_v10, %v7669_v12 }
 0x552   :  { %v2687_v38 = vmul.f32 0.125, %v2648_v31  ;;  %v2689_v41 = vmul.f32 0.125, %v2660_v33  ;;  %v2806_v31 = vrot.slane %v7666_v63, %v7677_v55 }
 0x553   :  { %v2694_v43 = vsub.f32 %v2372_v51, %v2686_v36  ;;  %v2696_v44 = vsub.f32 %v2454_v19, %v2688_v37 }
 0x554   :  { %v7652_v47 = vsub.f32 %v2374_v24, %v2687_v38  ;;  %v7654_v48 = vsub.f32 %v2456_v26, %v2689_v41  ;;  %v2847_v38 = vrot.slane %v7674_v10, %v7672_v42 }
 0x555   :  { %v2702_v49 = vmul.f32 %v2694_v43, %v2694_v43  ;;  %v2704_v45 = vmul.f32 %v2696_v44, %v2696_v44 }
 0x556   :  { %v2703_v52 = vmul.f32 %v7652_v47, %v7652_v47  ;;  %v2705_v53 = vmul.f32 %v7654_v48, %v7654_v48 }
 0x557   :  { %v2710_v54 = vrot.slane %v2702_v49, 4  ;;  %v2722_v56 = vrot.slane %v2704_v45, 4 }
 0x558   :  { %v2716_v57 = vrot.slane %v2703_v52, 4  ;;  %v2728_v58 = vrot.slane %v2705_v53, 4 }
 0x559   :  { %v2711_v39 = vadd.f32 %v2710_v54, %v2702_v49  ;;  %v2723_v59 = vadd.f32 %v2722_v56, %v2704_v45  ;;  %v2855_v49 = vrot.slane %v7674_v10, %v7677_v55 }
 0x55a   :  { %v2717_v17 = vadd.f32 %v2716_v57, %v2703_v52  ;;  %v2729_v62 = vadd.f32 %v2728_v58, %v2705_v53 }
 0x55b   :  { %v2712_v46 = vrot.slane %v2711_v39, 2  ;;  %v2724_v61 = vrot.slane %v2723_v59, 2 }
 0x55c   :  { %v2718_v0 = vrot.slane %v2717_v17, 2  ;;  %v2730_v1 = vrot.slane %v2729_v62, 2 }
 0x55d   :  { %v2713_v2 = vadd.f32 %v2712_v46, %v2711_v39  ;;  %v2725_v5 = vadd.f32 %v2724_v61, %v2723_v59 }
 0x55e   :  { %v2719_v35 = vadd.f32 %v2718_v0, %v2717_v17  ;;  %v2731_v34 = vadd.f32 %v2730_v1, %v2729_v62 }
 0x55f   :  { %v2714_v32 = vrot.slane %v2713_v2, 1  ;;  %v2726_v7 = vrot.slane %v2725_v5, 1 }
 0x560   :  { %v2720_v40 = vrot.slane %v2719_v35, 1  ;;  %v2732_v50 = vrot.slane %v2731_v34, 1 }
 0x561   :  { %v2715_v51 = vadd.f32 %v2714_v32, %v2713_v2  ;;  %v2727_v19 = vadd.f32 %v2726_v7, %v2725_v5 }
 0x562   :  { %v2721_v60 = vadd.f32 %v2720_v40, %v2719_v35  ;;  %v2733_v27 = vadd.f32 %v2732_v50, %v2731_v34 }
 0x563   :  { %v2758_v24 = vmul.f32 0.125, %v2715_v51  ;;  %v2760_v26 = vmul.f32 0.125, %v2727_v19 }
 0x564   :  { %v2759_v4 = vmul.f32 0.125, %v2721_v60  ;;  %v2761_v25 = vmul.f32 0.125, %v2733_v27 }
 0x565   :  { %v2766_v18 = vadd.f32 1e-05, %v2758_v24  ;;  %v2768_v6 = vadd.f32 1e-05, %v2760_v26 }
 0x566   :  { %v2767_v8 = vadd.f32 1e-05, %v2759_v4  ;;  %v2769_v3 = vadd.f32 1e-05, %v2761_v25 }
 0x567   :  { %6277 = vrsqrt.f32 %v2766_v18 }
 0x568   :  { %6279 = vrsqrt.f32 %v2768_v6 }
 0x569   :  { %6281 = vrsqrt.f32 %v2767_v8 }
 0x56a   :  { %6283 = vrsqrt.f32 %v2769_v3 }
 0x571   :  { %v6278_v14 = vpop.eup %6277 }
 0x572   :  { %v6280_v20 = vpop.eup %6279  ;;  %v2782_v21 = vmul.f32 %v6278_v14, %v2694_v43 }
 0x573   :  { %v6282_v28 = vpop.eup %6281  ;;  %v2784_v29 = vmul.f32 %v6280_v20, %v2696_v44 }
 0x574   :  { %v6284_v33 = vpop.eup %6283  ;;  %v2831_v36 = vmul.f32 %v2794_v13, %v2782_v21  ;;  %v2783_v37 = vmul.f32 %v6282_v28, %v7652_v47 }
 0x575   :  { %v2833_v41 = vmul.f32 %v2802_v15, %v2784_v29  ;;  %v2785_v43 = vmul.f32 %v6284_v33, %v7654_v48 }
 0x576   :  { %v7697_v44 = vadd.f32 %v2843_v22, %v2831_v36  ;;  %v2832_v45 = vmul.f32 %v2798_v23, %v2783_v37 }
 0x577   :  { %v7699_v52 = vadd.f32 %v2851_v30, %v2833_v41  ;;  %v2834_v53 = vmul.f32 %v2806_v31, %v2785_v43 }
 0x578   :  { %v2888_v54 = vmax.f32 %v7697_v44, 0.0  ;;  %v7702_v56 = vadd.f32 %v2847_v38, %v2832_v45 }
 0x579   :  { %v2890_v47 = vmax.f32 %v7699_v52, 0.0  ;;  %v7705_v57 = vadd.f32 %v2855_v49, %v2834_v53 }
 0x57a   :  { %v2889_v58 = vmax.f32 %v7702_v56, 0.0 }
 0x57b   :  { %v2891_v48 = vmax.f32 %v7705_v57, 0.0 }
 0x5c4   :  { %v2536_v39 = vpop.f32.mrb[4].mxu0  ;;  %v2618_v59 = vpop.f32.mrb[4].mxu1 }
 0x5c5   :  { %v2661_v17 = vrot.slane %v2536_v39, 4  ;;  %v2673_v62 = vrot.slane %v2618_v59, 4  ;;  %v2538_v46 = vpop.f32.mrb[5].mxu0  ;;  %v2620_v61 = vpop.f32.mrb[5].mxu1 }
 0x5c6   :  { %v2667_v0 = vrot.slane %v2538_v46, 4  ;;  %v2679_v1 = vrot.slane %v2620_v61, 4  ;;  %v2540_v2 = vpop.f32.mrb[6].mxu0  ;;  %v2622_v5 = vpop.f32.mrb[6].mxu1 }
 0x5c7   :  { %v2662_v35 = vadd.f32 %v2661_v17, %v2536_v39  ;;  %v2674_v34 = vadd.f32 %v2673_v62, %v2618_v59  ;;  %v2541_v32 = vpop.f32.mrb[7].mxu0  ;;  %v2623_v7 = vpop.f32.mrb[7].mxu1 }
 0x5c8   :  { %v2668_v40 = vadd.f32 %v2667_v0, %v2538_v46  ;;  %v2680_v50 = vadd.f32 %v2679_v1, %v2620_v61 }
 0x5c9   :  { %v2663_v51 = vrot.slane %v2662_v35, 2  ;;  %v2675_v19 = vrot.slane %v2674_v34, 2 }
 0x5ca   :  { %v2669_v60 = vrot.slane %v2668_v40, 2  ;;  %v2681_v27 = vrot.slane %v2680_v50, 2 }
 0x5cb   :  { %v2664_v24 = vadd.f32 %v2663_v51, %v2662_v35  ;;  %v2676_v26 = vadd.f32 %v2675_v19, %v2674_v34 }
 0x5cc   :  { %v2670_v4 = vadd.f32 %v2669_v60, %v2668_v40  ;;  %v2682_v25 = vadd.f32 %v2681_v27, %v2680_v50 }
 0x5cd   :  { %v2665_v18 = vrot.slane %v2664_v24, 1  ;;  %v2677_v6 = vrot.slane %v2676_v26, 1 }
 0x5ce   :  { %v2671_v8 = vrot.slane %v2670_v4, 1  ;;  %v2683_v3 = vrot.slane %v2682_v25, 1 }
 0x5cf   :  { %v2666_v13 = vadd.f32 %v2665_v18, %v2664_v24  ;;  %v2678_v14 = vadd.f32 %v2677_v6, %v2676_v26 }
 0x5d0   :  { %v2672_v15 = vadd.f32 %v2671_v8, %v2670_v4  ;;  %v2684_v20 = vadd.f32 %v2683_v3, %v2682_v25 }
 0x5d1   :  { %v2690_v21 = vmul.f32 0.125, %v2666_v13  ;;  %v2692_v22 = vmul.f32 0.125, %v2678_v14  ;;  %v2809_v13 = vsub.s32 4, %v7661_v9  ;;  %v2817_v14 = vsub.s32 6, %v7661_v9 }
 0x5d2   :  { %v2691_v23 = vmul.f32 0.125, %v2672_v15  ;;  %v2693_v28 = vmul.f32 0.125, %v2684_v20  ;;  %v2813_v15 = vsub.s32 5, %v7661_v9  ;;  %v2821_v20 = vsub.s32 7, %v7661_v9 }
 0x5d3   :  { %v2698_v29 = vsub.f32 %v2536_v39, %v2690_v21  ;;  %v2700_v30 = vsub.f32 %v2618_v59, %v2692_v22  ;;  %v2810_v21 = vrot.slane %v7666_v63, %v2809_v13 }
 0x5d4   :  { %v2699_v31 = vsub.f32 %v2538_v46, %v2691_v23  ;;  %v2701_v33 = vsub.f32 %v2620_v61, %v2693_v28  ;;  %v2818_v23 = vrot.slane %v7666_v63, %v2817_v14 }
 0x5d5   :  { %v2706_v36 = vmul.f32 %v2698_v29, %v2698_v29  ;;  %v2708_v37 = vmul.f32 %v2700_v30, %v2700_v30 }
 0x5d6   :  { %v2707_v38 = vmul.f32 %v2699_v31, %v2699_v31  ;;  %v2709_v41 = vmul.f32 %v2701_v33, %v2701_v33 }
 0x5d7   :  { %v2734_v43 = vrot.slane %v2706_v36, 4  ;;  %v2746_v49 = vrot.slane %v2708_v37, 4 }
 0x5d8   :  { %v2740_v45 = vrot.slane %v2707_v38, 4  ;;  %v2752_v53 = vrot.slane %v2709_v41, 4 }
 0x5d9   :  { %v2735_v17 = vadd.f32 %v2734_v43, %v2706_v36  ;;  %v2747_v62 = vadd.f32 %v2746_v49, %v2708_v37  ;;  %v2859_v37 = vrot.slane %v7674_v10, %v2809_v13  ;;  %v2867_v49 = vrot.slane %v7674_v10, %v2817_v14 }
 0x5da   :  { %v2741_v0 = vadd.f32 %v2740_v45, %v2707_v38  ;;  %v2753_v1 = vadd.f32 %v2752_v53, %v2709_v41  ;;  %v2814_v38 = vrot.slane %v7666_v63, %v2813_v15  ;;  %v2822_v45 = vrot.slane %v7666_v63, %v2821_v20 }
 0x5db   :  { %v2736_v2 = vrot.slane %v2735_v17, 2  ;;  %v2748_v5 = vrot.slane %v2747_v62, 2 }
 0x5dc   :  { %v2742_v35 = vrot.slane %v2741_v0, 2  ;;  %v2754_v34 = vrot.slane %v2753_v1, 2 }
 0x5dd   :  { %v2737_v39 = vadd.f32 %v2736_v2, %v2735_v17  ;;  %v2749_v59 = vadd.f32 %v2748_v5, %v2747_v62  ;;  %v2871_v5 = vrot.slane %v7674_v10, %v2821_v20 }
 0x5de   :  { %v2743_v46 = vadd.f32 %v2742_v35, %v2741_v0  ;;  %v2755_v61 = vadd.f32 %v2754_v34, %v2753_v1  ;;  %v2863_v0 = vrot.slane %v7674_v10, %v2813_v15 }
 0x5df   :  { %v2738_v32 = vrot.slane %v2737_v39, 1  ;;  %v2750_v7 = vrot.slane %v2749_v59, 1 }
 0x5e0   :  { %v2744_v40 = vrot.slane %v2743_v46, 1  ;;  %v2756_v50 = vrot.slane %v2755_v61, 1 }
 0x5e1   :  { %v2739_v51 = vadd.f32 %v2738_v32, %v2737_v39  ;;  %v2751_v19 = vadd.f32 %v2750_v7, %v2749_v59 }
 0x5e2   :  { %v2745_v60 = vadd.f32 %v2744_v40, %v2743_v46  ;;  %v2757_v27 = vadd.f32 %v2756_v50, %v2755_v61 }
 0x5e3   :  { %v2762_v24 = vmul.f32 0.125, %v2739_v51  ;;  %v2764_v26 = vmul.f32 0.125, %v2751_v19 }
 0x5e4   :  { %v2763_v4 = vmul.f32 0.125, %v2745_v60  ;;  %v2765_v25 = vmul.f32 0.125, %v2757_v27 }
 0x5e5   :  { %v2770_v18 = vadd.f32 1e-05, %v2762_v24  ;;  %v2772_v6 = vadd.f32 1e-05, %v2764_v26 }
 0x5e6   :  { %v2771_v8 = vadd.f32 1e-05, %v2763_v4  ;;  %v2773_v3 = vadd.f32 1e-05, %v2765_v25 }
 0x5e7   :  { %6285 = vrsqrt.f32 %v2770_v18 }
 0x5e8   :  { %6287 = vrsqrt.f32 %v2772_v6 }
 0x5e9   :  { %6289 = vrsqrt.f32 %v2771_v8 }
 0x5ea   :  { %6291 = vrsqrt.f32 %v2773_v3 }
 0x5f1   :  { %v6286_v22 = vpop.eup %6285 }
 0x5f2   :  { %v6288_v28 = vpop.eup %6287  ;;  %v2786_v36 = vmul.f32 %v6286_v22, %v2698_v29 }
 0x5f3   :  { %v6290_v41 = vpop.eup %6289  ;;  %v2788_v43 = vmul.f32 %v6288_v28, %v2700_v30 }
 0x5f4   :  { %v6292_v53 = vpop.eup %6291  ;;  %v2835_v17 = vmul.f32 %v2810_v21, %v2786_v36  ;;  %v2787_v62 = vmul.f32 %v6290_v41, %v2699_v31 }
 0x5f5   :  { %v2837_v1 = vmul.f32 %v2818_v23, %v2788_v43  ;;  %v2789_v2 = vmul.f32 %v6292_v53, %v2701_v33 }
 0x5f6   :  { %v7721_v29 = vadd.f32 %v2859_v37, %v2835_v17  ;;  %v2836_v35 = vmul.f32 %v2814_v38, %v2787_v62 }
 0x5f7   :  { %v7723_v34 = vadd.f32 %v2867_v49, %v2837_v1  ;;  %v2838_v39 = vmul.f32 %v2822_v45, %v2789_v2 }
 0x5f8   :  { %v7726_v59 = vadd.f32 %v2863_v0, %v2836_v35 }
 0x5f9   :  { %v7729_v46 = vadd.f32 %v2871_v5, %v2838_v39 }
 0x5fa   :  { %6487 = dma.done.wait [#allocation3], 16384 }
 0x5fb   :  { %6488 = vsyncadd [#allocation3], 4294950912  ;;  %v7736_v10 = vpack.c.bf16 %v2888_v54, %v2888_v54  ;;  %v7741_v61 = vpack.c.bf16 %v2889_v58, %v2889_v58  ;;  %v7746_v32 = vpack.c.bf16 %v2890_v47, %v2890_v47  ;;  %v7751_v7 = vpack.c.bf16 %v2891_v48, %v2891_v48  ;;  %2915 = sst [smem:[#allocation22]] %s6521_s28  ;;  %s2899_s0 = scalar_lea.hbm %s8512_s4, 16384 }
 0x5fc   :  { %2917 = sst [smem:[#allocation22 + $0x1]] %s6516_s25  ;;  %s6533_s24 = smov [#allocation21]  }
 0x5fd   :  { %8990 = vst [vmem:[#allocation122_spill] sm:$0xff] %v7736_v10  ;;  %8991 = vst [vmem:[#allocation129_spill] sm:$0xff] %v7746_v32  ;;  %2919 = sst [smem:[#allocation22 + $0x2]] %s6522_s30 }
 0x5fe   :  { %8992 = vst [vmem:[#allocation131_spill] sm:$0xff] %v7751_v7  ;;  %2921 = sst [smem:[#allocation22 + $0x3]] %s6518_s1 }
 0x5ff   :  { %2923 = sst [smem:[#allocation22 + $0x4]] %s6519_s19 }
 0x600   :  { %2925 = sst [smem:[#allocation22 + $0x5]] %s6520_s2 }
 0x601   :  { %2927 = sst [smem:[#allocation22 + $0x6]] %s6531_s3 }
 0x602   :  { %2929 = sst [smem:[#allocation22 + $0x7]] %s6518_s1 }
 0x603   :  { %2931 = sst [smem:[#allocation22 + $0x8]] %s6522_s30 }
 0x604   :  { %2933 = dma.general %s2899_s0, 16384, %s6717_s21, %s8541_s20, %s6533_s24, [#allocation22], %s6666_s29, 0  }
 0x605   :  { %v7768_v44 = vld [vmem:[#allocation2] sm:$0xff]  ;;  %v7770_v52 = vld [vmem:[#allocation2 + $0x8] sm:$0xff]  ;;  %v7772_v54 = vld [vmem:[#allocation2 + $0x10] sm:$0xff] }
 0x606   :  { %v7774_v56 = vld [vmem:[#allocation2 + $0x18] sm:$0xff]  ;;  %v7776_v47 = vld [vmem:[#allocation2 + $0x40] sm:$0xff]  ;;  %v7778_v57 = vld [vmem:[#allocation2 + $0x48] sm:$0xff] }
 0x607   :  { %v7780_v58 = vld [vmem:[#allocation2 + $0x50] sm:$0xff]  ;;  %v7782_v48 = vld [vmem:[#allocation2 + $0x58] sm:$0xff]  ;;  %v7784_v40 = vld [vmem:[#allocation2 + $0x80] sm:$0xff] }
 0x608   :  { %v7786_v50 = vld [vmem:[#allocation2 + $0x88] sm:$0xff]  ;;  %v7788_v51 = vld [vmem:[#allocation2 + $0x90] sm:$0xff]  ;;  %v7790_v19 = vld [vmem:[#allocation2 + $0x98] sm:$0xff] }
 0x609   :  { %v7792_v60 = vld [vmem:[#allocation2 + $0xc0] sm:$0xff]  ;;  %v7794_v27 = vld [vmem:[#allocation2 + $0xc8] sm:$0xff]  ;;  %v7796_v24 = vld [vmem:[#allocation2 + $0xd0] sm:$0xff] }
 0x60a   :  { %v7798_v26 = vld [vmem:[#allocation2 + $0xd8] sm:$0xff]  ;;  %v7800_v4 = vld [vmem:[#allocation2 + $0x100] sm:$0xff]  ;;  %v7802_v25 = vld [vmem:[#allocation2 + $0x108] sm:$0xff] }
 0x60b   :  { %v7804_v18 = vld [vmem:[#allocation2 + $0x110] sm:$0xff]  ;;  %v7806_v6 = vld [vmem:[#allocation2 + $0x118] sm:$0xff]  ;;  %v7808_v8 = vld [vmem:[#allocation2 + $0x140] sm:$0xff] }
 0x60c   :  { %v7810_v3 = vld [vmem:[#allocation2 + $0x148] sm:$0xff]  ;;  %v7812_v13 = vld [vmem:[#allocation2 + $0x150] sm:$0xff]  ;;  %v7814_v14 = vld [vmem:[#allocation2 + $0x158] sm:$0xff] }
 0x60d   :  { %v7816_v15 = vld [vmem:[#allocation2 + $0x180] sm:$0xff]  ;;  %v7818_v20 = vld [vmem:[#allocation2 + $0x188] sm:$0xff]  ;;  %v7820_v21 = vld [vmem:[#allocation2 + $0x190] sm:$0xff] }
 0x60e   :  { %v7822_v22 = vld [vmem:[#allocation2 + $0x198] sm:$0xff]  ;;  %v7824_v23 = vld [vmem:[#allocation2 + $0x1c0] sm:$0xff]  ;;  %v7826_v28 = vld [vmem:[#allocation2 + $0x1c8] sm:$0xff] }
 0x60f   :  { %v7828_v36 = vld [vmem:[#allocation2 + $0x1d0] sm:$0xff]  ;;  %v7830_v37 = vld [vmem:[#allocation2 + $0x1d8] sm:$0xff]  ;;  %v7832_v38 = vld [vmem:[#allocation2 + $0x200] sm:$0xff] }
 0x610   :  { %v7834_v41 = vld [vmem:[#allocation2 + $0x208] sm:$0xff]  ;;  %v7836_v43 = vld [vmem:[#allocation2 + $0x210] sm:$0xff]  ;;  %v7838_v49 = vld [vmem:[#allocation2 + $0x218] sm:$0xff] }
 0x611   :  { %v7840_v45 = vld [vmem:[#allocation2 + $0x240] sm:$0xff]  ;;  %v7842_v53 = vld [vmem:[#allocation2 + $0x248] sm:$0xff]  ;;  %v7844_v17 = vld [vmem:[#allocation2 + $0x250] sm:$0xff] }
 0x612   :  { %v7846_v62 = vld [vmem:[#allocation2 + $0x258] sm:$0xff]  ;;  %v7848_v0 = vld [vmem:[#allocation2 + $0x280] sm:$0xff]  ;;  %v7850_v1 = vld [vmem:[#allocation2 + $0x288] sm:$0xff] }
 0x613   :  { %v7852_v2 = vld [vmem:[#allocation2 + $0x290] sm:$0xff]  ;;  %v7854_v5 = vld [vmem:[#allocation2 + $0x298] sm:$0xff]  ;;  %v7856_v35 = vld [vmem:[#allocation2 + $0x2c0] sm:$0xff] }
 0x614   :  { %8993 = vst [vmem:[#allocation128_spill] sm:$0xff] %v7856_v35  ;;  %v7858_v39 = vld [vmem:[#allocation2 + $0x2c8] sm:$0xff]  ;;  %v7860_v16 = vld [vmem:[#allocation2 + $0x2d0] sm:$0xff]  ;;  %v7862_v63 = vld [vmem:[#allocation2 + $0x2d8] sm:$0xff] }
 0x615   :  { %8994 = vst [vmem:[#allocation130_spill] sm:$0xff] %v7860_v16  ;;  %v7864_v33 = vld [vmem:[#allocation2 + $0x300] sm:$0xff]  ;;  %v7866_v30 = vld [vmem:[#allocation2 + $0x308] sm:$0xff]  ;;  %v7868_v31 = vld [vmem:[#allocation2 + $0x310] sm:$0xff] }
 0x616   :  { %8995 = vst [vmem:[#allocation137_spill] sm:$0xff] %v7864_v33  ;;  %8996 = vst [vmem:[#allocation139_spill] sm:$0xff] %v7866_v30  ;;  %v7870_v9 = vld [vmem:[#allocation2 + $0x318] sm:$0xff]  ;;  %v7872_v55 = vld [vmem:[#allocation2 + $0x340] sm:$0xff] }
 0x617   :  { %8997 = vst [vmem:[#allocation136_spill] sm:$0xff] %v7868_v31  ;;  %8998 = vst [vmem:[#allocation138_spill] sm:$0xff] %v7870_v9  ;;  %v7874_v42 = vld [vmem:[#allocation2 + $0x348] sm:$0xff]  ;;  %v7876_v12 = vld [vmem:[#allocation2 + $0x350] sm:$0xff] }
 0x618   :  { %8999 = vst [vmem:[#allocation145_spill] sm:$0xff] %v7872_v55  ;;  %9000 = vst [vmem:[#allocation147_spill] sm:$0xff] %v7874_v42  ;;  %v7878_v11 = vld [vmem:[#allocation2 + $0x358] sm:$0xff]  ;;  %v7880_v32 = vld [vmem:[#allocation2 + $0x380] sm:$0xff] }
 0x619   :  { %9001 = vst [vmem:[#allocation144_spill] sm:$0xff] %v7876_v12  ;;  %9002 = vst [vmem:[#allocation146_spill] sm:$0xff] %v7878_v11  ;;  %v7882_v7 = vld [vmem:[#allocation2 + $0x388] sm:$0xff]  ;;  %v7884_v10 = vld [vmem:[#allocation2 + $0x390] sm:$0xff] }
 0x61a   :  { %9003 = vst [vmem:[#allocation153_spill] sm:$0xff] %v7880_v32  ;;  %9004 = vst [vmem:[#allocation155_spill] sm:$0xff] %v7882_v7  ;;  %v7886_v33 = vld [vmem:[#allocation2 + $0x398] sm:$0xff]  ;;  %v7888_v30 = vld [vmem:[#allocation2 + $0x3c0] sm:$0xff] }
 0x61b   :  { %9005 = vst [vmem:[#allocation67_spill] sm:$0xff] %v7884_v10  ;;  %9006 = vst [vmem:[#allocation152_spill] sm:$0xff] %v7886_v33  ;;  %v7890_v31 = vld [vmem:[#allocation2 + $0x3c8] sm:$0xff]  ;;  %v7892_v9 = vld [vmem:[#allocation2 + $0x3d0] sm:$0xff] }
 0x61c   :  { %9007 = vst [vmem:[#allocation154_spill] sm:$0xff] %v7888_v30  ;;  %9008 = vst [vmem:[#allocation161_spill] sm:$0xff] %v7890_v31  ;;  %v7894_v55 = vld [vmem:[#allocation2 + $0x3d8] sm:$0xff]  ;;  %v7896_v42 = vld [vmem:[#allocation2 + $0x400] sm:$0xff] }
 0x61d   :  { %9009 = vst [vmem:[#allocation163_spill] sm:$0xff] %v7892_v9  ;;  %9010 = vst [vmem:[#allocation69_spill] sm:$0xff] %v7894_v55  ;;  %v7898_v12 = vld [vmem:[#allocation2 + $0x408] sm:$0xff]  ;;  %v7900_v11 = vld [vmem:[#allocation2 + $0x410] sm:$0xff] }
 0x61e   :  { %9011 = vst [vmem:[#allocation160_spill] sm:$0xff] %v7896_v42  ;;  %9012 = vst [vmem:[#allocation162_spill] sm:$0xff] %v7898_v12  ;;  %v7902_v32 = vld [vmem:[#allocation2 + $0x418] sm:$0xff]  ;;  %v7904_v7 = vld [vmem:[#allocation2 + $0x440] sm:$0xff] }
 0x61f   :  { %9013 = vst [vmem:[#allocation169_spill] sm:$0xff] %v7900_v11  ;;  %9014 = vst [vmem:[#allocation171_spill] sm:$0xff] %v7902_v32  ;;  %v7906_v10 = vld [vmem:[#allocation2 + $0x448] sm:$0xff]  ;;  %v7908_v33 = vld [vmem:[#allocation2 + $0x450] sm:$0xff] }
 0x620   :  { %9015 = vst [vmem:[#allocation168_spill] sm:$0xff] %v7904_v7  ;;  %9016 = vst [vmem:[#allocation170_spill] sm:$0xff] %v7906_v10  ;;  %v7910_v30 = vld [vmem:[#allocation2 + $0x458] sm:$0xff]  ;;  %v7912_v31 = vld [vmem:[#allocation2 + $0x480] sm:$0xff] }
 0x621   :  { %9017 = vst [vmem:[#allocation177_spill] sm:$0xff] %v7908_v33  ;;  %9018 = vst [vmem:[#allocation179_spill] sm:$0xff] %v7910_v30  ;;  %v7914_v9 = vld [vmem:[#allocation2 + $0x488] sm:$0xff]  ;;  %v7916_v55 = vld [vmem:[#allocation2 + $0x490] sm:$0xff] }
 0x622   :  { %9019 = vst [vmem:[#allocation176_spill] sm:$0xff] %v7912_v31  ;;  %9020 = vst [vmem:[#allocation178_spill] sm:$0xff] %v7914_v9  ;;  %v7918_v42 = vld [vmem:[#allocation2 + $0x498] sm:$0xff]  ;;  %v7920_v12 = vld [vmem:[#allocation2 + $0x4c0] sm:$0xff] }
 0x623   :  { %9021 = vst [vmem:[#allocation185_spill] sm:$0xff] %v7916_v55  ;;  %9022 = vst [vmem:[#allocation187_spill] sm:$0xff] %v7918_v42  ;;  %v7922_v11 = vld [vmem:[#allocation2 + $0x4c8] sm:$0xff]  ;;  %v7924_v32 = vld [vmem:[#allocation2 + $0x4d0] sm:$0xff] }
 0x624   :  { %9023 = vst [vmem:[#allocation184_spill] sm:$0xff] %v7920_v12  ;;  %9024 = vst [vmem:[#allocation186_spill] sm:$0xff] %v7922_v11  ;;  %v7926_v7 = vld [vmem:[#allocation2 + $0x4d8] sm:$0xff]  ;;  %v7928_v10 = vld [vmem:[#allocation2 + $0x500] sm:$0xff] }
 0x625   :  { %9025 = vst [vmem:[#allocation193_spill] sm:$0xff] %v7924_v32  ;;  %9026 = vst [vmem:[#allocation195_spill] sm:$0xff] %v7926_v7  ;;  %v7930_v33 = vld [vmem:[#allocation2 + $0x508] sm:$0xff]  ;;  %v7932_v30 = vld [vmem:[#allocation2 + $0x510] sm:$0xff] }
 0x626   :  { %9027 = vst [vmem:[#allocation192_spill] sm:$0xff] %v7928_v10  ;;  %9028 = vst [vmem:[#allocation194_spill] sm:$0xff] %v7930_v33  ;;  %v7934_v31 = vld [vmem:[#allocation2 + $0x518] sm:$0xff]  ;;  %v7936_v9 = vld [vmem:[#allocation2 + $0x540] sm:$0xff] }
 0x627   :  { %9029 = vst [vmem:[#allocation201_spill] sm:$0xff] %v7932_v30  ;;  %9030 = vst [vmem:[#allocation203_spill] sm:$0xff] %v7934_v31  ;;  %v7938_v55 = vld [vmem:[#allocation2 + $0x548] sm:$0xff]  ;;  %v7940_v42 = vld [vmem:[#allocation2 + $0x550] sm:$0xff] }
 0x628   :  { %9031 = vst [vmem:[#allocation200_spill] sm:$0xff] %v7936_v9  ;;  %9032 = vst [vmem:[#allocation202_spill] sm:$0xff] %v7938_v55  ;;  %v7942_v12 = vld [vmem:[#allocation2 + $0x558] sm:$0xff]  ;;  %v7944_v11 = vld [vmem:[#allocation2 + $0x580] sm:$0xff] }
 0x629   :  { %9033 = vst [vmem:[#allocation209_spill] sm:$0xff] %v7940_v42  ;;  %9034 = vst [vmem:[#allocation211_spill] sm:$0xff] %v7942_v12  ;;  %v7946_v32 = vld [vmem:[#allocation2 + $0x588] sm:$0xff]  ;;  %v7948_v7 = vld [vmem:[#allocation2 + $0x590] sm:$0xff] }
 0x62a   :  { %9035 = vst [vmem:[#allocation208_spill] sm:$0xff] %v7944_v11  ;;  %9036 = vst [vmem:[#allocation210_spill] sm:$0xff] %v7946_v32  ;;  %v7950_v10 = vld [vmem:[#allocation2 + $0x598] sm:$0xff]  ;;  %v7952_v33 = vld [vmem:[#allocation2 + $0x5c0] sm:$0xff] }
 0x62b   :  { %9037 = vst [vmem:[#allocation217_spill] sm:$0xff] %v7948_v7  ;;  %9038 = vst [vmem:[#allocation219_spill] sm:$0xff] %v7950_v10  ;;  %v7954_v30 = vld [vmem:[#allocation2 + $0x5c8] sm:$0xff]  ;;  %v7956_v31 = vld [vmem:[#allocation2 + $0x5d0] sm:$0xff] }
 0x62c   :  { %9039 = vst [vmem:[#allocation216_spill] sm:$0xff] %v7952_v33  ;;  %9040 = vst [vmem:[#allocation218_spill] sm:$0xff] %v7954_v30  ;;  %v7958_v9 = vld [vmem:[#allocation2 + $0x5d8] sm:$0xff]  ;;  %v7960_v55 = vld [vmem:[#allocation2 + $0x600] sm:$0xff] }
 0x62d   :  { %9041 = vst [vmem:[#allocation225_spill] sm:$0xff] %v7956_v31  ;;  %9042 = vst [vmem:[#allocation227_spill] sm:$0xff] %v7958_v9  ;;  %v7962_v42 = vld [vmem:[#allocation2 + $0x608] sm:$0xff]  ;;  %v7964_v12 = vld [vmem:[#allocation2 + $0x610] sm:$0xff] }
 0x62e   :  { %9043 = vst [vmem:[#allocation224_spill] sm:$0xff] %v7960_v55  ;;  %9044 = vst [vmem:[#allocation226_spill] sm:$0xff] %v7962_v42  ;;  %v7966_v11 = vld [vmem:[#allocation2 + $0x618] sm:$0xff]  ;;  %v7968_v32 = vld [vmem:[#allocation2 + $0x640] sm:$0xff] }
 0x62f   :  { %9045 = vst [vmem:[#allocation233_spill] sm:$0xff] %v7964_v12  ;;  %9046 = vst [vmem:[#allocation235_spill] sm:$0xff] %v7966_v11  ;;  %v7970_v7 = vld [vmem:[#allocation2 + $0x648] sm:$0xff]  ;;  %v7972_v10 = vld [vmem:[#allocation2 + $0x650] sm:$0xff] }
 0x630   :  { %9047 = vst [vmem:[#allocation232_spill] sm:$0xff] %v7968_v32  ;;  %9048 = vst [vmem:[#allocation234_spill] sm:$0xff] %v7970_v7  ;;  %v7974_v33 = vld [vmem:[#allocation2 + $0x658] sm:$0xff]  ;;  %v7976_v30 = vld [vmem:[#allocation2 + $0x680] sm:$0xff] }
 0x631   :  { %9049 = vst [vmem:[#allocation241_spill] sm:$0xff] %v7972_v10  ;;  %9050 = vst [vmem:[#allocation243_spill] sm:$0xff] %v7974_v33  ;;  %v7978_v31 = vld [vmem:[#allocation2 + $0x688] sm:$0xff]  ;;  %v7980_v9 = vld [vmem:[#allocation2 + $0x690] sm:$0xff] }
 0x632   :  { %9051 = vst [vmem:[#allocation240_spill] sm:$0xff] %v7976_v30  ;;  %9052 = vst [vmem:[#allocation242_spill] sm:$0xff] %v7978_v31  ;;  %v7982_v55 = vld [vmem:[#allocation2 + $0x698] sm:$0xff]  ;;  %v7984_v42 = vld [vmem:[#allocation2 + $0x6c0] sm:$0xff] }
 0x633   :  { %9053 = vst [vmem:[#allocation249_spill] sm:$0xff] %v7980_v9  ;;  %9054 = vst [vmem:[#allocation251_spill] sm:$0xff] %v7982_v55  ;;  %v7986_v12 = vld [vmem:[#allocation2 + $0x6c8] sm:$0xff]  ;;  %v7988_v11 = vld [vmem:[#allocation2 + $0x6d0] sm:$0xff] }
 0x634   :  { %9055 = vst [vmem:[#allocation248_spill] sm:$0xff] %v7984_v42  ;;  %9056 = vst [vmem:[#allocation250_spill] sm:$0xff] %v7986_v12  ;;  %v7990_v32 = vld [vmem:[#allocation2 + $0x6d8] sm:$0xff]  ;;  %v7992_v7 = vld [vmem:[#allocation2 + $0x700] sm:$0xff] }
 0x635   :  { %9057 = vst [vmem:[#allocation257_spill] sm:$0xff] %v7988_v11  ;;  %9058 = vst [vmem:[#allocation259_spill] sm:$0xff] %v7990_v32  ;;  %v7994_v10 = vld [vmem:[#allocation2 + $0x708] sm:$0xff]  ;;  %v7996_v33 = vld [vmem:[#allocation2 + $0x710] sm:$0xff] }
 0x636   :  { %9059 = vst [vmem:[#allocation256_spill] sm:$0xff] %v7992_v7  ;;  %9060 = vst [vmem:[#allocation258_spill] sm:$0xff] %v7994_v10  ;;  %v7998_v30 = vld [vmem:[#allocation2 + $0x718] sm:$0xff]  ;;  %v8000_v31 = vld [vmem:[#allocation2 + $0x740] sm:$0xff] }
 0x637   :  { %9061 = vst [vmem:[#allocation265_spill] sm:$0xff] %v7996_v33  ;;  %9062 = vst [vmem:[#allocation267_spill] sm:$0xff] %v7998_v30  ;;  %v8002_v9 = vld [vmem:[#allocation2 + $0x748] sm:$0xff]  ;;  %v8004_v55 = vld [vmem:[#allocation2 + $0x750] sm:$0xff] }
 0x638   :  { %9063 = vst [vmem:[#allocation264_spill] sm:$0xff] %v8000_v31  ;;  %9064 = vst [vmem:[#allocation266_spill] sm:$0xff] %v8002_v9  ;;  %v8006_v42 = vld [vmem:[#allocation2 + $0x758] sm:$0xff]  ;;  %v8008_v12 = vld [vmem:[#allocation2 + $0x780] sm:$0xff] }
 0x639   :  { %9065 = vst [vmem:[#allocation273_spill] sm:$0xff] %v8004_v55  ;;  %9066 = vst [vmem:[#allocation275_spill] sm:$0xff] %v8006_v42  ;;  %v8010_v11 = vld [vmem:[#allocation2 + $0x788] sm:$0xff]  ;;  %v8012_v32 = vld [vmem:[#allocation2 + $0x790] sm:$0xff] }
 0x63a   :  { %9067 = vst [vmem:[#allocation272_spill] sm:$0xff] %v8008_v12  ;;  %9068 = vst [vmem:[#allocation274_spill] sm:$0xff] %v8010_v11  ;;  %v8014_v7 = vld [vmem:[#allocation2 + $0x798] sm:$0xff]  ;;  %v8016_v10 = vld [vmem:[#allocation2 + $0x7c0] sm:$0xff] }
 0x63b   :  { %9069 = vst [vmem:[#allocation71_spill] sm:$0xff] %v8012_v32  ;;  %9070 = vst [vmem:[#allocation73_spill] sm:$0xff] %v8014_v7  ;;  %v8018_v33 = vld [vmem:[#allocation2 + $0x7c8] sm:$0xff]  ;;  %v8020_v30 = vld [vmem:[#allocation2 + $0x7d0] sm:$0xff] }
 0x63c   :  { %9071 = vst [vmem:[#allocation68_spill] sm:$0xff] %v8016_v10  ;;  %9072 = vst [vmem:[#allocation70_spill] sm:$0xff] %v8018_v33  ;;  %v8022_v31 = vld [vmem:[#allocation2 + $0x7d8] sm:$0xff] }
 0x63d   :  { %9073 = vst [vmem:[#allocation72_spill] sm:$0xff] %v8020_v30  ;;  %9074 = vst [vmem:[#allocation75_spill] sm:$0xff] %v8022_v31 }
 0x63e   :  { %6489 = dma.done.wait [#allocation3 + $0x1], 16384 }
 0x63f   :  { %6490 = vsyncadd [#allocation3 + $0x1], 4294950912  ;;  %v9075_v55 = vmax.f32 %v7726_v59, 0.0  ;;  %3083 = sst [smem:[#allocation24]] %s6531_s3  ;;  %s6534_s4 = smov [#allocation23]  }
 0x640   :  { %3085 = sst [smem:[#allocation24 + $0x1]] %s6516_s25 }
 0x641   :  { %v3103_v12 = vpack.c.bf16 %v9075_v55, %v9075_v55  ;;  %3087 = sst [smem:[#allocation24 + $0x2]] %s6520_s2 }
 0x642   :  { %3089 = sst [smem:[#allocation24 + $0x3]] %s6518_s1 }
 0x643   :  { %3266 = vmatprep.mubr.bf16.mxu0 %v3103_v12  ;;  %3348 = vmatprep.mubr.bf16.mxu1 %v3103_v12  ;;  %3091 = sst [smem:[#allocation24 + $0x4]] %s6519_s19 }
 0x644   :  { %3093 = sst [smem:[#allocation24 + $0x5]] %s6520_s2 }
 0x645   :  { %3095 = sst [smem:[#allocation24 + $0x6]] %s6519_s19 }
 0x646   :  { %3097 = sst [smem:[#allocation24 + $0x7]] %s6518_s1 }
 0x647   :  { %3099 = sst [smem:[#allocation24 + $0x8]] %s6522_s30 }
 0x648   :  { %3101 = dma.general %s8513_s5, 8192, %s6670_s17, %s6524_s18, %s6534_s4, [#allocation24], %s6666_s29, 0  }
 0x649   :  { %v3107_v12 = vld [vmem:[#allocation2 + $0x808] sm:$0xff]  ;;  %v3109_v55 = vld [vmem:[#allocation2 + $0x818] sm:$0xff]  ;;  %v3106_v59 = vld [vmem:[#allocation2 + $0x800] sm:$0xff] }
 0x64a   :  { %3234 = vmatprep.subr.bf16.mxu0 %v3107_v12  ;;  %3316 = vmatprep.subr.bf16.mxu1 %v3109_v55  ;;  %v3108_v30 = vld [vmem:[#allocation2 + $0x810] sm:$0xff]  ;;  %v3111_v10 = vld [vmem:[#allocation2 + $0x848] sm:$0xff]  ;;  %v3113_v31 = vld [vmem:[#allocation2 + $0x858] sm:$0xff] }
 0x64b   :  { %3235 = vmatpush1.bf16.msra.mxu0 %v3106_v59  ;;  %3317 = vmatpush1.bf16.msra.mxu1 %v3108_v30  ;;  %v3110_v33 = vld [vmem:[#allocation2 + $0x840] sm:$0xff]  ;;  %v3112_v32 = vld [vmem:[#allocation2 + $0x850] sm:$0xff]  ;;  %v3115_v7 = vld [vmem:[#allocation2 + $0x888] sm:$0xff] }
 0x64c   :  { %3236 = vmatprep.subr.bf16.mxu0 %v3111_v10  ;;  %3318 = vmatprep.subr.bf16.mxu1 %v3113_v31  ;;  %v3117_v11 = vld [vmem:[#allocation2 + $0x898] sm:$0xff]  ;;  %v3114_v42 = vld [vmem:[#allocation2 + $0x880] sm:$0xff]  ;;  %v3116_v9 = vld [vmem:[#allocation2 + $0x890] sm:$0xff] }
 0x64d   :  { %v3119_v16 = vld [vmem:[#allocation2 + $0x8c8] sm:$0xff]  ;;  %v3121_v12 = vld [vmem:[#allocation2 + $0x8d8] sm:$0xff]  ;;  %v3118_v55 = vld [vmem:[#allocation2 + $0x8c0] sm:$0xff] }
 0x64e   :  { %v3120_v30 = vld [vmem:[#allocation2 + $0x8d0] sm:$0xff]  ;;  %v3123_v10 = vld [vmem:[#allocation2 + $0x908] sm:$0xff]  ;;  %v3125_v31 = vld [vmem:[#allocation2 + $0x918] sm:$0xff] }
 0x64f   :  { %3237 = vmatpush1.bf16.msra.mxu0 %v3110_v33  ;;  %3319 = vmatpush1.bf16.msra.mxu1 %v3112_v32  ;;  %v3122_v33 = vld [vmem:[#allocation2 + $0x900] sm:$0xff]  ;;  %v3124_v32 = vld [vmem:[#allocation2 + $0x910] sm:$0xff]  ;;  %v3133_v59 = vld [vmem:[#allocation2 + $0x998] sm:$0xff] }
 0x650   :  { %3238 = vmatprep.subr.bf16.mxu0 %v3115_v7  ;;  %3320 = vmatprep.subr.bf16.mxu1 %v3117_v11  ;;  %v3127_v7 = vld [vmem:[#allocation2 + $0x948] sm:$0xff]  ;;  %v3129_v11 = vld [vmem:[#allocation2 + $0x958] sm:$0xff] }
 0x653   :  { %3239 = vmatpush1.bf16.msra.mxu0 %v3114_v42  ;;  %3321 = vmatpush1.bf16.msra.mxu1 %v3116_v9  ;;  %v3126_v42 = vld [vmem:[#allocation2 + $0x940] sm:$0xff]  ;;  %v3128_v9 = vld [vmem:[#allocation2 + $0x950] sm:$0xff] }
 0x654   :  { %3240 = vmatprep.subr.bf16.mxu0 %v3119_v16  ;;  %3322 = vmatprep.subr.bf16.mxu1 %v3121_v12  ;;  %v3131_v16 = vld [vmem:[#allocation2 + $0x988] sm:$0xff]  ;;  %v3130_v12 = vld [vmem:[#allocation2 + $0x980] sm:$0xff] }
 0x657   :  { %3241 = vmatpush1.bf16.msra.mxu0 %v3118_v55  ;;  %3323 = vmatpush1.bf16.msra.mxu1 %v3120_v30  ;;  %v3132_v55 = vld [vmem:[#allocation2 + $0x990] sm:$0xff]  ;;  %v3135_v30 = vld [vmem:[#allocation2 + $0x9c8] sm:$0xff] }
 0x658   :  { %3242 = vmatprep.subr.bf16.mxu0 %v3123_v10  ;;  %3324 = vmatprep.subr.bf16.mxu1 %v3125_v31  ;;  %v3137_v10 = vld [vmem:[#allocation2 + $0x9d8] sm:$0xff]  ;;  %v3134_v31 = vld [vmem:[#allocation2 + $0x9c0] sm:$0xff] }
 0x65b   :  { %3243 = vmatpush1.bf16.msra.mxu0 %v3122_v33  ;;  %3325 = vmatpush1.bf16.msra.mxu1 %v3124_v32  ;;  %v3136_v33 = vld [vmem:[#allocation2 + $0x9d0] sm:$0xff]  ;;  %v3139_v32 = vld [vmem:[#allocation2 + $0xa08] sm:$0xff] }
 0x65c   :  { %3244 = vmatprep.subr.bf16.mxu0 %v3127_v7  ;;  %3326 = vmatprep.subr.bf16.mxu1 %v3129_v11  ;;  %v3141_v7 = vld [vmem:[#allocation2 + $0xa18] sm:$0xff]  ;;  %v3138_v11 = vld [vmem:[#allocation2 + $0xa00] sm:$0xff] }
 0x65f   :  { %3245 = vmatpush1.bf16.msra.mxu0 %v3126_v42  ;;  %3327 = vmatpush1.bf16.msra.mxu1 %v3128_v9  ;;  %v3140_v42 = vld [vmem:[#allocation2 + $0xa10] sm:$0xff]  ;;  %v3143_v9 = vld [vmem:[#allocation2 + $0xa48] sm:$0xff] }
 0x660   :  { %3246 = vmatprep.subr.bf16.mxu0 %v3131_v16  ;;  %3328 = vmatprep.subr.bf16.mxu1 %v3133_v59  ;;  %v3145_v16 = vld [vmem:[#allocation2 + $0xa58] sm:$0xff]  ;;  %v3142_v59 = vld [vmem:[#allocation2 + $0xa40] sm:$0xff] }
 0x663   :  { %3247 = vmatpush1.bf16.msra.mxu0 %v3130_v12  ;;  %3329 = vmatpush1.bf16.msra.mxu1 %v3132_v55  ;;  %v3144_v12 = vld [vmem:[#allocation2 + $0xa50] sm:$0xff]  ;;  %v3147_v55 = vld [vmem:[#allocation2 + $0xa88] sm:$0xff] }
 0x664   :  { %3248 = vmatprep.subr.bf16.mxu0 %v3135_v30  ;;  %3330 = vmatprep.subr.bf16.mxu1 %v3137_v10  ;;  %v3149_v30 = vld [vmem:[#allocation2 + $0xa98] sm:$0xff]  ;;  %v3146_v10 = vld [vmem:[#allocation2 + $0xa80] sm:$0xff] }
 0x667   :  { %3249 = vmatpush1.bf16.msra.mxu0 %v3134_v31  ;;  %3331 = vmatpush1.bf16.msra.mxu1 %v3136_v33  ;;  %v3148_v31 = vld [vmem:[#allocation2 + $0xa90] sm:$0xff]  ;;  %v3151_v33 = vld [vmem:[#allocation2 + $0xac8] sm:$0xff] }
 0x668   :  { %3250 = vmatprep.subr.bf16.mxu0 %v3139_v32  ;;  %3332 = vmatprep.subr.bf16.mxu1 %v3141_v7  ;;  %v3153_v32 = vld [vmem:[#allocation2 + $0xad8] sm:$0xff]  ;;  %v3150_v7 = vld [vmem:[#allocation2 + $0xac0] sm:$0xff] }
 0x66b   :  { %3251 = vmatpush1.bf16.msra.mxu0 %v3138_v11  ;;  %3333 = vmatpush1.bf16.msra.mxu1 %v3140_v42  ;;  %v3152_v11 = vld [vmem:[#allocation2 + $0xad0] sm:$0xff]  ;;  %v3155_v42 = vld [vmem:[#allocation2 + $0xb08] sm:$0xff] }
 0x66c   :  { %3252 = vmatprep.subr.bf16.mxu0 %v3143_v9  ;;  %3334 = vmatprep.subr.bf16.mxu1 %v3145_v16  ;;  %v3157_v9 = vld [vmem:[#allocation2 + $0xb18] sm:$0xff]  ;;  %v3154_v16 = vld [vmem:[#allocation2 + $0xb00] sm:$0xff] }
 0x66f   :  { %3253 = vmatpush1.bf16.msra.mxu0 %v3142_v59  ;;  %3335 = vmatpush1.bf16.msra.mxu1 %v3144_v12  ;;  %v3156_v59 = vld [vmem:[#allocation2 + $0xb10] sm:$0xff]  ;;  %v3159_v12 = vld [vmem:[#allocation2 + $0xb48] sm:$0xff] }
 0x670   :  { %3254 = vmatprep.subr.bf16.mxu0 %v3147_v55  ;;  %3336 = vmatprep.subr.bf16.mxu1 %v3149_v30  ;;  %v3161_v55 = vld [vmem:[#allocation2 + $0xb58] sm:$0xff]  ;;  %v3158_v30 = vld [vmem:[#allocation2 + $0xb40] sm:$0xff] }
 0x673   :  { %3255 = vmatpush1.bf16.msra.mxu0 %v3146_v10  ;;  %3337 = vmatpush1.bf16.msra.mxu1 %v3148_v31  ;;  %v3160_v10 = vld [vmem:[#allocation2 + $0xb50] sm:$0xff]  ;;  %v3163_v31 = vld [vmem:[#allocation2 + $0xb88] sm:$0xff] }
 0x674   :  { %3256 = vmatprep.subr.bf16.mxu0 %v3151_v33  ;;  %3338 = vmatprep.subr.bf16.mxu1 %v3153_v32  ;;  %v3165_v33 = vld [vmem:[#allocation2 + $0xb98] sm:$0xff]  ;;  %v3162_v32 = vld [vmem:[#allocation2 + $0xb80] sm:$0xff] }
 0x677   :  { %3257 = vmatpush1.bf16.msra.mxu0 %v3150_v7  ;;  %3339 = vmatpush1.bf16.msra.mxu1 %v3152_v11  ;;  %v3164_v7 = vld [vmem:[#allocation2 + $0xb90] sm:$0xff]  ;;  %v3167_v11 = vld [vmem:[#allocation2 + $0xbc8] sm:$0xff] }
 0x678   :  { %3258 = vmatprep.subr.bf16.mxu0 %v3155_v42  ;;  %3340 = vmatprep.subr.bf16.mxu1 %v3157_v9  ;;  %v3169_v42 = vld [vmem:[#allocation2 + $0xbd8] sm:$0xff]  ;;  %v3166_v9 = vld [vmem:[#allocation2 + $0xbc0] sm:$0xff] }
 0x67b   :  { %3259 = vmatpush1.bf16.msra.mxu0 %v3154_v16  ;;  %3341 = vmatpush1.bf16.msra.mxu1 %v3156_v59  ;;  %v3168_v16 = vld [vmem:[#allocation2 + $0xbd0] sm:$0xff]  ;;  %v3171_v59 = vld [vmem:[#allocation2 + $0xc08] sm:$0xff] }
 0x67c   :  { %3260 = vmatprep.subr.bf16.mxu0 %v3159_v12  ;;  %3342 = vmatprep.subr.bf16.mxu1 %v3161_v55  ;;  %v3173_v12 = vld [vmem:[#allocation2 + $0xc18] sm:$0xff]  ;;  %v9076_v55 = vmax.f32 %v7721_v29, 0.0  ;;  %v3174_v29 = vld [vmem:[#allocation2 + $0xc40] sm:$0xff] }
 0x67e   :  { %v3102_v35 = vpack.c.bf16 %v9076_v55, %v9076_v55  ;;  %v3184_v55 = vld [vmem:[#allocation2 + $0xcd0] sm:$0xff] }
 0x67f   :  { %3261 = vmatpush1.bf16.msra.mxu0 %v3158_v30  ;;  %3343 = vmatpush1.bf16.msra.mxu1 %v3160_v10  ;;  %v3170_v30 = vld [vmem:[#allocation2 + $0xc00] sm:$0xff]  ;;  %v3172_v10 = vld [vmem:[#allocation2 + $0xc10] sm:$0xff] }
 0x680   :  { %3262 = vmatprep.subr.bf16.mxu0 %v3163_v31  ;;  %3344 = vmatprep.subr.bf16.mxu1 %v3165_v33  ;;  %v3175_v31 = vld [vmem:[#allocation2 + $0xc48] sm:$0xff]  ;;  %v3177_v33 = vld [vmem:[#allocation2 + $0xc58] sm:$0xff] }
 0x683   :  { %3263 = vmatpush1.bf16.msra.mxu0 %v3162_v32  ;;  %3345 = vmatpush1.bf16.msra.mxu1 %v3164_v7  ;;  %v9077_v32 = vmax.f32 %v7729_v46, 0.0  ;;  %v3180_v46 = vld [vmem:[#allocation2 + $0xc90] sm:$0xff] }
 0x684   :  { %3264 = vmatprep.subr.bf16.mxu0 %v3167_v11  ;;  %3346 = vmatprep.subr.bf16.mxu1 %v3169_v42  ;;  %v3176_v11 = vld [vmem:[#allocation2 + $0xc50] sm:$0xff]  ;;  %v3179_v42 = vld [vmem:[#allocation2 + $0xc88] sm:$0xff] }
 0x685   :  { %v3105_v7 = vpack.c.bf16 %v9077_v32, %v9077_v32  ;;  %v3191_v32 = vld [vmem:[#allocation2 + $0xd48] sm:$0xff] }
 0x687   :  { %3265 = vmatpush1.bf16.msra.mxu0 %v3166_v9  ;;  %3347 = vmatpush1.bf16.msra.mxu1 %v3168_v16  ;;  %v3181_v9 = vld [vmem:[#allocation2 + $0xc98] sm:$0xff]  ;;  %v3178_v16 = vld [vmem:[#allocation2 + $0xc80] sm:$0xff] }
 0x688   :  { %3275 = vmatprep.subr.bf16.mxu0 %v3171_v59  ;;  %3357 = vmatprep.subr.bf16.mxu1 %v3173_v12  ;;  %v3183_v59 = vld [vmem:[#allocation2 + $0xcc8] sm:$0xff]  ;;  %v3185_v12 = vld [vmem:[#allocation2 + $0xcd8] sm:$0xff] }
 0x68a   :  { %3267 = vmatmul.mubr.bf16.vlgmr.msra.gmra.mrb[8].mxu0 %v3102_v35  ;;  %3349 = vmatmul.mubr.bf16.vlgmr.msra.gmra.mrb[8].mxu1 %v3102_v35  ;;  %v3182_v35 = vld [vmem:[#allocation2 + $0xcc0] sm:$0xff] }
 0x68b   :  { %3276 = vmatpush1.bf16.msra.mxu0 %v3170_v30  ;;  %3358 = vmatpush1.bf16.msra.mxu1 %v3172_v10  ;;  %v3187_v30 = vld [vmem:[#allocation2 + $0xd08] sm:$0xff]  ;;  %v3189_v10 = vld [vmem:[#allocation2 + $0xd18] sm:$0xff] }
 0x68c   :  { %3277 = vmatprep.subr.bf16.mxu0 %v3175_v31  ;;  %3359 = vmatprep.subr.bf16.mxu1 %v3177_v33  ;;  %v3186_v31 = vld [vmem:[#allocation2 + $0xd00] sm:$0xff]  ;;  %v3188_v33 = vld [vmem:[#allocation2 + $0xd10] sm:$0xff] }
 0x68d   :  { %3307 = vmatprep.mubr.bf16.mxu0 %v3105_v7  ;;  %3389 = vmatprep.mubr.bf16.mxu1 %v3105_v7  ;;  %v3193_v7 = vld [vmem:[#allocation2 + $0xd58] sm:$0xff] }
 0x68f   :  { %3278 = vmatpush1.bf16.msra.mxu0 %v3174_v29  ;;  %3360 = vmatpush1.bf16.msra.mxu1 %v3176_v11  ;;  %v3190_v29 = vld [vmem:[#allocation2 + $0xd40] sm:$0xff]  ;;  %v3192_v11 = vld [vmem:[#allocation2 + $0xd50] sm:$0xff] }
 0x690   :  { %3279 = vmatprep.subr.bf16.mxu0 %v3179_v42  ;;  %3361 = vmatprep.subr.bf16.mxu1 %v3181_v9  ;;  %v3195_v42 = vld [vmem:[#allocation2 + $0xd88] sm:$0xff]  ;;  %v3197_v9 = vld [vmem:[#allocation2 + $0xd98] sm:$0xff] }
 0x693   :  { %3280 = vmatpush1.bf16.msra.mxu0 %v3178_v16  ;;  %3362 = vmatpush1.bf16.msra.mxu1 %v3180_v46  ;;  %v3194_v16 = vld [vmem:[#allocation2 + $0xd80] sm:$0xff]  ;;  %v3196_v46 = vld [vmem:[#allocation2 + $0xd90] sm:$0xff] }
 0x694   :  { %3281 = vmatprep.subr.bf16.mxu0 %v3183_v59  ;;  %3363 = vmatprep.subr.bf16.mxu1 %v3185_v12  ;;  %v3199_v59 = vld [vmem:[#allocation2 + $0xdc8] sm:$0xff]  ;;  %v3201_v12 = vld [vmem:[#allocation2 + $0xdd8] sm:$0xff] }
 0x697   :  { %3282 = vmatpush1.bf16.msra.mxu0 %v3182_v35  ;;  %3364 = vmatpush1.bf16.msra.mxu1 %v3184_v55  ;;  %v3198_v35 = vld [vmem:[#allocation2 + $0xdc0] sm:$0xff]  ;;  %v3200_v55 = vld [vmem:[#allocation2 + $0xdd0] sm:$0xff] }
 0x698   :  { %3283 = vmatprep.subr.bf16.mxu0 %v3187_v30  ;;  %3365 = vmatprep.subr.bf16.mxu1 %v3189_v10  ;;  %v3203_v30 = vld [vmem:[#allocation2 + $0xe08] sm:$0xff]  ;;  %v3205_v10 = vld [vmem:[#allocation2 + $0xe18] sm:$0xff] }
 0x69b   :  { %3284 = vmatpush1.bf16.msra.mxu0 %v3186_v31  ;;  %3366 = vmatpush1.bf16.msra.mxu1 %v3188_v33  ;;  %v3202_v31 = vld [vmem:[#allocation2 + $0xe00] sm:$0xff]  ;;  %v3204_v33 = vld [vmem:[#allocation2 + $0xe10] sm:$0xff] }
 0x69c   :  { %3285 = vmatprep.subr.bf16.mxu0 %v3191_v32  ;;  %3367 = vmatprep.subr.bf16.mxu1 %v3193_v7  ;;  %v3207_v32 = vld [vmem:[#allocation2 + $0xe48] sm:$0xff]  ;;  %v3209_v7 = vld [vmem:[#allocation2 + $0xe58] sm:$0xff] }
 0x69f   :  { %3286 = vmatpush1.bf16.msra.mxu0 %v3190_v29  ;;  %3368 = vmatpush1.bf16.msra.mxu1 %v3192_v11  ;;  %v3206_v29 = vld [vmem:[#allocation2 + $0xe40] sm:$0xff]  ;;  %v3208_v11 = vld [vmem:[#allocation2 + $0xe50] sm:$0xff] }
 0x6a0   :  { %3287 = vmatprep.subr.bf16.mxu0 %v3195_v42  ;;  %3369 = vmatprep.subr.bf16.mxu1 %v3197_v9  ;;  %v3211_v42 = vld [vmem:[#allocation2 + $0xe88] sm:$0xff]  ;;  %v3213_v9 = vld [vmem:[#allocation2 + $0xe98] sm:$0xff] }
 0x6a3   :  { %3288 = vmatpush1.bf16.msra.mxu0 %v3194_v16  ;;  %3370 = vmatpush1.bf16.msra.mxu1 %v3196_v46  ;;  %v3210_v16 = vld [vmem:[#allocation2 + $0xe80] sm:$0xff]  ;;  %v3212_v46 = vld [vmem:[#allocation2 + $0xe90] sm:$0xff] }
 0x6a4   :  { %3289 = vmatprep.subr.bf16.mxu0 %v3199_v59  ;;  %3371 = vmatprep.subr.bf16.mxu1 %v3201_v12  ;;  %v3215_v59 = vld [vmem:[#allocation2 + $0xec8] sm:$0xff]  ;;  %v3217_v12 = vld [vmem:[#allocation2 + $0xed8] sm:$0xff] }
 0x6a7   :  { %3290 = vmatpush1.bf16.msra.mxu0 %v3198_v35  ;;  %3372 = vmatpush1.bf16.msra.mxu1 %v3200_v55  ;;  %v3214_v35 = vld [vmem:[#allocation2 + $0xec0] sm:$0xff]  ;;  %v3216_v55 = vld [vmem:[#allocation2 + $0xed0] sm:$0xff] }
 0x6a8   :  { %3291 = vmatprep.subr.bf16.mxu0 %v3203_v30  ;;  %3373 = vmatprep.subr.bf16.mxu1 %v3205_v10  ;;  %v3219_v30 = vld [vmem:[#allocation2 + $0xf08] sm:$0xff]  ;;  %v3221_v10 = vld [vmem:[#allocation2 + $0xf18] sm:$0xff] }
 0x6ab   :  { %3292 = vmatpush1.bf16.msra.mxu0 %v3202_v31  ;;  %3374 = vmatpush1.bf16.msra.mxu1 %v3204_v33  ;;  %v3218_v31 = vld [vmem:[#allocation2 + $0xf00] sm:$0xff]  ;;  %v3220_v33 = vld [vmem:[#allocation2 + $0xf10] sm:$0xff] }
 0x6ac   :  { %3293 = vmatprep.subr.bf16.mxu0 %v3207_v32  ;;  %3375 = vmatprep.subr.bf16.mxu1 %v3209_v7  ;;  %v3223_v32 = vld [vmem:[#allocation2 + $0xf48] sm:$0xff]  ;;  %v3225_v7 = vld [vmem:[#allocation2 + $0xf58] sm:$0xff] }
 0x6af   :  { %3294 = vmatpush1.bf16.msra.mxu0 %v3206_v29  ;;  %3376 = vmatpush1.bf16.msra.mxu1 %v3208_v11  ;;  %v3222_v29 = vld [vmem:[#allocation2 + $0xf40] sm:$0xff]  ;;  %v3224_v11 = vld [vmem:[#allocation2 + $0xf50] sm:$0xff] }
 0x6b0   :  { %3295 = vmatprep.subr.bf16.mxu0 %v3211_v42  ;;  %3377 = vmatprep.subr.bf16.mxu1 %v3213_v9  ;;  %v3227_v42 = vld [vmem:[#allocation2 + $0xf88] sm:$0xff]  ;;  %v3229_v9 = vld [vmem:[#allocation2 + $0xf98] sm:$0xff] }
 0x6b3   :  { %3296 = vmatpush1.bf16.msra.mxu0 %v3210_v16  ;;  %3378 = vmatpush1.bf16.msra.mxu1 %v3212_v46  ;;  %v3226_v16 = vld [vmem:[#allocation2 + $0xf80] sm:$0xff]  ;;  %v3228_v46 = vld [vmem:[#allocation2 + $0xf90] sm:$0xff] }
 0x6b4   :  { %3297 = vmatprep.subr.bf16.mxu0 %v3215_v59  ;;  %3379 = vmatprep.subr.bf16.mxu1 %v3217_v12  ;;  %v3231_v59 = vld [vmem:[#allocation2 + $0xfc8] sm:$0xff]  ;;  %v3233_v12 = vld [vmem:[#allocation2 + $0xfd8] sm:$0xff] }
 0x6b7   :  { %3298 = vmatpush1.bf16.msra.mxu0 %v3214_v35  ;;  %3380 = vmatpush1.bf16.msra.mxu1 %v3216_v55  ;;  %v3230_v35 = vld [vmem:[#allocation2 + $0xfc0] sm:$0xff]  ;;  %v3232_v55 = vld [vmem:[#allocation2 + $0xfd0] sm:$0xff] }
 0x6b8   :  { %3299 = vmatprep.subr.bf16.mxu0 %v3219_v30  ;;  %3381 = vmatprep.subr.bf16.mxu1 %v3221_v10  ;;  %v9078_v30 = vmax.f32 %v7723_v34, 0.0  ;;  %v9079_v34 = vld [vmem:[#allocation128_spill] sm:$0xff] }
 0x6ba   :  { %v3104_v10 = vpack.c.bf16 %v9078_v30, %v9078_v30  ;;  %v9141_v30 = vld [vmem:[#allocation240_spill] sm:$0xff] }
 0x6bb   :  { %3300 = vmatpush1.bf16.msra.mxu0 %v3218_v31  ;;  %3382 = vmatpush1.bf16.msra.mxu1 %v3220_v33  ;;  %v9127_v31 = vld [vmem:[#allocation218_spill] sm:$0xff]  ;;  %v9128_v33 = vld [vmem:[#allocation227_spill] sm:$0xff] }
 0x6bc   :  { %3301 = vmatprep.subr.bf16.mxu0 %v3223_v32  ;;  %3383 = vmatprep.subr.bf16.mxu1 %v3225_v7  ;;  %v9129_v32 = vld [vmem:[#allocation216_spill] sm:$0xff]  ;;  %v9130_v7 = vld [vmem:[#allocation225_spill] sm:$0xff] }
 0x6bf   :  { %3302 = vmatpush1.bf16.msra.mxu0 %v3222_v29  ;;  %3384 = vmatpush1.bf16.msra.mxu1 %v3224_v11  ;;  %v9131_v29 = vld [vmem:[#allocation226_spill] sm:$0xff]  ;;  %v9132_v11 = vld [vmem:[#allocation235_spill] sm:$0xff] }
 0x6c0   :  { %3303 = vmatprep.subr.bf16.mxu0 %v3227_v42  ;;  %3385 = vmatprep.subr.bf16.mxu1 %v3229_v9  ;;  %v9133_v42 = vld [vmem:[#allocation224_spill] sm:$0xff]  ;;  %v9134_v9 = vld [vmem:[#allocation233_spill] sm:$0xff] }
 0x6c3   :  { %3304 = vmatpush1.bf16.msra.mxu0 %v3226_v16  ;;  %3386 = vmatpush1.bf16.msra.mxu1 %v3228_v46  ;;  %v9135_v16 = vld [vmem:[#allocation234_spill] sm:$0xff]  ;;  %v9136_v46 = vld [vmem:[#allocation243_spill] sm:$0xff] }
 0x6c4   :  { %3305 = vmatprep.subr.bf16.mxu0 %v3231_v59  ;;  %3387 = vmatprep.subr.bf16.mxu1 %v3233_v12  ;;  %v9137_v59 = vld [vmem:[#allocation232_spill] sm:$0xff]  ;;  %v9138_v12 = vld [vmem:[#allocation241_spill] sm:$0xff] }
 0x6c7   :  { %3306 = vmatpush1.bf16.msra.mxu0 %v3230_v35  ;;  %3388 = vmatpush1.bf16.msra.mxu1 %v3232_v55  ;;  %v9139_v35 = vld [vmem:[#allocation242_spill] sm:$0xff]  ;;  %v9140_v55 = vld [vmem:[#allocation251_spill] sm:$0xff] }
 0x6c8   :  { %3398 = vmatprep.subr.bf16.mxu0 %v7770_v52  ;;  %3480 = vmatprep.subr.bf16.mxu1 %v7774_v56  ;;  %v9082_v52 = vld [vmem:[#allocation138_spill] sm:$0xff]  ;;  %v9084_v56 = vld [vmem:[#allocation136_spill] sm:$0xff] }
 0x6ca   :  { %3308 = vmatmul.mubr.bf16.vlgmr.msra.gmra.mrb[8].mxu0 %v3104_v10  ;;  %3390 = vmatmul.mubr.bf16.vlgmr.msra.gmra.mrb[8].mxu1 %v3104_v10  ;;  %v9142_v10 = vld [vmem:[#allocation249_spill] sm:$0xff] }
 0x6cb   :  { %3399 = vmatpush1.bf16.msra.mxu0 %v7768_v44  ;;  %3481 = vmatpush1.bf16.msra.mxu1 %v7772_v54  ;;  %v9081_v44 = vld [vmem:[#allocation139_spill] sm:$0xff]  ;;  %v9083_v54 = vld [vmem:[#allocation137_spill] sm:$0xff] }
 0x6cc   :  { %3400 = vmatprep.subr.bf16.mxu0 %v7778_v57  ;;  %3482 = vmatprep.subr.bf16.mxu1 %v7782_v48  ;;  %v9086_v57 = vld [vmem:[#allocation146_spill] sm:$0xff]  ;;  %v9088_v48 = vld [vmem:[#allocation144_spill] sm:$0xff] }
 0x6cd   :  { %3430 = vmatprep.mubr.bf16.mxu0 %v7741_v61  ;;  %3512 = vmatprep.mubr.bf16.mxu1 %v7741_v61  ;;  %v9080_v61 = vld [vmem:[#allocation130_spill] sm:$0xff] }
 0x6cf   :  { %3401 = vmatpush1.bf16.msra.mxu0 %v7776_v47  ;;  %3483 = vmatpush1.bf16.msra.mxu1 %v7780_v58  ;;  %v9085_v47 = vld [vmem:[#allocation147_spill] sm:$0xff]  ;;  %v9087_v58 = vld [vmem:[#allocation145_spill] sm:$0xff] }
 0x6d0   :  { %3402 = vmatprep.subr.bf16.mxu0 %v7786_v50  ;;  %3484 = vmatprep.subr.bf16.mxu1 %v7790_v19  ;;  %v9091_v50 = vld [vmem:[#allocation153_spill] sm:$0xff] }
 0x6d1   :  { %v9093_v19 = vld [vmem:[#allocation161_spill] sm:$0xff] }
 0x6d3   :  { %3403 = vmatpush1.bf16.msra.mxu0 %v7784_v40  ;;  %3485 = vmatpush1.bf16.msra.mxu1 %v7788_v51  ;;  %v9090_v40 = vld [vmem:[#allocation152_spill] sm:$0xff]  ;;  %v9092_v51 = vld [vmem:[#allocation67_spill] sm:$0xff] }
 0x6d4   :  { %3404 = vmatprep.subr.bf16.mxu0 %v7794_v27  ;;  %3486 = vmatprep.subr.bf16.mxu1 %v7798_v26  ;;  %v9095_v27 = vld [vmem:[#allocation154_spill] sm:$0xff] }
 0x6d5   :  { %v9097_v26 = vld [vmem:[#allocation162_spill] sm:$0xff] }
 0x6d7   :  { %3405 = vmatpush1.bf16.msra.mxu0 %v7792_v60  ;;  %3487 = vmatpush1.bf16.msra.mxu1 %v7796_v24  ;;  %v9094_v60 = vld [vmem:[#allocation69_spill] sm:$0xff]  ;;  %v9096_v24 = vld [vmem:[#allocation163_spill] sm:$0xff] }
 0x6d8   :  { %3406 = vmatprep.subr.bf16.mxu0 %v7802_v25  ;;  %3488 = vmatprep.subr.bf16.mxu1 %v7806_v6  ;;  %v9099_v25 = vld [vmem:[#allocation122_spill] sm:$0xff]  ;;  %v9101_v6 = vld [vmem:[#allocation169_spill] sm:$0xff] }
 0x6db   :  { %3407 = vmatpush1.bf16.msra.mxu0 %v7800_v4  ;;  %3489 = vmatpush1.bf16.msra.mxu1 %v7804_v18  ;;  %v9098_v4 = vld [vmem:[#allocation171_spill] sm:$0xff]  ;;  %v9100_v18 = vld [vmem:[#allocation160_spill] sm:$0xff] }
 0x6dc   :  { %3408 = vmatprep.subr.bf16.mxu0 %v7810_v3  ;;  %3490 = vmatprep.subr.bf16.mxu1 %v7814_v14  ;;  %v9103_v3 = vld [vmem:[#allocation179_spill] sm:$0xff]  ;;  %v9105_v14 = vld [vmem:[#allocation168_spill] sm:$0xff] }
 0x6df   :  { %3409 = vmatpush1.bf16.msra.mxu0 %v7808_v8  ;;  %3491 = vmatpush1.bf16.msra.mxu1 %v7812_v13  ;;  %v9102_v8 = vld [vmem:[#allocation170_spill] sm:$0xff]  ;;  %v9104_v13 = vld [vmem:[#allocation131_spill] sm:$0xff] }
 0x6e0   :  { %3410 = vmatprep.subr.bf16.mxu0 %v7818_v20  ;;  %3492 = vmatprep.subr.bf16.mxu1 %v7822_v22  ;;  %v9107_v20 = vld [vmem:[#allocation178_spill] sm:$0xff]  ;;  %v9109_v22 = vld [vmem:[#allocation176_spill] sm:$0xff] }
 0x6e3   :  { %3411 = vmatpush1.bf16.msra.mxu0 %v7816_v15  ;;  %3493 = vmatpush1.bf16.msra.mxu1 %v7820_v21  ;;  %v9106_v15 = vld [vmem:[#allocation177_spill] sm:$0xff]  ;;  %v9108_v21 = vld [vmem:[#allocation187_spill] sm:$0xff] }
 0x6e4   :  { %3412 = vmatprep.subr.bf16.mxu0 %v7826_v28  ;;  %3494 = vmatprep.subr.bf16.mxu1 %v7830_v37  ;;  %v9111_v28 = vld [vmem:[#allocation186_spill] sm:$0xff]  ;;  %v9113_v37 = vld [vmem:[#allocation184_spill] sm:$0xff] }
 0x6e7   :  { %3413 = vmatpush1.bf16.msra.mxu0 %v7824_v23  ;;  %3495 = vmatpush1.bf16.msra.mxu1 %v7828_v36  ;;  %v9110_v23 = vld [vmem:[#allocation185_spill] sm:$0xff]  ;;  %v9112_v36 = vld [vmem:[#allocation195_spill] sm:$0xff] }
 0x6e8   :  { %3414 = vmatprep.subr.bf16.mxu0 %v7834_v41  ;;  %3496 = vmatprep.subr.bf16.mxu1 %v7838_v49  ;;  %v9115_v41 = vld [vmem:[#allocation194_spill] sm:$0xff]  ;;  %v9117_v49 = vld [vmem:[#allocation192_spill] sm:$0xff] }
 0x6eb   :  { %3415 = vmatpush1.bf16.msra.mxu0 %v7832_v38  ;;  %3497 = vmatpush1.bf16.msra.mxu1 %v7836_v43  ;;  %v9114_v38 = vld [vmem:[#allocation193_spill] sm:$0xff]  ;;  %v9116_v43 = vld [vmem:[#allocation203_spill] sm:$0xff] }
 0x6ec   :  { %3416 = vmatprep.subr.bf16.mxu0 %v7842_v53  ;;  %3498 = vmatprep.subr.bf16.mxu1 %v7846_v62  ;;  %v9119_v53 = vld [vmem:[#allocation202_spill] sm:$0xff]  ;;  %v9121_v62 = vld [vmem:[#allocation200_spill] sm:$0xff] }
 0x6ef   :  { %3417 = vmatpush1.bf16.msra.mxu0 %v7840_v45  ;;  %3499 = vmatpush1.bf16.msra.mxu1 %v7844_v17  ;;  %v9118_v45 = vld [vmem:[#allocation201_spill] sm:$0xff]  ;;  %v9120_v17 = vld [vmem:[#allocation211_spill] sm:$0xff] }
 0x6f0   :  { %3418 = vmatprep.subr.bf16.mxu0 %v7850_v1  ;;  %3500 = vmatprep.subr.bf16.mxu1 %v7854_v5  ;;  %v9123_v1 = vld [vmem:[#allocation210_spill] sm:$0xff]  ;;  %v9125_v5 = vld [vmem:[#allocation208_spill] sm:$0xff] }
 0x6f3   :  { %3419 = vmatpush1.bf16.msra.mxu0 %v7848_v0  ;;  %3501 = vmatpush1.bf16.msra.mxu1 %v7852_v2  ;;  %v9122_v0 = vld [vmem:[#allocation209_spill] sm:$0xff]  ;;  %v9124_v2 = vld [vmem:[#allocation219_spill] sm:$0xff] }
 0x6f4   :  { %3420 = vmatprep.subr.bf16.mxu0 %v7858_v39  ;;  %3502 = vmatprep.subr.bf16.mxu1 %v7862_v63  ;;  %v9089_v63 = vld [vmem:[#allocation155_spill] sm:$0xff]  ;;  %v9126_v39 = vld [vmem:[#allocation217_spill] sm:$0xff] }
 0x6f7   :  { %3421 = vmatpush1.bf16.msra.mxu0 %v9079_v34  ;;  %3503 = vmatpush1.bf16.msra.mxu1 %v9080_v61  ;;  %v9143_v34 = vld [vmem:[#allocation250_spill] sm:$0xff]  ;;  %v9144_v61 = vld [vmem:[#allocation259_spill] sm:$0xff] }
 0x6f8   :  { %3422 = vmatprep.subr.bf16.mxu0 %v9081_v44  ;;  %3504 = vmatprep.subr.bf16.mxu1 %v9082_v52  ;;  %v9145_v44 = vld [vmem:[#allocation248_spill] sm:$0xff]  ;;  %v9146_v52 = vld [vmem:[#allocation257_spill] sm:$0xff] }
 0x6fb   :  { %3423 = vmatpush1.bf16.msra.mxu0 %v9083_v54  ;;  %3505 = vmatpush1.bf16.msra.mxu1 %v9084_v56  ;;  %v9147_v54 = vld [vmem:[#allocation258_spill] sm:$0xff]  ;;  %v9148_v56 = vld [vmem:[#allocation267_spill] sm:$0xff] }
 0x6fc   :  { %3424 = vmatprep.subr.bf16.mxu0 %v9085_v47  ;;  %3506 = vmatprep.subr.bf16.mxu1 %v9086_v57  ;;  %v9149_v47 = vld [vmem:[#allocation256_spill] sm:$0xff]  ;;  %v9150_v57 = vld [vmem:[#allocation265_spill] sm:$0xff] }
 0x6ff   :  { %3425 = vmatpush1.bf16.msra.mxu0 %v9087_v58  ;;  %3507 = vmatpush1.bf16.msra.mxu1 %v9088_v48  ;;  %v9151_v58 = vld [vmem:[#allocation266_spill] sm:$0xff]  ;;  %v9152_v48 = vld [vmem:[#allocation275_spill] sm:$0xff] }
 0x700   :  { %3426 = vmatprep.subr.bf16.mxu0 %v9089_v63  ;;  %3508 = vmatprep.subr.bf16.mxu1 %v9090_v40  ;;  %v9153_v63 = vld [vmem:[#allocation264_spill] sm:$0xff]  ;;  %v9154_v40 = vld [vmem:[#allocation273_spill] sm:$0xff] }
 0x703   :  { %3427 = vmatpush1.bf16.msra.mxu0 %v9091_v50  ;;  %3509 = vmatpush1.bf16.msra.mxu1 %v9092_v51  ;;  %v9155_v50 = vld [vmem:[#allocation274_spill] sm:$0xff]  ;;  %v9156_v51 = vld [vmem:[#allocation73_spill] sm:$0xff] }
 0x704   :  { %3428 = vmatprep.subr.bf16.mxu0 %v9093_v19  ;;  %3510 = vmatprep.subr.bf16.mxu1 %v9094_v60  ;;  %v9157_v19 = vld [vmem:[#allocation272_spill] sm:$0xff]  ;;  %v9158_v60 = vld [vmem:[#allocation71_spill] sm:$0xff] }
 0x707   :  { %3429 = vmatpush1.bf16.msra.mxu0 %v9095_v27  ;;  %3511 = vmatpush1.bf16.msra.mxu1 %v9096_v24  ;;  %v9159_v27 = vld [vmem:[#allocation70_spill] sm:$0xff]  ;;  %v9160_v24 = vld [vmem:[#allocation75_spill] sm:$0xff] }
 0x708   :  { %3439 = vmatprep.subr.bf16.mxu0 %v9097_v26  ;;  %3521 = vmatprep.subr.bf16.mxu1 %v9098_v4  ;;  %v9161_v26 = vld [vmem:[#allocation68_spill] sm:$0xff] }
 0x709   :  { %v9162_v4 = vld [vmem:[#allocation72_spill] sm:$0xff] }
 0x70a   :  { %3431 = vmatmul.mubr.bf16.vlgmr.msra.gmra.mrb[8].mxu0 %v9099_v25  ;;  %3513 = vmatmul.mubr.bf16.vlgmr.msra.gmra.mrb[8].mxu1 %v9099_v25  ;;  %v9163_v25 = vld [vmem:[#allocation129_spill] sm:$0xff] }
 0x70b   :  { %3440 = vmatpush1.bf16.msra.mxu0 %v9100_v18  ;;  %3522 = vmatpush1.bf16.msra.mxu1 %v9101_v6 }
 0x70c   :  { %3441 = vmatprep.subr.bf16.mxu0 %v9102_v8  ;;  %3523 = vmatprep.subr.bf16.mxu1 %v9103_v3 }
 0x70d   :  { %3471 = vmatprep.mubr.bf16.mxu0 %v9104_v13  ;;  %3553 = vmatprep.mubr.bf16.mxu1 %v9104_v13 }
 0x70f   :  { %3442 = vmatpush1.bf16.msra.mxu0 %v9105_v14  ;;  %3524 = vmatpush1.bf16.msra.mxu1 %v9106_v15 }
 0x710   :  { %3443 = vmatprep.subr.bf16.mxu0 %v9107_v20  ;;  %3525 = vmatprep.subr.bf16.mxu1 %v9108_v21 }
 0x713   :  { %3444 = vmatpush1.bf16.msra.mxu0 %v9109_v22  ;;  %3526 = vmatpush1.bf16.msra.mxu1 %v9110_v23 }
 0x714   :  { %3445 = vmatprep.subr.bf16.mxu0 %v9111_v28  ;;  %3527 = vmatprep.subr.bf16.mxu1 %v9112_v36 }
 0x717   :  { %3446 = vmatpush1.bf16.msra.mxu0 %v9113_v37  ;;  %3528 = vmatpush1.bf16.msra.mxu1 %v9114_v38 }
 0x718   :  { %3447 = vmatprep.subr.bf16.mxu0 %v9115_v41  ;;  %3529 = vmatprep.subr.bf16.mxu1 %v9116_v43 }
 0x71b   :  { %3448 = vmatpush1.bf16.msra.mxu0 %v9117_v49  ;;  %3530 = vmatpush1.bf16.msra.mxu1 %v9118_v45 }
 0x71c   :  { %3449 = vmatprep.subr.bf16.mxu0 %v9119_v53  ;;  %3531 = vmatprep.subr.bf16.mxu1 %v9120_v17 }
 0x71f   :  { %3450 = vmatpush1.bf16.msra.mxu0 %v9121_v62  ;;  %3532 = vmatpush1.bf16.msra.mxu1 %v9122_v0 }
 0x720   :  { %3451 = vmatprep.subr.bf16.mxu0 %v9123_v1  ;;  %3533 = vmatprep.subr.bf16.mxu1 %v9124_v2 }
 0x723   :  { %3452 = vmatpush1.bf16.msra.mxu0 %v9125_v5  ;;  %3534 = vmatpush1.bf16.msra.mxu1 %v9126_v39 }
 0x724   :  { %3453 = vmatprep.subr.bf16.mxu0 %v9127_v31  ;;  %3535 = vmatprep.subr.bf16.mxu1 %v9128_v33 }
 0x727   :  { %3454 = vmatpush1.bf16.msra.mxu0 %v9129_v32  ;;  %3536 = vmatpush1.bf16.msra.mxu1 %v9130_v7 }
 0x728   :  { %3455 = vmatprep.subr.bf16.mxu0 %v9131_v29  ;;  %3537 = vmatprep.subr.bf16.mxu1 %v9132_v11 }
 0x72b   :  { %3456 = vmatpush1.bf16.msra.mxu0 %v9133_v42  ;;  %3538 = vmatpush1.bf16.msra.mxu1 %v9134_v9 }
 0x72c   :  { %3457 = vmatprep.subr.bf16.mxu0 %v9135_v16  ;;  %3539 = vmatprep.subr.bf16.mxu1 %v9136_v46 }
 0x72f   :  { %3458 = vmatpush1.bf16.msra.mxu0 %v9137_v59  ;;  %3540 = vmatpush1.bf16.msra.mxu1 %v9138_v12 }
 0x730   :  { %3459 = vmatprep.subr.bf16.mxu0 %v9139_v35  ;;  %3541 = vmatprep.subr.bf16.mxu1 %v9140_v55 }
 0x733   :  { %3460 = vmatpush1.bf16.msra.mxu0 %v9141_v30  ;;  %3542 = vmatpush1.bf16.msra.mxu1 %v9142_v10 }
 0x734   :  { %3461 = vmatprep.subr.bf16.mxu0 %v9143_v34  ;;  %3543 = vmatprep.subr.bf16.mxu1 %v9144_v61 }
 0x737   :  { %3462 = vmatpush1.bf16.msra.mxu0 %v9145_v44  ;;  %3544 = vmatpush1.bf16.msra.mxu1 %v9146_v52 }
 0x738   :  { %3463 = vmatprep.subr.bf16.mxu0 %v9147_v54  ;;  %3545 = vmatprep.subr.bf16.mxu1 %v9148_v56 }
 0x73b   :  { %3464 = vmatpush1.bf16.msra.mxu0 %v9149_v47  ;;  %3546 = vmatpush1.bf16.msra.mxu1 %v9150_v57 }
 0x73c   :  { %3465 = vmatprep.subr.bf16.mxu0 %v9151_v58  ;;  %3547 = vmatprep.subr.bf16.mxu1 %v9152_v48 }
 0x73f   :  { %3466 = vmatpush1.bf16.msra.mxu0 %v9153_v63  ;;  %3548 = vmatpush1.bf16.msra.mxu1 %v9154_v40 }
 0x740   :  { %3467 = vmatprep.subr.bf16.mxu0 %v9155_v50  ;;  %3549 = vmatprep.subr.bf16.mxu1 %v9156_v51 }
 0x743   :  { %3468 = vmatpush1.bf16.msra.mxu0 %v9157_v19  ;;  %3550 = vmatpush1.bf16.msra.mxu1 %v9158_v60 }
 0x744   :  { %3469 = vmatprep.subr.bf16.mxu0 %v9159_v27  ;;  %3551 = vmatprep.subr.bf16.mxu1 %v9160_v24 }
 0x747   :  { %3470 = vmatpush1.bf16.msra.mxu0 %v9161_v26  ;;  %3552 = vmatpush1.bf16.msra.mxu1 %v9162_v4 }
 0x74a   :  { %3472 = vmatmul.mubr.bf16.vlgmr.msra.gmra.mrb[8].mxu0 %v9163_v25  ;;  %3554 = vmatmul.mubr.bf16.vlgmr.msra.gmra.mrb[8].mxu1 %v9163_v25 }
 0x81d   :  { %v3473_v18 = vpop.f32.mrb[8].mxu0  ;;  %v3555_v6 = vpop.f32.mrb[8].mxu1 }
 0x81e   :  { %v3566_v8 = vrot.slane %v3473_v18, 4  ;;  %v3578_v3 = vrot.slane %v3555_v6, 4  ;;  %v3475_v13 = vpop.f32.mrb[9].mxu0  ;;  %v3557_v14 = vpop.f32.mrb[9].mxu1 }
 0x81f   :  { %v3572_v15 = vrot.slane %v3475_v13, 4  ;;  %v3584_v20 = vrot.slane %v3557_v14, 4  ;;  %v3477_v21 = vpop.f32.mrb[10].mxu0  ;;  %v3559_v22 = vpop.f32.mrb[10].mxu1 }
 0x820   :  { %v3567_v23 = vadd.f32 %v3566_v8, %v3473_v18  ;;  %v3579_v28 = vadd.f32 %v3578_v3, %v3555_v6  ;;  %v3478_v36 = vpop.f32.mrb[11].mxu0  ;;  %v3560_v37 = vpop.f32.mrb[11].mxu1 }
 0x821   :  { %v3573_v38 = vadd.f32 %v3572_v15, %v3475_v13  ;;  %v3585_v41 = vadd.f32 %v3584_v20, %v3557_v14  ;;  %v3563_v36 = vld [vmem:[#allocation9 + $0x21] ss:$4 sm:$0xf]  ;;  %v3565_v37 = vld [vmem:[#allocation9 + $0x22] ss:$4 sm:$0xf] }
 0x822   :  { %v3568_v43 = vrot.slane %v3567_v23, 2  ;;  %v3580_v49 = vrot.slane %v3579_v28, 2 }
 0x823   :  { %v3574_v45 = vrot.slane %v3573_v38, 2  ;;  %v3586_v53 = vrot.slane %v3585_v41, 2 }
 0x824   :  { %v3569_v17 = vadd.f32 %v3568_v43, %v3567_v23  ;;  %v3581_v62 = vadd.f32 %v3580_v49, %v3579_v28  ;;  %v9165_v49 = vld [vmem:[#allocation121_spill] sm:$0xff] }
 0x825   :  { %v3575_v0 = vadd.f32 %v3574_v45, %v3573_v38  ;;  %v3587_v1 = vadd.f32 %v3586_v53, %v3585_v41  ;;  %v9164_v38 = vld [vmem:[#allocation115_spill] sm:$0xff]  ;;  %v3654_v45 = vrot.slane %v3563_v36, %v9165_v49 }
 0x826   :  { %v3570_v2 = vrot.slane %v3569_v17, 1  ;;  %v3582_v5 = vrot.slane %v3581_v62, 1  ;;  %v3646_v41 = vrot.slane %v3563_v36, %v9164_v38 }
 0x827   :  { %v3576_v39 = vrot.slane %v3575_v0, 1  ;;  %v3588_v31 = vrot.slane %v3587_v1, 1 }
 0x828   :  { %v3571_v33 = vadd.f32 %v3570_v2, %v3569_v17  ;;  %v3583_v32 = vadd.f32 %v3582_v5, %v3581_v62  ;;  %v3671_v62 = vrot.slane %v3565_v37, %v9164_v38 }
 0x829   :  { %v3577_v7 = vadd.f32 %v3576_v39, %v3575_v0  ;;  %v3589_v29 = vadd.f32 %v3588_v31, %v3587_v1  ;;  %v9166_v0 = vld [vmem:[#allocation123_spill] sm:$0xff]  ;;  %v3679_v39 = vrot.slane %v3565_v37, %v9165_v49  ;;  %v9167_v31 = vld [vmem:[#allocation120_spill] sm:$0xff] }
 0x82a   :  { %v3590_v11 = vmul.f32 0.125, %v3571_v33  ;;  %v3592_v42 = vmul.f32 0.125, %v3583_v32  ;;  %v3650_v1 = vrot.slane %v3563_v36, %v9166_v0  ;;  %v3658_v33 = vrot.slane %v3563_v36, %v9167_v31 }
 0x82b   :  { %v3591_v9 = vmul.f32 0.125, %v3577_v7  ;;  %v3593_v16 = vmul.f32 0.125, %v3589_v29 }
 0x82c   :  { %v3594_v46 = vsub.f32 %v3473_v18, %v3590_v11  ;;  %v3596_v59 = vsub.f32 %v3555_v6, %v3592_v42  ;;  %v3675_v11 = vrot.slane %v3565_v37, %v9166_v0 }
 0x82d   :  { %v3595_v12 = vsub.f32 %v3475_v13, %v3591_v9  ;;  %v3597_v35 = vsub.f32 %v3557_v14, %v3593_v16  ;;  %v3683_v16 = vrot.slane %v3565_v37, %v9167_v31 }
 0x82e   :  { %v3598_v55 = vmul.f32 %v3594_v46, %v3594_v46  ;;  %v3600_v30 = vmul.f32 %v3596_v59, %v3596_v59 }
 0x82f   :  { %v3599_v10 = vmul.f32 %v3595_v12, %v3595_v12  ;;  %v3601_v34 = vmul.f32 %v3597_v35, %v3597_v35 }
 0x830   :  { %v3602_v61 = vrot.slane %v3598_v55, 4  ;;  %v3614_v44 = vrot.slane %v3600_v30, 4 }
 0x831   :  { %v3608_v52 = vrot.slane %v3599_v10, 4  ;;  %v3620_v54 = vrot.slane %v3601_v34, 4 }
 0x832   :  { %v3603_v56 = vadd.f32 %v3602_v61, %v3598_v55  ;;  %v3615_v47 = vadd.f32 %v3614_v44, %v3600_v30 }
 0x833   :  { %v3609_v57 = vadd.f32 %v3608_v52, %v3599_v10  ;;  %v3621_v58 = vadd.f32 %v3620_v54, %v3601_v34 }
 0x834   :  { %v3604_v48 = vrot.slane %v3603_v56, 2  ;;  %v3616_v63 = vrot.slane %v3615_v47, 2 }
 0x835   :  { %v3610_v40 = vrot.slane %v3609_v57, 2  ;;  %v3622_v50 = vrot.slane %v3621_v58, 2 }
 0x836   :  { %v3605_v51 = vadd.f32 %v3604_v48, %v3603_v56  ;;  %v3617_v19 = vadd.f32 %v3616_v63, %v3615_v47 }
 0x837   :  { %v3611_v60 = vadd.f32 %v3610_v40, %v3609_v57  ;;  %v3623_v27 = vadd.f32 %v3622_v50, %v3621_v58 }
 0x838   :  { %v3606_v24 = vrot.slane %v3605_v51, 1  ;;  %v3618_v26 = vrot.slane %v3617_v19, 1 }
 0x839   :  { %v3612_v4 = vrot.slane %v3611_v60, 1  ;;  %v3624_v25 = vrot.slane %v3623_v27, 1 }
 0x83a   :  { %v3607_v18 = vadd.f32 %v3606_v24, %v3605_v51  ;;  %v3619_v6 = vadd.f32 %v3618_v26, %v3617_v19 }
 0x83b   :  { %v3613_v8 = vadd.f32 %v3612_v4, %v3611_v60  ;;  %v3625_v3 = vadd.f32 %v3624_v25, %v3623_v27 }
 0x83c   :  { %v3626_v13 = vmul.f32 0.125, %v3607_v18  ;;  %v3628_v14 = vmul.f32 0.125, %v3619_v6 }
 0x83d   :  { %v3627_v15 = vmul.f32 0.125, %v3613_v8  ;;  %v3629_v20 = vmul.f32 0.125, %v3625_v3 }
 0x83e   :  { %v3630_v21 = vadd.f32 1e-05, %v3626_v13  ;;  %v3632_v22 = vadd.f32 1e-05, %v3628_v14 }
 0x83f   :  { %v3631_v23 = vadd.f32 1e-05, %v3627_v15  ;;  %v3633_v28 = vadd.f32 1e-05, %v3629_v20 }
 0x840   :  { %6293 = vrsqrt.f32 %v3630_v21 }
 0x841   :  { %6295 = vrsqrt.f32 %v3632_v22 }
 0x842   :  { %6297 = vrsqrt.f32 %v3631_v23 }
 0x843   :  { %6299 = vrsqrt.f32 %v3633_v28 }
 0x84a   :  { %v6294_v43 = vpop.eup %6293 }
 0x84b   :  { %v6296_v53 = vpop.eup %6295  ;;  %v3638_v17 = vmul.f32 %v6294_v43, %v3594_v46 }
 0x84c   :  { %v6298_v2 = vpop.eup %6297  ;;  %v3640_v5 = vmul.f32 %v6296_v53, %v3596_v59 }
 0x84d   :  { %v6300_v32 = vpop.eup %6299  ;;  %v3663_v7 = vmul.f32 %v3646_v41, %v3638_v17  ;;  %v3639_v29 = vmul.f32 %v6298_v2, %v3595_v12 }
 0x84e   :  { %v3665_v42 = vmul.f32 %v3654_v45, %v3640_v5  ;;  %v3641_v9 = vmul.f32 %v6300_v32, %v3597_v35 }
 0x84f   :  { %v8195_v46 = vadd.f32 %v3671_v62, %v3663_v7  ;;  %v3664_v55 = vmul.f32 %v3650_v1, %v3639_v29 }
 0x850   :  { %v8197_v30 = vadd.f32 %v3679_v39, %v3665_v42  ;;  %v3666_v10 = vmul.f32 %v3658_v33, %v3641_v9 }
 0x851   :  { %v3692_v59 = vmax.f32 %v8195_v46, 0.0  ;;  %v3689_v34 = vadd.f32 %v3675_v11, %v3664_v55 }
 0x852   :  { %v3694_v61 = vmax.f32 %v8197_v30, 0.0  ;;  %v8201_v44 = vadd.f32 %v3683_v16, %v3666_v10 }
 0x853   :  { %v3693_v12 = vmax.f32 %v3689_v34, 0.0 }
 0x854   :  { %v3695_v52 = vmax.f32 %v8201_v44, 0.0 }
 0x855   :  { %6491 = dma.done.wait [#allocation3], 8192 }
 0x856   :  { %6492 = vsyncadd [#allocation3], 4294959104  ;;  %v3705_v35 = vpack.c.bf16 %v3693_v12, %v3693_v12  ;;  %s6399_s23 = scalar_lea.hbm %s8514_s6, 2048 }
 0x857   :  { %p6400_p10 = scmp.ne.s32.totalorder %s8514_s6, %s6399_s23  ;;  %p6403_p11 = scmp.lt.u32.totalorder %s6399_s23, %s8514_s6 }
 0x859   :  { %p6405_p12 = pnand %p6403_p11, %p6400_p10 }
 0x85b   :  { %6408 = shalt.err (!%p6405_p12)  }
 0x85c   :  { %s6409_s16 = scalar_lea.vmem %s6717_s21, 2048  ;;  %s6413_s20 = scalar_lea.vmem %s6670_s17, 65536 }
 0x85d   :  { %p6410_p13 = scmp.ne.s32.totalorder %s6717_s21, %s6409_s16  ;;  %p6414_p0 = scmp.lt.s32.totalorder %s6717_s21, %s6670_s17 }
 0x85e   :  { %p6415_p1 = scmp.lt.s32.totalorder %s6413_s20, %s6409_s16 }
 0x860   :  { %p6416_p2 = por %p6415_p1, %p6414_p0 }
 0x862   :  { %p8218_p3 = pnand %p6416_p2, %p6410_p13 }
 0x864   :  { %6420 = shalt.err (!%p8218_p3)  }
 0x865   :  { %3703 = dma.hbm_to_vmem [thread:$0]  %s8514_s6, 2048, %s6717_s21, [#allocation3 + $0x1], %s6519_s19, %s6516_s25, %s6517_s26  ;;  %3804 = vmatprep.mubr.bf16.mxu0 %v3705_v35  ;;  %v3704_v45 = vpack.c.bf16 %v3692_v59, %v3692_v59  ;;  %v3707_v53 = vpack.c.bf16 %v3695_v52, %v3695_v52 }
 0x866   :  { %v3709_v54 = vld [vmem:[#allocation2 + $0x8] sm:$0xff]  ;;  %v3708_v56 = vld [vmem:[#allocation2] sm:$0xff] }
 0x867   :  { %v3711_v47 = vld [vmem:[#allocation2 + $0x48] sm:$0xff]  ;;  %3772 = vmatprep.subr.bf16.mxu0 %v3709_v54  ;;  %v3710_v57 = vld [vmem:[#allocation2 + $0x40] sm:$0xff] }
 0x868   :  { %3773 = vmatpush1.bf16.msra.mxu0 %v3708_v56  ;;  %v3713_v58 = vld [vmem:[#allocation2 + $0x88] sm:$0xff]  ;;  %v3712_v48 = vld [vmem:[#allocation2 + $0x80] sm:$0xff] }
 0x869   :  { %3774 = vmatprep.subr.bf16.mxu0 %v3711_v47  ;;  %v3715_v63 = vld [vmem:[#allocation2 + $0xc8] sm:$0xff]  ;;  %v3714_v40 = vld [vmem:[#allocation2 + $0xc0] sm:$0xff] }
 0x86a   :  { %v3717_v50 = vld [vmem:[#allocation2 + $0x108] sm:$0xff]  ;;  %v3716_v51 = vld [vmem:[#allocation2 + $0x100] sm:$0xff] }
 0x86b   :  { %v3719_v19 = vld [vmem:[#allocation2 + $0x148] sm:$0xff]  ;;  %v3718_v60 = vld [vmem:[#allocation2 + $0x140] sm:$0xff] }
 0x86c   :  { %3775 = vmatpush1.bf16.msra.mxu0 %v3710_v57  ;;  %v3721_v27 = vld [vmem:[#allocation2 + $0x188] sm:$0xff]  ;;  %v3720_v24 = vld [vmem:[#allocation2 + $0x180] sm:$0xff] }
 0x86d   :  { %3776 = vmatprep.subr.bf16.mxu0 %v3713_v58  ;;  %v3723_v26 = vld [vmem:[#allocation2 + $0x1c8] sm:$0xff]  ;;  %v3722_v4 = vld [vmem:[#allocation2 + $0x1c0] sm:$0xff] }
 0x86e   :  { %v3725_v25 = vld [vmem:[#allocation2 + $0x208] sm:$0xff]  ;;  %v3724_v18 = vld [vmem:[#allocation2 + $0x200] sm:$0xff] }
 0x86f   :  { %v3727_v6 = vld [vmem:[#allocation2 + $0x248] sm:$0xff]  ;;  %v3726_v8 = vld [vmem:[#allocation2 + $0x240] sm:$0xff] }
 0x870   :  { %3777 = vmatpush1.bf16.msra.mxu0 %v3712_v48  ;;  %v3729_v3 = vld [vmem:[#allocation2 + $0x288] sm:$0xff]  ;;  %v3728_v13 = vld [vmem:[#allocation2 + $0x280] sm:$0xff] }
 0x871   :  { %3778 = vmatprep.subr.bf16.mxu0 %v3715_v63  ;;  %v3731_v14 = vld [vmem:[#allocation2 + $0x2c8] sm:$0xff]  ;;  %v3730_v15 = vld [vmem:[#allocation2 + $0x2c0] sm:$0xff] }
 0x872   :  { %v3733_v20 = vld [vmem:[#allocation2 + $0x308] sm:$0xff]  ;;  %v3732_v21 = vld [vmem:[#allocation2 + $0x300] sm:$0xff] }
 0x873   :  { %v3735_v22 = vld [vmem:[#allocation2 + $0x348] sm:$0xff]  ;;  %v3734_v23 = vld [vmem:[#allocation2 + $0x340] sm:$0xff] }
 0x874   :  { %3779 = vmatpush1.bf16.msra.mxu0 %v3714_v40  ;;  %v3737_v28 = vld [vmem:[#allocation2 + $0x388] sm:$0xff]  ;;  %v3736_v36 = vld [vmem:[#allocation2 + $0x380] sm:$0xff] }
 0x875   :  { %3780 = vmatprep.subr.bf16.mxu0 %v3717_v50  ;;  %v3739_v37 = vld [vmem:[#allocation2 + $0x3c8] sm:$0xff]  ;;  %v3738_v41 = vld [vmem:[#allocation2 + $0x3c0] sm:$0xff]  ;;  %v3706_v50 = vpack.c.bf16 %v3694_v61, %v3694_v61 }
 0x876   :  { %v3741_v43 = vld [vmem:[#allocation2 + $0x408] sm:$0xff]  ;;  %v3740_v17 = vld [vmem:[#allocation2 + $0x400] sm:$0xff] }
 0x877   :  { %v3743_v62 = vld [vmem:[#allocation2 + $0x448] sm:$0xff]  ;;  %v3742_v1 = vld [vmem:[#allocation2 + $0x440] sm:$0xff] }
 0x878   :  { %3781 = vmatpush1.bf16.msra.mxu0 %v3716_v51  ;;  %v3745_v2 = vld [vmem:[#allocation2 + $0x488] sm:$0xff]  ;;  %v3744_v5 = vld [vmem:[#allocation2 + $0x480] sm:$0xff] }
 0x879   :  { %3782 = vmatprep.subr.bf16.mxu0 %v3719_v19  ;;  %v3747_v39 = vld [vmem:[#allocation2 + $0x4c8] sm:$0xff]  ;;  %v3746_v33 = vld [vmem:[#allocation2 + $0x4c0] sm:$0xff] }
 0x87a   :  { %v3749_v32 = vld [vmem:[#allocation2 + $0x508] sm:$0xff]  ;;  %v3748_v7 = vld [vmem:[#allocation2 + $0x500] sm:$0xff] }
 0x87b   :  { %v3751_v29 = vld [vmem:[#allocation2 + $0x548] sm:$0xff]  ;;  %v3750_v11 = vld [vmem:[#allocation2 + $0x540] sm:$0xff] }
 0x87c   :  { %3783 = vmatpush1.bf16.msra.mxu0 %v3718_v60  ;;  %v3753_v42 = vld [vmem:[#allocation2 + $0x588] sm:$0xff]  ;;  %v3752_v9 = vld [vmem:[#allocation2 + $0x580] sm:$0xff] }
 0x87d   :  { %3784 = vmatprep.subr.bf16.mxu0 %v3721_v27  ;;  %v3755_v16 = vld [vmem:[#allocation2 + $0x5c8] sm:$0xff]  ;;  %v3754_v46 = vld [vmem:[#allocation2 + $0x5c0] sm:$0xff] }
 0x87e   :  { %v3757_v55 = vld [vmem:[#allocation2 + $0x608] sm:$0xff]  ;;  %v3756_v10 = vld [vmem:[#allocation2 + $0x600] sm:$0xff] }
 0x87f   :  { %v3759_v59 = vld [vmem:[#allocation2 + $0x648] sm:$0xff]  ;;  %v3758_v34 = vld [vmem:[#allocation2 + $0x640] sm:$0xff] }
 0x880   :  { %3785 = vmatpush1.bf16.msra.mxu0 %v3720_v24  ;;  %v3761_v44 = vld [vmem:[#allocation2 + $0x688] sm:$0xff]  ;;  %v3760_v12 = vld [vmem:[#allocation2 + $0x680] sm:$0xff] }
 0x881   :  { %3786 = vmatprep.subr.bf16.mxu0 %v3723_v26  ;;  %v3763_v52 = vld [vmem:[#allocation2 + $0x6c8] sm:$0xff]  ;;  %v3762_v35 = vld [vmem:[#allocation2 + $0x6c0] sm:$0xff] }
 0x882   :  { %v3765_v54 = vld [vmem:[#allocation2 + $0x708] sm:$0xff]  ;;  %v3764_v56 = vld [vmem:[#allocation2 + $0x700] sm:$0xff] }
 0x883   :  { %v3767_v47 = vld [vmem:[#allocation2 + $0x748] sm:$0xff]  ;;  %v3766_v57 = vld [vmem:[#allocation2 + $0x740] sm:$0xff] }
 0x884   :  { %3787 = vmatpush1.bf16.msra.mxu0 %v3722_v4  ;;  %v3769_v58 = vld [vmem:[#allocation2 + $0x788] sm:$0xff]  ;;  %v3768_v48 = vld [vmem:[#allocation2 + $0x780] sm:$0xff] }
 0x885   :  { %3788 = vmatprep.subr.bf16.mxu0 %v3725_v25  ;;  %v3771_v63 = vld [vmem:[#allocation2 + $0x7c8] sm:$0xff]  ;;  %v3770_v40 = vld [vmem:[#allocation2 + $0x7c0] sm:$0xff] }
 0x888   :  { %3789 = vmatpush1.bf16.msra.mxu0 %v3724_v18 }
 0x889   :  { %3790 = vmatprep.subr.bf16.mxu0 %v3727_v6 }
 0x88c   :  { %3791 = vmatpush1.bf16.msra.mxu0 %v3726_v8 }
 0x88d   :  { %3792 = vmatprep.subr.bf16.mxu0 %v3729_v3 }
 0x890   :  { %3793 = vmatpush1.bf16.msra.mxu0 %v3728_v13 }
 0x891   :  { %3794 = vmatprep.subr.bf16.mxu0 %v3731_v14 }
 0x894   :  { %3795 = vmatpush1.bf16.msra.mxu0 %v3730_v15 }
 0x895   :  { %3796 = vmatprep.subr.bf16.mxu0 %v3733_v20 }
 0x898   :  { %3797 = vmatpush1.bf16.msra.mxu0 %v3732_v21 }
 0x899   :  { %3798 = vmatprep.subr.bf16.mxu0 %v3735_v22 }
 0x89c   :  { %3799 = vmatpush1.bf16.msra.mxu0 %v3734_v23 }
 0x89d   :  { %3800 = vmatprep.subr.bf16.mxu0 %v3737_v28 }
 0x8a0   :  { %3801 = vmatpush1.bf16.msra.mxu0 %v3736_v36 }
 0x8a1   :  { %3802 = vmatprep.subr.bf16.mxu0 %v3739_v37 }
 0x8a4   :  { %3803 = vmatpush1.bf16.msra.mxu0 %v3738_v41 }
 0x8a5   :  { %3813 = vmatprep.subr.bf16.mxu0 %v3741_v43 }
 0x8a7   :  { %3805 = vmatmul.mubr.bf16.vlgmr.msra.gmra.mrb[12].mxu0 %v3704_v45 }
 0x8a8   :  { %3814 = vmatpush1.bf16.msra.mxu0 %v3740_v17  ;;  %3845 = vmatprep.mubr.bf16.mxu0 %v3707_v53 }
 0x8a9   :  { %3815 = vmatprep.subr.bf16.mxu0 %v3743_v62 }
 0x8ac   :  { %3816 = vmatpush1.bf16.msra.mxu0 %v3742_v1 }
 0x8ad   :  { %3817 = vmatprep.subr.bf16.mxu0 %v3745_v2 }
 0x8b0   :  { %3818 = vmatpush1.bf16.msra.mxu0 %v3744_v5 }
 0x8b1   :  { %3819 = vmatprep.subr.bf16.mxu0 %v3747_v39 }
 0x8b4   :  { %3820 = vmatpush1.bf16.msra.mxu0 %v3746_v33 }
 0x8b5   :  { %3821 = vmatprep.subr.bf16.mxu0 %v3749_v32 }
 0x8b8   :  { %3822 = vmatpush1.bf16.msra.mxu0 %v3748_v7 }
 0x8b9   :  { %3823 = vmatprep.subr.bf16.mxu0 %v3751_v29 }
 0x8bc   :  { %3824 = vmatpush1.bf16.msra.mxu0 %v3750_v11  ;;  %v3855_v11 = vld [vmem:[#allocation9 + $0x31] ss:$4 sm:$0x3] }
 0x8bd   :  { %3825 = vmatprep.subr.bf16.mxu0 %v3753_v42  ;;  %v3857_v42 = vld [vmem:[#allocation9 + $0x32] ss:$4 sm:$0x3] }
 0x8c0   :  { %3826 = vmatpush1.bf16.msra.mxu0 %v3752_v9  ;;  %v3900_v9 = vrot.slane %v3855_v11, %v9164_v38 }
 0x8c1   :  { %3827 = vmatprep.subr.bf16.mxu0 %v3755_v16 }
 0x8c4   :  { %3828 = vmatpush1.bf16.msra.mxu0 %v3754_v46  ;;  %v3904_v46 = vrot.slane %v3855_v11, %v9166_v0 }
 0x8c5   :  { %3829 = vmatprep.subr.bf16.mxu0 %v3757_v55 }
 0x8c8   :  { %3830 = vmatpush1.bf16.msra.mxu0 %v3756_v10 }
 0x8c9   :  { %3831 = vmatprep.subr.bf16.mxu0 %v3759_v59  ;;  %v3913_v59 = vrot.slane %v3857_v42, %v9164_v38 }
 0x8cc   :  { %3832 = vmatpush1.bf16.msra.mxu0 %v3758_v34 }
 0x8cd   :  { %3833 = vmatprep.subr.bf16.mxu0 %v3761_v44  ;;  %v3917_v44 = vrot.slane %v3857_v42, %v9166_v0 }
 0x8d0   :  { %3834 = vmatpush1.bf16.msra.mxu0 %v3760_v12 }
 0x8d1   :  { %3835 = vmatprep.subr.bf16.mxu0 %v3763_v52 }
 0x8d4   :  { %3836 = vmatpush1.bf16.msra.mxu0 %v3762_v35 }
 0x8d5   :  { %3837 = vmatprep.subr.bf16.mxu0 %v3765_v54 }
 0x8d8   :  { %3838 = vmatpush1.bf16.msra.mxu0 %v3764_v56 }
 0x8d9   :  { %3839 = vmatprep.subr.bf16.mxu0 %v3767_v47 }
 0x8dc   :  { %3840 = vmatpush1.bf16.msra.mxu0 %v3766_v57 }
 0x8dd   :  { %3841 = vmatprep.subr.bf16.mxu0 %v3769_v58 }
 0x8e0   :  { %3842 = vmatpush1.bf16.msra.mxu0 %v3768_v48 }
 0x8e1   :  { %3843 = vmatprep.subr.bf16.mxu0 %v3771_v63 }
 0x8e4   :  { %3844 = vmatpush1.bf16.msra.mxu0 %v3770_v40 }
 0x8e7   :  { %3846 = vmatmul.mubr.bf16.vlgmr.msra.gmra.mrb[12].mxu0 %v3706_v50 }
 0x9ba   :  { %v3847_v51 = vpop.f32.mrb[12].mxu0 }
 0x9bb   :  { %v3858_v19 = vrot.slane %v3847_v51, 4  ;;  %v3849_v60 = vpop.f32.mrb[13].mxu0 }
 0x9bc   :  { %v3864_v27 = vrot.slane %v3849_v60, 4  ;;  %v3851_v24 = vpop.f32.mrb[14].mxu0 }
 0x9bd   :  { %v3859_v26 = vadd.f32 %v3858_v19, %v3847_v51  ;;  %v3852_v4 = vpop.f32.mrb[15].mxu0 }
 0x9be   :  { %v3865_v25 = vadd.f32 %v3864_v27, %v3849_v60 }
 0x9bf   :  { %v3860_v18 = vrot.slane %v3859_v26, 2 }
 0x9c0   :  { %v3866_v6 = vrot.slane %v3865_v25, 2 }
 0x9c1   :  { %v3861_v8 = vadd.f32 %v3860_v18, %v3859_v26 }
 0x9c2   :  { %v3867_v3 = vadd.f32 %v3866_v6, %v3865_v25 }
 0x9c3   :  { %v3862_v13 = vrot.slane %v3861_v8, 1 }
 0x9c4   :  { %v3868_v14 = vrot.slane %v3867_v3, 1 }
 0x9c5   :  { %v3863_v15 = vadd.f32 %v3862_v13, %v3861_v8 }
 0x9c6   :  { %v3869_v30 = vadd.f32 %v3868_v14, %v3867_v3 }
 0x9c7   :  { %v3870_v20 = vmul.f32 0.125, %v3863_v15 }
 0x9c8   :  { %v3871_v61 = vmul.f32 0.125, %v3869_v30 }
 0x9c9   :  { %v3872_v21 = vsub.f32 %v3847_v51, %v3870_v20 }
 0x9ca   :  { %v3873_v22 = vsub.f32 %v3849_v60, %v3871_v61 }
 0x9cb   :  { %v3874_v23 = vmul.f32 %v3872_v21, %v3872_v21 }
 0x9cc   :  { %v3875_v28 = vmul.f32 %v3873_v22, %v3873_v22 }
 0x9cd   :  { %v3876_v36 = vrot.slane %v3874_v23, 4 }
 0x9ce   :  { %v3882_v37 = vrot.slane %v3875_v28, 4 }
 0x9cf   :  { %v3877_v41 = vadd.f32 %v3876_v36, %v3874_v23 }
 0x9d0   :  { %v3883_v43 = vadd.f32 %v3882_v37, %v3875_v28 }
 0x9d1   :  { %v3878_v45 = vrot.slane %v3877_v41, 2 }
 0x9d2   :  { %v3884_v53 = vrot.slane %v3883_v43, 2 }
 0x9d3   :  { %v3879_v17 = vadd.f32 %v3878_v45, %v3877_v41 }
 0x9d4   :  { %v3885_v62 = vadd.f32 %v3884_v53, %v3883_v43 }
 0x9d5   :  { %v3880_v1 = vrot.slane %v3879_v17, 1 }
 0x9d6   :  { %v3886_v2 = vrot.slane %v3885_v62, 1 }
 0x9d7   :  { %v3881_v5 = vadd.f32 %v3880_v1, %v3879_v17 }
 0x9d8   :  { %v3887_v39 = vadd.f32 %v3886_v2, %v3885_v62 }
 0x9d9   :  { %v3888_v33 = vmul.f32 0.125, %v3881_v5 }
 0x9da   :  { %v3889_v32 = vmul.f32 0.125, %v3887_v39 }
 0x9db   :  { %v3890_v7 = vadd.f32 1e-05, %v3888_v33 }
 0x9dc   :  { %v3891_v29 = vadd.f32 1e-05, %v3889_v32 }
 0x9dd   :  { %6301 = vrsqrt.f32 %v3890_v7 }
 0x9de   :  { %6303 = vrsqrt.f32 %v3891_v29 }
 0x9e7   :  { %v6302_v16 = vpop.eup %6301 }
 0x9e8   :  { %v6304_v55 = vpop.eup %6303  ;;  %v3894_v10 = vmul.f32 %v6302_v16, %v3872_v21 }
 0x9e9   :  { %v3895_v34 = vmul.f32 %v6304_v55, %v3873_v22 }
 0x9ea   :  { %v3907_v12 = vmul.f32 %v3900_v9, %v3894_v10 }
 0x9eb   :  { %v3908_v52 = vmul.f32 %v3904_v46, %v3895_v34 }
 0x9ec   :  { %v3920_v35 = vadd.f32 %v3913_v59, %v3907_v12 }
 0x9ed   :  { %v3921_v54 = vadd.f32 %v3917_v44, %v3908_v52 }
 0x9ee   :  { %v3922_v56 = vmax.f32 %v3920_v35, 0.0 }
 0x9ef   :  { %v3923_v47 = vmax.f32 %v3921_v54, 0.0 }
 0x9f0   :  { %6493 = dma.done.wait [#allocation3 + $0x1], 2048 }
 0x9f1   :  { %6494 = vsyncadd [#allocation3 + $0x1], 4294965248  ;;  %v3963_v57 = vpack.c.bf16 %v3923_v47, %v3923_v47  ;;  %3943 = sst [smem:[#allocation27]] %s6531_s3  ;;  %s6535_s6 = smov [#allocation26]   ;;  %v3962_v3 = vpack.c.bf16 %v3922_v56, %v3922_v56 }
 0x9f2   :  { %3945 = sst [smem:[#allocation27 + $0x1]] %s6516_s25 }
 0x9f3   :  { %4012 = vmatprep.mubr.bf16.mxu1 %v3963_v57  ;;  %3947 = sst [smem:[#allocation27 + $0x2]] %s6520_s2 }
 0x9f4   :  { %3949 = sst [smem:[#allocation27 + $0x3]] %s6518_s1 }
 0x9f5   :  { %3951 = sst [smem:[#allocation27 + $0x4]] %s6519_s19 }
 0x9f6   :  { %3953 = sst [smem:[#allocation27 + $0x5]] %s6520_s2 }
 0x9f7   :  { %3955 = sst [smem:[#allocation27 + $0x6]] %s6519_s19 }
 0x9f8   :  { %3957 = sst [smem:[#allocation27 + $0x7]] %s6518_s1 }
 0x9f9   :  { %3959 = sst [smem:[#allocation27 + $0x8]] %s6522_s30 }
 0x9fa   :  { %3961 = dma.general %s8515_s7, 2048, %s6670_s17, %s6524_s18, %s6535_s6, [#allocation27], %s6666_s29, 0  }
 0x9fb   :  { %v3972_v58 = vld [vmem:[#allocation2 + $0xa00] sm:$0xff]  ;;  %v5939_v32 = vld [vmem:[#allocation9 + $0x39] ss:$0 sm:$0xff]  ;;  %v5940_v29 = vld [vmem:[#allocation9 + $0x3a] ss:$0 sm:$0xff] }
 0x9fc   :  { %v3964_v48 = vld [vmem:[#allocation2 + $0x800] sm:$0xff]  ;;  %5987 = vmatprep.subr.bf16.mxu1 %v3972_v58 }
 0x9fd   :  { %v3973_v63 = vld [vmem:[#allocation2 + $0xa40] sm:$0xff]  ;;  %5988 = vmatpush3.bf16.msra.mxu1 %v3964_v48 }
 0x9fe   :  { %5989 = vmatprep.subr.bf16.mxu1 %v3973_v63  ;;  %v3965_v40 = vld [vmem:[#allocation2 + $0x840] sm:$0xff] }
 0x9ff   :  { %v3974_v50 = vld [vmem:[#allocation2 + $0xa80] sm:$0xff] }
 0xa00   :  { %v3966_v51 = vld [vmem:[#allocation2 + $0x880] sm:$0xff] }
 0xa01   :  { %5990 = vmatpush3.bf16.msra.mxu1 %v3965_v40  ;;  %v3975_v19 = vld [vmem:[#allocation2 + $0xac0] sm:$0xff] }
 0xa02   :  { %5991 = vmatprep.subr.bf16.mxu1 %v3974_v50  ;;  %v3967_v60 = vld [vmem:[#allocation2 + $0x8c0] sm:$0xff] }
 0xa03   :  { %v3976_v27 = vld [vmem:[#allocation2 + $0xb00] sm:$0xff] }
 0xa04   :  { %v3968_v24 = vld [vmem:[#allocation2 + $0x900] sm:$0xff] }
 0xa05   :  { %5992 = vmatpush3.bf16.msra.mxu1 %v3966_v51  ;;  %v3977_v26 = vld [vmem:[#allocation2 + $0xb40] sm:$0xff] }
 0xa06   :  { %5993 = vmatprep.subr.bf16.mxu1 %v3975_v19  ;;  %v3969_v4 = vld [vmem:[#allocation2 + $0x940] sm:$0xff] }
 0xa07   :  { %v3978_v25 = vld [vmem:[#allocation2 + $0xb80] sm:$0xff] }
 0xa08   :  { %v3970_v18 = vld [vmem:[#allocation2 + $0x980] sm:$0xff] }
 0xa09   :  { %5994 = vmatpush3.bf16.msra.mxu1 %v3967_v60  ;;  %v3979_v6 = vld [vmem:[#allocation2 + $0xbc0] sm:$0xff] }
 0xa0a   :  { %5995 = vmatprep.subr.bf16.mxu1 %v3976_v27  ;;  %v3971_v8 = vld [vmem:[#allocation2 + $0x9c0] sm:$0xff] }
 0xa0d   :  { %5996 = vmatpush3.bf16.msra.mxu1 %v3968_v24 }
 0xa0e   :  { %5997 = vmatprep.subr.bf16.mxu1 %v3977_v26 }
 0xa11   :  { %5998 = vmatpush3.bf16.msra.mxu1 %v3969_v4 }
 0xa12   :  { %5999 = vmatprep.subr.bf16.mxu1 %v3978_v25 }
 0xa15   :  { %6000 = vmatpush3.bf16.msra.mxu1 %v3970_v18 }
 0xa16   :  { %6001 = vmatprep.subr.bf16.mxu1 %v3979_v6 }
 0xa19   :  { %6002 = vmatpush3.bf16.msra.mxu1 %v3971_v8 }
 0xa1c   :  { %4013 = vmatmul.mubr.bf16.vlgmr.msra.gmra.mrb[12].mxu1 %v3962_v3 }
 0xaef   :  { %v6003_v13 = vpop.f32.mrb[12].mxu1 }
 0xaf0   :  { %v6004_v14 = vpop.f32.mrb[13].mxu1 }
 0xaf1   :  { %v6005_v15 = vadd.f32 %v6004_v14, %v6003_v13  ;;  %v6006_v30 = vpop.f32.mrb[14].mxu1 }
 0xaf2   :  { %v6007_v20 = vpop.f32.mrb[15].mxu1 }
 0xaf3   :  { %v4022_v61 = vrot.slane %v6005_v15, 4 }
 0xaf5   :  { %v4023_v21 = vadd.f32 %v6005_v15, %v4022_v61 }
 0xaf7   :  { %v4024_v22 = vrot.slane %v4023_v21, 2 }
 0xaf9   :  { %v4025_v23 = vadd.f32 %v4024_v22, %v4023_v21 }
 0xafb   :  { %v4026_v28 = vrot.slane %v4025_v23, 1 }
 0xafd   :  { %v4027_v36 = vadd.f32 %v4026_v28, %v4025_v23 }
 0xaff   :  { %v4028_v37 = vmul.f32 0.125, %v4027_v36 }
 0xb01   :  { %v4029_v41 = vsub.f32 %v6005_v15, %v4028_v37 }
 0xb03   :  { %v4030_v43 = vmul.f32 %v4029_v41, %v4029_v41 }
 0xb05   :  { %v4031_v45 = vrot.slane %v4030_v43, 4 }
 0xb07   :  { %v4032_v53 = vadd.f32 %v4031_v45, %v4030_v43 }
 0xb09   :  { %v4033_v17 = vrot.slane %v4032_v53, 2 }
 0xb0b   :  { %v4034_v62 = vadd.f32 %v4033_v17, %v4032_v53 }
 0xb0d   :  { %v4035_v1 = vrot.slane %v4034_v62, 1 }
 0xb0f   :  { %v4036_v2 = vadd.f32 %v4035_v1, %v4034_v62 }
 0xb11   :  { %v4037_v5 = vmul.f32 0.125, %v4036_v2 }
 0xb13   :  { %v4038_v39 = vadd.f32 1e-05, %v4037_v5 }
 0xb15   :  { %6305 = vrsqrt.f32 %v4038_v39 }
 0xb1f   :  { %v6306_v33 = vpop.eup %6305 }
 0xb20   :  { %v4040_v7 = vmul.f32 %v6306_v33, %v4029_v41 }
 0xb22   :  { %v4045_v11 = vmul.f32 %v5939_v32, %v4040_v7 }
 0xb24   :  { %v4050_v42 = vadd.f32 %v5940_v29, %v4045_v11 }
 0xb26   :  { %v4051_v9 = vmax.f32 %v4050_v42, 0.0 }
 0xb27   :  { %6495 = dma.done.wait [#allocation3], 2048 }
 0xb28   :  { %6496 = vsyncadd [#allocation3], 4294965248  ;;  %4071 = sst [smem:[#allocation29]] %s6521_s28  ;;  %v6536_v16 = vmov 0   ;;  %s6537_s7 = smov [#allocation28]   ;;  %v4090_v40 = vpack.c.bf16 %v4051_v9, %v4051_v9 }
 0xb29   :  { %4139 = vmatprep.mubr.bf16.mxu1 %v6536_v16  ;;  %4073 = sst [smem:[#allocation29 + $0x1]] %s6516_s25  ;;  %s9169_s24 = smov [#allocation3 + $0x1]  }
 0xb2a   :  { %4075 = sst [smem:[#allocation29 + $0x2]] %s6522_s30 }
 0xb2b   :  { %4077 = sst [smem:[#allocation29 + $0x3]] %s6518_s1 }
 0xb2c   :  { %4079 = sst [smem:[#allocation29 + $0x4]] %s6519_s19 }
 0xb2d   :  { %4081 = sst [smem:[#allocation29 + $0x5]] %s6520_s2 }
 0xb2e   :  { %4083 = sst [smem:[#allocation29 + $0x6]] %s6531_s3 }
 0xb2f   :  { %4085 = sst [smem:[#allocation29 + $0x7]] %s6518_s1 }
 0xb30   :  { %4087 = sst [smem:[#allocation29 + $0x8]] %s6522_s30 }
 0xb31   :  { %4089 = dma.general %s8516_s8, 8192, %s6717_s21, %s9169_s24, %s6537_s7, [#allocation29], %s6666_s29, 0  }
 0xb32   :  { %v4092_v46 = vld [vmem:[#allocation2 + $0x8] sm:$0xff]  ;;  %v4091_v55 = vld [vmem:[#allocation2] sm:$0xff] }
 0xb33   :  { %v4094_v10 = vld [vmem:[#allocation2 + $0x48] sm:$0xff]  ;;  %4107 = vmatprep.subr.bf16.mxu1 %v4092_v46  ;;  %v4093_v59 = vld [vmem:[#allocation2 + $0x40] sm:$0xff] }
 0xb34   :  { %4108 = vmatpush1.bf16.msra.mxu1 %v4091_v55  ;;  %v4096_v34 = vld [vmem:[#allocation2 + $0x88] sm:$0xff]  ;;  %v4095_v44 = vld [vmem:[#allocation2 + $0x80] sm:$0xff] }
 0xb35   :  { %4109 = vmatprep.subr.bf16.mxu1 %v4094_v10  ;;  %v4098_v12 = vld [vmem:[#allocation2 + $0xc8] sm:$0xff]  ;;  %v4097_v52 = vld [vmem:[#allocation2 + $0xc0] sm:$0xff] }
 0xb36   :  { %v4100_v35 = vld [vmem:[#allocation2 + $0x108] sm:$0xff]  ;;  %v4099_v54 = vld [vmem:[#allocation2 + $0x100] sm:$0xff] }
 0xb37   :  { %v4102_v56 = vld [vmem:[#allocation2 + $0x148] sm:$0xff]  ;;  %v4101_v47 = vld [vmem:[#allocation2 + $0x140] sm:$0xff] }
 0xb38   :  { %4110 = vmatpush1.bf16.msra.mxu1 %v4093_v59  ;;  %v4104_v57 = vld [vmem:[#allocation2 + $0x188] sm:$0xff]  ;;  %v4103_v58 = vld [vmem:[#allocation2 + $0x180] sm:$0xff] }
 0xb39   :  { %4111 = vmatprep.subr.bf16.mxu1 %v4096_v34  ;;  %v4106_v48 = vld [vmem:[#allocation2 + $0x1c8] sm:$0xff]  ;;  %v4105_v63 = vld [vmem:[#allocation2 + $0x1c0] sm:$0xff] }
 0xb3a   :  { %v4149_v29 = vld [vmem:[#allocation9 + $0x3d] ss:$4 sm:$0x3]  ;;  %v4151_v11 = vld [vmem:[#allocation9 + $0x3e] ss:$4 sm:$0x3] }
 0xb3b   :  { %v4194_v42 = vrot.slane %v4149_v29, %v9164_v38  ;;  %v4198_v46 = vrot.slane %v4149_v29, %v9166_v0  ;;  %v4207_v59 = vrot.slane %v4151_v11, %v9164_v38 }
 0xb3c   :  { %4112 = vmatpush1.bf16.msra.mxu1 %v4095_v44  ;;  %v4211_v44 = vrot.slane %v4151_v11, %v9166_v0 }
 0xb3d   :  { %4113 = vmatprep.subr.bf16.mxu1 %v4098_v12 }
 0xb40   :  { %4114 = vmatpush1.bf16.msra.mxu1 %v4097_v52 }
 0xb41   :  { %4115 = vmatprep.subr.bf16.mxu1 %v4100_v35 }
 0xb44   :  { %4116 = vmatpush1.bf16.msra.mxu1 %v4099_v54 }
 0xb45   :  { %4117 = vmatprep.subr.bf16.mxu1 %v4102_v56 }
 0xb48   :  { %4118 = vmatpush1.bf16.msra.mxu1 %v4101_v47 }
 0xb49   :  { %4119 = vmatprep.subr.bf16.mxu1 %v4104_v57 }
 0xb4c   :  { %4120 = vmatpush1.bf16.msra.mxu1 %v4103_v58 }
 0xb4d   :  { %4121 = vmatprep.subr.bf16.mxu1 %v4106_v48 }
 0xb50   :  { %4122 = vmatpush1.bf16.msra.mxu1 %v4105_v63 }
 0xb53   :  { %4140 = vmatmul.mubr.bf16.vlgmr.msra.gmra.mrb[16].mxu1 %v4090_v40 }
 0xc26   :  { %v4141_v50 = vpop.f32.mrb[16].mxu1 }
 0xc27   :  { %v4152_v51 = vrot.slane %v4141_v50, 4  ;;  %v4143_v19 = vpop.f32.mrb[17].mxu1 }
 0xc28   :  { %v4158_v60 = vrot.slane %v4143_v19, 4  ;;  %v4145_v27 = vpop.f32.mrb[18].mxu1 }
 0xc29   :  { %v4153_v24 = vadd.f32 %v4152_v51, %v4141_v50  ;;  %v4146_v26 = vpop.f32.mrb[19].mxu1 }
 0xc2a   :  { %v4159_v4 = vadd.f32 %v4158_v60, %v4143_v19 }
 0xc2b   :  { %v4154_v25 = vrot.slane %v4153_v24, 2 }
 0xc2c   :  { %v4160_v18 = vrot.slane %v4159_v4, 2 }
 0xc2d   :  { %v4155_v6 = vadd.f32 %v4154_v25, %v4153_v24 }
 0xc2e   :  { %v4161_v8 = vadd.f32 %v4160_v18, %v4159_v4 }
 0xc2f   :  { %v4156_v3 = vrot.slane %v4155_v6, 1 }
 0xc30   :  { %v4162_v13 = vrot.slane %v4161_v8, 1 }
 0xc31   :  { %v4157_v14 = vadd.f32 %v4156_v3, %v4155_v6 }
 0xc32   :  { %v4163_v15 = vadd.f32 %v4162_v13, %v4161_v8 }
 0xc33   :  { %v4164_v30 = vmul.f32 0.125, %v4157_v14 }
 0xc34   :  { %v4165_v20 = vmul.f32 0.125, %v4163_v15 }
 0xc35   :  { %v4166_v61 = vsub.f32 %v4141_v50, %v4164_v30 }
 0xc36   :  { %v4167_v21 = vsub.f32 %v4143_v19, %v4165_v20 }
 0xc37   :  { %v4168_v22 = vmul.f32 %v4166_v61, %v4166_v61 }
 0xc38   :  { %v4169_v23 = vmul.f32 %v4167_v21, %v4167_v21 }
 0xc39   :  { %v4170_v28 = vrot.slane %v4168_v22, 4 }
 0xc3a   :  { %v4176_v36 = vrot.slane %v4169_v23, 4 }
 0xc3b   :  { %v4171_v37 = vadd.f32 %v4170_v28, %v4168_v22 }
 0xc3c   :  { %v4177_v41 = vadd.f32 %v4176_v36, %v4169_v23 }
 0xc3d   :  { %v4172_v43 = vrot.slane %v4171_v37, 2 }
 0xc3e   :  { %v4178_v45 = vrot.slane %v4177_v41, 2 }
 0xc3f   :  { %v4173_v53 = vadd.f32 %v4172_v43, %v4171_v37 }
 0xc40   :  { %v4179_v17 = vadd.f32 %v4178_v45, %v4177_v41 }
 0xc41   :  { %v4174_v62 = vrot.slane %v4173_v53, 1 }
 0xc42   :  { %v4180_v1 = vrot.slane %v4179_v17, 1 }
 0xc43   :  { %v4175_v2 = vadd.f32 %v4174_v62, %v4173_v53 }
 0xc44   :  { %v4181_v5 = vadd.f32 %v4180_v1, %v4179_v17 }
 0xc45   :  { %v4182_v39 = vmul.f32 0.125, %v4175_v2 }
 0xc46   :  { %v4183_v33 = vmul.f32 0.125, %v4181_v5 }
 0xc47   :  { %v4184_v32 = vadd.f32 1e-05, %v4182_v39 }
 0xc48   :  { %v4185_v7 = vadd.f32 1e-05, %v4183_v33 }
 0xc49   :  { %6307 = vrsqrt.f32 %v4184_v32 }
 0xc4a   :  { %6309 = vrsqrt.f32 %v4185_v7 }
 0xc53   :  { %v6308_v9 = vpop.eup %6307 }
 0xc54   :  { %v6310_v55 = vpop.eup %6309  ;;  %v4188_v10 = vmul.f32 %v6308_v9, %v4166_v61 }
 0xc55   :  { %v4189_v34 = vmul.f32 %v6310_v55, %v4167_v21 }
 0xc56   :  { %v4201_v12 = vmul.f32 %v4194_v42, %v4188_v10 }
 0xc57   :  { %v4202_v52 = vmul.f32 %v4198_v46, %v4189_v34 }
 0xc58   :  { %v8279_v35 = vadd.f32 %v4207_v59, %v4201_v12 }
 0xc59   :  { %v4215_v54 = vadd.f32 %v4211_v44, %v4202_v52 }
 0xc5a   :  { %v4216_v56 = vmax.f32 %v8279_v35, 0.0 }
 0xc5b   :  { %v4217_v47 = vmax.f32 %v4215_v54, 0.0 }
 0xc5c   :  { %6497 = dma.done.wait [#allocation3 + $0x1], 8192 }
 0xc5d   :  { %6498 = vsyncadd [#allocation3 + $0x1], 4294959104  ;;  %v4256_v57 = vpack.c.bf16 %v4217_v47, %v4217_v47  ;;  %4236 = sst [smem:[#allocation31]] %s6531_s3  ;;  %s6538_s8 = smov [#allocation30]  }
 0xc5e   :  { %4238 = sst [smem:[#allocation31 + $0x1]] %s6516_s25 }
 0xc5f   :  { %4376 = vmatprep.mubr.bf16.mxu1 %v4256_v57  ;;  %4417 = vmatprep.mubr.bf16.mxu0 %v4256_v57  ;;  %4240 = sst [smem:[#allocation31 + $0x2]] %s6520_s2 }
 0xc60   :  { %4242 = sst [smem:[#allocation31 + $0x3]] %s6518_s1 }
 0xc61   :  { %4244 = sst [smem:[#allocation31 + $0x4]] %s6519_s19 }
 0xc62   :  { %4246 = sst [smem:[#allocation31 + $0x5]] %s6520_s2 }
 0xc63   :  { %4248 = sst [smem:[#allocation31 + $0x6]] %s6519_s19 }
 0xc64   :  { %4250 = sst [smem:[#allocation31 + $0x7]] %s6518_s1 }
 0xc65   :  { %4252 = sst [smem:[#allocation31 + $0x8]] %s6522_s30 }
 0xc66   :  { %4254 = dma.general %s8517_s9, 8192, %s6670_s17, %s6524_s18, %s6538_s8, [#allocation31], %s6666_s29, 0  }
 0xc67   :  { %v8297_v58 = vld [vmem:[#allocation7] sm:$0xff]  ;;  %v8299_v48 = vld [vmem:[#allocation7 + $0x8] sm:$0xff]  ;;  %v8301_v63 = vld [vmem:[#allocation7 + $0x10] sm:$0xff] }
 0xc68   :  { %v8303_v40 = vld [vmem:[#allocation7 + $0x18] sm:$0xff]  ;;  %v4258_v50 = vld [vmem:[#allocation2 + $0x808] sm:$0xff]  ;;  %v4257_v19 = vld [vmem:[#allocation2 + $0x800] sm:$0xff] }
 0xc69   :  { %v4260_v51 = vld [vmem:[#allocation2 + $0x818] sm:$0xff]  ;;  %4344 = vmatprep.subr.bf16.mxu1 %v4258_v50  ;;  %v4259_v60 = vld [vmem:[#allocation2 + $0x810] sm:$0xff]  ;;  %v4262_v27 = vld [vmem:[#allocation2 + $0x848] sm:$0xff] }
 0xc6a   :  { %4385 = vmatprep.subr.bf16.mxu0 %v4260_v51  ;;  %4345 = vmatpush1.bf16.msra.mxu1 %v4257_v19  ;;  %v4264_v24 = vld [vmem:[#allocation2 + $0x858] sm:$0xff]  ;;  %v4261_v26 = vld [vmem:[#allocation2 + $0x840] sm:$0xff]  ;;  %v4263_v4 = vld [vmem:[#allocation2 + $0x850] sm:$0xff] }
 0xc6b   :  { %4386 = vmatpush1.bf16.msra.mxu0 %v4259_v60  ;;  %4346 = vmatprep.subr.bf16.mxu1 %v4262_v27  ;;  %v4266_v25 = vld [vmem:[#allocation2 + $0x888] sm:$0xff]  ;;  %v4268_v18 = vld [vmem:[#allocation2 + $0x898] sm:$0xff]  ;;  %v4265_v6 = vld [vmem:[#allocation2 + $0x880] sm:$0xff] }
 0xc6c   :  { %4387 = vmatprep.subr.bf16.mxu0 %v4264_v24  ;;  %v4267_v8 = vld [vmem:[#allocation2 + $0x890] sm:$0xff]  ;;  %v4270_v3 = vld [vmem:[#allocation2 + $0x8c8] sm:$0xff]  ;;  %v4272_v13 = vld [vmem:[#allocation2 + $0x8d8] sm:$0xff] }
 0xc6d   :  { %v4269_v14 = vld [vmem:[#allocation2 + $0x8c0] sm:$0xff]  ;;  %v4271_v15 = vld [vmem:[#allocation2 + $0x8d0] sm:$0xff]  ;;  %v4274_v30 = vld [vmem:[#allocation2 + $0x908] sm:$0xff] }
 0xc6e   :  { %4347 = vmatpush1.bf16.msra.mxu1 %v4261_v26  ;;  %v4276_v20 = vld [vmem:[#allocation2 + $0x918] sm:$0xff]  ;;  %v4273_v61 = vld [vmem:[#allocation2 + $0x900] sm:$0xff]  ;;  %v4275_v21 = vld [vmem:[#allocation2 + $0x910] sm:$0xff] }
 0xc6f   :  { %4388 = vmatpush1.bf16.msra.mxu0 %v4263_v4  ;;  %4348 = vmatprep.subr.bf16.mxu1 %v4266_v25  ;;  %v4278_v22 = vld [vmem:[#allocation2 + $0x948] sm:$0xff]  ;;  %v4280_v23 = vld [vmem:[#allocation2 + $0x958] sm:$0xff]  ;;  %v4277_v28 = vld [vmem:[#allocation2 + $0x940] sm:$0xff] }
 0xc70   :  { %4389 = vmatprep.subr.bf16.mxu0 %v4268_v18  ;;  %v4279_v36 = vld [vmem:[#allocation2 + $0x950] sm:$0xff]  ;;  %v4282_v37 = vld [vmem:[#allocation2 + $0x988] sm:$0xff]  ;;  %v4284_v41 = vld [vmem:[#allocation2 + $0x998] sm:$0xff] }
 0xc71   :  { %v4281_v43 = vld [vmem:[#allocation2 + $0x980] sm:$0xff]  ;;  %v4283_v45 = vld [vmem:[#allocation2 + $0x990] sm:$0xff]  ;;  %v4286_v53 = vld [vmem:[#allocation2 + $0x9c8] sm:$0xff] }
 0xc72   :  { %4349 = vmatpush1.bf16.msra.mxu1 %v4265_v6  ;;  %v4288_v17 = vld [vmem:[#allocation2 + $0x9d8] sm:$0xff]  ;;  %v4285_v62 = vld [vmem:[#allocation2 + $0x9c0] sm:$0xff]  ;;  %v4287_v1 = vld [vmem:[#allocation2 + $0x9d0] sm:$0xff] }
 0xc73   :  { %4390 = vmatpush1.bf16.msra.mxu0 %v4267_v8  ;;  %4350 = vmatprep.subr.bf16.mxu1 %v4270_v3  ;;  %v4290_v2 = vld [vmem:[#allocation2 + $0xa08] sm:$0xff]  ;;  %v4292_v5 = vld [vmem:[#allocation2 + $0xa18] sm:$0xff]  ;;  %v4289_v39 = vld [vmem:[#allocation2 + $0xa00] sm:$0xff]  ;;  %v4255_v8 = vpack.c.bf16 %v4216_v56, %v4216_v56 }
 0xc74   :  { %4391 = vmatprep.subr.bf16.mxu0 %v4272_v13  ;;  %v4291_v33 = vld [vmem:[#allocation2 + $0xa10] sm:$0xff]  ;;  %v4294_v32 = vld [vmem:[#allocation2 + $0xa48] sm:$0xff]  ;;  %v4296_v7 = vld [vmem:[#allocation2 + $0xa58] sm:$0xff] }
 0xc75   :  { %v4293_v29 = vld [vmem:[#allocation2 + $0xa40] sm:$0xff]  ;;  %v4295_v11 = vld [vmem:[#allocation2 + $0xa50] sm:$0xff]  ;;  %v4298_v42 = vld [vmem:[#allocation2 + $0xa88] sm:$0xff] }
 0xc76   :  { %4351 = vmatpush1.bf16.msra.mxu1 %v4269_v14  ;;  %v4300_v9 = vld [vmem:[#allocation2 + $0xa98] sm:$0xff]  ;;  %v4297_v46 = vld [vmem:[#allocation2 + $0xa80] sm:$0xff]  ;;  %v4299_v55 = vld [vmem:[#allocation2 + $0xa90] sm:$0xff] }
 0xc77   :  { %4392 = vmatpush1.bf16.msra.mxu0 %v4271_v15  ;;  %4352 = vmatprep.subr.bf16.mxu1 %v4274_v30  ;;  %v4302_v10 = vld [vmem:[#allocation2 + $0xac8] sm:$0xff]  ;;  %v4304_v59 = vld [vmem:[#allocation2 + $0xad8] sm:$0xff]  ;;  %v4301_v34 = vld [vmem:[#allocation2 + $0xac0] sm:$0xff] }
 0xc78   :  { %4393 = vmatprep.subr.bf16.mxu0 %v4276_v20  ;;  %v4303_v44 = vld [vmem:[#allocation2 + $0xad0] sm:$0xff]  ;;  %v4306_v12 = vld [vmem:[#allocation2 + $0xb08] sm:$0xff]  ;;  %v4308_v52 = vld [vmem:[#allocation2 + $0xb18] sm:$0xff] }
 0xc79   :  { %v4305_v54 = vld [vmem:[#allocation2 + $0xb00] sm:$0xff]  ;;  %v4307_v47 = vld [vmem:[#allocation2 + $0xb10] sm:$0xff]  ;;  %v4310_v57 = vld [vmem:[#allocation2 + $0xb48] sm:$0xff] }
 0xc7a   :  { %4353 = vmatpush1.bf16.msra.mxu1 %v4273_v61  ;;  %v4312_v50 = vld [vmem:[#allocation2 + $0xb58] sm:$0xff]  ;;  %v4309_v51 = vld [vmem:[#allocation2 + $0xb40] sm:$0xff]  ;;  %v4311_v19 = vld [vmem:[#allocation2 + $0xb50] sm:$0xff] }
 0xc7b   :  { %4394 = vmatpush1.bf16.msra.mxu0 %v4275_v21  ;;  %4354 = vmatprep.subr.bf16.mxu1 %v4278_v22  ;;  %v4314_v60 = vld [vmem:[#allocation2 + $0xb88] sm:$0xff]  ;;  %v4316_v27 = vld [vmem:[#allocation2 + $0xb98] sm:$0xff]  ;;  %v4313_v24 = vld [vmem:[#allocation2 + $0xb80] sm:$0xff] }
 0xc7c   :  { %4395 = vmatprep.subr.bf16.mxu0 %v4280_v23  ;;  %v4315_v26 = vld [vmem:[#allocation2 + $0xb90] sm:$0xff]  ;;  %v4318_v4 = vld [vmem:[#allocation2 + $0xbc8] sm:$0xff]  ;;  %v4320_v25 = vld [vmem:[#allocation2 + $0xbd8] sm:$0xff] }
 0xc7d   :  { %v4317_v18 = vld [vmem:[#allocation2 + $0xbc0] sm:$0xff]  ;;  %v4319_v6 = vld [vmem:[#allocation2 + $0xbd0] sm:$0xff] }
 0xc7e   :  { %4355 = vmatpush1.bf16.msra.mxu1 %v4277_v28  ;;  %v4322_v3 = vld [vmem:[#allocation9 + $0x44] ss:$4 sm:$0xf] }
 0xc7f   :  { %4396 = vmatpush1.bf16.msra.mxu0 %v4279_v36  ;;  %4356 = vmatprep.subr.bf16.mxu1 %v4282_v37  ;;  %v4327_v13 = vrot.slane %v4322_v3, %v9164_v38  ;;  %v4335_v14 = vrot.slane %v4322_v3, %v9165_v49  ;;  %v4331_v15 = vrot.slane %v4322_v3, %v9166_v0 }
 0xc80   :  { %4397 = vmatprep.subr.bf16.mxu0 %v4284_v41  ;;  %v4339_v30 = vrot.slane %v4322_v3, %v9167_v31 }
 0xc82   :  { %4357 = vmatpush1.bf16.msra.mxu1 %v4281_v43 }
 0xc83   :  { %4398 = vmatpush1.bf16.msra.mxu0 %v4283_v45  ;;  %4358 = vmatprep.subr.bf16.mxu1 %v4286_v53 }
 0xc84   :  { %4399 = vmatprep.subr.bf16.mxu0 %v4288_v17 }
 0xc86   :  { %4359 = vmatpush1.bf16.msra.mxu1 %v4285_v62 }
 0xc87   :  { %4400 = vmatpush1.bf16.msra.mxu0 %v4287_v1  ;;  %4360 = vmatprep.subr.bf16.mxu1 %v4290_v2 }
 0xc88   :  { %4401 = vmatprep.subr.bf16.mxu0 %v4292_v5 }
 0xc8a   :  { %4361 = vmatpush1.bf16.msra.mxu1 %v4289_v39 }
 0xc8b   :  { %4402 = vmatpush1.bf16.msra.mxu0 %v4291_v33  ;;  %4362 = vmatprep.subr.bf16.mxu1 %v4294_v32 }
 0xc8c   :  { %4403 = vmatprep.subr.bf16.mxu0 %v4296_v7 }
 0xc8e   :  { %4363 = vmatpush1.bf16.msra.mxu1 %v4293_v29 }
 0xc8f   :  { %4404 = vmatpush1.bf16.msra.mxu0 %v4295_v11  ;;  %4364 = vmatprep.subr.bf16.mxu1 %v4298_v42 }
 0xc90   :  { %4405 = vmatprep.subr.bf16.mxu0 %v4300_v9 }
 0xc92   :  { %4365 = vmatpush1.bf16.msra.mxu1 %v4297_v46 }
 0xc93   :  { %4406 = vmatpush1.bf16.msra.mxu0 %v4299_v55  ;;  %4366 = vmatprep.subr.bf16.mxu1 %v4302_v10 }
 0xc94   :  { %4407 = vmatprep.subr.bf16.mxu0 %v4304_v59 }
 0xc96   :  { %4367 = vmatpush1.bf16.msra.mxu1 %v4301_v34 }
 0xc97   :  { %4408 = vmatpush1.bf16.msra.mxu0 %v4303_v44  ;;  %4368 = vmatprep.subr.bf16.mxu1 %v4306_v12 }
 0xc98   :  { %4409 = vmatprep.subr.bf16.mxu0 %v4308_v52 }
 0xc9a   :  { %4369 = vmatpush1.bf16.msra.mxu1 %v4305_v54 }
 0xc9b   :  { %4410 = vmatpush1.bf16.msra.mxu0 %v4307_v47  ;;  %4370 = vmatprep.subr.bf16.mxu1 %v4310_v57 }
 0xc9c   :  { %4411 = vmatprep.subr.bf16.mxu0 %v4312_v50 }
 0xc9e   :  { %4371 = vmatpush1.bf16.msra.mxu1 %v4309_v51 }
 0xc9f   :  { %4412 = vmatpush1.bf16.msra.mxu0 %v4311_v19  ;;  %4372 = vmatprep.subr.bf16.mxu1 %v4314_v60 }
 0xca0   :  { %4413 = vmatprep.subr.bf16.mxu0 %v4316_v27 }
 0xca2   :  { %4373 = vmatpush1.bf16.msra.mxu1 %v4313_v24 }
 0xca3   :  { %4414 = vmatpush1.bf16.msra.mxu0 %v4315_v26  ;;  %4374 = vmatprep.subr.bf16.mxu1 %v4318_v4 }
 0xca4   :  { %4415 = vmatprep.subr.bf16.mxu0 %v4320_v25 }
 0xca6   :  { %4375 = vmatpush1.bf16.msra.mxu1 %v4317_v18 }
 0xca7   :  { %4416 = vmatpush1.bf16.msra.mxu0 %v4319_v6 }
 0xca9   :  { %4377 = vmatmul.mubr.bf16.vlgmr.msra.gmra.mrb[20].mxu1 %v4255_v8 }
 0xcaa   :  { %4418 = vmatmul.mubr.bf16.vlgmr.msra.gmra.mrb[16].mxu0 %v4255_v8 }
 0xd7c   :  { %v4378_v20 = vpop.f32.mrb[20].mxu1 }
 0xd7d   :  { %v4419_v61 = vpop.f32.mrb[16].mxu0  ;;  %v8312_v21 = vadd.f32 %v4378_v20, %v4327_v13  ;;  %v4380_v56 = vpop.f32.mrb[21].mxu1 }
 0xd7e   :  { %v8314_v35 = vadd.f32 %v4419_v61, %v4335_v14  ;;  %v4421_v22 = vpop.f32.mrb[17].mxu0  ;;  %v8316_v23 = vadd.f32 %v4380_v56, %v4331_v15  ;;  %v4382_v36 = vpop.f32.mrb[22].mxu1 }
 0xd7f   :  { %v8318_v28 = vadd.f32 %v4421_v22, %v4339_v30  ;;  %v4423_v37 = vpop.f32.mrb[18].mxu0  ;;  %v4383_v41 = vpop.f32.mrb[23].mxu1 }
 0xd80   :  { %v4424_v43 = vpop.f32.mrb[19].mxu0 }
 0xd81   :  { %6499 = dma.done.wait [#allocation3], 8192 }
 0xd82   :  { %6500 = vsyncadd [#allocation3], 4294959104  ;;  %v4438_v45 = vpack.c.bf16 %v8299_v48, %v8299_v48  ;;  %s6421_s6 = scalar_lea.hbm %s8518_s10, 2048 }
 0xd83   :  { %p6422_p4 = scmp.ne.s32.totalorder %s8518_s10, %s6421_s6  ;;  %p6425_p5 = scmp.lt.u32.totalorder %s6421_s6, %s8518_s10 }
 0xd85   :  { %p6427_p6 = pnand %p6425_p5, %p6422_p4 }
 0xd87   :  { %6430 = shalt.err (!%p6427_p6)  }
 0xd88   :  { %6442 = shalt.err (!%p8218_p3)  }
 0xd89   :  { %4436 = dma.hbm_to_vmem [thread:$0]  %s8518_s10, 2048, %s6717_s21, [#allocation3 + $0x1], %s6519_s19, %s6516_s25, %s6517_s26  ;;  %4537 = vmatprep.mubr.bf16.mxu1 %v4438_v45  ;;  %v4437_v4 = vpack.c.bf16 %v8297_v58, %v8297_v58  ;;  %v4440_v25 = vpack.c.bf16 %v8303_v40, %v8303_v40 }
 0xd8a   :  { %v4442_v48 = vld [vmem:[#allocation2 + $0x8] sm:$0xff]  ;;  %v4441_v53 = vld [vmem:[#allocation2] sm:$0xff] }
 0xd8b   :  { %v4444_v17 = vld [vmem:[#allocation2 + $0x48] sm:$0xff]  ;;  %4505 = vmatprep.subr.bf16.mxu1 %v4442_v48  ;;  %v4443_v62 = vld [vmem:[#allocation2 + $0x40] sm:$0xff] }
 0xd8c   :  { %4506 = vmatpush1.bf16.msra.mxu1 %v4441_v53  ;;  %v4446_v1 = vld [vmem:[#allocation2 + $0x88] sm:$0xff]  ;;  %v4445_v2 = vld [vmem:[#allocation2 + $0x80] sm:$0xff] }
 0xd8d   :  { %4507 = vmatprep.subr.bf16.mxu1 %v4444_v17  ;;  %v4448_v5 = vld [vmem:[#allocation2 + $0xc8] sm:$0xff]  ;;  %v4447_v39 = vld [vmem:[#allocation2 + $0xc0] sm:$0xff] }
 0xd8e   :  { %v4450_v33 = vld [vmem:[#allocation2 + $0x108] sm:$0xff]  ;;  %v4449_v32 = vld [vmem:[#allocation2 + $0x100] sm:$0xff] }
 0xd8f   :  { %v4452_v7 = vld [vmem:[#allocation2 + $0x148] sm:$0xff]  ;;  %v4451_v29 = vld [vmem:[#allocation2 + $0x140] sm:$0xff] }
 0xd90   :  { %4508 = vmatpush1.bf16.msra.mxu1 %v4443_v62  ;;  %v4454_v11 = vld [vmem:[#allocation2 + $0x188] sm:$0xff]  ;;  %v4453_v42 = vld [vmem:[#allocation2 + $0x180] sm:$0xff] }
 0xd91   :  { %4509 = vmatprep.subr.bf16.mxu1 %v4446_v1  ;;  %v4456_v9 = vld [vmem:[#allocation2 + $0x1c8] sm:$0xff]  ;;  %v4455_v46 = vld [vmem:[#allocation2 + $0x1c0] sm:$0xff] }
 0xd92   :  { %v4458_v55 = vld [vmem:[#allocation2 + $0x208] sm:$0xff]  ;;  %v4457_v10 = vld [vmem:[#allocation2 + $0x200] sm:$0xff] }
 0xd93   :  { %v4460_v59 = vld [vmem:[#allocation2 + $0x248] sm:$0xff]  ;;  %v4459_v34 = vld [vmem:[#allocation2 + $0x240] sm:$0xff] }
 0xd94   :  { %4510 = vmatpush1.bf16.msra.mxu1 %v4445_v2  ;;  %v4462_v44 = vld [vmem:[#allocation2 + $0x288] sm:$0xff]  ;;  %v4461_v12 = vld [vmem:[#allocation2 + $0x280] sm:$0xff] }
 0xd95   :  { %4511 = vmatprep.subr.bf16.mxu1 %v4448_v5  ;;  %v4464_v52 = vld [vmem:[#allocation2 + $0x2c8] sm:$0xff]  ;;  %v4463_v54 = vld [vmem:[#allocation2 + $0x2c0] sm:$0xff] }
 0xd96   :  { %v4466_v47 = vld [vmem:[#allocation2 + $0x308] sm:$0xff]  ;;  %v4465_v57 = vld [vmem:[#allocation2 + $0x300] sm:$0xff] }
 0xd97   :  { %v4468_v50 = vld [vmem:[#allocation2 + $0x348] sm:$0xff]  ;;  %v4467_v51 = vld [vmem:[#allocation2 + $0x340] sm:$0xff] }
 0xd98   :  { %4512 = vmatpush1.bf16.msra.mxu1 %v4447_v39  ;;  %v4470_v19 = vld [vmem:[#allocation2 + $0x388] sm:$0xff]  ;;  %v4469_v60 = vld [vmem:[#allocation2 + $0x380] sm:$0xff] }
 0xd99   :  { %4513 = vmatprep.subr.bf16.mxu1 %v4450_v33  ;;  %v4472_v27 = vld [vmem:[#allocation2 + $0x3c8] sm:$0xff]  ;;  %v4471_v24 = vld [vmem:[#allocation2 + $0x3c0] sm:$0xff] }
 0xd9a   :  { %v4474_v26 = vld [vmem:[#allocation2 + $0x408] sm:$0xff]  ;;  %v4473_v18 = vld [vmem:[#allocation2 + $0x400] sm:$0xff] }
 0xd9b   :  { %v4476_v6 = vld [vmem:[#allocation2 + $0x448] sm:$0xff]  ;;  %v4475_v8 = vld [vmem:[#allocation2 + $0x440] sm:$0xff] }
 0xd9c   :  { %4514 = vmatpush1.bf16.msra.mxu1 %v4449_v32  ;;  %v4478_v3 = vld [vmem:[#allocation2 + $0x488] sm:$0xff]  ;;  %v4477_v13 = vld [vmem:[#allocation2 + $0x480] sm:$0xff] }
 0xd9d   :  { %4515 = vmatprep.subr.bf16.mxu1 %v4452_v7  ;;  %v4480_v14 = vld [vmem:[#allocation2 + $0x4c8] sm:$0xff]  ;;  %v4479_v58 = vld [vmem:[#allocation2 + $0x4c0] sm:$0xff] }
 0xd9e   :  { %v4482_v15 = vld [vmem:[#allocation2 + $0x508] sm:$0xff]  ;;  %v4481_v40 = vld [vmem:[#allocation2 + $0x500] sm:$0xff] }
 0xd9f   :  { %v4484_v30 = vld [vmem:[#allocation2 + $0x548] sm:$0xff]  ;;  %v4483_v20 = vld [vmem:[#allocation2 + $0x540] sm:$0xff] }
 0xda0   :  { %4516 = vmatpush1.bf16.msra.mxu1 %v4451_v29  ;;  %v4486_v61 = vld [vmem:[#allocation2 + $0x588] sm:$0xff]  ;;  %v4485_v56 = vld [vmem:[#allocation2 + $0x580] sm:$0xff] }
 0xda1   :  { %4517 = vmatprep.subr.bf16.mxu1 %v4454_v11  ;;  %v4488_v22 = vld [vmem:[#allocation2 + $0x5c8] sm:$0xff]  ;;  %v4487_v36 = vld [vmem:[#allocation2 + $0x5c0] sm:$0xff]  ;;  %v4439_v11 = vpack.c.bf16 %v8301_v63, %v8301_v63 }
 0xda2   :  { %v4490_v37 = vld [vmem:[#allocation2 + $0x608] sm:$0xff]  ;;  %v4489_v41 = vld [vmem:[#allocation2 + $0x600] sm:$0xff] }
 0xda3   :  { %v4492_v43 = vld [vmem:[#allocation2 + $0x648] sm:$0xff]  ;;  %v4491_v45 = vld [vmem:[#allocation2 + $0x640] sm:$0xff] }
 0xda4   :  { %4518 = vmatpush1.bf16.msra.mxu1 %v4453_v42  ;;  %v4494_v48 = vld [vmem:[#allocation2 + $0x688] sm:$0xff]  ;;  %v4493_v53 = vld [vmem:[#allocation2 + $0x680] sm:$0xff] }
 0xda5   :  { %4519 = vmatprep.subr.bf16.mxu1 %v4456_v9  ;;  %v4496_v17 = vld [vmem:[#allocation2 + $0x6c8] sm:$0xff]  ;;  %v4495_v62 = vld [vmem:[#allocation2 + $0x6c0] sm:$0xff] }
 0xda6   :  { %v4498_v1 = vld [vmem:[#allocation2 + $0x708] sm:$0xff]  ;;  %v4497_v2 = vld [vmem:[#allocation2 + $0x700] sm:$0xff] }
 0xda7   :  { %v4500_v5 = vld [vmem:[#allocation2 + $0x748] sm:$0xff]  ;;  %v4499_v39 = vld [vmem:[#allocation2 + $0x740] sm:$0xff] }
 0xda8   :  { %4520 = vmatpush1.bf16.msra.mxu1 %v4455_v46  ;;  %v4502_v33 = vld [vmem:[#allocation2 + $0x788] sm:$0xff]  ;;  %v4501_v32 = vld [vmem:[#allocation2 + $0x780] sm:$0xff] }
 0xda9   :  { %4521 = vmatprep.subr.bf16.mxu1 %v4458_v55  ;;  %v4504_v7 = vld [vmem:[#allocation2 + $0x7c8] sm:$0xff]  ;;  %v4503_v29 = vld [vmem:[#allocation2 + $0x7c0] sm:$0xff] }
 0xdac   :  { %4522 = vmatpush1.bf16.msra.mxu1 %v4457_v10 }
 0xdad   :  { %4523 = vmatprep.subr.bf16.mxu1 %v4460_v59 }
 0xdb0   :  { %4524 = vmatpush1.bf16.msra.mxu1 %v4459_v34 }
 0xdb1   :  { %4525 = vmatprep.subr.bf16.mxu1 %v4462_v44 }
 0xdb4   :  { %4526 = vmatpush1.bf16.msra.mxu1 %v4461_v12 }
 0xdb5   :  { %4527 = vmatprep.subr.bf16.mxu1 %v4464_v52 }
 0xdb8   :  { %4528 = vmatpush1.bf16.msra.mxu1 %v4463_v54 }
 0xdb9   :  { %4529 = vmatprep.subr.bf16.mxu1 %v4466_v47 }
 0xdbc   :  { %4530 = vmatpush1.bf16.msra.mxu1 %v4465_v57 }
 0xdbd   :  { %4531 = vmatprep.subr.bf16.mxu1 %v4468_v50 }
 0xdc0   :  { %4532 = vmatpush1.bf16.msra.mxu1 %v4467_v51 }
 0xdc1   :  { %4533 = vmatprep.subr.bf16.mxu1 %v4470_v19 }
 0xdc4   :  { %4534 = vmatpush1.bf16.msra.mxu1 %v4469_v60 }
 0xdc5   :  { %4535 = vmatprep.subr.bf16.mxu1 %v4472_v27 }
 0xdc8   :  { %4536 = vmatpush1.bf16.msra.mxu1 %v4471_v24 }
 0xdc9   :  { %4546 = vmatprep.subr.bf16.mxu1 %v4474_v26 }
 0xdcb   :  { %4538 = vmatmul.mubr.bf16.vlgmr.msra.gmra.mrb[24].mxu1 %v4437_v4 }
 0xdcc   :  { %4547 = vmatpush1.bf16.msra.mxu1 %v4473_v18  ;;  %4578 = vmatprep.mubr.bf16.mxu1 %v4440_v25 }
 0xdcd   :  { %4548 = vmatprep.subr.bf16.mxu1 %v4476_v6 }
 0xdd0   :  { %4549 = vmatpush1.bf16.msra.mxu1 %v4475_v8 }
 0xdd1   :  { %4550 = vmatprep.subr.bf16.mxu1 %v4478_v3 }
 0xdd4   :  { %4551 = vmatpush1.bf16.msra.mxu1 %v4477_v13 }
 0xdd5   :  { %4552 = vmatprep.subr.bf16.mxu1 %v4480_v14 }
 0xdd8   :  { %4553 = vmatpush1.bf16.msra.mxu1 %v4479_v58 }
 0xdd9   :  { %4554 = vmatprep.subr.bf16.mxu1 %v4482_v15 }
 0xddc   :  { %4555 = vmatpush1.bf16.msra.mxu1 %v4481_v40 }
 0xddd   :  { %4556 = vmatprep.subr.bf16.mxu1 %v4484_v30 }
 0xde0   :  { %4557 = vmatpush1.bf16.msra.mxu1 %v4483_v20 }
 0xde1   :  { %4558 = vmatprep.subr.bf16.mxu1 %v4486_v61 }
 0xde4   :  { %4559 = vmatpush1.bf16.msra.mxu1 %v4485_v56 }
 0xde5   :  { %4560 = vmatprep.subr.bf16.mxu1 %v4488_v22 }
 0xde8   :  { %4561 = vmatpush1.bf16.msra.mxu1 %v4487_v36 }
 0xde9   :  { %4562 = vmatprep.subr.bf16.mxu1 %v4490_v37  ;;  %v4588_v37 = vld [vmem:[#allocation9 + $0x55] ss:$4 sm:$0x3] }
 0xdec   :  { %4563 = vmatpush1.bf16.msra.mxu1 %v4489_v41  ;;  %v4590_v41 = vld [vmem:[#allocation9 + $0x56] ss:$4 sm:$0x3] }
 0xded   :  { %4564 = vmatprep.subr.bf16.mxu1 %v4492_v43  ;;  %v4633_v43 = vrot.slane %v4588_v37, %v9164_v38 }
 0xdf0   :  { %4565 = vmatpush1.bf16.msra.mxu1 %v4491_v45 }
 0xdf1   :  { %4566 = vmatprep.subr.bf16.mxu1 %v4494_v48  ;;  %v4637_v48 = vrot.slane %v4588_v37, %v9166_v0 }
 0xdf4   :  { %4567 = vmatpush1.bf16.msra.mxu1 %v4493_v53 }
 0xdf5   :  { %4568 = vmatprep.subr.bf16.mxu1 %v4496_v17 }
 0xdf8   :  { %4569 = vmatpush1.bf16.msra.mxu1 %v4495_v62  ;;  %v4646_v62 = vrot.slane %v4590_v41, %v9164_v38 }
 0xdf9   :  { %4570 = vmatprep.subr.bf16.mxu1 %v4498_v1 }
 0xdfc   :  { %4571 = vmatpush1.bf16.msra.mxu1 %v4497_v2  ;;  %v4650_v2 = vrot.slane %v4590_v41, %v9166_v0 }
 0xdfd   :  { %4572 = vmatprep.subr.bf16.mxu1 %v4500_v5 }
 0xe00   :  { %4573 = vmatpush1.bf16.msra.mxu1 %v4499_v39 }
 0xe01   :  { %4574 = vmatprep.subr.bf16.mxu1 %v4502_v33 }
 0xe04   :  { %4575 = vmatpush1.bf16.msra.mxu1 %v4501_v32 }
 0xe05   :  { %4576 = vmatprep.subr.bf16.mxu1 %v4504_v7 }
 0xe08   :  { %4577 = vmatpush1.bf16.msra.mxu1 %v4503_v29 }
 0xe0b   :  { %4579 = vmatmul.mubr.bf16.vlgmr.msra.gmra.mrb[24].mxu1 %v4439_v11 }
 0xede   :  { %v4580_v42 = vpop.f32.mrb[24].mxu1 }
 0xedf   :  { %v4591_v9 = vrot.slane %v4580_v42, 4  ;;  %v4582_v46 = vpop.f32.mrb[25].mxu1 }
 0xee0   :  { %v4597_v55 = vrot.slane %v4582_v46, 4  ;;  %v4584_v10 = vpop.f32.mrb[26].mxu1 }
 0xee1   :  { %v4592_v59 = vadd.f32 %v4591_v9, %v4580_v42  ;;  %v4585_v34 = vpop.f32.mrb[27].mxu1 }
 0xee2   :  { %v4598_v44 = vadd.f32 %v4597_v55, %v4582_v46 }
 0xee3   :  { %v4593_v12 = vrot.slane %v4592_v59, 2 }
 0xee4   :  { %v4599_v52 = vrot.slane %v4598_v44, 2 }
 0xee5   :  { %v4594_v54 = vadd.f32 %v4593_v12, %v4592_v59 }
 0xee6   :  { %v4600_v47 = vadd.f32 %v4599_v52, %v4598_v44 }
 0xee7   :  { %v4595_v57 = vrot.slane %v4594_v54, 1 }
 0xee8   :  { %v4601_v50 = vrot.slane %v4600_v47, 1 }
 0xee9   :  { %v4596_v51 = vadd.f32 %v4595_v57, %v4594_v54 }
 0xeea   :  { %v4602_v19 = vadd.f32 %v4601_v50, %v4600_v47 }
 0xeeb   :  { %v4603_v60 = vmul.f32 0.125, %v4596_v51 }
 0xeec   :  { %v4604_v63 = vmul.f32 0.125, %v4602_v19 }
 0xeed   :  { %v4605_v27 = vsub.f32 %v4580_v42, %v4603_v60 }
 0xeee   :  { %v4606_v24 = vsub.f32 %v4582_v46, %v4604_v63 }
 0xeef   :  { %v4607_v26 = vmul.f32 %v4605_v27, %v4605_v27 }
 0xef0   :  { %v4608_v4 = vmul.f32 %v4606_v24, %v4606_v24 }
 0xef1   :  { %v4609_v25 = vrot.slane %v4607_v26, 4 }
 0xef2   :  { %v4615_v18 = vrot.slane %v4608_v4, 4 }
 0xef3   :  { %v4610_v6 = vadd.f32 %v4609_v25, %v4607_v26 }
 0xef4   :  { %v4616_v8 = vadd.f32 %v4615_v18, %v4608_v4 }
 0xef5   :  { %v4611_v3 = vrot.slane %v4610_v6, 2 }
 0xef6   :  { %v4617_v13 = vrot.slane %v4616_v8, 2 }
 0xef7   :  { %v4612_v14 = vadd.f32 %v4611_v3, %v4610_v6 }
 0xef8   :  { %v4618_v58 = vadd.f32 %v4617_v13, %v4616_v8 }
 0xef9   :  { %v4613_v15 = vrot.slane %v4612_v14, 1 }
 0xefa   :  { %v4619_v40 = vrot.slane %v4618_v58, 1 }
 0xefb   :  { %v4614_v30 = vadd.f32 %v4613_v15, %v4612_v14 }
 0xefc   :  { %v4620_v20 = vadd.f32 %v4619_v40, %v4618_v58 }
 0xefd   :  { %v4621_v61 = vmul.f32 0.125, %v4614_v30 }
 0xefe   :  { %v4622_v56 = vmul.f32 0.125, %v4620_v20 }
 0xeff   :  { %v4623_v22 = vadd.f32 1e-05, %v4621_v61 }
 0xf00   :  { %v4624_v36 = vadd.f32 1e-05, %v4622_v56 }
 0xf01   :  { %6311 = vrsqrt.f32 %v4623_v22 }
 0xf02   :  { %6313 = vrsqrt.f32 %v4624_v36 }
 0xf0b   :  { %v6312_v45 = vpop.eup %6311 }
 0xf0c   :  { %v6314_v53 = vpop.eup %6313  ;;  %v4627_v17 = vmul.f32 %v6312_v45, %v4605_v27 }
 0xf0d   :  { %v4628_v1 = vmul.f32 %v6314_v53, %v4606_v24 }
 0xf0e   :  { %v4640_v5 = vmul.f32 %v4633_v43, %v4627_v17 }
 0xf0f   :  { %v4641_v39 = vmul.f32 %v4637_v48, %v4628_v1 }
 0xf10   :  { %v4653_v33 = vadd.f32 %v4646_v62, %v4640_v5 }
 0xf11   :  { %v4654_v32 = vadd.f32 %v4650_v2, %v4641_v39 }
 0xf12   :  { %v4655_v7 = vmax.f32 %v4653_v33, 0.0 }
 0xf13   :  { %v4656_v29 = vmax.f32 %v4654_v32, 0.0 }
 0xf14   :  { %6501 = dma.done.wait [#allocation3 + $0x1], 2048 }
 0xf15   :  { %6502 = vsyncadd [#allocation3 + $0x1], 4294965248  ;;  %v4694_v11 = vpack.c.bf16 %v4656_v29, %v4656_v29  ;;  %4674 = sst [smem:[#allocation34]] %s6531_s3  ;;  %s6539_s10 = smov [#allocation33]   ;;  %v4693_v60 = vpack.c.bf16 %v4655_v7, %v4655_v7 }
 0xf16   :  { %4676 = sst [smem:[#allocation34 + $0x1]] %s6516_s25 }
 0xf17   :  { %4743 = vmatprep.mubr.bf16.mxu1 %v4694_v11  ;;  %4678 = sst [smem:[#allocation34 + $0x2]] %s6520_s2 }
 0xf18   :  { %4680 = sst [smem:[#allocation34 + $0x3]] %s6518_s1 }
 0xf19   :  { %4682 = sst [smem:[#allocation34 + $0x4]] %s6519_s19 }
 0xf1a   :  { %4684 = sst [smem:[#allocation34 + $0x5]] %s6520_s2 }
 0xf1b   :  { %4686 = sst [smem:[#allocation34 + $0x6]] %s6519_s19 }
 0xf1c   :  { %4688 = sst [smem:[#allocation34 + $0x7]] %s6518_s1 }
 0xf1d   :  { %4690 = sst [smem:[#allocation34 + $0x8]] %s6522_s30 }
 0xf1e   :  { %4692 = dma.general %s8519_s11, 2048, %s6670_s17, %s6524_s18, %s6539_s10, [#allocation34], %s6666_s29, 0  }
 0xf1f   :  { %v4703_v42 = vld [vmem:[#allocation2 + $0xa00] sm:$0xff]  ;;  %v5947_v43 = vld [vmem:[#allocation9 + $0x5d] ss:$0 sm:$0xff]  ;;  %v5948_v48 = vld [vmem:[#allocation9 + $0x5e] ss:$0 sm:$0xff] }
 0xf20   :  { %v4695_v9 = vld [vmem:[#allocation2 + $0x800] sm:$0xff]  ;;  %6009 = vmatprep.subr.bf16.mxu1 %v4703_v42 }
 0xf21   :  { %v4704_v46 = vld [vmem:[#allocation2 + $0xa40] sm:$0xff]  ;;  %6010 = vmatpush3.bf16.msra.mxu1 %v4695_v9 }
 0xf22   :  { %6011 = vmatprep.subr.bf16.mxu1 %v4704_v46  ;;  %v4696_v55 = vld [vmem:[#allocation2 + $0x840] sm:$0xff] }
 0xf23   :  { %v4705_v10 = vld [vmem:[#allocation2 + $0xa80] sm:$0xff] }
 0xf24   :  { %v4697_v59 = vld [vmem:[#allocation2 + $0x880] sm:$0xff] }
 0xf25   :  { %6012 = vmatpush3.bf16.msra.mxu1 %v4696_v55  ;;  %v4706_v34 = vld [vmem:[#allocation2 + $0xac0] sm:$0xff] }
 0xf26   :  { %6013 = vmatprep.subr.bf16.mxu1 %v4705_v10  ;;  %v4698_v44 = vld [vmem:[#allocation2 + $0x8c0] sm:$0xff] }
 0xf27   :  { %v4707_v12 = vld [vmem:[#allocation2 + $0xb00] sm:$0xff] }
 0xf28   :  { %v4699_v52 = vld [vmem:[#allocation2 + $0x900] sm:$0xff] }
 0xf29   :  { %6014 = vmatpush3.bf16.msra.mxu1 %v4697_v59  ;;  %v4708_v54 = vld [vmem:[#allocation2 + $0xb40] sm:$0xff] }
 0xf2a   :  { %6015 = vmatprep.subr.bf16.mxu1 %v4706_v34  ;;  %v4700_v47 = vld [vmem:[#allocation2 + $0x940] sm:$0xff] }
 0xf2b   :  { %v4709_v57 = vld [vmem:[#allocation2 + $0xb80] sm:$0xff] }
 0xf2c   :  { %v4701_v50 = vld [vmem:[#allocation2 + $0x980] sm:$0xff] }
 0xf2d   :  { %6016 = vmatpush3.bf16.msra.mxu1 %v4698_v44  ;;  %v4710_v51 = vld [vmem:[#allocation2 + $0xbc0] sm:$0xff] }
 0xf2e   :  { %6017 = vmatprep.subr.bf16.mxu1 %v4707_v12  ;;  %v4702_v19 = vld [vmem:[#allocation2 + $0x9c0] sm:$0xff] }
 0xf31   :  { %6018 = vmatpush3.bf16.msra.mxu1 %v4699_v52 }
 0xf32   :  { %6019 = vmatprep.subr.bf16.mxu1 %v4708_v54 }
 0xf35   :  { %6020 = vmatpush3.bf16.msra.mxu1 %v4700_v47 }
 0xf36   :  { %6021 = vmatprep.subr.bf16.mxu1 %v4709_v57 }
 0xf39   :  { %6022 = vmatpush3.bf16.msra.mxu1 %v4701_v50 }
 0xf3a   :  { %6023 = vmatprep.subr.bf16.mxu1 %v4710_v51 }
 0xf3d   :  { %6024 = vmatpush3.bf16.msra.mxu1 %v4702_v19 }
 0xf40   :  { %4744 = vmatmul.mubr.bf16.vlgmr.msra.gmra.mrb[28].mxu1 %v4693_v60 }
0x1013   :  { %v6025_v63 = vpop.f32.mrb[28].mxu1 }
0x1014   :  { %v6026_v27 = vpop.f32.mrb[29].mxu1 }
0x1015   :  { %v6027_v24 = vadd.f32 %v6026_v27, %v6025_v63  ;;  %v6028_v26 = vpop.f32.mrb[30].mxu1 }
0x1016   :  { %v6029_v4 = vpop.f32.mrb[31].mxu1 }
0x1017   :  { %v4753_v25 = vrot.slane %v6027_v24, 4 }
0x1019   :  { %v4754_v18 = vadd.f32 %v6027_v24, %v4753_v25 }
0x101b   :  { %v4755_v6 = vrot.slane %v4754_v18, 2 }
0x101d   :  { %v4756_v8 = vadd.f32 %v4755_v6, %v4754_v18 }
0x101f   :  { %v4757_v3 = vrot.slane %v4756_v8, 1 }
0x1021   :  { %v4758_v13 = vadd.f32 %v4757_v3, %v4756_v8 }
0x1023   :  { %v4759_v14 = vmul.f32 0.125, %v4758_v13 }
0x1025   :  { %v4760_v58 = vsub.f32 %v6027_v24, %v4759_v14 }
0x1027   :  { %v4761_v15 = vmul.f32 %v4760_v58, %v4760_v58 }
0x1029   :  { %v4762_v40 = vrot.slane %v4761_v15, 4 }
0x102b   :  { %v4763_v30 = vadd.f32 %v4762_v40, %v4761_v15 }
0x102d   :  { %v4764_v20 = vrot.slane %v4763_v30, 2 }
0x102f   :  { %v4765_v61 = vadd.f32 %v4764_v20, %v4763_v30 }
0x1031   :  { %v4766_v56 = vrot.slane %v4765_v61, 1 }
0x1033   :  { %v4767_v22 = vadd.f32 %v4766_v56, %v4765_v61 }
0x1035   :  { %v4768_v36 = vmul.f32 0.125, %v4767_v22 }
0x1037   :  { %v4769_v37 = vadd.f32 1e-05, %v4768_v36 }
0x1039   :  { %6315 = vrsqrt.f32 %v4769_v37 }
0x1043   :  { %v6316_v41 = vpop.eup %6315 }
0x1044   :  { %v4771_v45 = vmul.f32 %v6316_v41, %v4760_v58 }
0x1046   :  { %v4776_v53 = vmul.f32 %v5947_v43, %v4771_v45 }
0x1048   :  { %v4781_v17 = vadd.f32 %v5948_v48, %v4776_v53 }
0x104a   :  { %v4782_v62 = vmax.f32 %v4781_v17, 0.0 }
0x104b   :  { %6503 = dma.done.wait [#allocation3], 2048 }
0x104c   :  { %6504 = vsyncadd [#allocation3], 4294965248  ;;  %4868 = vmatprep.mubr.bf16.mxu0 %v6536_v16  ;;  %4800 = sst [smem:[#allocation36]] %s6521_s28  ;;  %s6540_s11 = smov [#allocation35]   ;;  %v4819_v34 = vpack.c.bf16 %v4782_v62, %v4782_v62 }
0x104d   :  { %4802 = sst [smem:[#allocation36 + $0x1]] %s6516_s25 }
0x104e   :  { %4804 = sst [smem:[#allocation36 + $0x2]] %s6522_s30 }
0x104f   :  { %4806 = sst [smem:[#allocation36 + $0x3]] %s6518_s1 }
0x1050   :  { %4808 = sst [smem:[#allocation36 + $0x4]] %s6519_s19 }
0x1051   :  { %4810 = sst [smem:[#allocation36 + $0x5]] %s6520_s2 }
0x1052   :  { %4812 = sst [smem:[#allocation36 + $0x6]] %s6531_s3 }
0x1053   :  { %4814 = sst [smem:[#allocation36 + $0x7]] %s6518_s1 }
0x1054   :  { %4816 = sst [smem:[#allocation36 + $0x8]] %s6522_s30 }
0x1055   :  { %4818 = dma.general %s8520_s12, 8192, %s6717_s21, %s9169_s24, %s6540_s11, [#allocation36], %s6666_s29, 0  }
0x1056   :  { %v4821_v16 = vld [vmem:[#allocation2 + $0x8] sm:$0xff]  ;;  %v4820_v1 = vld [vmem:[#allocation2] sm:$0xff] }
0x1057   :  { %v4823_v2 = vld [vmem:[#allocation2 + $0x48] sm:$0xff]  ;;  %4836 = vmatprep.subr.bf16.mxu0 %v4821_v16  ;;  %v4822_v5 = vld [vmem:[#allocation2 + $0x40] sm:$0xff] }
0x1058   :  { %4837 = vmatpush1.bf16.msra.mxu0 %v4820_v1  ;;  %v4825_v39 = vld [vmem:[#allocation2 + $0x88] sm:$0xff]  ;;  %v4824_v33 = vld [vmem:[#allocation2 + $0x80] sm:$0xff] }
0x1059   :  { %4838 = vmatprep.subr.bf16.mxu0 %v4823_v2  ;;  %v4827_v32 = vld [vmem:[#allocation2 + $0xc8] sm:$0xff]  ;;  %v4826_v7 = vld [vmem:[#allocation2 + $0xc0] sm:$0xff] }
0x105a   :  { %v4829_v29 = vld [vmem:[#allocation2 + $0x108] sm:$0xff]  ;;  %v4828_v11 = vld [vmem:[#allocation2 + $0x100] sm:$0xff] }
0x105b   :  { %v4831_v42 = vld [vmem:[#allocation2 + $0x148] sm:$0xff]  ;;  %v4830_v9 = vld [vmem:[#allocation2 + $0x140] sm:$0xff] }
0x105c   :  { %4839 = vmatpush1.bf16.msra.mxu0 %v4822_v5  ;;  %v4833_v46 = vld [vmem:[#allocation2 + $0x188] sm:$0xff]  ;;  %v4832_v55 = vld [vmem:[#allocation2 + $0x180] sm:$0xff] }
0x105d   :  { %4840 = vmatprep.subr.bf16.mxu0 %v4825_v39  ;;  %v4835_v10 = vld [vmem:[#allocation2 + $0x1c8] sm:$0xff]  ;;  %v4834_v59 = vld [vmem:[#allocation2 + $0x1c0] sm:$0xff] }
0x105e   :  { %v4878_v62 = vld [vmem:[#allocation9 + $0x61] ss:$4 sm:$0x3]  ;;  %v4880_v16 = vld [vmem:[#allocation9 + $0x62] ss:$4 sm:$0x3] }
0x105f   :  { %v4923_v1 = vrot.slane %v4878_v62, %v9164_v38  ;;  %v4927_v5 = vrot.slane %v4878_v62, %v9166_v0 }
0x1060   :  { %4841 = vmatpush1.bf16.msra.mxu0 %v4824_v33 }
0x1061   :  { %4842 = vmatprep.subr.bf16.mxu0 %v4827_v32  ;;  %v4936_v32 = vrot.slane %v4880_v16, %v9164_v38 }
0x1064   :  { %4843 = vmatpush1.bf16.msra.mxu0 %v4826_v7 }
0x1065   :  { %4844 = vmatprep.subr.bf16.mxu0 %v4829_v29  ;;  %v4940_v29 = vrot.slane %v4880_v16, %v9166_v0 }
0x1068   :  { %4845 = vmatpush1.bf16.msra.mxu0 %v4828_v11 }
0x1069   :  { %4846 = vmatprep.subr.bf16.mxu0 %v4831_v42 }
0x106c   :  { %4847 = vmatpush1.bf16.msra.mxu0 %v4830_v9 }
0x106d   :  { %4848 = vmatprep.subr.bf16.mxu0 %v4833_v46 }
0x1070   :  { %4849 = vmatpush1.bf16.msra.mxu0 %v4832_v55 }
0x1071   :  { %4850 = vmatprep.subr.bf16.mxu0 %v4835_v10 }
0x1074   :  { %4851 = vmatpush1.bf16.msra.mxu0 %v4834_v59 }
0x1077   :  { %4869 = vmatmul.mubr.bf16.vlgmr.msra.gmra.mrb[20].mxu0 %v4819_v34 }
0x114a   :  { %v4870_v44 = vpop.f32.mrb[20].mxu0 }
0x114b   :  { %v4881_v12 = vrot.slane %v4870_v44, 4  ;;  %v4872_v52 = vpop.f32.mrb[21].mxu0 }
0x114c   :  { %v4887_v54 = vrot.slane %v4872_v52, 4  ;;  %v4874_v47 = vpop.f32.mrb[22].mxu0 }
0x114d   :  { %v4882_v57 = vadd.f32 %v4881_v12, %v4870_v44  ;;  %v4875_v50 = vpop.f32.mrb[23].mxu0 }
0x114e   :  { %v4888_v51 = vadd.f32 %v4887_v54, %v4872_v52 }
0x114f   :  { %v4883_v19 = vrot.slane %v4882_v57, 2 }
0x1150   :  { %v4889_v60 = vrot.slane %v4888_v51, 2 }
0x1151   :  { %v4884_v63 = vadd.f32 %v4883_v19, %v4882_v57 }
0x1152   :  { %v4890_v27 = vadd.f32 %v4889_v60, %v4888_v51 }
0x1153   :  { %v4885_v24 = vrot.slane %v4884_v63, 1 }
0x1154   :  { %v4891_v26 = vrot.slane %v4890_v27, 1 }
0x1155   :  { %v4886_v4 = vadd.f32 %v4885_v24, %v4884_v63 }
0x1156   :  { %v4892_v25 = vadd.f32 %v4891_v26, %v4890_v27 }
0x1157   :  { %v4893_v18 = vmul.f32 0.125, %v4886_v4 }
0x1158   :  { %v4894_v6 = vmul.f32 0.125, %v4892_v25 }
0x1159   :  { %v4895_v8 = vsub.f32 %v4870_v44, %v4893_v18 }
0x115a   :  { %v4896_v3 = vsub.f32 %v4872_v52, %v4894_v6 }
0x115b   :  { %v4897_v13 = vmul.f32 %v4895_v8, %v4895_v8 }
0x115c   :  { %v4898_v14 = vmul.f32 %v4896_v3, %v4896_v3 }
0x115d   :  { %v4899_v58 = vrot.slane %v4897_v13, 4 }
0x115e   :  { %v4905_v15 = vrot.slane %v4898_v14, 4 }
0x115f   :  { %v4900_v40 = vadd.f32 %v4899_v58, %v4897_v13 }
0x1160   :  { %v4906_v30 = vadd.f32 %v4905_v15, %v4898_v14 }
0x1161   :  { %v4901_v20 = vrot.slane %v4900_v40, 2 }
0x1162   :  { %v4907_v61 = vrot.slane %v4906_v30, 2 }
0x1163   :  { %v4902_v56 = vadd.f32 %v4901_v20, %v4900_v40 }
0x1164   :  { %v4908_v22 = vadd.f32 %v4907_v61, %v4906_v30 }
0x1165   :  { %v4903_v36 = vrot.slane %v4902_v56, 1 }
0x1166   :  { %v4909_v37 = vrot.slane %v4908_v22, 1 }
0x1167   :  { %v4904_v41 = vadd.f32 %v4903_v36, %v4902_v56 }
0x1168   :  { %v4910_v43 = vadd.f32 %v4909_v37, %v4908_v22 }
0x1169   :  { %v4911_v45 = vmul.f32 0.125, %v4904_v41 }
0x116a   :  { %v4912_v48 = vmul.f32 0.125, %v4910_v43 }
0x116b   :  { %v4913_v53 = vadd.f32 1e-05, %v4911_v45 }
0x116c   :  { %v4914_v17 = vadd.f32 1e-05, %v4912_v48 }
0x116d   :  { %6317 = vrsqrt.f32 %v4913_v53 }
0x116e   :  { %6319 = vrsqrt.f32 %v4914_v17 }
0x1177   :  { %v6318_v2 = vpop.eup %6317 }
0x1178   :  { %v6320_v39 = vpop.eup %6319  ;;  %v4917_v33 = vmul.f32 %v6318_v2, %v4895_v8 }
0x1179   :  { %v4918_v7 = vmul.f32 %v6320_v39, %v4896_v3 }
0x117a   :  { %v4930_v11 = vmul.f32 %v4923_v1, %v4917_v33 }
0x117b   :  { %v4931_v42 = vmul.f32 %v4927_v5, %v4918_v7 }
0x117c   :  { %v8385_v9 = vadd.f32 %v4936_v32, %v4930_v11 }
0x117d   :  { %v4944_v46 = vadd.f32 %v4940_v29, %v4931_v42 }
0x117e   :  { %v4945_v55 = vmax.f32 %v8385_v9, 0.0 }
0x117f   :  { %v4946_v10 = vmax.f32 %v4944_v46, 0.0 }
0x1180   :  { %6505 = dma.done.wait [#allocation3 + $0x1], 8192 }
0x1181   :  { %6506 = vsyncadd [#allocation3 + $0x1], 4294959104  ;;  %v4984_v59 = vpack.c.bf16 %v4946_v10, %v4946_v10  ;;  %4964 = sst [smem:[#allocation38]] %s6531_s3  ;;  %s6541_s12 = smov [#allocation37]  }
0x1182   :  { %4966 = sst [smem:[#allocation38 + $0x1]] %s6516_s25 }
0x1183   :  { %5104 = vmatprep.mubr.bf16.mxu0 %v4984_v59  ;;  %5145 = vmatprep.mubr.bf16.mxu1 %v4984_v59  ;;  %4968 = sst [smem:[#allocation38 + $0x2]] %s6520_s2 }
0x1184   :  { %4970 = sst [smem:[#allocation38 + $0x3]] %s6518_s1 }
0x1185   :  { %4972 = sst [smem:[#allocation38 + $0x4]] %s6519_s19 }
0x1186   :  { %4974 = sst [smem:[#allocation38 + $0x5]] %s6520_s2 }
0x1187   :  { %4976 = sst [smem:[#allocation38 + $0x6]] %s6519_s19 }
0x1188   :  { %4978 = sst [smem:[#allocation38 + $0x7]] %s6518_s1 }
0x1189   :  { %4980 = sst [smem:[#allocation38 + $0x8]] %s6522_s30 }
0x118a   :  { %4982 = dma.general %s8521_s13, 8192, %s6670_s17, %s6524_s18, %s6541_s12, [#allocation38], %s6666_s29, 0  }
0x118b   :  { %v4986_v34 = vld [vmem:[#allocation2 + $0x808] sm:$0xff]  ;;  %v4988_v44 = vld [vmem:[#allocation2 + $0x818] sm:$0xff]  ;;  %v4985_v12 = vld [vmem:[#allocation2 + $0x800] sm:$0xff] }
0x118c   :  { %5072 = vmatprep.subr.bf16.mxu0 %v4986_v34  ;;  %5113 = vmatprep.subr.bf16.mxu1 %v4988_v44  ;;  %v4987_v52 = vld [vmem:[#allocation2 + $0x810] sm:$0xff]  ;;  %v4990_v54 = vld [vmem:[#allocation2 + $0x848] sm:$0xff]  ;;  %v4992_v47 = vld [vmem:[#allocation2 + $0x858] sm:$0xff] }
0x118d   :  { %5073 = vmatpush1.bf16.msra.mxu0 %v4985_v12  ;;  %5114 = vmatpush1.bf16.msra.mxu1 %v4987_v52  ;;  %v4989_v57 = vld [vmem:[#allocation2 + $0x840] sm:$0xff]  ;;  %v4991_v50 = vld [vmem:[#allocation2 + $0x850] sm:$0xff]  ;;  %v4994_v51 = vld [vmem:[#allocation2 + $0x888] sm:$0xff] }
0x118e   :  { %5074 = vmatprep.subr.bf16.mxu0 %v4990_v54  ;;  %5115 = vmatprep.subr.bf16.mxu1 %v4992_v47  ;;  %v4996_v19 = vld [vmem:[#allocation2 + $0x898] sm:$0xff]  ;;  %v4993_v60 = vld [vmem:[#allocation2 + $0x880] sm:$0xff]  ;;  %v4995_v63 = vld [vmem:[#allocation2 + $0x890] sm:$0xff] }
0x118f   :  { %v4998_v27 = vld [vmem:[#allocation2 + $0x8c8] sm:$0xff]  ;;  %v5000_v24 = vld [vmem:[#allocation2 + $0x8d8] sm:$0xff]  ;;  %v4997_v26 = vld [vmem:[#allocation2 + $0x8c0] sm:$0xff] }
0x1190   :  { %v4999_v4 = vld [vmem:[#allocation2 + $0x8d0] sm:$0xff]  ;;  %v5002_v25 = vld [vmem:[#allocation2 + $0x908] sm:$0xff]  ;;  %v5004_v18 = vld [vmem:[#allocation2 + $0x918] sm:$0xff] }
0x1191   :  { %5075 = vmatpush1.bf16.msra.mxu0 %v4989_v57  ;;  %5116 = vmatpush1.bf16.msra.mxu1 %v4991_v50  ;;  %v5001_v6 = vld [vmem:[#allocation2 + $0x900] sm:$0xff]  ;;  %v5003_v8 = vld [vmem:[#allocation2 + $0x910] sm:$0xff]  ;;  %v5006_v3 = vld [vmem:[#allocation2 + $0x948] sm:$0xff] }
0x1192   :  { %5076 = vmatprep.subr.bf16.mxu0 %v4994_v51  ;;  %5117 = vmatprep.subr.bf16.mxu1 %v4996_v19  ;;  %v5008_v13 = vld [vmem:[#allocation2 + $0x958] sm:$0xff]  ;;  %v5005_v14 = vld [vmem:[#allocation2 + $0x940] sm:$0xff]  ;;  %v5007_v58 = vld [vmem:[#allocation2 + $0x950] sm:$0xff] }
0x1193   :  { %v5010_v15 = vld [vmem:[#allocation2 + $0x988] sm:$0xff]  ;;  %v5012_v40 = vld [vmem:[#allocation2 + $0x998] sm:$0xff]  ;;  %v5009_v30 = vld [vmem:[#allocation2 + $0x980] sm:$0xff] }
0x1194   :  { %v5011_v20 = vld [vmem:[#allocation2 + $0x990] sm:$0xff]  ;;  %v5014_v61 = vld [vmem:[#allocation2 + $0x9c8] sm:$0xff]  ;;  %v5016_v56 = vld [vmem:[#allocation2 + $0x9d8] sm:$0xff] }
0x1195   :  { %5077 = vmatpush1.bf16.msra.mxu0 %v4993_v60  ;;  %5118 = vmatpush1.bf16.msra.mxu1 %v4995_v63  ;;  %v5013_v22 = vld [vmem:[#allocation2 + $0x9c0] sm:$0xff]  ;;  %v5015_v36 = vld [vmem:[#allocation2 + $0x9d0] sm:$0xff]  ;;  %v5018_v37 = vld [vmem:[#allocation2 + $0xa08] sm:$0xff]  ;;  %v4983_v60 = vpack.c.bf16 %v4945_v55, %v4945_v55 }
0x1196   :  { %5078 = vmatprep.subr.bf16.mxu0 %v4998_v27  ;;  %5119 = vmatprep.subr.bf16.mxu1 %v5000_v24  ;;  %v5020_v41 = vld [vmem:[#allocation2 + $0xa18] sm:$0xff]  ;;  %v5017_v43 = vld [vmem:[#allocation2 + $0xa00] sm:$0xff]  ;;  %v5019_v45 = vld [vmem:[#allocation2 + $0xa10] sm:$0xff] }
0x1197   :  { %v5022_v48 = vld [vmem:[#allocation2 + $0xa48] sm:$0xff]  ;;  %v5024_v53 = vld [vmem:[#allocation2 + $0xa58] sm:$0xff]  ;;  %v5021_v17 = vld [vmem:[#allocation2 + $0xa40] sm:$0xff] }
0x1198   :  { %v5023_v62 = vld [vmem:[#allocation2 + $0xa50] sm:$0xff]  ;;  %v5026_v16 = vld [vmem:[#allocation2 + $0xa88] sm:$0xff]  ;;  %v5028_v1 = vld [vmem:[#allocation2 + $0xa98] sm:$0xff] }
0x1199   :  { %5079 = vmatpush1.bf16.msra.mxu0 %v4997_v26  ;;  %5120 = vmatpush1.bf16.msra.mxu1 %v4999_v4  ;;  %v5025_v2 = vld [vmem:[#allocation2 + $0xa80] sm:$0xff]  ;;  %v5027_v5 = vld [vmem:[#allocation2 + $0xa90] sm:$0xff]  ;;  %v5030_v39 = vld [vmem:[#allocation2 + $0xac8] sm:$0xff] }
0x119a   :  { %5080 = vmatprep.subr.bf16.mxu0 %v5002_v25  ;;  %5121 = vmatprep.subr.bf16.mxu1 %v5004_v18  ;;  %v5032_v33 = vld [vmem:[#allocation2 + $0xad8] sm:$0xff]  ;;  %v5029_v32 = vld [vmem:[#allocation2 + $0xac0] sm:$0xff]  ;;  %v5031_v7 = vld [vmem:[#allocation2 + $0xad0] sm:$0xff] }
0x119b   :  { %v5034_v29 = vld [vmem:[#allocation2 + $0xb08] sm:$0xff]  ;;  %v5036_v11 = vld [vmem:[#allocation2 + $0xb18] sm:$0xff]  ;;  %v5033_v42 = vld [vmem:[#allocation2 + $0xb00] sm:$0xff] }
0x119c   :  { %v5035_v46 = vld [vmem:[#allocation2 + $0xb10] sm:$0xff]  ;;  %v5038_v10 = vld [vmem:[#allocation2 + $0xb48] sm:$0xff]  ;;  %v5040_v59 = vld [vmem:[#allocation2 + $0xb58] sm:$0xff] }
0x119d   :  { %5081 = vmatpush1.bf16.msra.mxu0 %v5001_v6  ;;  %5122 = vmatpush1.bf16.msra.mxu1 %v5003_v8  ;;  %v5037_v34 = vld [vmem:[#allocation2 + $0xb40] sm:$0xff]  ;;  %v5039_v44 = vld [vmem:[#allocation2 + $0xb50] sm:$0xff]  ;;  %v5042_v12 = vld [vmem:[#allocation2 + $0xb88] sm:$0xff] }
0x119e   :  { %5082 = vmatprep.subr.bf16.mxu0 %v5006_v3  ;;  %5123 = vmatprep.subr.bf16.mxu1 %v5008_v13  ;;  %v5044_v52 = vld [vmem:[#allocation2 + $0xb98] sm:$0xff]  ;;  %v5041_v54 = vld [vmem:[#allocation2 + $0xb80] sm:$0xff]  ;;  %v5043_v47 = vld [vmem:[#allocation2 + $0xb90] sm:$0xff] }
0x119f   :  { %v5046_v57 = vld [vmem:[#allocation2 + $0xbc8] sm:$0xff]  ;;  %v5048_v50 = vld [vmem:[#allocation2 + $0xbd8] sm:$0xff]  ;;  %v5045_v51 = vld [vmem:[#allocation2 + $0xbc0] sm:$0xff] }
0x11a0   :  { %v5047_v19 = vld [vmem:[#allocation2 + $0xbd0] sm:$0xff] }
0x11a1   :  { %5083 = vmatpush1.bf16.msra.mxu0 %v5005_v14  ;;  %5124 = vmatpush1.bf16.msra.mxu1 %v5007_v58  ;;  %v5050_v63 = vld [vmem:[#allocation9 + $0x68] ss:$4 sm:$0xf] }
0x11a2   :  { %5084 = vmatprep.subr.bf16.mxu0 %v5010_v15  ;;  %5125 = vmatprep.subr.bf16.mxu1 %v5012_v40  ;;  %v5055_v27 = vrot.slane %v5050_v63, %v9164_v38  ;;  %v5063_v24 = vrot.slane %v5050_v63, %v9165_v49  ;;  %v5059_v26 = vrot.slane %v5050_v63, %v9166_v0 }
0x11a3   :  { %v5067_v4 = vrot.slane %v5050_v63, %v9167_v31 }
0x11a5   :  { %5085 = vmatpush1.bf16.msra.mxu0 %v5009_v30  ;;  %5126 = vmatpush1.bf16.msra.mxu1 %v5011_v20 }
0x11a6   :  { %5086 = vmatprep.subr.bf16.mxu0 %v5014_v61  ;;  %5127 = vmatprep.subr.bf16.mxu1 %v5016_v56 }
0x11a9   :  { %5087 = vmatpush1.bf16.msra.mxu0 %v5013_v22  ;;  %5128 = vmatpush1.bf16.msra.mxu1 %v5015_v36 }
0x11aa   :  { %5088 = vmatprep.subr.bf16.mxu0 %v5018_v37  ;;  %5129 = vmatprep.subr.bf16.mxu1 %v5020_v41 }
0x11ad   :  { %5089 = vmatpush1.bf16.msra.mxu0 %v5017_v43  ;;  %5130 = vmatpush1.bf16.msra.mxu1 %v5019_v45 }
0x11ae   :  { %5090 = vmatprep.subr.bf16.mxu0 %v5022_v48  ;;  %5131 = vmatprep.subr.bf16.mxu1 %v5024_v53 }
0x11b1   :  { %5091 = vmatpush1.bf16.msra.mxu0 %v5021_v17  ;;  %5132 = vmatpush1.bf16.msra.mxu1 %v5023_v62 }
0x11b2   :  { %5092 = vmatprep.subr.bf16.mxu0 %v5026_v16  ;;  %5133 = vmatprep.subr.bf16.mxu1 %v5028_v1 }
0x11b5   :  { %5093 = vmatpush1.bf16.msra.mxu0 %v5025_v2  ;;  %5134 = vmatpush1.bf16.msra.mxu1 %v5027_v5 }
0x11b6   :  { %5094 = vmatprep.subr.bf16.mxu0 %v5030_v39  ;;  %5135 = vmatprep.subr.bf16.mxu1 %v5032_v33 }
0x11b9   :  { %5095 = vmatpush1.bf16.msra.mxu0 %v5029_v32  ;;  %5136 = vmatpush1.bf16.msra.mxu1 %v5031_v7 }
0x11ba   :  { %5096 = vmatprep.subr.bf16.mxu0 %v5034_v29  ;;  %5137 = vmatprep.subr.bf16.mxu1 %v5036_v11 }
0x11bd   :  { %5097 = vmatpush1.bf16.msra.mxu0 %v5033_v42  ;;  %5138 = vmatpush1.bf16.msra.mxu1 %v5035_v46 }
0x11be   :  { %5098 = vmatprep.subr.bf16.mxu0 %v5038_v10  ;;  %5139 = vmatprep.subr.bf16.mxu1 %v5040_v59 }
0x11c1   :  { %5099 = vmatpush1.bf16.msra.mxu0 %v5037_v34  ;;  %5140 = vmatpush1.bf16.msra.mxu1 %v5039_v44 }
0x11c2   :  { %5100 = vmatprep.subr.bf16.mxu0 %v5042_v12  ;;  %5141 = vmatprep.subr.bf16.mxu1 %v5044_v52 }
0x11c5   :  { %5101 = vmatpush1.bf16.msra.mxu0 %v5041_v54  ;;  %5142 = vmatpush1.bf16.msra.mxu1 %v5043_v47 }
0x11c6   :  { %5102 = vmatprep.subr.bf16.mxu0 %v5046_v57  ;;  %5143 = vmatprep.subr.bf16.mxu1 %v5048_v50 }
0x11c9   :  { %5103 = vmatpush1.bf16.msra.mxu0 %v5045_v51  ;;  %5144 = vmatpush1.bf16.msra.mxu1 %v5047_v19 }
0x11cc   :  { %5105 = vmatmul.mubr.bf16.vlgmr.msra.gmra.mrb[24].mxu0 %v4983_v60  ;;  %5146 = vmatmul.mubr.bf16.vlgmr.msra.gmra.mrb[32].mxu1 %v4983_v60 }
0x129f   :  { %v5106_v25 = vpop.f32.mrb[24].mxu0  ;;  %v5147_v18 = vpop.f32.mrb[32].mxu1 }
0x12a0   :  { %v8410_v6 = vadd.f32 %v5106_v25, %v5055_v27  ;;  %v8412_v9 = vadd.f32 %v5147_v18, %v5063_v24  ;;  %v5108_v55 = vpop.f32.mrb[25].mxu0  ;;  %v5149_v8 = vpop.f32.mrb[33].mxu1 }
0x12a1   :  { %v5109_v3 = vadd.f32 %v5108_v55, %v5059_v26  ;;  %v8414_v13 = vadd.f32 %v5149_v8, %v5067_v4  ;;  %v5110_v14 = vpop.f32.mrb[26].mxu0  ;;  %v5151_v58 = vpop.f32.mrb[34].mxu1 }
0x12a2   :  { %v5111_v15 = vpop.f32.mrb[27].mxu0  ;;  %v5152_v40 = vpop.f32.mrb[35].mxu1 }
0x12a3   :  { %6507 = dma.done.wait [#allocation3], 8192 }
0x12a4   :  { %6508 = vsyncadd [#allocation3], 4294959104  ;;  %v5162_v49 = vpack.c.bf16 %v5109_v3, %v8316_v23  ;;  %s6443_s2 = scalar_lea.hbm %s8522_s14, 2048 }
0x12a5   :  { %p6444_p7 = scmp.ne.s32.totalorder %s8522_s14, %s6443_s2  ;;  %p6447_p8 = scmp.lt.u32.totalorder %s6443_s2, %s8522_s14 }
0x12a7   :  { %p6449_p9 = pnand %p6447_p8, %p6444_p7 }
0x12a9   :  { %6452 = shalt.err (!%p6449_p9)  }
0x12aa   :  { %6464 = shalt.err (!%p8218_p3)  }
0x12ab   :  { %5160 = dma.hbm_to_vmem [thread:$0]  %s8522_s14, 2048, %s6717_s21, [#allocation3 + $0x1], %s6519_s19, %s6516_s25, %s6517_s26  ;;  %5261 = vmatprep.mubr.bf16.mxu0 %v5162_v49  ;;  %v5161_v52 = vpack.c.bf16 %v8410_v6, %v8312_v21  ;;  %v5164_v54 = vpack.c.bf16 %v8414_v13, %v8318_v28 }
0x12ac   :  { %v5166_v31 = vld [vmem:[#allocation2 + $0x8] sm:$0xff]  ;;  %v5165_v23 = vld [vmem:[#allocation2] sm:$0xff] }
0x12ad   :  { %v5168_v30 = vld [vmem:[#allocation2 + $0x48] sm:$0xff]  ;;  %5229 = vmatprep.subr.bf16.mxu0 %v5166_v31  ;;  %v5167_v20 = vld [vmem:[#allocation2 + $0x40] sm:$0xff] }
0x12ae   :  { %5230 = vmatpush1.bf16.msra.mxu0 %v5165_v23  ;;  %v5170_v61 = vld [vmem:[#allocation2 + $0x88] sm:$0xff]  ;;  %v5169_v56 = vld [vmem:[#allocation2 + $0x80] sm:$0xff] }
0x12af   :  { %5231 = vmatprep.subr.bf16.mxu0 %v5168_v30  ;;  %v5172_v22 = vld [vmem:[#allocation2 + $0xc8] sm:$0xff]  ;;  %v5171_v36 = vld [vmem:[#allocation2 + $0xc0] sm:$0xff] }
0x12b0   :  { %v5174_v37 = vld [vmem:[#allocation2 + $0x108] sm:$0xff]  ;;  %v5173_v41 = vld [vmem:[#allocation2 + $0x100] sm:$0xff] }
0x12b1   :  { %v5176_v43 = vld [vmem:[#allocation2 + $0x148] sm:$0xff]  ;;  %v5175_v45 = vld [vmem:[#allocation2 + $0x140] sm:$0xff] }
0x12b2   :  { %5232 = vmatpush1.bf16.msra.mxu0 %v5167_v20  ;;  %v5178_v48 = vld [vmem:[#allocation2 + $0x188] sm:$0xff]  ;;  %v5177_v53 = vld [vmem:[#allocation2 + $0x180] sm:$0xff] }
0x12b3   :  { %5233 = vmatprep.subr.bf16.mxu0 %v5170_v61  ;;  %v5180_v17 = vld [vmem:[#allocation2 + $0x1c8] sm:$0xff]  ;;  %v5179_v62 = vld [vmem:[#allocation2 + $0x1c0] sm:$0xff] }
0x12b4   :  { %v5182_v16 = vld [vmem:[#allocation2 + $0x208] sm:$0xff]  ;;  %v5181_v1 = vld [vmem:[#allocation2 + $0x200] sm:$0xff] }
0x12b5   :  { %v5184_v2 = vld [vmem:[#allocation2 + $0x248] sm:$0xff]  ;;  %v5183_v5 = vld [vmem:[#allocation2 + $0x240] sm:$0xff] }
0x12b6   :  { %5234 = vmatpush1.bf16.msra.mxu0 %v5169_v56  ;;  %v5186_v39 = vld [vmem:[#allocation2 + $0x288] sm:$0xff]  ;;  %v5185_v33 = vld [vmem:[#allocation2 + $0x280] sm:$0xff] }
0x12b7   :  { %5235 = vmatprep.subr.bf16.mxu0 %v5172_v22  ;;  %v5188_v32 = vld [vmem:[#allocation2 + $0x2c8] sm:$0xff]  ;;  %v5187_v7 = vld [vmem:[#allocation2 + $0x2c0] sm:$0xff]  ;;  %v5163_v22 = vpack.c.bf16 %v8412_v9, %v8314_v35 }
0x12b8   :  { %v5190_v29 = vld [vmem:[#allocation2 + $0x308] sm:$0xff]  ;;  %v5189_v11 = vld [vmem:[#allocation2 + $0x300] sm:$0xff] }
0x12b9   :  { %v5192_v42 = vld [vmem:[#allocation2 + $0x348] sm:$0xff]  ;;  %v5191_v46 = vld [vmem:[#allocation2 + $0x340] sm:$0xff] }
0x12ba   :  { %5236 = vmatpush1.bf16.msra.mxu0 %v5171_v36  ;;  %v5194_v10 = vld [vmem:[#allocation2 + $0x388] sm:$0xff]  ;;  %v5193_v59 = vld [vmem:[#allocation2 + $0x380] sm:$0xff] }
0x12bb   :  { %5237 = vmatprep.subr.bf16.mxu0 %v5174_v37  ;;  %v5196_v34 = vld [vmem:[#allocation2 + $0x3c8] sm:$0xff]  ;;  %v5195_v44 = vld [vmem:[#allocation2 + $0x3c0] sm:$0xff] }
0x12bc   :  { %v5198_v12 = vld [vmem:[#allocation2 + $0x408] sm:$0xff]  ;;  %v5197_v47 = vld [vmem:[#allocation2 + $0x400] sm:$0xff] }
0x12bd   :  { %v5200_v57 = vld [vmem:[#allocation2 + $0x448] sm:$0xff]  ;;  %v5199_v50 = vld [vmem:[#allocation2 + $0x440] sm:$0xff] }
0x12be   :  { %5238 = vmatpush1.bf16.msra.mxu0 %v5173_v41  ;;  %v5202_v51 = vld [vmem:[#allocation2 + $0x488] sm:$0xff]  ;;  %v5201_v19 = vld [vmem:[#allocation2 + $0x480] sm:$0xff] }
0x12bf   :  { %5239 = vmatprep.subr.bf16.mxu0 %v5176_v43  ;;  %v5204_v60 = vld [vmem:[#allocation2 + $0x4c8] sm:$0xff]  ;;  %v5203_v21 = vld [vmem:[#allocation2 + $0x4c0] sm:$0xff] }
0x12c0   :  { %v5206_v63 = vld [vmem:[#allocation2 + $0x508] sm:$0xff]  ;;  %v5205_v28 = vld [vmem:[#allocation2 + $0x500] sm:$0xff] }
0x12c1   :  { %v5208_v27 = vld [vmem:[#allocation2 + $0x548] sm:$0xff]  ;;  %v5207_v24 = vld [vmem:[#allocation2 + $0x540] sm:$0xff] }
0x12c2   :  { %5240 = vmatpush1.bf16.msra.mxu0 %v5175_v45  ;;  %v5210_v26 = vld [vmem:[#allocation2 + $0x588] sm:$0xff]  ;;  %v5209_v4 = vld [vmem:[#allocation2 + $0x580] sm:$0xff] }
0x12c3   :  { %5241 = vmatprep.subr.bf16.mxu0 %v5178_v48  ;;  %v5212_v25 = vld [vmem:[#allocation2 + $0x5c8] sm:$0xff]  ;;  %v5211_v18 = vld [vmem:[#allocation2 + $0x5c0] sm:$0xff] }
0x12c4   :  { %v5214_v6 = vld [vmem:[#allocation2 + $0x608] sm:$0xff]  ;;  %v5213_v55 = vld [vmem:[#allocation2 + $0x600] sm:$0xff] }
0x12c5   :  { %v5216_v8 = vld [vmem:[#allocation2 + $0x648] sm:$0xff]  ;;  %v5215_v3 = vld [vmem:[#allocation2 + $0x640] sm:$0xff] }
0x12c6   :  { %5242 = vmatpush1.bf16.msra.mxu0 %v5177_v53  ;;  %v5218_v13 = vld [vmem:[#allocation2 + $0x688] sm:$0xff]  ;;  %v5217_v14 = vld [vmem:[#allocation2 + $0x680] sm:$0xff] }
0x12c7   :  { %5243 = vmatprep.subr.bf16.mxu0 %v5180_v17  ;;  %v5220_v58 = vld [vmem:[#allocation2 + $0x6c8] sm:$0xff]  ;;  %v5219_v15 = vld [vmem:[#allocation2 + $0x6c0] sm:$0xff] }
0x12c8   :  { %v5222_v40 = vld [vmem:[#allocation2 + $0x708] sm:$0xff]  ;;  %v5221_v49 = vld [vmem:[#allocation2 + $0x700] sm:$0xff] }
0x12c9   :  { %v5224_v31 = vld [vmem:[#allocation2 + $0x748] sm:$0xff]  ;;  %v5223_v23 = vld [vmem:[#allocation2 + $0x740] sm:$0xff] }
0x12ca   :  { %5244 = vmatpush1.bf16.msra.mxu0 %v5179_v62  ;;  %v5226_v30 = vld [vmem:[#allocation2 + $0x788] sm:$0xff]  ;;  %v5225_v20 = vld [vmem:[#allocation2 + $0x780] sm:$0xff] }
0x12cb   :  { %5245 = vmatprep.subr.bf16.mxu0 %v5182_v16  ;;  %v5228_v61 = vld [vmem:[#allocation2 + $0x7c8] sm:$0xff]  ;;  %v5227_v56 = vld [vmem:[#allocation2 + $0x7c0] sm:$0xff] }
0x12ce   :  { %5246 = vmatpush1.bf16.msra.mxu0 %v5181_v1 }
0x12cf   :  { %5247 = vmatprep.subr.bf16.mxu0 %v5184_v2 }
0x12d2   :  { %5248 = vmatpush1.bf16.msra.mxu0 %v5183_v5 }
0x12d3   :  { %5249 = vmatprep.subr.bf16.mxu0 %v5186_v39 }
0x12d6   :  { %5250 = vmatpush1.bf16.msra.mxu0 %v5185_v33 }
0x12d7   :  { %5251 = vmatprep.subr.bf16.mxu0 %v5188_v32 }
0x12da   :  { %5252 = vmatpush1.bf16.msra.mxu0 %v5187_v7 }
0x12db   :  { %5253 = vmatprep.subr.bf16.mxu0 %v5190_v29 }
0x12de   :  { %5254 = vmatpush1.bf16.msra.mxu0 %v5189_v11 }
0x12df   :  { %5255 = vmatprep.subr.bf16.mxu0 %v5192_v42 }
0x12e2   :  { %5256 = vmatpush1.bf16.msra.mxu0 %v5191_v46 }
0x12e3   :  { %5257 = vmatprep.subr.bf16.mxu0 %v5194_v10 }
0x12e6   :  { %5258 = vmatpush1.bf16.msra.mxu0 %v5193_v59 }
0x12e7   :  { %5259 = vmatprep.subr.bf16.mxu0 %v5196_v34 }
0x12ea   :  { %5260 = vmatpush1.bf16.msra.mxu0 %v5195_v44 }
0x12eb   :  { %5272 = vmatprep.subr.bf16.mxu0 %v5198_v12 }
0x12ed   :  { %5262 = vmatmul.mubr.bf16.vlgmr.msra.gmra.mrb[28].mxu0 %v5161_v52 }
0x12ee   :  { %5273 = vmatpush1.bf16.msra.mxu0 %v5197_v47  ;;  %5304 = vmatprep.mubr.bf16.mxu0 %v5164_v54 }
0x12ef   :  { %5274 = vmatprep.subr.bf16.mxu0 %v5200_v57 }
0x12f2   :  { %5275 = vmatpush1.bf16.msra.mxu0 %v5199_v50 }
0x12f3   :  { %5276 = vmatprep.subr.bf16.mxu0 %v5202_v51 }
0x12f6   :  { %5277 = vmatpush1.bf16.msra.mxu0 %v5201_v19 }
0x12f7   :  { %5278 = vmatprep.subr.bf16.mxu0 %v5204_v60 }
0x12fa   :  { %5279 = vmatpush1.bf16.msra.mxu0 %v5203_v21 }
0x12fb   :  { %5280 = vmatprep.subr.bf16.mxu0 %v5206_v63 }
0x12fe   :  { %5281 = vmatpush1.bf16.msra.mxu0 %v5205_v28 }
0x12ff   :  { %5282 = vmatprep.subr.bf16.mxu0 %v5208_v27 }
0x1302   :  { %5283 = vmatpush1.bf16.msra.mxu0 %v5207_v24 }
0x1303   :  { %5284 = vmatprep.subr.bf16.mxu0 %v5210_v26 }
0x1306   :  { %5285 = vmatpush1.bf16.msra.mxu0 %v5209_v4 }
0x1307   :  { %5286 = vmatprep.subr.bf16.mxu0 %v5212_v25 }
0x130a   :  { %5287 = vmatpush1.bf16.msra.mxu0 %v5211_v18 }
0x130b   :  { %5288 = vmatprep.subr.bf16.mxu0 %v5214_v6 }
0x130e   :  { %5289 = vmatpush1.bf16.msra.mxu0 %v5213_v55 }
0x130f   :  { %5290 = vmatprep.subr.bf16.mxu0 %v5216_v8 }
0x1312   :  { %5291 = vmatpush1.bf16.msra.mxu0 %v5215_v3 }
0x1313   :  { %5292 = vmatprep.subr.bf16.mxu0 %v5218_v13 }
0x1316   :  { %5293 = vmatpush1.bf16.msra.mxu0 %v5217_v14 }
0x1317   :  { %5294 = vmatprep.subr.bf16.mxu0 %v5220_v58 }
0x131a   :  { %5295 = vmatpush1.bf16.msra.mxu0 %v5219_v15 }
0x131b   :  { %5296 = vmatprep.subr.bf16.mxu0 %v5222_v40 }
0x131e   :  { %5297 = vmatpush1.bf16.msra.mxu0 %v5221_v49 }
0x131f   :  { %5298 = vmatprep.subr.bf16.mxu0 %v5224_v31 }
0x1322   :  { %5299 = vmatpush1.bf16.msra.mxu0 %v5223_v23 }
0x1323   :  { %5300 = vmatprep.subr.bf16.mxu0 %v5226_v30 }
0x1326   :  { %5301 = vmatpush1.bf16.msra.mxu0 %v5225_v20 }
0x1327   :  { %5302 = vmatprep.subr.bf16.mxu0 %v5228_v61 }
0x132a   :  { %5303 = vmatpush1.bf16.msra.mxu0 %v5227_v56 }
0x132d   :  { %5305 = vmatmul.mubr.bf16.vlgmr.msra.gmra.mrb[28].mxu0 %v5163_v22 }
0x1400   :  { %v5306_v36 = vpop.f32.mrb[28].mxu0 }
0x1401   :  { %v5319_v37 = vrot.slane %v5306_v36, 4  ;;  %v5308_v41 = vpop.f32.mrb[29].mxu0 }
0x1402   :  { %v5325_v43 = vrot.slane %v5308_v41, 4  ;;  %v5310_v45 = vpop.f32.mrb[30].mxu0 }
0x1403   :  { %v5320_v48 = vadd.f32 %v5319_v37, %v5306_v36  ;;  %v5383_v53 = vrot.slane %v5310_v45, 4  ;;  %v5312_v17 = vpop.f32.mrb[31].mxu0 }
0x1404   :  { %v5326_v62 = vadd.f32 %v5325_v43, %v5308_v41  ;;  %v5389_v16 = vrot.slane %v5312_v17, 4 }
0x1405   :  { %v5321_v1 = vrot.slane %v5320_v48, 2  ;;  %v5384_v2 = vadd.f32 %v5383_v53, %v5310_v45 }
0x1406   :  { %v5327_v5 = vrot.slane %v5326_v62, 2  ;;  %v5390_v39 = vadd.f32 %v5389_v16, %v5312_v17 }
0x1407   :  { %v5322_v33 = vadd.f32 %v5321_v1, %v5320_v48  ;;  %v5385_v32 = vrot.slane %v5384_v2, 2  ;;  %v5316_v1 = vld [vmem:[#allocation9 + $0x79] ss:$4 sm:$0x3] }
0x1408   :  { %v5328_v7 = vadd.f32 %v5327_v5, %v5326_v62  ;;  %v5391_v35 = vrot.slane %v5390_v39, 2  ;;  %v5361_v5 = vrot.slane %v5316_v1, %v9164_v38 }
0x1409   :  { %v5323_v9 = vrot.slane %v5322_v33, 1  ;;  %v5386_v29 = vadd.f32 %v5385_v32, %v5384_v2  ;;  %v5318_v2 = vld [vmem:[#allocation9 + $0x7a] ss:$4 sm:$0x3] }
0x140a   :  { %v5329_v11 = vrot.slane %v5328_v7, 1  ;;  %v5392_v42 = vadd.f32 %v5391_v35, %v5390_v39  ;;  %v5374_v35 = vrot.slane %v5318_v2, %v9164_v38 }
0x140b   :  { %v5324_v46 = vadd.f32 %v5323_v9, %v5322_v33  ;;  %v5387_v10 = vrot.slane %v5386_v29, 1  ;;  %v5365_v33 = vrot.slane %v5316_v1, %v9166_v0 }
0x140c   :  { %v5330_v59 = vadd.f32 %v5329_v11, %v5328_v7  ;;  %v5393_v34 = vrot.slane %v5392_v42, 1  ;;  %v5378_v11 = vrot.slane %v5318_v2, %v9166_v0 }
0x140d   :  { %v5331_v44 = vmul.f32 0.125, %v5324_v46  ;;  %v5388_v12 = vadd.f32 %v5387_v10, %v5386_v29 }
0x140e   :  { %v5332_v52 = vmul.f32 0.125, %v5330_v59  ;;  %v5394_v54 = vadd.f32 %v5393_v34, %v5392_v42 }
0x140f   :  { %v5333_v47 = vsub.f32 %v5306_v36, %v5331_v44  ;;  %v5395_v57 = vmul.f32 0.125, %v5388_v12 }
0x1410   :  { %v5334_v50 = vsub.f32 %v5308_v41, %v5332_v52  ;;  %v5396_v51 = vmul.f32 0.125, %v5394_v54 }
0x1411   :  { %v5335_v19 = vmul.f32 %v5333_v47, %v5333_v47  ;;  %v5397_v60 = vsub.f32 %v5310_v45, %v5395_v57 }
0x1412   :  { %v5336_v21 = vmul.f32 %v5334_v50, %v5334_v50  ;;  %v5398_v63 = vsub.f32 %v5312_v17, %v5396_v51 }
0x1413   :  { %v5337_v28 = vrot.slane %v5335_v19, 4  ;;  %v5399_v27 = vmul.f32 %v5397_v60, %v5397_v60 }
0x1414   :  { %v5343_v24 = vrot.slane %v5336_v21, 4  ;;  %v5400_v26 = vmul.f32 %v5398_v63, %v5398_v63 }
0x1415   :  { %v5338_v4 = vadd.f32 %v5337_v28, %v5335_v19  ;;  %v5401_v25 = vrot.slane %v5399_v27, 4 }
0x1416   :  { %v5344_v18 = vadd.f32 %v5343_v24, %v5336_v21  ;;  %v5407_v6 = vrot.slane %v5400_v26, 4 }
0x1417   :  { %v5339_v55 = vrot.slane %v5338_v4, 2  ;;  %v5402_v8 = vadd.f32 %v5401_v25, %v5399_v27 }
0x1418   :  { %v5345_v3 = vrot.slane %v5344_v18, 2  ;;  %v5408_v13 = vadd.f32 %v5407_v6, %v5400_v26 }
0x1419   :  { %v5340_v14 = vadd.f32 %v5339_v55, %v5338_v4  ;;  %v5403_v58 = vrot.slane %v5402_v8, 2 }
0x141a   :  { %v5346_v15 = vadd.f32 %v5345_v3, %v5344_v18  ;;  %v5409_v40 = vrot.slane %v5408_v13, 2 }
0x141b   :  { %v5341_v49 = vrot.slane %v5340_v14, 1  ;;  %v5404_v31 = vadd.f32 %v5403_v58, %v5402_v8 }
0x141c   :  { %v5347_v23 = vrot.slane %v5346_v15, 1  ;;  %v5410_v30 = vadd.f32 %v5409_v40, %v5408_v13 }
0x141d   :  { %v5342_v20 = vadd.f32 %v5341_v49, %v5340_v14  ;;  %v5405_v61 = vrot.slane %v5404_v31, 1 }
0x141e   :  { %v5348_v56 = vadd.f32 %v5347_v23, %v5346_v15  ;;  %v5411_v22 = vrot.slane %v5410_v30, 1 }
0x141f   :  { %v5349_v36 = vmul.f32 0.125, %v5342_v20  ;;  %v5406_v37 = vadd.f32 %v5405_v61, %v5404_v31 }
0x1420   :  { %v5350_v41 = vmul.f32 0.125, %v5348_v56  ;;  %v5412_v43 = vadd.f32 %v5411_v22, %v5410_v30 }
0x1421   :  { %v5351_v45 = vadd.f32 1e-05, %v5349_v36  ;;  %v5413_v48 = vmul.f32 0.125, %v5406_v37 }
0x1422   :  { %v5352_v53 = vadd.f32 1e-05, %v5350_v41  ;;  %v5414_v17 = vmul.f32 0.125, %v5412_v43 }
0x1423   :  { %6321 = vrsqrt.f32 %v5351_v45  ;;  %v5415_v62 = vadd.f32 1e-05, %v5413_v48 }
0x1424   :  { %6323 = vrsqrt.f32 %v5352_v53  ;;  %v5416_v16 = vadd.f32 1e-05, %v5414_v17 }
0x1425   :  { %6325 = vrsqrt.f32 %v5415_v62 }
0x1426   :  { %6327 = vrsqrt.f32 %v5416_v16 }
0x142d   :  { %v6322_v39 = vpop.eup %6321 }
0x142e   :  { %v6324_v32 = vpop.eup %6323  ;;  %v5355_v7 = vmul.f32 %v6322_v39, %v5333_v47 }
0x142f   :  { %v6326_v9 = vpop.eup %6325  ;;  %v5356_v29 = vmul.f32 %v6324_v32, %v5334_v50 }
0x1430   :  { %v6328_v42 = vpop.eup %6327  ;;  %v5368_v46 = vmul.f32 %v5361_v5, %v5355_v7  ;;  %v5419_v10 = vmul.f32 %v6326_v9, %v5397_v60 }
0x1431   :  { %v5369_v59 = vmul.f32 %v5365_v33, %v5356_v29  ;;  %v5420_v34 = vmul.f32 %v6328_v42, %v5398_v63 }
0x1432   :  { %v5381_v44 = vadd.f32 %v5374_v35, %v5368_v46  ;;  %v5421_v12 = vmul.f32 %v5419_v10, %v5361_v5 }
0x1433   :  { %v5382_v52 = vadd.f32 %v5378_v11, %v5369_v59  ;;  %v5422_v54 = vmul.f32 %v5420_v34, %v5365_v33 }
0x1434   :  { %v5425_v57 = vmax.f32 %v5381_v44, 0.0  ;;  %v5423_v51 = vadd.f32 %v5421_v12, %v5374_v35 }
0x1435   :  { %v5426_v19 = vmax.f32 %v5382_v52, 0.0  ;;  %v5424_v21 = vadd.f32 %v5422_v54, %v5378_v11 }
0x1436   :  { %v5427_v47 = vmax.f32 %v5423_v51, 0.0 }
0x1437   :  { %v5428_v28 = vmax.f32 %v5424_v21, 0.0 }
0x1438   :  { %6509 = dma.done.wait [#allocation3 + $0x1], 2048 }
0x1439   :  { %6510 = vsyncadd [#allocation3 + $0x1], 4294965248  ;;  %v5432_v38 = vpack.c.bf16 %v5428_v28, %v5426_v19  ;;  %v5441_v0 = vld [vmem:[#allocation2 + $0xa00] sm:$0xff]  ;;  %v5431_v58 = vpack.c.bf16 %v5427_v47, %v5425_v57  ;;  %vm5560_vm0 = vcmask 64512   ;;  %s6465_s19 = scalar_lea.hbm %s8523_s15, 16 }
0x143a   :  { %v5433_v50 = vld [vmem:[#allocation2 + $0x800] sm:$0xff]  ;;  %6031 = vmatprep.subr.bf16.mxu1 %v5441_v0  ;;  %p6466_p10 = scmp.ne.s32.totalorder %s8523_s15, %s6465_s19  ;;  %p6469_p11 = scmp.lt.u32.totalorder %s6465_s19, %s8523_s15 }
0x143b   :  { %5481 = vmatprep.mubr.bf16.mxu1 %v5432_v38  ;;  %v5442_v27 = vld [vmem:[#allocation2 + $0xa40] sm:$0xff]  ;;  %6032 = vmatpush3.bf16.msra.mxu1 %v5433_v50 }
0x143c   :  { %6033 = vmatprep.subr.bf16.mxu1 %v5442_v27  ;;  %v5434_v60 = vld [vmem:[#allocation2 + $0x840] sm:$0xff]  ;;  %p6471_p12 = pnand %p6469_p11, %p6466_p10 }
0x143d   :  { %v5443_v63 = vld [vmem:[#allocation2 + $0xa80] sm:$0xff] }
0x143e   :  { %v5435_v24 = vld [vmem:[#allocation2 + $0x880] sm:$0xff] }
0x143f   :  { %6034 = vmatpush3.bf16.msra.mxu1 %v5434_v60  ;;  %v5444_v26 = vld [vmem:[#allocation2 + $0xac0] sm:$0xff] }
0x1440   :  { %6035 = vmatprep.subr.bf16.mxu1 %v5443_v63  ;;  %v5436_v4 = vld [vmem:[#allocation2 + $0x8c0] sm:$0xff] }
0x1441   :  { %v5445_v25 = vld [vmem:[#allocation2 + $0xb00] sm:$0xff] }
0x1442   :  { %v5437_v18 = vld [vmem:[#allocation2 + $0x900] sm:$0xff] }
0x1443   :  { %6036 = vmatpush3.bf16.msra.mxu1 %v5435_v24  ;;  %v5446_v6 = vld [vmem:[#allocation2 + $0xb40] sm:$0xff] }
0x1444   :  { %6037 = vmatprep.subr.bf16.mxu1 %v5444_v26  ;;  %v5438_v55 = vld [vmem:[#allocation2 + $0x940] sm:$0xff] }
0x1445   :  { %v5447_v8 = vld [vmem:[#allocation2 + $0xb80] sm:$0xff] }
0x1446   :  { %v5439_v3 = vld [vmem:[#allocation2 + $0x980] sm:$0xff] }
0x1447   :  { %6038 = vmatpush3.bf16.msra.mxu1 %v5436_v4  ;;  %v5448_v13 = vld [vmem:[#allocation2 + $0xbc0] sm:$0xff] }
0x1448   :  { %6039 = vmatprep.subr.bf16.mxu1 %v5445_v25  ;;  %v5440_v14 = vld [vmem:[#allocation2 + $0x9c0] sm:$0xff] }
0x144b   :  { %6040 = vmatpush3.bf16.msra.mxu1 %v5437_v18 }
0x144c   :  { %6041 = vmatprep.subr.bf16.mxu1 %v5446_v6 }
0x144f   :  { %6042 = vmatpush3.bf16.msra.mxu1 %v5438_v55 }
0x1450   :  { %6043 = vmatprep.subr.bf16.mxu1 %v5447_v8 }
0x1453   :  { %6044 = vmatpush3.bf16.msra.mxu1 %v5439_v3  ;;  %v9170_v3 = vld [vmem:[#allocation114_spill] sm:$0xff] }
0x1454   :  { %6045 = vmatprep.subr.bf16.mxu1 %v5448_v13  ;;  %v5756_v13 = vadd.s32 8, %v9170_v3 }
0x1457   :  { %6046 = vmatpush3.bf16.msra.mxu1 %v5440_v14  ;;  %v9171_v14 = vlaneseq }
0x145a   :  { %5482 = vmatmul.mubr.bf16.vlgmr.msra.gmra.mrb[36].mxu1 %v5431_v58  ;;  %v8463_v58 = vand.u32 127, %v9171_v14 }
0x145c   :  { %vm5774_vm1 = vcmp.eq.s32.totalorder %v5756_v13, %v8463_v58  ;;  %vm5773_vm2 = vcmp.eq.s32.totalorder %v9170_v3, %v8463_v58 }
0x152d   :  { %v6047_v15 = vpop.f32.mrb[36].mxu1 }
0x152e   :  { %v6048_v40 = vpop.f32.mrb[37].mxu1 }
0x152f   :  { %v6049_v49 = vadd.f32 %v6048_v40, %v6047_v15  ;;  %v6050_v31 = vpop.f32.mrb[38].mxu1 }
0x1530   :  { %v6051_v23 = vpop.f32.mrb[39].mxu1 }
0x1531   :  { %v5490_v30 = vrot.slane %v6049_v49, 4  ;;  %v6052_v20 = vadd.f32 %v6051_v23, %v6050_v31 }
0x1533   :  { %v5491_v61 = vadd.f32 %v6049_v49, %v5490_v30  ;;  %v5509_v56 = vrot.slane %v6052_v20, 4 }
0x1535   :  { %v5492_v22 = vrot.slane %v5491_v61, 2  ;;  %v5510_v36 = vadd.f32 %v6052_v20, %v5509_v56 }
0x1537   :  { %v5511_v37 = vrot.slane %v5510_v36, 2  ;;  %v5493_v41 = vadd.f32 %v5492_v22, %v5491_v61 }
0x1539   :  { %v5512_v43 = vadd.f32 %v5511_v37, %v5510_v36  ;;  %v5494_v45 = vrot.slane %v5493_v41, 1 }
0x153b   :  { %v5513_v48 = vrot.slane %v5512_v43, 1  ;;  %v5495_v53 = vadd.f32 %v5494_v45, %v5493_v41 }
0x153d   :  { %v5514_v17 = vadd.f32 %v5513_v48, %v5512_v43  ;;  %v5496_v62 = vmul.f32 0.125, %v5495_v53  ;;  %v5757_v43 = vadd.s32 16, %v9170_v3  ;;  %v5758_v48 = vadd.s32 24, %v9170_v3 }
0x153f   :  { %v5515_v16 = vmul.f32 0.125, %v5514_v17  ;;  %v5497_v1 = vsub.f32 %v6049_v49, %v5496_v62  ;;  %vm5775_vm3 = vcmp.eq.s32.totalorder %v5757_v43, %v8463_v58  ;;  %vm5776_vm4 = vcmp.eq.s32.totalorder %v5758_v48, %v8463_v58 }
0x1540   :  { %v5765_v43 = vadd.s32 80, %v9170_v3 }
0x1541   :  { %v5516_v2 = vsub.f32 %v6052_v20, %v5515_v16  ;;  %v5498_v5 = vmul.f32 %v5497_v1, %v5497_v1 }
0x1542   :  { %vm5783_vm11 = vcmp.eq.s32.totalorder %v5765_v43, %v8463_v58 }
0x1543   :  { %v5517_v39 = vmul.f32 %v5516_v2, %v5516_v2  ;;  %v5499_v33 = vrot.slane %v5498_v5, 4 }
0x1545   :  { %v5518_v32 = vrot.slane %v5517_v39, 4  ;;  %v5500_v7 = vadd.f32 %v5499_v33, %v5498_v5 }
0x1547   :  { %v5519_v35 = vadd.f32 %v5518_v32, %v5517_v39  ;;  %v5501_v9 = vrot.slane %v5500_v7, 2 }
0x1549   :  { %v5520_v29 = vrot.slane %v5519_v35, 2  ;;  %v5502_v11 = vadd.f32 %v5501_v9, %v5500_v7 }
0x154b   :  { %v5521_v42 = vadd.f32 %v5520_v29, %v5519_v35  ;;  %v5503_v46 = vrot.slane %v5502_v11, 1  ;;  %v5759_v35 = vadd.s32 32, %v9170_v3 }
0x154d   :  { %v5522_v10 = vrot.slane %v5521_v42, 1  ;;  %v5504_v59 = vadd.f32 %v5503_v46, %v5502_v11  ;;  %v5760_v11 = vadd.s32 40, %v9170_v3  ;;  %vm5777_vm5 = vcmp.eq.s32.totalorder %v5759_v35, %v8463_v58 }
0x154f   :  { %v5523_v34 = vadd.f32 %v5522_v10, %v5521_v42  ;;  %v5505_v44 = vmul.f32 0.125, %v5504_v59  ;;  %vm5778_vm6 = vcmp.eq.s32.totalorder %v5760_v11, %v8463_v58 }
0x1551   :  { %v5524_v12 = vmul.f32 0.125, %v5523_v34  ;;  %v5506_v52 = vadd.f32 1e-05, %v5505_v44 }
0x1553   :  { %v5525_v54 = vadd.f32 1e-05, %v5524_v12  ;;  %6329 = vrsqrt.f32 %v5506_v52 }
0x1555   :  { %6331 = vrsqrt.f32 %v5525_v54 }
0x155d   :  { %v6330_v57 = vpop.eup %6329 }
0x155e   :  { %v5508_v51 = vmul.f32 %v6330_v57, %v5497_v1 }
0x155f   :  { %v6332_v19 = vpop.eup %6331 }
0x1560   :  { %5528 = vxpose.xlu0.b32.start.end [1/1] (short) %v5508_v51, 128  ;;  %v5527_v21 = vmul.f32 %v6332_v19, %v5516_v2 }
0x1562   :  { %6070 = vmatprep.subr.mxu1 %v5527_v21 }
0x1563   :  { %6071 = vmatpush3.msra.mxu1 %v5527_v21  ;;  %v5761_v21 = vadd.s32 48, %v9170_v3 }
0x1565   :  { %vm5779_vm7 = vcmp.eq.s32.totalorder %v5761_v21, %v8463_v58 }
0x15e0   :  { %v5544_v47 = vpop.trf.xlu0 }
0x15e1   :  { %6072 = vmatprep.mubr.msk.f32.mxu1 %vm5560_vm0, %v5544_v47 }
0x15e4   :  { %v5545_v28 = vpop.trf.xlu0 }
0x15e5   :  { %6073 = vmatmul.mubr.msk.f32.vlgmr.msra.gmra.mrb[40].mxu1 %vm5560_vm0, %v5545_v28 }
0x15e8   :  { %v5546_v38 = vpop.trf.xlu0 }
0x15e9   :  { %6075 = vmatprep.mubr.msk.f32.mxu1 %vm5560_vm0, %v5546_v38  ;;  %v5762_v38 = vadd.s32 56, %v9170_v3 }
0x15eb   :  { %vm5780_vm8 = vcmp.eq.s32.totalorder %v5762_v38, %v8463_v58 }
0x15ec   :  { %v5547_v0 = vpop.trf.xlu0 }
0x15ed   :  { %6076 = vmatmul.mubr.msk.f32.gmra.mrb[42].mxu1 %vm5560_vm0, %v5547_v0 }
0x15f0   :  { %v5548_v50 = vpop.trf.xlu0 }
0x15f1   :  { %6078 = vmatprep.mubr.msk.f32.mxu1 %vm5560_vm0, %v5548_v50 }
0x15f4   :  { %v5549_v27 = vpop.trf.xlu0 }
0x15f5   :  { %6079 = vmatmul.mubr.msk.f32.gmra.mrb[44].mxu1 %vm5560_vm0, %v5549_v27 }
0x15f8   :  { %v5550_v60 = vpop.trf.xlu0 }
0x15f9   :  { %6081 = vmatprep.mubr.msk.f32.mxu1 %vm5560_vm0, %v5550_v60 }
0x15fc   :  { %v5551_v63 = vpop.trf.xlu0 }
0x15fd   :  { %6082 = vmatmul.mubr.msk.f32.gmra.mrb[46].mxu1 %vm5560_vm0, %v5551_v63 }
0x1600   :  { %v5552_v24 = vpop.trf.xlu0 }
0x1601   :  { %6084 = vmatprep.mubr.msk.f32.mxu1 %vm5560_vm0, %v5552_v24 }
0x1604   :  { %v5553_v26 = vpop.trf.xlu0 }
0x1605   :  { %6085 = vmatmul.mubr.msk.f32.gmra.mrb[48].mxu1 %vm5560_vm0, %v5553_v26 }
0x1608   :  { %v5554_v4 = vpop.trf.xlu0 }
0x1609   :  { %6087 = vmatprep.mubr.msk.f32.mxu1 %vm5560_vm0, %v5554_v4 }
0x160c   :  { %v5555_v25 = vpop.trf.xlu0 }
0x160d   :  { %6088 = vmatmul.mubr.msk.f32.gmra.mrb[50].mxu1 %vm5560_vm0, %v5555_v25 }
0x1610   :  { %v5556_v18 = vpop.trf.xlu0 }
0x1611   :  { %6090 = vmatprep.mubr.msk.f32.mxu1 %vm5560_vm0, %v5556_v18 }
0x1614   :  { %v5557_v6 = vpop.trf.xlu0 }
0x1615   :  { %6091 = vmatmul.mubr.msk.f32.gmra.mrb[52].mxu1 %vm5560_vm0, %v5557_v6 }
0x1618   :  { %v5558_v55 = vpop.trf.xlu0 }
0x1619   :  { %6093 = vmatprep.mubr.msk.f32.mxu1 %vm5560_vm0, %v5558_v55 }
0x161c   :  { %v5559_v8 = vpop.trf.xlu0 }
0x161d   :  { %6094 = vmatmul.mubr.msk.f32.gmra.mrb[54].mxu1 %vm5560_vm0, %v5559_v8  ;;  %v5763_v8 = vadd.s32 64, %v9170_v3 }
0x161f   :  { %vm5781_vm9 = vcmp.eq.s32.totalorder %v5763_v8, %v8463_v58 }
0x16b8   :  { %v6074_v15 = vpop.f32.mrb[40].mxu1 }
0x16b9   :  { %v5970_v40 = vadd.f32 -1.0, %v6074_v15  ;;  %v5822_v49 = vmul.f32 %v6074_v15, %v6074_v15  ;;  %v5675_v31 = vpop.f32.mrb[41].mxu1  ;;  %v5764_v15 = vadd.s32 72, %v9170_v3 }
0x16ba   :  { %v5969_v23 = vadd.f32 -1.0, %v5675_v31  ;;  %v5821_v30 = vmul.f32 %v5675_v31, %v5675_v31 }
0x16bb   :  { %v5806_v20 = vmul.f32 %v5970_v40, %v5970_v40  ;;  %v5838_v61 = vmul.f32 0.0051, %v5822_v49  ;;  %vm5782_vm10 = vcmp.eq.s32.totalorder %v5764_v15, %v8463_v58 }
0x16bc   :  { %v5805_v56 = vmul.f32 %v5969_v23, %v5969_v23  ;;  %v5837_v22 = vmul.f32 0.0051, %v5821_v30 }
0x16bd   :  { %v5854_v36 = vsel %vm5774_vm1, %v5806_v20, %v5838_v61 }
0x16be   :  { %v5853_v37 = vsel %vm5773_vm2, %v5805_v56, %v5837_v22 }
0x16bf   :  { %v5869_v41 = vadd.f32 %v5854_v36, %v5853_v37 }
0x16c0   :  { %v6077_v45 = vpop.f32.mrb[42].mxu1 }
0x16c1   :  { %v5972_v53 = vadd.f32 -1.0, %v6077_v45  ;;  %v5824_v17 = vmul.f32 %v6077_v45, %v6077_v45  ;;  %v5685_v62 = vpop.f32.mrb[43].mxu1 }
0x16c2   :  { %v5971_v16 = vadd.f32 -1.0, %v5685_v62  ;;  %v5823_v1 = vmul.f32 %v5685_v62, %v5685_v62 }
0x16c3   :  { %v5808_v2 = vmul.f32 %v5972_v53, %v5972_v53  ;;  %v5840_v5 = vmul.f32 0.0051, %v5824_v17  ;;  %v5766_v53 = vadd.s32 88, %v9170_v3 }
0x16c4   :  { %v5807_v39 = vmul.f32 %v5971_v16, %v5971_v16  ;;  %v5839_v33 = vmul.f32 0.0051, %v5823_v1 }
0x16c5   :  { %v5856_v9 = vsel %vm5776_vm4, %v5808_v2, %v5840_v5  ;;  %vm5784_vm12 = vcmp.eq.s32.totalorder %v5766_v53, %v8463_v58 }
0x16c6   :  { %v5855_v32 = vsel %vm5775_vm3, %v5807_v39, %v5839_v33 }
0x16c7   :  { %v5870_v7 = vadd.f32 %v5869_v41, %v5855_v32 }
0x16c8   :  { %v6080_v29 = vpop.f32.mrb[44].mxu1 }
0x16c9   :  { %v5974_v42 = vadd.f32 -1.0, %v6080_v29  ;;  %v5826_v46 = vmul.f32 %v6080_v29, %v6080_v29  ;;  %v5695_v10 = vpop.f32.mrb[45].mxu1  ;;  %v5871_v59 = vadd.f32 %v5870_v7, %v5856_v9  ;;  %v5767_v29 = vadd.s32 96, %v9170_v3 }
0x16ca   :  { %v5973_v34 = vadd.f32 -1.0, %v5695_v10  ;;  %v5825_v44 = vmul.f32 %v5695_v10, %v5695_v10 }
0x16cb   :  { %v5810_v12 = vmul.f32 %v5974_v42, %v5974_v42  ;;  %v5842_v52 = vmul.f32 0.0051, %v5826_v46  ;;  %vm5785_vm13 = vcmp.eq.s32.totalorder %v5767_v29, %v8463_v58 }
0x16cc   :  { %v5809_v54 = vmul.f32 %v5973_v34, %v5973_v34  ;;  %v5841_v57 = vmul.f32 0.0051, %v5825_v44  ;;  %v5768_v34 = vadd.s32 104, %v9170_v3 }
0x16cd   :  { %v5858_v47 = vsel %vm5778_vm6, %v5810_v12, %v5842_v52 }
0x16ce   :  { %v5857_v51 = vsel %vm5777_vm5, %v5809_v54, %v5841_v57  ;;  %vm5786_vm14 = vcmp.eq.s32.totalorder %v5768_v34, %v8463_v58 }
0x16cf   :  { %v5872_v19 = vadd.f32 %v5871_v59, %v5857_v51 }
0x16d0   :  { %v6083_v28 = vpop.f32.mrb[46].mxu1 }
0x16d1   :  { %v5976_v0 = vadd.f32 -1.0, %v6083_v28  ;;  %v5828_v50 = vmul.f32 %v6083_v28, %v6083_v28  ;;  %v5705_v27 = vpop.f32.mrb[47].mxu1  ;;  %v5873_v60 = vadd.f32 %v5872_v19, %v5858_v47  ;;  %v5769_v47 = vadd.s32 112, %v9170_v3 }
0x16d2   :  { %v5975_v63 = vadd.f32 -1.0, %v5705_v27  ;;  %v5827_v24 = vmul.f32 %v5705_v27, %v5705_v27 }
0x16d3   :  { %v5812_v26 = vmul.f32 %v5976_v0, %v5976_v0  ;;  %v5844_v4 = vmul.f32 0.0051, %v5828_v50  ;;  %vm5787_vm15 = vcmp.eq.s32.totalorder %v5769_v47, %v8463_v58 }
0x16d4   :  { %v5811_v25 = vmul.f32 %v5975_v63, %v5975_v63  ;;  %v5843_v18 = vmul.f32 0.0051, %v5827_v24  ;;  %v5770_v63 = vadd.s32 120, %v9170_v3 }
0x16d5   :  { %v5860_v13 = vsel %vm5780_vm8, %v5812_v26, %v5844_v4 }
0x16d6   :  { %v5859_v6 = vsel %vm5779_vm7, %v5811_v25, %v5843_v18  ;;  %vm5788_vm0 = vcmp.eq.s32.totalorder %v5770_v63, %v8463_v58 }
0x16d7   :  { %v5874_v55 = vadd.f32 %v5873_v60, %v5859_v6 }
0x16d8   :  { %v6086_v14 = vpop.f32.mrb[48].mxu1 }
0x16d9   :  { %v5978_v40 = vadd.f32 -1.0, %v6086_v14  ;;  %v5830_v49 = vmul.f32 %v6086_v14, %v6086_v14  ;;  %v5715_v31 = vpop.f32.mrb[49].mxu1  ;;  %v5875_v23 = vadd.f32 %v5874_v55, %v5860_v13 }
0x16da   :  { %v5977_v30 = vadd.f32 -1.0, %v5715_v31  ;;  %v5829_v20 = vmul.f32 %v5715_v31, %v5715_v31 }
0x16db   :  { %v5814_v61 = vmul.f32 %v5978_v40, %v5978_v40  ;;  %v5846_v56 = vmul.f32 0.0051, %v5830_v49 }
0x16dc   :  { %v5813_v22 = vmul.f32 %v5977_v30, %v5977_v30  ;;  %v5845_v36 = vmul.f32 0.0051, %v5829_v20 }
0x16dd   :  { %v5862_v45 = vsel %vm5782_vm10, %v5814_v61, %v5846_v56 }
0x16de   :  { %v5861_v37 = vsel %vm5781_vm9, %v5813_v22, %v5845_v36 }
0x16df   :  { %v5876_v41 = vadd.f32 %v5875_v23, %v5861_v37 }
0x16e0   :  { %v6089_v48 = vpop.f32.mrb[50].mxu1 }
0x16e1   :  { %v5980_v17 = vadd.f32 -1.0, %v6089_v48  ;;  %v5832_v62 = vmul.f32 %v6089_v48, %v6089_v48  ;;  %v5725_v16 = vpop.f32.mrb[51].mxu1  ;;  %v5877_v1 = vadd.f32 %v5876_v41, %v5862_v45 }
0x16e2   :  { %v5979_v2 = vadd.f32 -1.0, %v5725_v16  ;;  %v5831_v5 = vmul.f32 %v5725_v16, %v5725_v16 }
0x16e3   :  { %v5816_v39 = vmul.f32 %v5980_v17, %v5980_v17  ;;  %v5848_v33 = vmul.f32 0.0051, %v5832_v62 }
0x16e4   :  { %v5815_v32 = vmul.f32 %v5979_v2, %v5979_v2  ;;  %v5847_v7 = vmul.f32 0.0051, %v5831_v5 }
0x16e5   :  { %v5864_v11 = vsel %vm5784_vm12, %v5816_v39, %v5848_v33 }
0x16e6   :  { %v5863_v35 = vsel %vm5783_vm11, %v5815_v32, %v5847_v7 }
0x16e7   :  { %v5878_v9 = vadd.f32 %v5877_v1, %v5863_v35 }
0x16e8   :  { %v6092_v42 = vpop.f32.mrb[52].mxu1 }
0x16e9   :  { %v5982_v46 = vadd.f32 -1.0, %v6092_v42  ;;  %v5834_v10 = vmul.f32 %v6092_v42, %v6092_v42  ;;  %v5735_v59 = vpop.f32.mrb[53].mxu1  ;;  %v5879_v44 = vadd.f32 %v5878_v9, %v5864_v11 }
0x16ea   :  { %v5981_v12 = vadd.f32 -1.0, %v5735_v59  ;;  %v5833_v52 = vmul.f32 %v5735_v59, %v5735_v59 }
0x16eb   :  { %v5818_v54 = vmul.f32 %v5982_v46, %v5982_v46  ;;  %v5850_v57 = vmul.f32 0.0051, %v5834_v10 }
0x16ec   :  { %v5817_v51 = vmul.f32 %v5981_v12, %v5981_v12  ;;  %v5849_v19 = vmul.f32 0.0051, %v5833_v52 }
0x16ed   :  { %v5866_v0 = vsel %vm5786_vm14, %v5818_v54, %v5850_v57 }
0x16ee   :  { %v5865_v21 = vsel %vm5785_vm13, %v5817_v51, %v5849_v19 }
0x16ef   :  { %v5880_v28 = vadd.f32 %v5879_v44, %v5865_v21 }
0x16f0   :  { %v6095_v38 = vpop.f32.mrb[54].mxu1 }
0x16f1   :  { %v5984_v50 = vadd.f32 -1.0, %v6095_v38  ;;  %v5836_v27 = vmul.f32 %v6095_v38, %v6095_v38  ;;  %v5745_v60 = vpop.f32.mrb[55].mxu1  ;;  %v5881_v24 = vadd.f32 %v5880_v28, %v5866_v0 }
0x16f2   :  { %v5983_v26 = vadd.f32 -1.0, %v5745_v60  ;;  %v5835_v4 = vmul.f32 %v5745_v60, %v5745_v60 }
0x16f3   :  { %v5820_v25 = vmul.f32 %v5984_v50, %v5984_v50  ;;  %v5852_v18 = vmul.f32 0.0051, %v5836_v27 }
0x16f4   :  { %v5819_v6 = vmul.f32 %v5983_v26, %v5983_v26  ;;  %v5851_v55 = vmul.f32 0.0051, %v5835_v4 }
0x16f5   :  { %v5868_v14 = vsel %vm5788_vm0, %v5820_v25, %v5852_v18 }
0x16f6   :  { %v5867_v8 = vsel %vm5787_vm15, %v5819_v6, %v5851_v55 }
0x16f7   :  { %v5882_v13 = vadd.f32 %v5881_v24, %v5867_v8 }
0x16f9   :  { %v5883_v15 = vadd.f32 %v5882_v13, %v5868_v14 }
0x16fb   :  { %5884 = vadd.xlane.f32.xlu0 %v5883_v15 }
0x1788   :  { %v5885_v40 = vpop.xlane.xlu0 %5884 }
0x1789   :  { %v5886_v49 = vrot.slane %v5885_v40, 4 }
0x178b   :  { %v5887_v31 = vadd.f32 %v5886_v49, %v5885_v40 }
0x178d   :  { %v5888_v3 = vrot.slane %v5887_v31, 2 }
0x178f   :  { %v5889_v23 = vadd.f32 %v5888_v3, %v5887_v31 }
0x1791   :  { %v5890_v30 = vrot.slane %v5889_v23, 1 }
0x1793   :  { %v5891_v20 = vadd.f32 %v5890_v30, %v5889_v23 }
0x1795   :  { %6244 = vpush %v5891_v20 }
0x17c6   :  { %s6245_s14 = spop %6244 }
0x17c7   :  { %5894 = sst [smem:[#allocation10]] %s6245_s14 }
0x17c8   :  { %6474 = shalt.err (!%p6471_p12)
}
0x17c9   :  { %s6542_s7 = smov [#allocation10]  }
0x17ca   :  { %5902 = dma.smem_to_hbm %s6542_s7, 16, %s8523_s15, [#allocation6]  }
0x17cb   :  { %6511 = dma.done.wait [#allocation6], 16  }
0x17cc   :  { %6512 = vsyncadd [#allocation6], 4294967280 }
0x17cd   :  { %5906 = sfence }
0x17ce   :  { %5907 = vsyncpa [#allocation5], 1 }
0x17cf   :  { %5908 = vsyncpa [#allocation8], 1 }
0x17d0   :  { %5909 = vsyncpa [#allocation6], 1 }
0x17d1   :  { %5910 = vsyncmov [#allocation3] }
0x17d4   :  { %s5911_s8 = vpop.sfrf %5910 }
0x17d5   :  { %p5985_p13 = scmp.ne.s32.totalorder %s5911_s8, 0 }
0x17d7   :  { %5915 = shalt.err (%p5985_p13)  }
0x17d8   :  { %5917 = vsyncmov [#allocation3 + $0x1] }
0x17db   :  { %s5918_s10 = vpop.sfrf %5917 }
0x17dc   :  { %p5986_p0 = scmp.ne.s32.totalorder %s5918_s10, 0 }
0x17de   :  { %5922 = shalt.err (%p5986_p0)  }

</bundles_post_ra>
